<compile_context>
chip_gen: v7x
topology: tpu7x:2x2x1
jax: 0.10.0
libtpu: 0.0.40
codegen_flags: <defaults>
</compile_context>

<pallas_src>
import numpy as np
import jax
import jax.numpy as jnp
from jax import lax
from jax.experimental import pallas as pl
from jax.experimental.pallas import tpu as pltpu

# ---------------- model hyper-parameters (small, deterministic) -------------
N, CIN, H, W = 2, 4, 16, 16       # input  [N, CIN, H, W]  (NCHW, like PyTorch)
C1, C2, F = 8, 16, 32             # conv1 out, conv2 out, feature dim
KH = KW = 3
HP, WP = H + 2, W + 2             # spatially padded grid (SAME conv1): 18 x 18
H2, W2 = H - 2, W - 2             # VALID conv2 output spatial dims: 14 x 14
NROWS = N * HP * WP               # 648 rows of the flattened padded grid
ROWPAD = 40                       # >= max tap offset (2*WP + 2 = 38), mult of 8
NPADR = NROWS + ROWPAD            # 688
CINP = 8                          # CIN(4) + ones column(1) + zero pad
C1P = 16                          # C1(8) + constant-1 channel(1) + zero pad
C2P = 24                          # C2(16) + constant-1 channel(1) + zero pad
FPAD = 128                        # feature dim padded to a full lane tile
TAP_OFFS = tuple(kh * WP + kw for kh in range(KH) for kw in range(KW))  # 0..38


# ------------------------------ Pallas kernel --------------------------------
def feature_kernel(x_ref, w1_ref, w2_ref, pool_ref, wf_ref, o_ref, h1_ref):
    # conv1 (3x3 SAME) = 9 shifted-row taps over the flattened padded grid.
    # The bias b1 and the constant-1 channel of h1 ride in through x's ones
    # column (tap 0 only), so there is no bias operand / broadcast-add.
    acc1 = jnp.zeros((NROWS, C1P), jnp.float32)
    for t, off in enumerate(TAP_OFFS):
        acc1 = acc1 + jnp.dot(x_ref[pl.ds(off, NROWS), :],
                              w1_ref[pl.ds(t * CINP, CINP), :],
                              preferred_element_type=jnp.float32)
    # Keep h1 VMEM-resident in a scratch with ROWPAD zero rows so conv2's
    # shifted taps are plain in-bounds slices (no HBM round-trip, no im2col).
    h1_ref[pl.ds(0, NROWS), :] = jnp.maximum(acc1, 0.0)
    h1_ref[pl.ds(NROWS, ROWPAD), :] = jnp.zeros((ROWPAD, C1P), jnp.float32)

    # conv2 (3x3 VALID) = 9 shifted-row taps on the scratch; b2 folded via the
    # constant-1 channel (column C1) of h1.
    acc2 = jnp.zeros((NROWS, C2P), jnp.float32)
    for t, off in enumerate(TAP_OFFS):
        acc2 = acc2 + jnp.dot(h1_ref[pl.ds(off, NROWS), :],
                              w2_ref[pl.ds(t * C1P, C1P), :],
                              preferred_element_type=jnp.float32)
    h2 = jnp.maximum(acc2, 0.0)                       # [NROWS, C2P]

    # Global average pool as a masked matmul (pool_ref zeroes every invalid /
    # out-of-window row of the padded grid), then the linear head; bf is
    # folded via h2's constant-1 channel.  Output store is lane-dense (128).
    pooled = jnp.dot(pool_ref[...], h2, preferred_element_type=jnp.float32)
    o_ref[...] = jnp.dot(pooled, wf_ref[...], preferred_element_type=jnp.float32)


# --------------------- one-time host-side weight packing ---------------------
def pack_frozen_params(params):
    """Pack the frozen weights into MXU-friendly operands (biases folded)."""
    w1, b1, w2, b2, wf, bf = (np.asarray(p, np.float32) for p in params)
    w1p = np.zeros((KH * KW * CINP, C1P), np.float32)
    w2p = np.zeros((KH * KW * C1P, C2P), np.float32)
    for kh in range(KH):
        for kw in range(KW):
            t = kh * KW + kw
            w1p[t * CINP:t * CINP + CIN, :C1] = w1[kh, kw]   # [CIN, C1]
            w2p[t * C1P:t * C1P + C1, :C2] = w2[kh, kw]      # [C1,  C2]
    # Bias rows, read through x's ones column / h1's constant-1 channel
    # (tap 0 only, offset 0 -> added exactly once per output position).
    w1p[CIN, :C1] = b1[0]
    w1p[CIN, C1] = 1.0            # propagate the constant 1 into h1[:, C1]
    w2p[C1, :C2] = b2[0]
    w2p[C1, C2] = 1.0             # propagate the constant 1 into h2[:, C2]
    wfp = np.zeros((C2P, FPAD), np.float32)
    wfp[:C2, :F] = wf
    wfp[C2, :F] = bf[0]           # bf folded via h2's constant-1 channel
    # Global-average-pool matrix over the padded-grid rows: selects the
    # H2*W2 valid conv2 positions (yo < 14, xo < 14) of each image.
    pool = np.zeros((N, NROWS), np.float32)
    for n in range(N):
        base = n * HP * WP
        for yo in range(H2):
            pool[n, base + yo * WP: base + yo * WP + W2] = 1.0 / (H2 * W2)
    return (jnp.asarray(w1p), jnp.asarray(w2p),
            jnp.asarray(pool), jnp.asarray(wfp))


# ------------------------------ jitted wrapper --------------------------------
_VMEM = pl.BlockSpec(memory_space=pltpu.MemorySpace.VMEM)   # whole array in VMEM

_COST = pl.CostEstimate(
    flops=(2 * NROWS * (9 * CINP * C1P + 9 * C1P * C2P)
           + 2 * N * NROWS * C2P + 2 * N * C2P * FPAD),
    transcendentals=0,
    bytes_accessed=4 * (NPADR * CINP + 9 * CINP * C1P + 9 * C1P * C2P
                        + N * NROWS + C2P * FPAD + N * FPAD))


@jax.jit
def extract_features(x_nchw, packed):
    """img [N, CIN, H, W] -> features [N, F]   (frozen, inference only)."""
    w1p, w2p, pool, wfp = packed
    # Minimal per-call XLA plumbing: NHWC transpose, SAME pre-pad, flatten,
    # append the ones column (bias source) and the row padding.  Everything
    # else happens inside ONE fused Pallas kernel.
    x = jnp.transpose(x_nchw, (0, 2, 3, 1)).astype(jnp.float32)
    xpad = jnp.pad(x, ((0, 0), (1, 1), (1, 1), (0, 0)))      # [N, HP, WP, CIN]
    xf = xpad.reshape(NROWS, CIN)
    xf = jnp.concatenate([xf, jnp.ones((NROWS, 1), jnp.float32)], axis=1)
    xf = jnp.pad(xf, ((0, ROWPAD), (0, CINP - CIN - 1)))     # [NPADR, CINP]

    feat = pl.pallas_call(
        feature_kernel,
        out_shape=jax.ShapeDtypeStruct((N, FPAD), jnp.float32),
        in_specs=[_VMEM] * 5,
        out_specs=_VMEM,
        scratch_shapes=[pltpu.VMEM((NPADR, C1P), jnp.float32)],
        cost_estimate=_COST,
    )(xf, w1p, w2p, pool, wfp)
    return feat[:, :F]                                       # [N, F]


# --------------------------- plain-JAX reference -----------------------------
def reference(x_nchw, params):
    w1, b1, w2, b2, wf, bf = params
    x = jnp.transpose(x_nchw, (0, 2, 3, 1)).astype(jnp.float32)
    dn = ("NHWC", "HWIO", "NHWC")
    h1 = jax.nn.relu(lax.conv_general_dilated(
        x, w1, (1, 1), "SAME", dimension_numbers=dn) + b1[0])
    h2 = jax.nn.relu(lax.conv_general_dilated(
        h1, w2, (1, 1), "VALID", dimension_numbers=dn) + b2[0])
    pooled = jnp.mean(h2, axis=(1, 2))                       # [N, C2]
    return pooled @ wf + bf[0]                               # [N, F]


# ------------------------------- entry point ----------------------------------
if __name__ == "__main__":
    key = jax.random.PRNGKey(0)
    kx, k1, k2, k3, k4, k5, k6 = jax.random.split(key, 7)

    # Deterministic synthetic "pretrained" weights (frozen; inference only).
    w1 = 0.1 * jax.random.normal(k1, (KH, KW, CIN, C1), jnp.float32)
    b1 = 0.1 * jax.random.normal(k2, (1, C1), jnp.float32)
    w2 = 0.1 * jax.random.normal(k3, (KH, KW, C1, C2), jnp.float32)
    b2 = 0.1 * jax.random.normal(k4, (1, C2), jnp.float32)
    wf = 0.1 * jax.random.normal(k5, (C2, F), jnp.float32)
    bf = 0.1 * jax.random.normal(k6, (1, F), jnp.float32)
    params = (w1, b1, w2, b2, wf, bf)
    packed = pack_frozen_params(params)      # one-time host-side packing

    x = jax.random.normal(kx, (N, CIN, H, W), jnp.float32)   # NCHW like PyTorch

    feats = jax.block_until_ready(extract_features(x, packed))
    ref = jax.block_until_ready(reference(x, params))

    assert feats.shape == (N, F), feats.shape
    max_err = float(jnp.max(jnp.abs(feats - ref)))
    assert jnp.allclose(feats, ref, atol=1e-3, rtol=1e-3), max_err
    print("KERNEL_OK")
</pallas_src>

<mosaic_0001>
module attributes {stable_mosaic.version = 11 : i64} {
  func.func @feature_kernel(%arg0: memref<688x8xf32, #tpu.memory_space<vmem>>, %arg1: memref<72x16xf32, #tpu.memory_space<vmem>>, %arg2: memref<144x24xf32, #tpu.memory_space<vmem>>, %arg3: memref<2x648xf32, #tpu.memory_space<vmem>>, %arg4: memref<24x128xf32, #tpu.memory_space<vmem>>, %arg5: memref<2x128xf32, #tpu.memory_space<vmem>>, %arg6: memref<688x16xf32, #tpu.memory_space<vmem>>) attributes {dimension_semantics = [], scalar_prefetch = 0 : i64, scratch_operands = 1 : i64, tpu.core_type = #tpu.core_type<tc>} {
    %cst = arith.constant 0.000000e+00 : f32
    %0 = vector.broadcast %cst : f32 to vector<648x16xf32>
    %c0 = arith.constant 0 : index
    %c0_0 = arith.constant 0 : index
    %1 = vector.load %arg0[%c0, %c0_0] : memref<688x8xf32, #tpu.memory_space<vmem>>, vector<648x8xf32>
    %c0_1 = arith.constant 0 : index
    %c0_2 = arith.constant 0 : index
    %2 = vector.load %arg1[%c0_1, %c0_2] : memref<72x16xf32, #tpu.memory_space<vmem>>, vector<8x16xf32>
    %cst_3 = arith.constant dense<0.000000e+00> : vector<648x16xf32>
    %3 = tpu.matmul %1, %2, %cst_3 {dimension_numbers = #tpu.dot_dimension_numbers<[1], [0], [0], [1], [0, 0, 1, 1], [], []>} : vector<648x8xf32>, vector<8x16xf32>, vector<648x16xf32> -> vector<648x16xf32>
    %4 = arith.addf %0, %3 : vector<648x16xf32>
    %c1 = arith.constant 1 : index
    %c0_4 = arith.constant 0 : index
    %5 = vector.load %arg0[%c1, %c0_4] : memref<688x8xf32, #tpu.memory_space<vmem>>, vector<648x8xf32>
    %c8 = arith.constant 8 : index
    %c0_5 = arith.constant 0 : index
    %6 = vector.load %arg1[%c8, %c0_5] : memref<72x16xf32, #tpu.memory_space<vmem>>, vector<8x16xf32>
    %cst_6 = arith.constant dense<0.000000e+00> : vector<648x16xf32>
    %7 = tpu.matmul %5, %6, %cst_6 {dimension_numbers = #tpu.dot_dimension_numbers<[1], [0], [0], [1], [0, 0, 1, 1], [], []>} : vector<648x8xf32>, vector<8x16xf32>, vector<648x16xf32> -> vector<648x16xf32>
    %8 = arith.addf %4, %7 : vector<648x16xf32>
    %c2 = arith.constant 2 : index
    %c0_7 = arith.constant 0 : index
    %9 = vector.load %arg0[%c2, %c0_7] : memref<688x8xf32, #tpu.memory_space<vmem>>, vector<648x8xf32>
    %c16 = arith.constant 16 : index
    %c0_8 = arith.constant 0 : index
    %10 = vector.load %arg1[%c16, %c0_8] : memref<72x16xf32, #tpu.memory_space<vmem>>, vector<8x16xf32>
    %cst_9 = arith.constant dense<0.000000e+00> : vector<648x16xf32>
    %11 = tpu.matmul %9, %10, %cst_9 {dimension_numbers = #tpu.dot_dimension_numbers<[1], [0], [0], [1], [0, 0, 1, 1], [], []>} : vector<648x8xf32>, vector<8x16xf32>, vector<648x16xf32> -> vector<648x16xf32>
    %12 = arith.addf %8, %11 : vector<648x16xf32>
    %c18 = arith.constant 18 : index
    %c0_10 = arith.constant 0 : index
    %13 = vector.load %arg0[%c18, %c0_10] : memref<688x8xf32, #tpu.memory_space<vmem>>, vector<648x8xf32>
    %c24 = arith.constant 24 : index
    %c0_11 = arith.constant 0 : index
    %14 = vector.load %arg1[%c24, %c0_11] : memref<72x16xf32, #tpu.memory_space<vmem>>, vector<8x16xf32>
    %cst_12 = arith.constant dense<0.000000e+00> : vector<648x16xf32>
    %15 = tpu.matmul %13, %14, %cst_12 {dimension_numbers = #tpu.dot_dimension_numbers<[1], [0], [0], [1], [0, 0, 1, 1], [], []>} : vector<648x8xf32>, vector<8x16xf32>, vector<648x16xf32> -> vector<648x16xf32>
    %16 = arith.addf %12, %15 : vector<648x16xf32>
    %c19 = arith.constant 19 : index
    %c0_13 = arith.constant 0 : index
    %17 = vector.load %arg0[%c19, %c0_13] : memref<688x8xf32, #tpu.memory_space<vmem>>, vector<648x8xf32>
    %c32 = arith.constant 32 : index
    %c0_14 = arith.constant 0 : index
    %18 = vector.load %arg1[%c32, %c0_14] : memref<72x16xf32, #tpu.memory_space<vmem>>, vector<8x16xf32>
    %cst_15 = arith.constant dense<0.000000e+00> : vector<648x16xf32>
    %19 = tpu.matmul %17, %18, %cst_15 {dimension_numbers = #tpu.dot_dimension_numbers<[1], [0], [0], [1], [0, 0, 1, 1], [], []>} : vector<648x8xf32>, vector<8x16xf32>, vector<648x16xf32> -> vector<648x16xf32>
    %20 = arith.addf %16, %19 : vector<648x16xf32>
    %c20 = arith.constant 20 : index
    %c0_16 = arith.constant 0 : index
    %21 = vector.load %arg0[%c20, %c0_16] : memref<688x8xf32, #tpu.memory_space<vmem>>, vector<648x8xf32>
    %c40 = arith.constant 40 : index
    %c0_17 = arith.constant 0 : index
    %22 = vector.load %arg1[%c40, %c0_17] : memref<72x16xf32, #tpu.memory_space<vmem>>, vector<8x16xf32>
    %cst_18 = arith.constant dense<0.000000e+00> : vector<648x16xf32>
    %23 = tpu.matmul %21, %22, %cst_18 {dimension_numbers = #tpu.dot_dimension_numbers<[1], [0], [0], [1], [0, 0, 1, 1], [], []>} : vector<648x8xf32>, vector<8x16xf32>, vector<648x16xf32> -> vector<648x16xf32>
    %24 = arith.addf %20, %23 : vector<648x16xf32>
    %c36 = arith.constant 36 : index
    %c0_19 = arith.constant 0 : index
    %25 = vector.load %arg0[%c36, %c0_19] : memref<688x8xf32, #tpu.memory_space<vmem>>, vector<648x8xf32>
    %c48 = arith.constant 48 : index
    %c0_20 = arith.constant 0 : index
    %26 = vector.load %arg1[%c48, %c0_20] : memref<72x16xf32, #tpu.memory_space<vmem>>, vector<8x16xf32>
    %cst_21 = arith.constant dense<0.000000e+00> : vector<648x16xf32>
    %27 = tpu.matmul %25, %26, %cst_21 {dimension_numbers = #tpu.dot_dimension_numbers<[1], [0], [0], [1], [0, 0, 1, 1], [], []>} : vector<648x8xf32>, vector<8x16xf32>, vector<648x16xf32> -> vector<648x16xf32>
    %28 = arith.addf %24, %27 : vector<648x16xf32>
    %c37 = arith.constant 37 : index
    %c0_22 = arith.constant 0 : index
    %29 = vector.load %arg0[%c37, %c0_22] : memref<688x8xf32, #tpu.memory_space<vmem>>, vector<648x8xf32>
    %c56 = arith.constant 56 : index
    %c0_23 = arith.constant 0 : index
    %30 = vector.load %arg1[%c56, %c0_23] : memref<72x16xf32, #tpu.memory_space<vmem>>, vector<8x16xf32>
    %cst_24 = arith.constant dense<0.000000e+00> : vector<648x16xf32>
    %31 = tpu.matmul %29, %30, %cst_24 {dimension_numbers = #tpu.dot_dimension_numbers<[1], [0], [0], [1], [0, 0, 1, 1], [], []>} : vector<648x8xf32>, vector<8x16xf32>, vector<648x16xf32> -> vector<648x16xf32>
    %32 = arith.addf %28, %31 : vector<648x16xf32>
    %c38 = arith.constant 38 : index
    %c0_25 = arith.constant 0 : index
    %33 = vector.load %arg0[%c38, %c0_25] : memref<688x8xf32, #tpu.memory_space<vmem>>, vector<648x8xf32>
    %c64 = arith.constant 64 : index
    %c0_26 = arith.constant 0 : index
    %34 = vector.load %arg1[%c64, %c0_26] : memref<72x16xf32, #tpu.memory_space<vmem>>, vector<8x16xf32>
    %cst_27 = arith.constant dense<0.000000e+00> : vector<648x16xf32>
    %35 = tpu.matmul %33, %34, %cst_27 {dimension_numbers = #tpu.dot_dimension_numbers<[1], [0], [0], [1], [0, 0, 1, 1], [], []>} : vector<648x8xf32>, vector<8x16xf32>, vector<648x16xf32> -> vector<648x16xf32>
    %36 = arith.addf %32, %35 : vector<648x16xf32>
    %cst_28 = arith.constant 0.000000e+00 : f32
    %37 = vector.broadcast %cst_28 : f32 to vector<648x16xf32>
    %38 = arith.maximumf %36, %37 : vector<648x16xf32>
    %c0_29 = arith.constant 0 : index
    %c0_30 = arith.constant 0 : index
    %39 = vector.load %arg6[%c0_29, %c0_30] : memref<688x16xf32, #tpu.memory_space<vmem>>, vector<648x16xf32>
    tpu.vector_store %arg6[%c0_29, %c0_30], %38 {strides = array<i32>} : memref<688x16xf32, #tpu.memory_space<vmem>>, vector<648x16xf32>,
    %cst_31 = arith.constant 0.000000e+00 : f32
    %40 = vector.broadcast %cst_31 : f32 to vector<40x16xf32>
    %c648 = arith.constant 648 : index
    %c0_32 = arith.constant 0 : index
    %41 = vector.load %arg6[%c648, %c0_32] : memref<688x16xf32, #tpu.memory_space<vmem>>, vector<40x16xf32>
    tpu.vector_store %arg6[%c648, %c0_32], %40 {strides = array<i32>} : memref<688x16xf32, #tpu.memory_space<vmem>>, vector<40x16xf32>,
    %cst_33 = arith.constant 0.000000e+00 : f32
    %42 = vector.broadcast %cst_33 : f32 to vector<648x24xf32>
    %c0_34 = arith.constant 0 : index
    %c0_35 = arith.constant 0 : index
    %43 = vector.load %arg6[%c0_34, %c0_35] : memref<688x16xf32, #tpu.memory_space<vmem>>, vector<648x16xf32>
    %c0_36 = arith.constant 0 : index
    %c0_37 = arith.constant 0 : index
    %44 = vector.load %arg2[%c0_36, %c0_37] : memref<144x24xf32, #tpu.memory_space<vmem>>, vector<16x24xf32>
    %cst_38 = arith.constant dense<0.000000e+00> : vector<648x24xf32>
    %45 = tpu.matmul %43, %44, %cst_38 {dimension_numbers = #tpu.dot_dimension_numbers<[1], [0], [0], [1], [0, 0, 1, 1], [], []>} : vector<648x16xf32>, vector<16x24xf32>, vector<648x24xf32> -> vector<648x24xf32>
    %46 = arith.addf %42, %45 : vector<648x24xf32>
    %c1_39 = arith.constant 1 : index
    %c0_40 = arith.constant 0 : index
    %47 = vector.load %arg6[%c1_39, %c0_40] : memref<688x16xf32, #tpu.memory_space<vmem>>, vector<648x16xf32>
    %c16_41 = arith.constant 16 : index
    %c0_42 = arith.constant 0 : index
    %48 = vector.load %arg2[%c16_41, %c0_42] : memref<144x24xf32, #tpu.memory_space<vmem>>, vector<16x24xf32>
    %cst_43 = arith.constant dense<0.000000e+00> : vector<648x24xf32>
    %49 = tpu.matmul %47, %48, %cst_43 {dimension_numbers = #tpu.dot_dimension_numbers<[1], [0], [0], [1], [0, 0, 1, 1], [], []>} : vector<648x16xf32>, vector<16x24xf32>, vector<648x24xf32> -> vector<648x24xf32>
    %50 = arith.addf %46, %49 : vector<648x24xf32>
    %c2_44 = arith.constant 2 : index
    %c0_45 = arith.constant 0 : index
    %51 = vector.load %arg6[%c2_44, %c0_45] : memref<688x16xf32, #tpu.memory_space<vmem>>, vector<648x16xf32>
    %c32_46 = arith.constant 32 : index
    %c0_47 = arith.constant 0 : index
    %52 = vector.load %arg2[%c32_46, %c0_47] : memref<144x24xf32, #tpu.memory_space<vmem>>, vector<16x24xf32>
    %cst_48 = arith.constant dense<0.000000e+00> : vector<648x24xf32>
    %53 = tpu.matmul %51, %52, %cst_48 {dimension_numbers = #tpu.dot_dimension_numbers<[1], [0], [0], [1], [0, 0, 1, 1], [], []>} : vector<648x16xf32>, vector<16x24xf32>, vector<648x24xf32> -> vector<648x24xf32>
    %54 = arith.addf %50, %53 : vector<648x24xf32>
    %c18_49 = arith.constant 18 : index
    %c0_50 = arith.constant 0 : index
    %55 = vector.load %arg6[%c18_49, %c0_50] : memref<688x16xf32, #tpu.memory_space<vmem>>, vector<648x16xf32>
    %c48_51 = arith.constant 48 : index
    %c0_52 = arith.constant 0 : index
    %56 = vector.load %arg2[%c48_51, %c0_52] : memref<144x24xf32, #tpu.memory_space<vmem>>, vector<16x24xf32>
    %cst_53 = arith.constant dense<0.000000e+00> : vector<648x24xf32>
    %57 = tpu.matmul %55, %56, %cst_53 {dimension_numbers = #tpu.dot_dimension_numbers<[1], [0], [0], [1], [0, 0, 1, 1], [], []>} : vector<648x16xf32>, vector<16x24xf32>, vector<648x24xf32> -> vector<648x24xf32>
    %58 = arith.addf %54, %57 : vector<648x24xf32>
    %c19_54 = arith.constant 19 : index
    %c0_55 = arith.constant 0 : index
    %59 = vector.load %arg6[%c19_54, %c0_55] : memref<688x16xf32, #tpu.memory_space<vmem>>, vector<648x16xf32>
    %c64_56 = arith.constant 64 : index
    %c0_57 = arith.constant 0 : index
    %60 = vector.load %arg2[%c64_56, %c0_57] : memref<144x24xf32, #tpu.memory_space<vmem>>, vector<16x24xf32>
    %cst_58 = arith.constant dense<0.000000e+00> : vector<648x24xf32>
    %61 = tpu.matmul %59, %60, %cst_58 {dimension_numbers = #tpu.dot_dimension_numbers<[1], [0], [0], [1], [0, 0, 1, 1], [], []>} : vector<648x16xf32>, vector<16x24xf32>, vector<648x24xf32> -> vector<648x24xf32>
    %62 = arith.addf %58, %61 : vector<648x24xf32>
    %c20_59 = arith.constant 20 : index
    %c0_60 = arith.constant 0 : index
    %63 = vector.load %arg6[%c20_59, %c0_60] : memref<688x16xf32, #tpu.memory_space<vmem>>, vector<648x16xf32>
    %c80 = arith.constant 80 : index
    %c0_61 = arith.constant 0 : index
    %64 = vector.load %arg2[%c80, %c0_61] : memref<144x24xf32, #tpu.memory_space<vmem>>, vector<16x24xf32>
    %cst_62 = arith.constant dense<0.000000e+00> : vector<648x24xf32>
    %65 = tpu.matmul %63, %64, %cst_62 {dimension_numbers = #tpu.dot_dimension_numbers<[1], [0], [0], [1], [0, 0, 1, 1], [], []>} : vector<648x16xf32>, vector<16x24xf32>, vector<648x24xf32> -> vector<648x24xf32>
    %66 = arith.addf %62, %65 : vector<648x24xf32>
    %c36_63 = arith.constant 36 : index
    %c0_64 = arith.constant 0 : index
    %67 = vector.load %arg6[%c36_63, %c0_64] : memref<688x16xf32, #tpu.memory_space<vmem>>, vector<648x16xf32>
    %c96 = arith.constant 96 : index
    %c0_65 = arith.constant 0 : index
    %68 = vector.load %arg2[%c96, %c0_65] : memref<144x24xf32, #tpu.memory_space<vmem>>, vector<16x24xf32>
    %cst_66 = arith.constant dense<0.000000e+00> : vector<648x24xf32>
    %69 = tpu.matmul %67, %68, %cst_66 {dimension_numbers = #tpu.dot_dimension_numbers<[1], [0], [0], [1], [0, 0, 1, 1], [], []>} : vector<648x16xf32>, vector<16x24xf32>, vector<648x24xf32> -> vector<648x24xf32>
    %70 = arith.addf %66, %69 : vector<648x24xf32>
    %c37_67 = arith.constant 37 : index
    %c0_68 = arith.constant 0 : index
    %71 = vector.load %arg6[%c37_67, %c0_68] : memref<688x16xf32, #tpu.memory_space<vmem>>, vector<648x16xf32>
    %c112 = arith.constant 112 : index
    %c0_69 = arith.constant 0 : index
    %72 = vector.load %arg2[%c112, %c0_69] : memref<144x24xf32, #tpu.memory_space<vmem>>, vector<16x24xf32>
    %cst_70 = arith.constant dense<0.000000e+00> : vector<648x24xf32>
    %73 = tpu.matmul %71, %72, %cst_70 {dimension_numbers = #tpu.dot_dimension_numbers<[1], [0], [0], [1], [0, 0, 1, 1], [], []>} : vector<648x16xf32>, vector<16x24xf32>, vector<648x24xf32> -> vector<648x24xf32>
    %74 = arith.addf %70, %73 : vector<648x24xf32>
    %c38_71 = arith.constant 38 : index
    %c0_72 = arith.constant 0 : index
    %75 = vector.load %arg6[%c38_71, %c0_72] : memref<688x16xf32, #tpu.memory_space<vmem>>, vector<648x16xf32>
    %c128 = arith.constant 128 : index
    %c0_73 = arith.constant 0 : index
    %76 = vector.load %arg2[%c128, %c0_73] : memref<144x24xf32, #tpu.memory_space<vmem>>, vector<16x24xf32>
    %cst_74 = arith.constant dense<0.000000e+00> : vector<648x24xf32>
    %77 = tpu.matmul %75, %76, %cst_74 {dimension_numbers = #tpu.dot_dimension_numbers<[1], [0], [0], [1], [0, 0, 1, 1], [], []>} : vector<648x16xf32>, vector<16x24xf32>, vector<648x24xf32> -> vector<648x24xf32>
    %78 = arith.addf %74, %77 : vector<648x24xf32>
    %cst_75 = arith.constant 0.000000e+00 : f32
    %79 = vector.broadcast %cst_75 : f32 to vector<648x24xf32>
    %80 = arith.maximumf %78, %79 : vector<648x24xf32>
    %c0_76 = arith.constant 0 : index
    %c0_77 = arith.constant 0 : index
    %81 = vector.load %arg3[%c0_76, %c0_77] : memref<2x648xf32, #tpu.memory_space<vmem>>, vector<2x648xf32>
    %cst_78 = arith.constant dense<0.000000e+00> : vector<2x24xf32>
    %82 = tpu.matmul %81, %80, %cst_78 {dimension_numbers = #tpu.dot_dimension_numbers<[1], [0], [0], [1], [0, 0, 1, 1], [], []>} : vector<2x648xf32>, vector<648x24xf32>, vector<2x24xf32> -> vector<2x24xf32>
    %c0_79 = arith.constant 0 : index
    %c0_80 = arith.constant 0 : index
    %83 = vector.load %arg4[%c0_79, %c0_80] : memref<24x128xf32, #tpu.memory_space<vmem>>, vector<24x128xf32>
    %cst_81 = arith.constant dense<0.000000e+00> : vector<2x128xf32>
    %84 = tpu.matmul %82, %83, %cst_81 {dimension_numbers = #tpu.dot_dimension_numbers<[1], [0], [0], [1], [0, 0, 1, 1], [], []>} : vector<2x24xf32>, vector<24x128xf32>, vector<2x128xf32> -> vector<2x128xf32>
    %c0_82 = arith.constant 0 : index
    %c0_83 = arith.constant 0 : index
    %85 = vector.load %arg5[%c0_82, %c0_83] : memref<2x128xf32, #tpu.memory_space<vmem>>, vector<2x128xf32>
    tpu.vector_store %arg5[%c0_82, %c0_83], %84 {strides = array<i32>} : memref<2x128xf32, #tpu.memory_space<vmem>>, vector<2x128xf32>,
    return
  }
}

</mosaic_0001>

<bundles_post_ra>
// kernel: extract_features.1
= control target key start
LH: loop header
LB: loop body
LE: loop exit
PB: predicated region body
PF: predicated region fallthrough
CT: control target
= control target key end

     0   :  { %vm185_vm0 = vcmask 64512   ;;  %v26258_v2 = vmov 0.0   ;;  %vm26259_vm1 = vmmov 0   ;;  %s33943_s0 = inlined_call_operand.vmem [shape: f32[688,8], index: 0, kind: input, shape index: {}]   ;;  %s33944_s1 = inlined_call_operand.vmem [shape: f32[72,16], index: 1, kind: input, shape index: {}]   ;;  %s33945_s2 = inlined_call_operand.vmem [shape: f32[144,24], index: 2, kind: input, shape index: {}]   ;;  %s33946_s3 = inlined_call_operand.vmem [shape: f32[2,648], index: 3, kind: input, shape index: {}]   ;;  %s33947_s4 = inlined_call_operand.vmem [shape: f32[24,128], index: 4, kind: input, shape index: {}]   ;;  %s33948_s5 = inlined_call_operand.hbm [shape: f32[2,128], index: 5, kind: output, shape index: {}]  }
   0x1   :  { %v184_v0 = vld [vmem:[%s33944_s1 + $0x8] sm:$0xff]  ;;  %19082 = vmatprep.subr.mxu0 %v26258_v2  ;;  %19084 = vmatprep.mubr.msk.f32.mxu0 %vm26259_vm1, %v26258_v2  ;;  %v105_v4 = vld [vmem:[%s33943_s0 + $0x11] sm:$0xff]  ;;  %v106_v5 = vld [vmem:[%s33943_s0 + $0x19] sm:$0xff] }
   0x2   :  { %v103_v1 = vld [vmem:[%s33943_s0 + $0x1] sm:$0xff]  ;;  %19083 = vmatpush3.msra.mxu0 %v184_v0  ;;  %23637 = vmatprep.subr.mxu1 %v26258_v2  ;;  %v104_v3 = vld [vmem:[%s33943_s0 + $0x9] sm:$0xff] }
   0x3   :  { %19085 = vmatmul.mubr.msk.f32.vlgmr.msra.gmra.mrb[0].mxu0 %vm185_vm0, %v103_v1  ;;  %19327 = vmatprep.subr.mxu0 %v26258_v2 }
   0x4   :  { %19087 = vmatprep.mubr.msk.f32.mxu0 %vm26259_vm1, %v26258_v2  ;;  %23638 = vmatpush3.msra.mxu1 %v184_v0 }
   0x5   :  { %19318 = vmatprep.mubr.msk.f32.mxu1 %vm26259_vm1, %v26258_v2 }
   0x7   :  { %19088 = vmatmul.mubr.msk.f32.gmra.mrb[2].mxu0 %vm185_vm0, %v104_v3 }
   0x8   :  { %19090 = vmatprep.mubr.msk.f32.mxu0 %vm26259_vm1, %v26258_v2 }
   0xb   :  { %19091 = vmatmul.mubr.msk.f32.gmra.mrb[4].mxu0 %vm185_vm0, %v105_v4 }
   0xc   :  { %19093 = vmatprep.mubr.msk.f32.mxu0 %vm26259_vm1, %v26258_v2 }
   0xd   :  { %10 = vsyncpa [#allocation4], 0  ;;  %v107_v6 = vld [vmem:[%s33943_s0 + $0x21] sm:$0xff]  ;;  %v108_v7 = vld [vmem:[%s33943_s0 + $0x29] sm:$0xff]  ;;  %vm7825_vm2 = vcmask 130048   ;;  %vm15973_vm3 = vcmask 195584  }
   0xe   :  { %v109_v8 = vld [vmem:[%s33943_s0 + $0x31] sm:$0xff]  ;;  %v110_v9 = vld [vmem:[%s33943_s0 + $0x39] sm:$0xff]  ;;  %v111_v10 = vld [vmem:[%s33943_s0 + $0x41] sm:$0xff]  ;;  %7907 = vst.msk [vmem:[#allocation2 + $0x288] sm:$0xff] %vm7825_vm2, %v26258_v2  ;;  %s26262_s7 = smov [#allocation3]  }
   0xf   :  { %19094 = vmatmul.mubr.msk.f32.gmra.mrb[6].mxu0 %vm185_vm0, %v106_v5  ;;  %v112_v11 = vld [vmem:[%s33943_s0 + $0x49] sm:$0xff]  ;;  %v113_v12 = vld [vmem:[%s33943_s0 + $0x51] sm:$0xff]  ;;  %v114_v13 = vld [vmem:[%s33943_s0 + $0x59] sm:$0xff]  ;;  %7908 = vst.msk [vmem:[#allocation2 + $0x290] sm:$0xff] %vm7825_vm2, %v26258_v2  ;;  %s16054_s8 = sshll.u32 %s26262_s7, 4  ;;  %s16055_s8 = int_to_ptr.vmem [resolvable:$true] %s16054_s8 }
  0x10   :  { %19096 = vmatprep.mubr.msk.f32.mxu0 %vm26259_vm1, %v26258_v2  ;;  %v115_v14 = vld [vmem:[%s33943_s0 + $0x61] sm:$0xff]  ;;  %v116_v15 = vld [vmem:[%s33943_s0 + $0x69] sm:$0xff]  ;;  %v117_v16 = vld [vmem:[%s33943_s0 + $0x71] sm:$0xff]  ;;  %7909 = vst.msk [vmem:[#allocation2 + $0x298] sm:$0xff] %vm7825_vm2, %v26258_v2  ;;  %s26234_s9 = scalar_lea.vmem %s16055_s8, 32  ;;  %p26239_p1 = scmp.lt.s32.totalorder %s16055_s8, %s16055_s8 }
  0x11   :  { %v118_v17 = vld [vmem:[%s33943_s0 + $0x79] sm:$0xff]  ;;  %v119_v18 = vld [vmem:[%s33943_s0 + $0x81] sm:$0xff]  ;;  %v120_v19 = vld [vmem:[%s33943_s0 + $0x89] sm:$0xff]  ;;  %7910 = vst.msk [vmem:[#allocation2 + $0x2a0] sm:$0xff] %vm7825_vm2, %v26258_v2  ;;  %p26235_p0 = scmp.ne.s32.totalorder %s16055_s8, %s26234_s9  ;;  %p26240_p2 = scmp.lt.s32.totalorder %s26234_s9, %s26234_s9 }
  0x12   :  { %v121_v20 = vld [vmem:[%s33943_s0 + $0x91] sm:$0xff]  ;;  %v122_v21 = vld [vmem:[%s33943_s0 + $0x99] sm:$0xff]  ;;  %v123_v23 = vld [vmem:[%s33943_s0 + $0xa1] sm:$0xff]  ;;  %7911 = vst.msk [vmem:[#allocation2 + $0x2a8] sm:$0xff] %vm7825_vm2, %v26258_v2 }
  0x13   :  { %19097 = vmatmul.mubr.msk.f32.gmra.mrb[8].mxu0 %vm185_vm0, %v107_v6  ;;  %v102_v22 = vld [vmem:[%s33944_s1] sm:$0xff]  ;;  %v124_v24 = vld [vmem:[%s33943_s0 + $0xa9] sm:$0xff]  ;;  %v125_v25 = vld [vmem:[%s33943_s0 + $0xb1] sm:$0xff]  ;;  %p26241_p3 = por %p26240_p2, %p26239_p1 }
  0x14   :  { %19099 = vmatprep.mubr.msk.f32.mxu0 %vm26259_vm1, %v26258_v2  ;;  %19328 = vmatpush3.msra.mxu0 %v102_v22  ;;  %v126_v26 = vld [vmem:[%s33943_s0 + $0xb9] sm:$0xff]  ;;  %v127_v27 = vld [vmem:[%s33943_s0 + $0xc1] sm:$0xff]  ;;  %v128_v28 = vld [vmem:[%s33943_s0 + $0xc9] sm:$0xff] }
  0x15   :  { %19572 = vmatprep.subr.mxu0 %v26258_v2  ;;  %v129_v29 = vld [vmem:[%s33943_s0 + $0xd1] sm:$0xff]  ;;  %v130_v30 = vld [vmem:[%s33943_s0 + $0xd9] sm:$0xff]  ;;  %v131_v31 = vld [vmem:[%s33943_s0 + $0xe1] sm:$0xff]  ;;  %p26242_p4 = pnand %p26241_p3, %p26235_p0 }
  0x16   :  { %v132_v32 = vld [vmem:[%s33943_s0 + $0xe9] sm:$0xff]  ;;  %v133_v33 = vld [vmem:[%s33943_s0 + $0xf1] sm:$0xff]  ;;  %v134_v34 = vld [vmem:[%s33943_s0 + $0xf9] sm:$0xff] }
  0x17   :  { %19100 = vmatmul.mubr.msk.f32.gmra.mrb[10].mxu0 %vm185_vm0, %v108_v7  ;;  %v135_v35 = vld [vmem:[%s33943_s0 + $0x101] sm:$0xff]  ;;  %v136_v36 = vld [vmem:[%s33943_s0 + $0x109] sm:$0xff]  ;;  %v137_v37 = vld [vmem:[%s33943_s0 + $0x111] sm:$0xff] }
  0x18   :  { %19102 = vmatprep.mubr.msk.f32.mxu0 %vm26259_vm1, %v26258_v2  ;;  %v138_v38 = vld [vmem:[%s33943_s0 + $0x119] sm:$0xff]  ;;  %v139_v39 = vld [vmem:[%s33943_s0 + $0x121] sm:$0xff]  ;;  %v140_v40 = vld [vmem:[%s33943_s0 + $0x129] sm:$0xff] }
  0x19   :  { %v141_v41 = vld [vmem:[%s33943_s0 + $0x131] sm:$0xff]  ;;  %v142_v42 = vld [vmem:[%s33943_s0 + $0x139] sm:$0xff]  ;;  %v143_v43 = vld [vmem:[%s33943_s0 + $0x141] sm:$0xff] }
  0x1a   :  { %v144_v44 = vld [vmem:[%s33943_s0 + $0x149] sm:$0xff]  ;;  %v145_v45 = vld [vmem:[%s33943_s0 + $0x151] sm:$0xff]  ;;  %v146_v46 = vld [vmem:[%s33943_s0 + $0x159] sm:$0xff] }
  0x1b   :  { %19103 = vmatmul.mubr.msk.f32.gmra.mrb[12].mxu0 %vm185_vm0, %v109_v8  ;;  %v147_v47 = vld [vmem:[%s33943_s0 + $0x161] sm:$0xff]  ;;  %v148_v48 = vld [vmem:[%s33943_s0 + $0x169] sm:$0xff]  ;;  %v149_v49 = vld [vmem:[%s33943_s0 + $0x171] sm:$0xff] }
  0x1c   :  { %19105 = vmatprep.mubr.msk.f32.mxu0 %vm26259_vm1, %v26258_v2  ;;  %v150_v50 = vld [vmem:[%s33943_s0 + $0x179] sm:$0xff]  ;;  %v151_v51 = vld [vmem:[%s33943_s0 + $0x181] sm:$0xff]  ;;  %v152_v52 = vld [vmem:[%s33943_s0 + $0x189] sm:$0xff] }
  0x1d   :  { %v153_v53 = vld [vmem:[%s33943_s0 + $0x191] sm:$0xff]  ;;  %v154_v54 = vld [vmem:[%s33943_s0 + $0x199] sm:$0xff]  ;;  %v155_v55 = vld [vmem:[%s33943_s0 + $0x1a1] sm:$0xff] }
  0x1e   :  { %v156_v56 = vld [vmem:[%s33943_s0 + $0x1a9] sm:$0xff]  ;;  %v157_v57 = vld [vmem:[%s33943_s0 + $0x1b1] sm:$0xff]  ;;  %v158_v58 = vld [vmem:[%s33943_s0 + $0x1b9] sm:$0xff] }
  0x1f   :  { %19106 = vmatmul.mubr.msk.f32.gmra.mrb[14].mxu0 %vm185_vm0, %v110_v9  ;;  %v159_v59 = vld [vmem:[%s33943_s0 + $0x1c1] sm:$0xff]  ;;  %v160_v60 = vld [vmem:[%s33943_s0 + $0x1c9] sm:$0xff]  ;;  %v161_v61 = vld [vmem:[%s33943_s0 + $0x1d1] sm:$0xff] }
  0x20   :  { %19108 = vmatprep.mubr.msk.f32.mxu0 %vm26259_vm1, %v26258_v2  ;;  %v162_v62 = vld [vmem:[%s33943_s0 + $0x1d9] sm:$0xff]  ;;  %v163_v63 = vld [vmem:[%s33943_s0 + $0x1e1] sm:$0xff]  ;;  %v164_v0 = vld [vmem:[%s33943_s0 + $0x1e9] sm:$0xff] }
  0x21   :  { %v165_v1 = vld [vmem:[%s33943_s0 + $0x1f1] sm:$0xff]  ;;  %v166_v3 = vld [vmem:[%s33943_s0 + $0x1f9] sm:$0xff]  ;;  %v167_v4 = vld [vmem:[%s33943_s0 + $0x201] sm:$0xff] }
  0x22   :  { %v168_v5 = vld [vmem:[%s33943_s0 + $0x209] sm:$0xff]  ;;  %v169_v6 = vld [vmem:[%s33943_s0 + $0x211] sm:$0xff]  ;;  %v170_v7 = vld [vmem:[%s33943_s0 + $0x219] sm:$0xff] }
  0x23   :  { %19109 = vmatmul.mubr.msk.f32.gmra.mrb[16].mxu0 %vm185_vm0, %v111_v10  ;;  %v171_v8 = vld [vmem:[%s33943_s0 + $0x221] sm:$0xff]  ;;  %v172_v9 = vld [vmem:[%s33943_s0 + $0x229] sm:$0xff]  ;;  %v173_v10 = vld [vmem:[%s33943_s0 + $0x231] sm:$0xff] }
  0x24   :  { %19111 = vmatprep.mubr.msk.f32.mxu0 %vm26259_vm1, %v26258_v2  ;;  %v25_v22 = vld [vmem:[%s33943_s0 + $0x20] sm:$0xff] }
  0x27   :  { %19112 = vmatmul.mubr.msk.f32.gmra.mrb[18].mxu0 %vm185_vm0, %v112_v11  ;;  %v174_v11 = vld [vmem:[%s33943_s0 + $0x239] sm:$0xff] }
  0x28   :  { %19114 = vmatprep.mubr.msk.f32.mxu0 %vm26259_vm1, %v26258_v2 }
  0x2b   :  { %19115 = vmatmul.mubr.msk.f32.gmra.mrb[20].mxu0 %vm185_vm0, %v113_v12  ;;  %v175_v12 = vld [vmem:[%s33943_s0 + $0x241] sm:$0xff] }
  0x2c   :  { %19117 = vmatprep.mubr.msk.f32.mxu0 %vm26259_vm1, %v26258_v2 }
  0x2f   :  { %19118 = vmatmul.mubr.msk.f32.gmra.mrb[22].mxu0 %vm185_vm0, %v114_v13  ;;  %v176_v13 = vld [vmem:[%s33943_s0 + $0x249] sm:$0xff] }
  0x30   :  { %19120 = vmatprep.mubr.msk.f32.mxu0 %vm26259_vm1, %v26258_v2 }
  0x33   :  { %19121 = vmatmul.mubr.msk.f32.gmra.mrb[24].mxu0 %vm185_vm0, %v115_v14  ;;  %v177_v14 = vld [vmem:[%s33943_s0 + $0x251] sm:$0xff] }
  0x34   :  { %19123 = vmatprep.mubr.msk.f32.mxu0 %vm26259_vm1, %v26258_v2 }
  0x37   :  { %19124 = vmatmul.mubr.msk.f32.gmra.mrb[26].mxu0 %vm185_vm0, %v116_v15  ;;  %v178_v15 = vld [vmem:[%s33943_s0 + $0x259] sm:$0xff] }
  0x38   :  { %19126 = vmatprep.mubr.msk.f32.mxu0 %vm26259_vm1, %v26258_v2 }
  0x3b   :  { %19127 = vmatmul.mubr.msk.f32.gmra.mrb[28].mxu0 %vm185_vm0, %v117_v16  ;;  %v179_v16 = vld [vmem:[%s33943_s0 + $0x261] sm:$0xff] }
  0x3c   :  { %19129 = vmatprep.mubr.msk.f32.mxu0 %vm26259_vm1, %v26258_v2 }
  0x3f   :  { %19130 = vmatmul.mubr.msk.f32.gmra.mrb[30].mxu0 %vm185_vm0, %v118_v17  ;;  %v180_v17 = vld [vmem:[%s33943_s0 + $0x269] sm:$0xff] }
  0x40   :  { %19132 = vmatprep.mubr.msk.f32.mxu0 %vm26259_vm1, %v26258_v2 }
  0x43   :  { %19133 = vmatmul.mubr.msk.f32.gmra.mrb[32].mxu0 %vm185_vm0, %v119_v18  ;;  %v21_v18 = vld [vmem:[%s33943_s0] sm:$0xff] }
  0x44   :  { %19135 = vmatprep.mubr.msk.f32.mxu0 %vm26259_vm1, %v26258_v2 }
  0x47   :  { %19136 = vmatmul.mubr.msk.f32.gmra.mrb[34].mxu0 %vm185_vm0, %v120_v19  ;;  %v22_v19 = vld [vmem:[%s33943_s0 + $0x8] sm:$0xff] }
  0x48   :  { %19138 = vmatprep.mubr.msk.f32.mxu0 %vm26259_vm1, %v26258_v2 }
  0x4b   :  { %19139 = vmatmul.mubr.msk.f32.gmra.mrb[36].mxu0 %vm185_vm0, %v121_v20  ;;  %v23_v20 = vld [vmem:[%s33943_s0 + $0x10] sm:$0xff] }
  0x4c   :  { %19141 = vmatprep.mubr.msk.f32.mxu0 %vm26259_vm1, %v26258_v2 }
  0x4f   :  { %19142 = vmatmul.mubr.msk.f32.gmra.mrb[38].mxu0 %vm185_vm0, %v122_v21  ;;  %v24_v21 = vld [vmem:[%s33943_s0 + $0x18] sm:$0xff] }
  0x50   :  { %19144 = vmatprep.mubr.msk.f32.mxu0 %vm26259_vm1, %v26258_v2 }
  0x53   :  { %19145 = vmatmul.mubr.msk.f32.gmra.mrb[40].mxu0 %vm185_vm0, %v123_v23  ;;  %v26_v23 = vld [vmem:[%s33943_s0 + $0x28] sm:$0xff] }
  0x54   :  { %19147 = vmatprep.mubr.msk.f32.mxu0 %vm26259_vm1, %v26258_v2 }
  0x57   :  { %19148 = vmatmul.mubr.msk.f32.gmra.mrb[42].mxu0 %vm185_vm0, %v124_v24  ;;  %v27_v24 = vld [vmem:[%s33943_s0 + $0x30] sm:$0xff] }
  0x58   :  { %19150 = vmatprep.mubr.msk.f32.mxu0 %vm26259_vm1, %v26258_v2 }
  0x5b   :  { %19151 = vmatmul.mubr.msk.f32.gmra.mrb[44].mxu0 %vm185_vm0, %v125_v25  ;;  %v28_v25 = vld [vmem:[%s33943_s0 + $0x38] sm:$0xff] }
  0x5c   :  { %19153 = vmatprep.mubr.msk.f32.mxu0 %vm26259_vm1, %v26258_v2 }
  0x5f   :  { %19154 = vmatmul.mubr.msk.f32.gmra.mrb[46].mxu0 %vm185_vm0, %v126_v26  ;;  %v29_v26 = vld [vmem:[%s33943_s0 + $0x40] sm:$0xff] }
  0x60   :  { %19156 = vmatprep.mubr.msk.f32.mxu0 %vm26259_vm1, %v26258_v2 }
  0x63   :  { %19157 = vmatmul.mubr.msk.f32.gmra.mrb[48].mxu0 %vm185_vm0, %v127_v27  ;;  %v30_v27 = vld [vmem:[%s33943_s0 + $0x48] sm:$0xff] }
  0x64   :  { %19159 = vmatprep.mubr.msk.f32.mxu0 %vm26259_vm1, %v26258_v2 }
  0x67   :  { %19160 = vmatmul.mubr.msk.f32.gmra.mrb[50].mxu0 %vm185_vm0, %v128_v28  ;;  %v31_v28 = vld [vmem:[%s33943_s0 + $0x50] sm:$0xff] }
  0x68   :  { %19162 = vmatprep.mubr.msk.f32.mxu0 %vm26259_vm1, %v26258_v2 }
  0x6b   :  { %19163 = vmatmul.mubr.msk.f32.gmra.mrb[52].mxu0 %vm185_vm0, %v129_v29  ;;  %v32_v29 = vld [vmem:[%s33943_s0 + $0x58] sm:$0xff] }
  0x6c   :  { %19165 = vmatprep.mubr.msk.f32.mxu0 %vm26259_vm1, %v26258_v2 }
  0x6f   :  { %19166 = vmatmul.mubr.msk.f32.gmra.mrb[54].mxu0 %vm185_vm0, %v130_v30  ;;  %v33_v30 = vld [vmem:[%s33943_s0 + $0x60] sm:$0xff] }
  0x70   :  { %19168 = vmatprep.mubr.msk.f32.mxu0 %vm26259_vm1, %v26258_v2 }
  0x73   :  { %19169 = vmatmul.mubr.msk.f32.gmra.mrb[56].mxu0 %vm185_vm0, %v131_v31  ;;  %v34_v31 = vld [vmem:[%s33943_s0 + $0x68] sm:$0xff] }
  0x74   :  { %19171 = vmatprep.mubr.msk.f32.mxu0 %vm26259_vm1, %v26258_v2 }
  0x77   :  { %19172 = vmatmul.mubr.msk.f32.gmra.mrb[58].mxu0 %vm185_vm0, %v132_v32  ;;  %v35_v32 = vld [vmem:[%s33943_s0 + $0x70] sm:$0xff] }
  0x78   :  { %19174 = vmatprep.mubr.msk.f32.mxu0 %vm26259_vm1, %v26258_v2 }
  0x7b   :  { %19175 = vmatmul.mubr.msk.f32.gmra.mrb[60].mxu0 %vm185_vm0, %v133_v33  ;;  %v36_v33 = vld [vmem:[%s33943_s0 + $0x78] sm:$0xff] }
  0x7c   :  { %19177 = vmatprep.mubr.msk.f32.mxu0 %vm26259_vm1, %v26258_v2 }
  0x7f   :  { %19178 = vmatmul.mubr.msk.f32.gmra.mrb[62].mxu0 %vm185_vm0, %v134_v34  ;;  %v37_v34 = vld [vmem:[%s33943_s0 + $0x80] sm:$0xff] }
  0x80   :  { %19180 = vmatprep.mubr.msk.f32.mxu0 %vm26259_vm1, %v26258_v2 }
  0x83   :  { %19181 = vmatmul.mubr.msk.f32.gmra.mrb[64].mxu0 %vm185_vm0, %v135_v35  ;;  %v38_v35 = vld [vmem:[%s33943_s0 + $0x88] sm:$0xff] }
  0x84   :  { %19183 = vmatprep.mubr.msk.f32.mxu0 %vm26259_vm1, %v26258_v2 }
  0x87   :  { %19184 = vmatmul.mubr.msk.f32.gmra.mrb[66].mxu0 %vm185_vm0, %v136_v36  ;;  %v39_v36 = vld [vmem:[%s33943_s0 + $0x90] sm:$0xff] }
  0x88   :  { %19186 = vmatprep.mubr.msk.f32.mxu0 %vm26259_vm1, %v26258_v2 }
  0x8b   :  { %19187 = vmatmul.mubr.msk.f32.gmra.mrb[68].mxu0 %vm185_vm0, %v137_v37  ;;  %v40_v37 = vld [vmem:[%s33943_s0 + $0x98] sm:$0xff] }
  0x8c   :  { %19189 = vmatprep.mubr.msk.f32.mxu0 %vm26259_vm1, %v26258_v2 }
  0x8f   :  { %19190 = vmatmul.mubr.msk.f32.gmra.mrb[70].mxu0 %vm185_vm0, %v138_v38  ;;  %v1693_v38 = vld [vmem:[%s33944_s1 + $0x10] sm:$0xff] }
  0x90   :  { %19192 = vmatprep.mubr.msk.f32.mxu0 %vm26259_vm1, %v26258_v2 }
  0x93   :  { %19193 = vmatmul.mubr.msk.f32.gmra.mrb[72].mxu0 %vm185_vm0, %v139_v39  ;;  %v41_v39 = vld [vmem:[%s33943_s0 + $0xa0] sm:$0xff] }
  0x94   :  { %19195 = vmatprep.mubr.msk.f32.mxu0 %vm26259_vm1, %v26258_v2 }
  0x97   :  { %19196 = vmatmul.mubr.msk.f32.gmra.mrb[74].mxu0 %vm185_vm0, %v140_v40  ;;  %v42_v40 = vld [vmem:[%s33943_s0 + $0xa8] sm:$0xff] }
  0x98   :  { %19198 = vmatprep.mubr.msk.f32.mxu0 %vm26259_vm1, %v26258_v2 }
  0x9b   :  { %19199 = vmatmul.mubr.msk.f32.gmra.mrb[76].mxu0 %vm185_vm0, %v141_v41  ;;  %v43_v41 = vld [vmem:[%s33943_s0 + $0xb0] sm:$0xff] }
  0x9c   :  { %19201 = vmatprep.mubr.msk.f32.mxu0 %vm26259_vm1, %v26258_v2 }
  0x9f   :  { %19202 = vmatmul.mubr.msk.f32.gmra.mrb[78].mxu0 %vm185_vm0, %v142_v42  ;;  %v44_v42 = vld [vmem:[%s33943_s0 + $0xb8] sm:$0xff] }
  0xa0   :  { %19204 = vmatprep.mubr.msk.f32.mxu0 %vm26259_vm1, %v26258_v2 }
  0xa3   :  { %19205 = vmatmul.mubr.msk.f32.gmra.mrb[80].mxu0 %vm185_vm0, %v143_v43  ;;  %v45_v43 = vld [vmem:[%s33943_s0 + $0xc0] sm:$0xff] }
  0xa4   :  { %19207 = vmatprep.mubr.msk.f32.mxu0 %vm26259_vm1, %v26258_v2 }
  0xa7   :  { %19208 = vmatmul.mubr.msk.f32.gmra.mrb[82].mxu0 %vm185_vm0, %v144_v44  ;;  %v46_v44 = vld [vmem:[%s33943_s0 + $0xc8] sm:$0xff] }
  0xa8   :  { %19210 = vmatprep.mubr.msk.f32.mxu0 %vm26259_vm1, %v26258_v2 }
  0xab   :  { %19211 = vmatmul.mubr.msk.f32.gmra.mrb[84].mxu0 %vm185_vm0, %v145_v45  ;;  %v47_v45 = vld [vmem:[%s33943_s0 + $0xd0] sm:$0xff] }
  0xac   :  { %19213 = vmatprep.mubr.msk.f32.mxu0 %vm26259_vm1, %v26258_v2 }
  0xaf   :  { %19214 = vmatmul.mubr.msk.f32.gmra.mrb[86].mxu0 %vm185_vm0, %v146_v46  ;;  %v48_v46 = vld [vmem:[%s33943_s0 + $0xd8] sm:$0xff] }
  0xb0   :  { %19216 = vmatprep.mubr.msk.f32.mxu0 %vm26259_vm1, %v26258_v2 }
  0xb3   :  { %19217 = vmatmul.mubr.msk.f32.gmra.mrb[88].mxu0 %vm185_vm0, %v147_v47  ;;  %v49_v47 = vld [vmem:[%s33943_s0 + $0xe0] sm:$0xff] }
  0xb4   :  { %19219 = vmatprep.mubr.msk.f32.mxu0 %vm26259_vm1, %v26258_v2 }
  0xb7   :  { %19220 = vmatmul.mubr.msk.f32.gmra.mrb[90].mxu0 %vm185_vm0, %v148_v48  ;;  %v50_v48 = vld [vmem:[%s33943_s0 + $0xe8] sm:$0xff] }
  0xb8   :  { %19222 = vmatprep.mubr.msk.f32.mxu0 %vm26259_vm1, %v26258_v2 }
  0xbb   :  { %19223 = vmatmul.mubr.msk.f32.gmra.mrb[92].mxu0 %vm185_vm0, %v149_v49  ;;  %v51_v49 = vld [vmem:[%s33943_s0 + $0xf0] sm:$0xff] }
  0xbc   :  { %19225 = vmatprep.mubr.msk.f32.mxu0 %vm26259_vm1, %v26258_v2 }
  0xbf   :  { %19226 = vmatmul.mubr.msk.f32.gmra.mrb[94].mxu0 %vm185_vm0, %v150_v50  ;;  %v52_v50 = vld [vmem:[%s33943_s0 + $0xf8] sm:$0xff] }
  0xc0   :  { %19228 = vmatprep.mubr.msk.f32.mxu0 %vm26259_vm1, %v26258_v2 }
  0xc3   :  { %19229 = vmatmul.mubr.msk.f32.gmra.mrb[96].mxu0 %vm185_vm0, %v151_v51  ;;  %v53_v51 = vld [vmem:[%s33943_s0 + $0x100] sm:$0xff] }
  0xc4   :  { %19231 = vmatprep.mubr.msk.f32.mxu0 %vm26259_vm1, %v26258_v2 }
  0xc7   :  { %19232 = vmatmul.mubr.msk.f32.gmra.mrb[98].mxu0 %vm185_vm0, %v152_v52  ;;  %v54_v52 = vld [vmem:[%s33943_s0 + $0x108] sm:$0xff] }
  0xc8   :  { %19234 = vmatprep.mubr.msk.f32.mxu0 %vm26259_vm1, %v26258_v2 }
  0xcb   :  { %19235 = vmatmul.mubr.msk.f32.gmra.mrb[100].mxu0 %vm185_vm0, %v153_v53  ;;  %v55_v53 = vld [vmem:[%s33943_s0 + $0x110] sm:$0xff] }
  0xcc   :  { %19237 = vmatprep.mubr.msk.f32.mxu0 %vm26259_vm1, %v26258_v2 }
  0xcf   :  { %19238 = vmatmul.mubr.msk.f32.gmra.mrb[102].mxu0 %vm185_vm0, %v154_v54  ;;  %v56_v54 = vld [vmem:[%s33943_s0 + $0x118] sm:$0xff] }
  0xd0   :  { %19240 = vmatprep.mubr.msk.f32.mxu0 %vm26259_vm1, %v26258_v2 }
  0xd3   :  { %19241 = vmatmul.mubr.msk.f32.gmra.mrb[104].mxu0 %vm185_vm0, %v155_v55  ;;  %v57_v55 = vld [vmem:[%s33943_s0 + $0x120] sm:$0xff] }
  0xd4   :  { %19243 = vmatprep.mubr.msk.f32.mxu0 %vm26259_vm1, %v26258_v2 }
  0xd7   :  { %19244 = vmatmul.mubr.msk.f32.gmra.mrb[106].mxu0 %vm185_vm0, %v156_v56  ;;  %v58_v56 = vld [vmem:[%s33943_s0 + $0x128] sm:$0xff] }
  0xd8   :  { %19246 = vmatprep.mubr.msk.f32.mxu0 %vm26259_vm1, %v26258_v2 }
  0xdb   :  { %19247 = vmatmul.mubr.msk.f32.gmra.mrb[108].mxu0 %vm185_vm0, %v157_v57  ;;  %v59_v57 = vld [vmem:[%s33943_s0 + $0x130] sm:$0xff] }
  0xdc   :  { %19249 = vmatprep.mubr.msk.f32.mxu0 %vm26259_vm1, %v26258_v2 }
  0xdf   :  { %19250 = vmatmul.mubr.msk.f32.gmra.mrb[110].mxu0 %vm185_vm0, %v158_v58  ;;  %v60_v58 = vld [vmem:[%s33943_s0 + $0x138] sm:$0xff] }
  0xe0   :  { %19252 = vmatprep.mubr.msk.f32.mxu0 %vm26259_vm1, %v26258_v2 }
  0xe3   :  { %19253 = vmatmul.mubr.msk.f32.gmra.mrb[112].mxu0 %vm185_vm0, %v159_v59  ;;  %v61_v59 = vld [vmem:[%s33943_s0 + $0x140] sm:$0xff] }
  0xe4   :  { %19255 = vmatprep.mubr.msk.f32.mxu0 %vm26259_vm1, %v26258_v2 }
  0xe7   :  { %19256 = vmatmul.mubr.msk.f32.gmra.mrb[114].mxu0 %vm185_vm0, %v160_v60  ;;  %v62_v60 = vld [vmem:[%s33943_s0 + $0x148] sm:$0xff] }
  0xe8   :  { %19258 = vmatprep.mubr.msk.f32.mxu0 %vm26259_vm1, %v26258_v2 }
  0xeb   :  { %19259 = vmatmul.mubr.msk.f32.gmra.mrb[116].mxu0 %vm185_vm0, %v161_v61  ;;  %v63_v61 = vld [vmem:[%s33943_s0 + $0x150] sm:$0xff] }
  0xec   :  { %19261 = vmatprep.mubr.msk.f32.mxu0 %vm26259_vm1, %v26258_v2 }
  0xef   :  { %19262 = vmatmul.mubr.msk.f32.gmra.mrb[118].mxu0 %vm185_vm0, %v162_v62  ;;  %v64_v62 = vld [vmem:[%s33943_s0 + $0x158] sm:$0xff] }
  0xf0   :  { %19264 = vmatprep.mubr.msk.f32.mxu0 %vm26259_vm1, %v26258_v2 }
  0xf3   :  { %19265 = vmatmul.mubr.msk.f32.gmra.mrb[120].mxu0 %vm185_vm0, %v163_v63  ;;  %v65_v63 = vld [vmem:[%s33943_s0 + $0x160] sm:$0xff] }
  0xf4   :  { %19267 = vmatprep.mubr.msk.f32.mxu0 %vm26259_vm1, %v26258_v2 }
  0xf7   :  { %19268 = vmatmul.mubr.msk.f32.gmra.mrb[122].mxu0 %vm185_vm0, %v164_v0  ;;  %v66_v0 = vld [vmem:[%s33943_s0 + $0x168] sm:$0xff] }
  0xf8   :  { %19270 = vmatprep.mubr.msk.f32.mxu0 %vm26259_vm1, %v26258_v2 }
  0xfb   :  { %19271 = vmatmul.mubr.msk.f32.gmra.mrb[124].mxu0 %vm185_vm0, %v165_v1  ;;  %v67_v1 = vld [vmem:[%s33943_s0 + $0x170] sm:$0xff] }
  0xfc   :  { %19273 = vmatprep.mubr.msk.f32.mxu0 %vm26259_vm1, %v26258_v2 }
  0xff   :  { %19274 = vmatmul.mubr.msk.f32.gmra.mrb[126].mxu0 %vm185_vm0, %v166_v3  ;;  %v68_v3 = vld [vmem:[%s33943_s0 + $0x178] sm:$0xff] }
 0x100   :  { %19276 = vmatprep.mubr.msk.f32.mxu0 %vm26259_vm1, %v26258_v2 }
 0x103   :  { %19277 = vmatmul.mubr.msk.f32.gmra.mrb[128].mxu0 %vm185_vm0, %v167_v4  ;;  %v69_v4 = vld [vmem:[%s33943_s0 + $0x180] sm:$0xff] }
 0x104   :  { %19279 = vmatprep.mubr.msk.f32.mxu0 %vm26259_vm1, %v26258_v2 }
 0x107   :  { %19280 = vmatmul.mubr.msk.f32.gmra.mrb[130].mxu0 %vm185_vm0, %v168_v5  ;;  %v70_v5 = vld [vmem:[%s33943_s0 + $0x188] sm:$0xff] }
 0x108   :  { %19282 = vmatprep.mubr.msk.f32.mxu0 %vm26259_vm1, %v26258_v2 }
 0x10b   :  { %19283 = vmatmul.mubr.msk.f32.gmra.mrb[132].mxu0 %vm185_vm0, %v169_v6  ;;  %v71_v6 = vld [vmem:[%s33943_s0 + $0x190] sm:$0xff] }
 0x10c   :  { %19285 = vmatprep.mubr.msk.f32.mxu0 %vm26259_vm1, %v26258_v2 }
 0x10f   :  { %19286 = vmatmul.mubr.msk.f32.gmra.mrb[134].mxu0 %vm185_vm0, %v170_v7  ;;  %v72_v7 = vld [vmem:[%s33943_s0 + $0x198] sm:$0xff] }
 0x110   :  { %19288 = vmatprep.mubr.msk.f32.mxu0 %vm26259_vm1, %v26258_v2 }
 0x113   :  { %19289 = vmatmul.mubr.msk.f32.gmra.mrb[136].mxu0 %vm185_vm0, %v171_v8  ;;  %v73_v8 = vld [vmem:[%s33943_s0 + $0x1a0] sm:$0xff] }
 0x114   :  { %19291 = vmatprep.mubr.msk.f32.mxu0 %vm26259_vm1, %v26258_v2 }
 0x117   :  { %19292 = vmatmul.mubr.msk.f32.gmra.mrb[138].mxu0 %vm185_vm0, %v172_v9  ;;  %v74_v9 = vld [vmem:[%s33943_s0 + $0x1a8] sm:$0xff] }
 0x118   :  { %19294 = vmatprep.mubr.msk.f32.mxu0 %vm26259_vm1, %v26258_v2 }
 0x11b   :  { %19295 = vmatmul.mubr.msk.f32.gmra.mrb[140].mxu0 %vm185_vm0, %v173_v10  ;;  %v75_v10 = vld [vmem:[%s33943_s0 + $0x1b0] sm:$0xff] }
 0x11c   :  { %19297 = vmatprep.mubr.msk.f32.mxu0 %vm26259_vm1, %v26258_v2 }
 0x11f   :  { %19298 = vmatmul.mubr.msk.f32.gmra.mrb[142].mxu0 %vm185_vm0, %v174_v11  ;;  %v76_v11 = vld [vmem:[%s33943_s0 + $0x1b8] sm:$0xff] }
 0x120   :  { %19300 = vmatprep.mubr.msk.f32.mxu0 %vm26259_vm1, %v26258_v2 }
 0x123   :  { %19301 = vmatmul.mubr.msk.f32.gmra.mrb[144].mxu0 %vm185_vm0, %v175_v12  ;;  %v77_v12 = vld [vmem:[%s33943_s0 + $0x1c0] sm:$0xff] }
 0x124   :  { %19303 = vmatprep.mubr.msk.f32.mxu0 %vm26259_vm1, %v26258_v2 }
 0x127   :  { %19304 = vmatmul.mubr.msk.f32.gmra.mrb[146].mxu0 %vm185_vm0, %v176_v13  ;;  %v78_v13 = vld [vmem:[%s33943_s0 + $0x1c8] sm:$0xff] }
 0x128   :  { %19306 = vmatprep.mubr.msk.f32.mxu0 %vm26259_vm1, %v26258_v2 }
 0x12b   :  { %19307 = vmatmul.mubr.msk.f32.gmra.mrb[148].mxu0 %vm185_vm0, %v177_v14  ;;  %v79_v14 = vld [vmem:[%s33943_s0 + $0x1d0] sm:$0xff] }
 0x12c   :  { %19309 = vmatprep.mubr.msk.f32.mxu0 %vm26259_vm1, %v26258_v2 }
 0x12f   :  { %19310 = vmatmul.mubr.msk.f32.gmra.mrb[150].mxu0 %vm185_vm0, %v178_v15  ;;  %v80_v15 = vld [vmem:[%s33943_s0 + $0x1d8] sm:$0xff] }
 0x130   :  { %19312 = vmatprep.mubr.msk.f32.mxu0 %vm26259_vm1, %v26258_v2 }
 0x133   :  { %19313 = vmatmul.mubr.msk.f32.gmra.mrb[152].mxu0 %vm185_vm0, %v179_v16  ;;  %v81_v16 = vld [vmem:[%s33943_s0 + $0x1e0] sm:$0xff] }
 0x134   :  { %19315 = vmatprep.mubr.msk.f32.mxu0 %vm26259_vm1, %v26258_v2 }
 0x137   :  { %19316 = vmatmul.mubr.msk.f32.gmra.mrb[154].mxu0 %vm185_vm0, %v180_v17  ;;  %v82_v17 = vld [vmem:[%s33943_s0 + $0x1e8] sm:$0xff] }
 0x138   :  { %19329 = vmatprep.mubr.msk.f32.mxu0 %vm26259_vm1, %v26258_v2 }
 0x13b   :  { %19330 = vmatmul.mubr.msk.f32.vlgmr.msra.gmra.mrb[0].mxu0 %vm185_vm0, %v21_v18  ;;  %v83_v18 = vld [vmem:[%s33943_s0 + $0x1f0] sm:$0xff] }
 0x13c   :  { %19332 = vmatprep.mubr.msk.f32.mxu0 %vm26259_vm1, %v26258_v2  ;;  %19573 = vmatpush3.msra.mxu0 %v1693_v38  ;;  %v1613_v38 = vld [vmem:[%s33943_s0 + $0xa] sm:$0xff] }
 0x13d   :  { %19817 = vmatprep.subr.mxu0 %v26258_v2 }
 0x13f   :  { %19333 = vmatmul.mubr.msk.f32.gmra.mrb[2].mxu0 %vm185_vm0, %v22_v19  ;;  %v84_v19 = vld [vmem:[%s33943_s0 + $0x1f8] sm:$0xff] }
 0x140   :  { %19335 = vmatprep.mubr.msk.f32.mxu0 %vm26259_vm1, %v26258_v2 }
 0x143   :  { %19336 = vmatmul.mubr.msk.f32.gmra.mrb[4].mxu0 %vm185_vm0, %v23_v20  ;;  %v85_v20 = vld [vmem:[%s33943_s0 + $0x200] sm:$0xff] }
 0x144   :  { %19338 = vmatprep.mubr.msk.f32.mxu0 %vm26259_vm1, %v26258_v2 }
 0x147   :  { %19339 = vmatmul.mubr.msk.f32.gmra.mrb[6].mxu0 %vm185_vm0, %v24_v21  ;;  %v86_v21 = vld [vmem:[%s33943_s0 + $0x208] sm:$0xff] }
 0x148   :  { %19341 = vmatprep.mubr.msk.f32.mxu0 %vm26259_vm1, %v26258_v2 }
 0x14b   :  { %19342 = vmatmul.mubr.msk.f32.gmra.mrb[8].mxu0 %vm185_vm0, %v25_v22  ;;  %v87_v22 = vld [vmem:[%s33943_s0 + $0x210] sm:$0xff] }
 0x14c   :  { %19344 = vmatprep.mubr.msk.f32.mxu0 %vm26259_vm1, %v26258_v2 }
 0x14f   :  { %19345 = vmatmul.mubr.msk.f32.gmra.mrb[10].mxu0 %vm185_vm0, %v26_v23  ;;  %v88_v23 = vld [vmem:[%s33943_s0 + $0x218] sm:$0xff] }
 0x150   :  { %19347 = vmatprep.mubr.msk.f32.mxu0 %vm26259_vm1, %v26258_v2 }
 0x153   :  { %19348 = vmatmul.mubr.msk.f32.gmra.mrb[12].mxu0 %vm185_vm0, %v27_v24  ;;  %v89_v24 = vld [vmem:[%s33943_s0 + $0x220] sm:$0xff] }
 0x154   :  { %19350 = vmatprep.mubr.msk.f32.mxu0 %vm26259_vm1, %v26258_v2 }
 0x157   :  { %19351 = vmatmul.mubr.msk.f32.gmra.mrb[14].mxu0 %vm185_vm0, %v28_v25  ;;  %v90_v25 = vld [vmem:[%s33943_s0 + $0x228] sm:$0xff] }
 0x158   :  { %19353 = vmatprep.mubr.msk.f32.mxu0 %vm26259_vm1, %v26258_v2 }
 0x15b   :  { %19354 = vmatmul.mubr.msk.f32.gmra.mrb[16].mxu0 %vm185_vm0, %v29_v26  ;;  %v91_v26 = vld [vmem:[%s33943_s0 + $0x230] sm:$0xff] }
 0x15c   :  { %19356 = vmatprep.mubr.msk.f32.mxu0 %vm26259_vm1, %v26258_v2 }
 0x15f   :  { %19357 = vmatmul.mubr.msk.f32.gmra.mrb[18].mxu0 %vm185_vm0, %v30_v27  ;;  %v92_v27 = vld [vmem:[%s33943_s0 + $0x238] sm:$0xff] }
 0x160   :  { %19359 = vmatprep.mubr.msk.f32.mxu0 %vm26259_vm1, %v26258_v2 }
 0x163   :  { %19360 = vmatmul.mubr.msk.f32.gmra.mrb[20].mxu0 %vm185_vm0, %v31_v28  ;;  %v93_v28 = vld [vmem:[%s33943_s0 + $0x240] sm:$0xff] }
 0x164   :  { %19362 = vmatprep.mubr.msk.f32.mxu0 %vm26259_vm1, %v26258_v2 }
 0x167   :  { %19363 = vmatmul.mubr.msk.f32.gmra.mrb[22].mxu0 %vm185_vm0, %v32_v29  ;;  %v94_v29 = vld [vmem:[%s33943_s0 + $0x248] sm:$0xff] }
 0x168   :  { %19365 = vmatprep.mubr.msk.f32.mxu0 %vm26259_vm1, %v26258_v2 }
 0x16b   :  { %19366 = vmatmul.mubr.msk.f32.gmra.mrb[24].mxu0 %vm185_vm0, %v33_v30  ;;  %v95_v30 = vld [vmem:[%s33943_s0 + $0x250] sm:$0xff] }
 0x16c   :  { %19368 = vmatprep.mubr.msk.f32.mxu0 %vm26259_vm1, %v26258_v2 }
 0x16f   :  { %19369 = vmatmul.mubr.msk.f32.gmra.mrb[26].mxu0 %vm185_vm0, %v34_v31  ;;  %v96_v31 = vld [vmem:[%s33943_s0 + $0x258] sm:$0xff] }
 0x170   :  { %19371 = vmatprep.mubr.msk.f32.mxu0 %vm26259_vm1, %v26258_v2 }
 0x173   :  { %19372 = vmatmul.mubr.msk.f32.gmra.mrb[28].mxu0 %vm185_vm0, %v35_v32  ;;  %v97_v32 = vld [vmem:[%s33943_s0 + $0x260] sm:$0xff] }
 0x174   :  { %19374 = vmatprep.mubr.msk.f32.mxu0 %vm26259_vm1, %v26258_v2 }
 0x177   :  { %19375 = vmatmul.mubr.msk.f32.gmra.mrb[30].mxu0 %vm185_vm0, %v36_v33  ;;  %v98_v33 = vld [vmem:[%s33943_s0 + $0x268] sm:$0xff] }
 0x178   :  { %19377 = vmatprep.mubr.msk.f32.mxu0 %vm26259_vm1, %v26258_v2 }
 0x17b   :  { %19378 = vmatmul.mubr.msk.f32.gmra.mrb[32].mxu0 %vm185_vm0, %v37_v34  ;;  %v99_v34 = vld [vmem:[%s33943_s0 + $0x270] sm:$0xff] }
 0x17c   :  { %19380 = vmatprep.mubr.msk.f32.mxu0 %vm26259_vm1, %v26258_v2 }
 0x17f   :  { %19381 = vmatmul.mubr.msk.f32.gmra.mrb[34].mxu0 %vm185_vm0, %v38_v35  ;;  %v100_v35 = vld [vmem:[%s33943_s0 + $0x278] sm:$0xff] }
 0x180   :  { %19383 = vmatprep.mubr.msk.f32.mxu0 %vm26259_vm1, %v26258_v2 }
 0x183   :  { %19384 = vmatmul.mubr.msk.f32.gmra.mrb[36].mxu0 %vm185_vm0, %v39_v36  ;;  %v101_v36 = vld [vmem:[%s33943_s0 + $0x280] sm:$0xff] }
 0x184   :  { %19386 = vmatprep.mubr.msk.f32.mxu0 %vm26259_vm1, %v26258_v2 }
 0x187   :  { %19387 = vmatmul.mubr.msk.f32.gmra.mrb[38].mxu0 %vm185_vm0, %v40_v37  ;;  %v1612_v37 = vld [vmem:[%s33943_s0 + $0x2] sm:$0xff] }
 0x188   :  { %19389 = vmatprep.mubr.msk.f32.mxu0 %vm26259_vm1, %v26258_v2 }
 0x18b   :  { %19390 = vmatmul.mubr.msk.f32.gmra.mrb[40].mxu0 %vm185_vm0, %v41_v39  ;;  %v27280_v39 = vld [vmem:[%s33943_s0 + $0x12] sm:$0xff] }
 0x18c   :  { %19392 = vmatprep.mubr.msk.f32.mxu0 %vm26259_vm1, %v26258_v2 }
 0x18f   :  { %19393 = vmatmul.mubr.msk.f32.gmra.mrb[42].mxu0 %vm185_vm0, %v42_v40  ;;  %v27289_v40 = vld [vmem:[%s33943_s0 + $0x1a] sm:$0xff] }
 0x190   :  { %19395 = vmatprep.mubr.msk.f32.mxu0 %vm26259_vm1, %v26258_v2 }
 0x193   :  { %19396 = vmatmul.mubr.msk.f32.gmra.mrb[44].mxu0 %vm185_vm0, %v43_v41  ;;  %v27298_v41 = vld [vmem:[%s33943_s0 + $0x22] sm:$0xff] }
 0x194   :  { %19398 = vmatprep.mubr.msk.f32.mxu0 %vm26259_vm1, %v26258_v2 }
 0x197   :  { %19399 = vmatmul.mubr.msk.f32.gmra.mrb[46].mxu0 %vm185_vm0, %v44_v42  ;;  %v27307_v42 = vld [vmem:[%s33943_s0 + $0x2a] sm:$0xff] }
 0x198   :  { %19401 = vmatprep.mubr.msk.f32.mxu0 %vm26259_vm1, %v26258_v2 }
 0x19b   :  { %19402 = vmatmul.mubr.msk.f32.gmra.mrb[48].mxu0 %vm185_vm0, %v45_v43  ;;  %v27316_v43 = vld [vmem:[%s33943_s0 + $0x32] sm:$0xff] }
 0x19c   :  { %19404 = vmatprep.mubr.msk.f32.mxu0 %vm26259_vm1, %v26258_v2 }
 0x19f   :  { %19405 = vmatmul.mubr.msk.f32.gmra.mrb[50].mxu0 %vm185_vm0, %v46_v44  ;;  %v27325_v44 = vld [vmem:[%s33943_s0 + $0x3a] sm:$0xff] }
 0x1a0   :  { %19407 = vmatprep.mubr.msk.f32.mxu0 %vm26259_vm1, %v26258_v2 }
 0x1a3   :  { %19408 = vmatmul.mubr.msk.f32.gmra.mrb[52].mxu0 %vm185_vm0, %v47_v45  ;;  %v27334_v45 = vld [vmem:[%s33943_s0 + $0x42] sm:$0xff] }
 0x1a4   :  { %19410 = vmatprep.mubr.msk.f32.mxu0 %vm26259_vm1, %v26258_v2 }
 0x1a7   :  { %19411 = vmatmul.mubr.msk.f32.gmra.mrb[54].mxu0 %vm185_vm0, %v48_v46  ;;  %v27343_v46 = vld [vmem:[%s33943_s0 + $0x4a] sm:$0xff] }
 0x1a8   :  { %19413 = vmatprep.mubr.msk.f32.mxu0 %vm26259_vm1, %v26258_v2 }
 0x1ab   :  { %19414 = vmatmul.mubr.msk.f32.gmra.mrb[56].mxu0 %vm185_vm0, %v49_v47  ;;  %v27352_v47 = vld [vmem:[%s33943_s0 + $0x52] sm:$0xff] }
 0x1ac   :  { %19416 = vmatprep.mubr.msk.f32.mxu0 %vm26259_vm1, %v26258_v2 }
 0x1af   :  { %19417 = vmatmul.mubr.msk.f32.gmra.mrb[58].mxu0 %vm185_vm0, %v50_v48  ;;  %v27361_v48 = vld [vmem:[%s33943_s0 + $0x5a] sm:$0xff] }
 0x1b0   :  { %19419 = vmatprep.mubr.msk.f32.mxu0 %vm26259_vm1, %v26258_v2 }
 0x1b3   :  { %19420 = vmatmul.mubr.msk.f32.gmra.mrb[60].mxu0 %vm185_vm0, %v51_v49  ;;  %v27370_v49 = vld [vmem:[%s33943_s0 + $0x62] sm:$0xff] }
 0x1b4   :  { %19422 = vmatprep.mubr.msk.f32.mxu0 %vm26259_vm1, %v26258_v2 }
 0x1b7   :  { %19423 = vmatmul.mubr.msk.f32.gmra.mrb[62].mxu0 %vm185_vm0, %v52_v50  ;;  %v27379_v50 = vld [vmem:[%s33943_s0 + $0x6a] sm:$0xff] }
 0x1b8   :  { %19425 = vmatprep.mubr.msk.f32.mxu0 %vm26259_vm1, %v26258_v2 }
 0x1bb   :  { %19426 = vmatmul.mubr.msk.f32.gmra.mrb[64].mxu0 %vm185_vm0, %v53_v51  ;;  %v27388_v51 = vld [vmem:[%s33943_s0 + $0x72] sm:$0xff] }
 0x1bc   :  { %19428 = vmatprep.mubr.msk.f32.mxu0 %vm26259_vm1, %v26258_v2 }
 0x1bf   :  { %19429 = vmatmul.mubr.msk.f32.gmra.mrb[66].mxu0 %vm185_vm0, %v54_v52  ;;  %v27397_v52 = vld [vmem:[%s33943_s0 + $0x7a] sm:$0xff] }
 0x1c0   :  { %19431 = vmatprep.mubr.msk.f32.mxu0 %vm26259_vm1, %v26258_v2 }
 0x1c3   :  { %19432 = vmatmul.mubr.msk.f32.gmra.mrb[68].mxu0 %vm185_vm0, %v55_v53  ;;  %v27406_v53 = vld [vmem:[%s33943_s0 + $0x82] sm:$0xff] }
 0x1c4   :  { %19434 = vmatprep.mubr.msk.f32.mxu0 %vm26259_vm1, %v26258_v2 }
 0x1c7   :  { %19435 = vmatmul.mubr.msk.f32.gmra.mrb[70].mxu0 %vm185_vm0, %v56_v54  ;;  %v27415_v54 = vld [vmem:[%s33943_s0 + $0x8a] sm:$0xff] }
 0x1c8   :  { %19437 = vmatprep.mubr.msk.f32.mxu0 %vm26259_vm1, %v26258_v2 }
 0x1cb   :  { %19438 = vmatmul.mubr.msk.f32.gmra.mrb[72].mxu0 %vm185_vm0, %v57_v55  ;;  %v27424_v55 = vld [vmem:[%s33943_s0 + $0x92] sm:$0xff] }
 0x1cc   :  { %19440 = vmatprep.mubr.msk.f32.mxu0 %vm26259_vm1, %v26258_v2 }
 0x1cf   :  { %19441 = vmatmul.mubr.msk.f32.gmra.mrb[74].mxu0 %vm185_vm0, %v58_v56  ;;  %v27433_v56 = vld [vmem:[%s33943_s0 + $0x9a] sm:$0xff] }
 0x1d0   :  { %19443 = vmatprep.mubr.msk.f32.mxu0 %vm26259_vm1, %v26258_v2 }
 0x1d3   :  { %19444 = vmatmul.mubr.msk.f32.gmra.mrb[76].mxu0 %vm185_vm0, %v59_v57  ;;  %v2569_v57 = vld [vmem:[%s33944_s1 + $0x18] sm:$0xff] }
 0x1d4   :  { %19446 = vmatprep.mubr.msk.f32.mxu0 %vm26259_vm1, %v26258_v2 }
 0x1d7   :  { %19447 = vmatmul.mubr.msk.f32.gmra.mrb[78].mxu0 %vm185_vm0, %v60_v58  ;;  %v27445_v58 = vld [vmem:[%s33943_s0 + $0xa2] sm:$0xff] }
 0x1d8   :  { %19449 = vmatprep.mubr.msk.f32.mxu0 %vm26259_vm1, %v26258_v2 }
 0x1db   :  { %19450 = vmatmul.mubr.msk.f32.gmra.mrb[80].mxu0 %vm185_vm0, %v61_v59  ;;  %v27455_v59 = vld [vmem:[%s33943_s0 + $0xaa] sm:$0xff] }
 0x1dc   :  { %19452 = vmatprep.mubr.msk.f32.mxu0 %vm26259_vm1, %v26258_v2 }
 0x1df   :  { %19453 = vmatmul.mubr.msk.f32.gmra.mrb[82].mxu0 %vm185_vm0, %v62_v60  ;;  %v27464_v60 = vld [vmem:[%s33943_s0 + $0xb2] sm:$0xff] }
 0x1e0   :  { %19455 = vmatprep.mubr.msk.f32.mxu0 %vm26259_vm1, %v26258_v2 }
 0x1e3   :  { %19456 = vmatmul.mubr.msk.f32.gmra.mrb[84].mxu0 %vm185_vm0, %v63_v61  ;;  %v27473_v61 = vld [vmem:[%s33943_s0 + $0xba] sm:$0xff] }
 0x1e4   :  { %19458 = vmatprep.mubr.msk.f32.mxu0 %vm26259_vm1, %v26258_v2 }
 0x1e7   :  { %19459 = vmatmul.mubr.msk.f32.gmra.mrb[86].mxu0 %vm185_vm0, %v64_v62  ;;  %v27482_v62 = vld [vmem:[%s33943_s0 + $0xc2] sm:$0xff] }
 0x1e8   :  { %19461 = vmatprep.mubr.msk.f32.mxu0 %vm26259_vm1, %v26258_v2 }
 0x1eb   :  { %19462 = vmatmul.mubr.msk.f32.gmra.mrb[88].mxu0 %vm185_vm0, %v65_v63  ;;  %v27491_v63 = vld [vmem:[%s33943_s0 + $0xca] sm:$0xff] }
 0x1ec   :  { %19464 = vmatprep.mubr.msk.f32.mxu0 %vm26259_vm1, %v26258_v2 }
 0x1ef   :  { %19465 = vmatmul.mubr.msk.f32.gmra.mrb[90].mxu0 %vm185_vm0, %v66_v0  ;;  %v27500_v0 = vld [vmem:[%s33943_s0 + $0xd2] sm:$0xff] }
 0x1f0   :  { %19467 = vmatprep.mubr.msk.f32.mxu0 %vm26259_vm1, %v26258_v2 }
 0x1f3   :  { %19468 = vmatmul.mubr.msk.f32.gmra.mrb[92].mxu0 %vm185_vm0, %v67_v1  ;;  %v27509_v1 = vld [vmem:[%s33943_s0 + $0xda] sm:$0xff] }
 0x1f4   :  { %19470 = vmatprep.mubr.msk.f32.mxu0 %vm26259_vm1, %v26258_v2 }
 0x1f7   :  { %19471 = vmatmul.mubr.msk.f32.gmra.mrb[94].mxu0 %vm185_vm0, %v68_v3  ;;  %v27518_v3 = vld [vmem:[%s33943_s0 + $0xe2] sm:$0xff] }
 0x1f8   :  { %19473 = vmatprep.mubr.msk.f32.mxu0 %vm26259_vm1, %v26258_v2 }
 0x1fb   :  { %19474 = vmatmul.mubr.msk.f32.gmra.mrb[96].mxu0 %vm185_vm0, %v69_v4  ;;  %v27527_v4 = vld [vmem:[%s33943_s0 + $0xea] sm:$0xff] }
 0x1fc   :  { %19476 = vmatprep.mubr.msk.f32.mxu0 %vm26259_vm1, %v26258_v2 }
 0x1ff   :  { %19477 = vmatmul.mubr.msk.f32.gmra.mrb[98].mxu0 %vm185_vm0, %v70_v5  ;;  %v27536_v5 = vld [vmem:[%s33943_s0 + $0xf2] sm:$0xff] }
 0x200   :  { %19479 = vmatprep.mubr.msk.f32.mxu0 %vm26259_vm1, %v26258_v2 }
 0x203   :  { %19480 = vmatmul.mubr.msk.f32.gmra.mrb[100].mxu0 %vm185_vm0, %v71_v6  ;;  %v27545_v6 = vld [vmem:[%s33943_s0 + $0xfa] sm:$0xff] }
 0x204   :  { %19482 = vmatprep.mubr.msk.f32.mxu0 %vm26259_vm1, %v26258_v2 }
 0x207   :  { %19483 = vmatmul.mubr.msk.f32.gmra.mrb[102].mxu0 %vm185_vm0, %v72_v7  ;;  %v27554_v7 = vld [vmem:[%s33943_s0 + $0x102] sm:$0xff] }
 0x208   :  { %19485 = vmatprep.mubr.msk.f32.mxu0 %vm26259_vm1, %v26258_v2 }
 0x20b   :  { %19486 = vmatmul.mubr.msk.f32.gmra.mrb[104].mxu0 %vm185_vm0, %v73_v8  ;;  %v27563_v8 = vld [vmem:[%s33943_s0 + $0x10a] sm:$0xff] }
 0x20c   :  { %19488 = vmatprep.mubr.msk.f32.mxu0 %vm26259_vm1, %v26258_v2 }
 0x20f   :  { %19489 = vmatmul.mubr.msk.f32.gmra.mrb[106].mxu0 %vm185_vm0, %v74_v9  ;;  %v27572_v9 = vld [vmem:[%s33943_s0 + $0x112] sm:$0xff] }
 0x210   :  { %19491 = vmatprep.mubr.msk.f32.mxu0 %vm26259_vm1, %v26258_v2 }
 0x213   :  { %19492 = vmatmul.mubr.msk.f32.gmra.mrb[108].mxu0 %vm185_vm0, %v75_v10  ;;  %v27581_v10 = vld [vmem:[%s33943_s0 + $0x11a] sm:$0xff] }
 0x214   :  { %19494 = vmatprep.mubr.msk.f32.mxu0 %vm26259_vm1, %v26258_v2 }
 0x217   :  { %19495 = vmatmul.mubr.msk.f32.gmra.mrb[110].mxu0 %vm185_vm0, %v76_v11  ;;  %v27590_v11 = vld [vmem:[%s33943_s0 + $0x122] sm:$0xff] }
 0x218   :  { %19497 = vmatprep.mubr.msk.f32.mxu0 %vm26259_vm1, %v26258_v2 }
 0x21b   :  { %19498 = vmatmul.mubr.msk.f32.gmra.mrb[112].mxu0 %vm185_vm0, %v77_v12  ;;  %v27599_v12 = vld [vmem:[%s33943_s0 + $0x12a] sm:$0xff] }
 0x21c   :  { %19500 = vmatprep.mubr.msk.f32.mxu0 %vm26259_vm1, %v26258_v2 }
 0x21f   :  { %19501 = vmatmul.mubr.msk.f32.gmra.mrb[114].mxu0 %vm185_vm0, %v78_v13  ;;  %v27608_v13 = vld [vmem:[%s33943_s0 + $0x132] sm:$0xff] }
 0x220   :  { %19503 = vmatprep.mubr.msk.f32.mxu0 %vm26259_vm1, %v26258_v2 }
 0x223   :  { %19504 = vmatmul.mubr.msk.f32.gmra.mrb[116].mxu0 %vm185_vm0, %v79_v14  ;;  %v27617_v14 = vld [vmem:[%s33943_s0 + $0x13a] sm:$0xff] }
 0x224   :  { %19506 = vmatprep.mubr.msk.f32.mxu0 %vm26259_vm1, %v26258_v2 }
 0x227   :  { %19507 = vmatmul.mubr.msk.f32.gmra.mrb[118].mxu0 %vm185_vm0, %v80_v15  ;;  %v27626_v15 = vld [vmem:[%s33943_s0 + $0x142] sm:$0xff] }
 0x228   :  { %19509 = vmatprep.mubr.msk.f32.mxu0 %vm26259_vm1, %v26258_v2 }
 0x22b   :  { %19510 = vmatmul.mubr.msk.f32.gmra.mrb[120].mxu0 %vm185_vm0, %v81_v16  ;;  %v27635_v16 = vld [vmem:[%s33943_s0 + $0x14a] sm:$0xff] }
 0x22c   :  { %19512 = vmatprep.mubr.msk.f32.mxu0 %vm26259_vm1, %v26258_v2 }
 0x22f   :  { %19513 = vmatmul.mubr.msk.f32.gmra.mrb[122].mxu0 %vm185_vm0, %v82_v17  ;;  %v27644_v17 = vld [vmem:[%s33943_s0 + $0x152] sm:$0xff] }
 0x230   :  { %19515 = vmatprep.mubr.msk.f32.mxu0 %vm26259_vm1, %v26258_v2 }
 0x233   :  { %19516 = vmatmul.mubr.msk.f32.gmra.mrb[124].mxu0 %vm185_vm0, %v83_v18  ;;  %v27653_v18 = vld [vmem:[%s33943_s0 + $0x15a] sm:$0xff] }
 0x234   :  { %19518 = vmatprep.mubr.msk.f32.mxu0 %vm26259_vm1, %v26258_v2 }
 0x237   :  { %19519 = vmatmul.mubr.msk.f32.gmra.mrb[126].mxu0 %vm185_vm0, %v84_v19  ;;  %v27662_v19 = vld [vmem:[%s33943_s0 + $0x162] sm:$0xff] }
 0x238   :  { %19521 = vmatprep.mubr.msk.f32.mxu0 %vm26259_vm1, %v26258_v2 }
 0x23b   :  { %19522 = vmatmul.mubr.msk.f32.gmra.mrb[128].mxu0 %vm185_vm0, %v85_v20  ;;  %v27671_v20 = vld [vmem:[%s33943_s0 + $0x16a] sm:$0xff] }
 0x23c   :  { %19524 = vmatprep.mubr.msk.f32.mxu0 %vm26259_vm1, %v26258_v2 }
 0x23f   :  { %19525 = vmatmul.mubr.msk.f32.gmra.mrb[130].mxu0 %vm185_vm0, %v86_v21  ;;  %v27680_v21 = vld [vmem:[%s33943_s0 + $0x172] sm:$0xff] }
 0x240   :  { %19527 = vmatprep.mubr.msk.f32.mxu0 %vm26259_vm1, %v26258_v2 }
 0x243   :  { %19528 = vmatmul.mubr.msk.f32.gmra.mrb[132].mxu0 %vm185_vm0, %v87_v22  ;;  %v27689_v22 = vld [vmem:[%s33943_s0 + $0x17a] sm:$0xff] }
 0x244   :  { %19530 = vmatprep.mubr.msk.f32.mxu0 %vm26259_vm1, %v26258_v2 }
 0x247   :  { %19531 = vmatmul.mubr.msk.f32.gmra.mrb[134].mxu0 %vm185_vm0, %v88_v23  ;;  %v27698_v23 = vld [vmem:[%s33943_s0 + $0x182] sm:$0xff] }
 0x248   :  { %19533 = vmatprep.mubr.msk.f32.mxu0 %vm26259_vm1, %v26258_v2 }
 0x24b   :  { %19534 = vmatmul.mubr.msk.f32.gmra.mrb[136].mxu0 %vm185_vm0, %v89_v24  ;;  %v27707_v24 = vld [vmem:[%s33943_s0 + $0x18a] sm:$0xff] }
 0x24c   :  { %19536 = vmatprep.mubr.msk.f32.mxu0 %vm26259_vm1, %v26258_v2 }
 0x24f   :  { %19537 = vmatmul.mubr.msk.f32.gmra.mrb[138].mxu0 %vm185_vm0, %v90_v25  ;;  %v27716_v25 = vld [vmem:[%s33943_s0 + $0x192] sm:$0xff] }
 0x250   :  { %19539 = vmatprep.mubr.msk.f32.mxu0 %vm26259_vm1, %v26258_v2 }
 0x253   :  { %19540 = vmatmul.mubr.msk.f32.gmra.mrb[140].mxu0 %vm185_vm0, %v91_v26  ;;  %v27725_v26 = vld [vmem:[%s33943_s0 + $0x19a] sm:$0xff] }
 0x254   :  { %19542 = vmatprep.mubr.msk.f32.mxu0 %vm26259_vm1, %v26258_v2 }
 0x257   :  { %19543 = vmatmul.mubr.msk.f32.gmra.mrb[142].mxu0 %vm185_vm0, %v92_v27  ;;  %v27734_v27 = vld [vmem:[%s33943_s0 + $0x1a2] sm:$0xff] }
 0x258   :  { %19545 = vmatprep.mubr.msk.f32.mxu0 %vm26259_vm1, %v26258_v2 }
 0x25b   :  { %19546 = vmatmul.mubr.msk.f32.gmra.mrb[144].mxu0 %vm185_vm0, %v93_v28  ;;  %v27743_v28 = vld [vmem:[%s33943_s0 + $0x1aa] sm:$0xff] }
 0x25c   :  { %19548 = vmatprep.mubr.msk.f32.mxu0 %vm26259_vm1, %v26258_v2 }
 0x25f   :  { %19549 = vmatmul.mubr.msk.f32.gmra.mrb[146].mxu0 %vm185_vm0, %v94_v29  ;;  %v27752_v29 = vld [vmem:[%s33943_s0 + $0x1b2] sm:$0xff] }
 0x260   :  { %19551 = vmatprep.mubr.msk.f32.mxu0 %vm26259_vm1, %v26258_v2 }
 0x263   :  { %19552 = vmatmul.mubr.msk.f32.gmra.mrb[148].mxu0 %vm185_vm0, %v95_v30  ;;  %v27761_v30 = vld [vmem:[%s33943_s0 + $0x1ba] sm:$0xff] }
 0x264   :  { %19554 = vmatprep.mubr.msk.f32.mxu0 %vm26259_vm1, %v26258_v2 }
 0x267   :  { %19555 = vmatmul.mubr.msk.f32.gmra.mrb[150].mxu0 %vm185_vm0, %v96_v31  ;;  %v27770_v31 = vld [vmem:[%s33943_s0 + $0x1c2] sm:$0xff] }
 0x268   :  { %19557 = vmatprep.mubr.msk.f32.mxu0 %vm26259_vm1, %v26258_v2 }
 0x26b   :  { %19558 = vmatmul.mubr.msk.f32.gmra.mrb[152].mxu0 %vm185_vm0, %v97_v32  ;;  %v27779_v32 = vld [vmem:[%s33943_s0 + $0x1ca] sm:$0xff] }
 0x26c   :  { %19560 = vmatprep.mubr.msk.f32.mxu0 %vm26259_vm1, %v26258_v2 }
 0x26f   :  { %19561 = vmatmul.mubr.msk.f32.gmra.mrb[154].mxu0 %vm185_vm0, %v98_v33  ;;  %v27788_v33 = vld [vmem:[%s33943_s0 + $0x1d2] sm:$0xff] }
 0x270   :  { %19563 = vmatprep.mubr.msk.f32.mxu0 %vm26259_vm1, %v26258_v2 }
 0x273   :  { %19564 = vmatmul.mubr.msk.f32.gmra.mrb[156].mxu0 %vm185_vm0, %v99_v34  ;;  %v27797_v34 = vld [vmem:[%s33943_s0 + $0x1da] sm:$0xff] }
 0x274   :  { %19566 = vmatprep.mubr.msk.f32.mxu0 %vm26259_vm1, %v26258_v2 }
 0x277   :  { %19567 = vmatmul.mubr.msk.f32.gmra.mrb[158].mxu0 %vm185_vm0, %v100_v35  ;;  %v27806_v35 = vld [vmem:[%s33943_s0 + $0x1e2] sm:$0xff] }
 0x278   :  { %19569 = vmatprep.mubr.msk.f32.mxu0 %vm26259_vm1, %v26258_v2 }
 0x27b   :  { %19570 = vmatmul.mubr.msk.f32.gmra.mrb[160].mxu0 %vm185_vm0, %v101_v36  ;;  %v27815_v36 = vld [vmem:[%s33943_s0 + $0x1ea] sm:$0xff] }
 0x27c   :  { %19574 = vmatprep.mubr.msk.f32.mxu0 %vm26259_vm1, %v26258_v2 }
 0x27f   :  { %19575 = vmatmul.mubr.msk.f32.vlgmr.msra.gmra.mrb[0].mxu0 %vm185_vm0, %v1612_v37  ;;  %v27824_v37 = vld [vmem:[%s33943_s0 + $0x1f2] sm:$0xff] }
 0x280   :  { %19577 = vmatprep.mubr.msk.f32.mxu0 %vm26259_vm1, %v26258_v2  ;;  %19818 = vmatpush3.msra.mxu0 %v2569_v57  ;;  %34016 = vst [vmem:[#allocation6_spill] sm:$0xff] %v27824_v37  ;;  %v27842_v57 = vld [vmem:[%s33943_s0 + $0x202] sm:$0xff] }
 0x281   :  { %20062 = vmatprep.subr.mxu0 %v26258_v2  ;;  %34018 = vst [vmem:[#allocation8_spill] sm:$0xff] %v27842_v57 }
 0x283   :  { %19578 = vmatmul.mubr.msk.f32.gmra.mrb[2].mxu0 %vm185_vm0, %v1613_v38  ;;  %v27833_v38 = vld [vmem:[%s33943_s0 + $0x1fa] sm:$0xff] }
 0x284   :  { %19580 = vmatprep.mubr.msk.f32.mxu0 %vm26259_vm1, %v26258_v2  ;;  %34017 = vst [vmem:[#allocation7_spill] sm:$0xff] %v27833_v38 }
 0x287   :  { %19581 = vmatmul.mubr.msk.f32.gmra.mrb[4].mxu0 %vm185_vm0, %v27280_v39 }
 0x288   :  { %19583 = vmatprep.mubr.msk.f32.mxu0 %vm26259_vm1, %v26258_v2 }
 0x28b   :  { %19584 = vmatmul.mubr.msk.f32.gmra.mrb[6].mxu0 %vm185_vm0, %v27289_v40 }
 0x28c   :  { %19586 = vmatprep.mubr.msk.f32.mxu0 %vm26259_vm1, %v26258_v2 }
 0x28f   :  { %19587 = vmatmul.mubr.msk.f32.gmra.mrb[8].mxu0 %vm185_vm0, %v27298_v41 }
 0x290   :  { %19589 = vmatprep.mubr.msk.f32.mxu0 %vm26259_vm1, %v26258_v2 }
 0x293   :  { %19590 = vmatmul.mubr.msk.f32.gmra.mrb[10].mxu0 %vm185_vm0, %v27307_v42 }
 0x294   :  { %19592 = vmatprep.mubr.msk.f32.mxu0 %vm26259_vm1, %v26258_v2 }
 0x297   :  { %19593 = vmatmul.mubr.msk.f32.gmra.mrb[12].mxu0 %vm185_vm0, %v27316_v43 }
 0x298   :  { %19595 = vmatprep.mubr.msk.f32.mxu0 %vm26259_vm1, %v26258_v2 }
 0x29b   :  { %19596 = vmatmul.mubr.msk.f32.gmra.mrb[14].mxu0 %vm185_vm0, %v27325_v44 }
 0x29c   :  { %19598 = vmatprep.mubr.msk.f32.mxu0 %vm26259_vm1, %v26258_v2 }
 0x29f   :  { %19599 = vmatmul.mubr.msk.f32.gmra.mrb[16].mxu0 %vm185_vm0, %v27334_v45 }
 0x2a0   :  { %19601 = vmatprep.mubr.msk.f32.mxu0 %vm26259_vm1, %v26258_v2 }
 0x2a3   :  { %19602 = vmatmul.mubr.msk.f32.gmra.mrb[18].mxu0 %vm185_vm0, %v27343_v46 }
 0x2a4   :  { %19604 = vmatprep.mubr.msk.f32.mxu0 %vm26259_vm1, %v26258_v2 }
 0x2a7   :  { %19605 = vmatmul.mubr.msk.f32.gmra.mrb[20].mxu0 %vm185_vm0, %v27352_v47 }
 0x2a8   :  { %19607 = vmatprep.mubr.msk.f32.mxu0 %vm26259_vm1, %v26258_v2 }
 0x2ab   :  { %19608 = vmatmul.mubr.msk.f32.gmra.mrb[22].mxu0 %vm185_vm0, %v27361_v48 }
 0x2ac   :  { %19610 = vmatprep.mubr.msk.f32.mxu0 %vm26259_vm1, %v26258_v2 }
 0x2af   :  { %19611 = vmatmul.mubr.msk.f32.gmra.mrb[24].mxu0 %vm185_vm0, %v27370_v49 }
 0x2b0   :  { %19613 = vmatprep.mubr.msk.f32.mxu0 %vm26259_vm1, %v26258_v2 }
 0x2b3   :  { %19614 = vmatmul.mubr.msk.f32.gmra.mrb[26].mxu0 %vm185_vm0, %v27379_v50 }
 0x2b4   :  { %19616 = vmatprep.mubr.msk.f32.mxu0 %vm26259_vm1, %v26258_v2 }
 0x2b7   :  { %19617 = vmatmul.mubr.msk.f32.gmra.mrb[28].mxu0 %vm185_vm0, %v27388_v51 }
 0x2b8   :  { %19619 = vmatprep.mubr.msk.f32.mxu0 %vm26259_vm1, %v26258_v2 }
 0x2bb   :  { %19620 = vmatmul.mubr.msk.f32.gmra.mrb[30].mxu0 %vm185_vm0, %v27397_v52 }
 0x2bc   :  { %19622 = vmatprep.mubr.msk.f32.mxu0 %vm26259_vm1, %v26258_v2 }
 0x2bf   :  { %19623 = vmatmul.mubr.msk.f32.gmra.mrb[32].mxu0 %vm185_vm0, %v27406_v53 }
 0x2c0   :  { %19625 = vmatprep.mubr.msk.f32.mxu0 %vm26259_vm1, %v26258_v2 }
 0x2c3   :  { %19626 = vmatmul.mubr.msk.f32.gmra.mrb[34].mxu0 %vm185_vm0, %v27415_v54 }
 0x2c4   :  { %19628 = vmatprep.mubr.msk.f32.mxu0 %vm26259_vm1, %v26258_v2 }
 0x2c7   :  { %19629 = vmatmul.mubr.msk.f32.gmra.mrb[36].mxu0 %vm185_vm0, %v27424_v55 }
 0x2c8   :  { %19631 = vmatprep.mubr.msk.f32.mxu0 %vm26259_vm1, %v26258_v2 }
 0x2cb   :  { %19632 = vmatmul.mubr.msk.f32.gmra.mrb[38].mxu0 %vm185_vm0, %v27433_v56 }
 0x2cc   :  { %19634 = vmatprep.mubr.msk.f32.mxu0 %vm26259_vm1, %v26258_v2 }
 0x2cf   :  { %19635 = vmatmul.mubr.msk.f32.gmra.mrb[40].mxu0 %vm185_vm0, %v27445_v58 }
 0x2d0   :  { %19637 = vmatprep.mubr.msk.f32.mxu0 %vm26259_vm1, %v26258_v2 }
 0x2d3   :  { %19638 = vmatmul.mubr.msk.f32.gmra.mrb[42].mxu0 %vm185_vm0, %v27455_v59 }
 0x2d4   :  { %19640 = vmatprep.mubr.msk.f32.mxu0 %vm26259_vm1, %v26258_v2 }
 0x2d7   :  { %19641 = vmatmul.mubr.msk.f32.gmra.mrb[44].mxu0 %vm185_vm0, %v27464_v60 }
 0x2d8   :  { %19643 = vmatprep.mubr.msk.f32.mxu0 %vm26259_vm1, %v26258_v2 }
 0x2db   :  { %19644 = vmatmul.mubr.msk.f32.gmra.mrb[46].mxu0 %vm185_vm0, %v27473_v61 }
 0x2dc   :  { %19646 = vmatprep.mubr.msk.f32.mxu0 %vm26259_vm1, %v26258_v2 }
 0x2df   :  { %19647 = vmatmul.mubr.msk.f32.gmra.mrb[48].mxu0 %vm185_vm0, %v27482_v62 }
 0x2e0   :  { %19649 = vmatprep.mubr.msk.f32.mxu0 %vm26259_vm1, %v26258_v2 }
 0x2e3   :  { %19650 = vmatmul.mubr.msk.f32.gmra.mrb[50].mxu0 %vm185_vm0, %v27491_v63 }
 0x2e4   :  { %19652 = vmatprep.mubr.msk.f32.mxu0 %vm26259_vm1, %v26258_v2 }
 0x2e7   :  { %19653 = vmatmul.mubr.msk.f32.gmra.mrb[52].mxu0 %vm185_vm0, %v27500_v0 }
 0x2e8   :  { %19655 = vmatprep.mubr.msk.f32.mxu0 %vm26259_vm1, %v26258_v2 }
 0x2eb   :  { %19656 = vmatmul.mubr.msk.f32.gmra.mrb[54].mxu0 %vm185_vm0, %v27509_v1 }
 0x2ec   :  { %19658 = vmatprep.mubr.msk.f32.mxu0 %vm26259_vm1, %v26258_v2 }
 0x2ef   :  { %19659 = vmatmul.mubr.msk.f32.gmra.mrb[56].mxu0 %vm185_vm0, %v27518_v3 }
 0x2f0   :  { %19661 = vmatprep.mubr.msk.f32.mxu0 %vm26259_vm1, %v26258_v2 }
 0x2f3   :  { %19662 = vmatmul.mubr.msk.f32.gmra.mrb[58].mxu0 %vm185_vm0, %v27527_v4 }
 0x2f4   :  { %19664 = vmatprep.mubr.msk.f32.mxu0 %vm26259_vm1, %v26258_v2 }
 0x2f7   :  { %19665 = vmatmul.mubr.msk.f32.gmra.mrb[60].mxu0 %vm185_vm0, %v27536_v5 }
 0x2f8   :  { %19667 = vmatprep.mubr.msk.f32.mxu0 %vm26259_vm1, %v26258_v2 }
 0x2fb   :  { %19668 = vmatmul.mubr.msk.f32.gmra.mrb[62].mxu0 %vm185_vm0, %v27545_v6 }
 0x2fc   :  { %19670 = vmatprep.mubr.msk.f32.mxu0 %vm26259_vm1, %v26258_v2 }
 0x2ff   :  { %19671 = vmatmul.mubr.msk.f32.gmra.mrb[64].mxu0 %vm185_vm0, %v27554_v7 }
 0x300   :  { %19673 = vmatprep.mubr.msk.f32.mxu0 %vm26259_vm1, %v26258_v2 }
 0x303   :  { %19674 = vmatmul.mubr.msk.f32.gmra.mrb[66].mxu0 %vm185_vm0, %v27563_v8 }
 0x304   :  { %19676 = vmatprep.mubr.msk.f32.mxu0 %vm26259_vm1, %v26258_v2 }
 0x307   :  { %19677 = vmatmul.mubr.msk.f32.gmra.mrb[68].mxu0 %vm185_vm0, %v27572_v9 }
 0x308   :  { %19679 = vmatprep.mubr.msk.f32.mxu0 %vm26259_vm1, %v26258_v2 }
 0x30b   :  { %19680 = vmatmul.mubr.msk.f32.gmra.mrb[70].mxu0 %vm185_vm0, %v27581_v10 }
 0x30c   :  { %19682 = vmatprep.mubr.msk.f32.mxu0 %vm26259_vm1, %v26258_v2 }
 0x30f   :  { %19683 = vmatmul.mubr.msk.f32.gmra.mrb[72].mxu0 %vm185_vm0, %v27590_v11 }
 0x310   :  { %19685 = vmatprep.mubr.msk.f32.mxu0 %vm26259_vm1, %v26258_v2 }
 0x313   :  { %19686 = vmatmul.mubr.msk.f32.gmra.mrb[74].mxu0 %vm185_vm0, %v27599_v12 }
 0x314   :  { %19688 = vmatprep.mubr.msk.f32.mxu0 %vm26259_vm1, %v26258_v2 }
 0x317   :  { %19689 = vmatmul.mubr.msk.f32.gmra.mrb[76].mxu0 %vm185_vm0, %v27608_v13 }
 0x318   :  { %19691 = vmatprep.mubr.msk.f32.mxu0 %vm26259_vm1, %v26258_v2 }
 0x31b   :  { %19692 = vmatmul.mubr.msk.f32.gmra.mrb[78].mxu0 %vm185_vm0, %v27617_v14 }
 0x31c   :  { %19694 = vmatprep.mubr.msk.f32.mxu0 %vm26259_vm1, %v26258_v2 }
 0x31f   :  { %19695 = vmatmul.mubr.msk.f32.gmra.mrb[80].mxu0 %vm185_vm0, %v27626_v15 }
 0x320   :  { %19697 = vmatprep.mubr.msk.f32.mxu0 %vm26259_vm1, %v26258_v2 }
 0x323   :  { %19698 = vmatmul.mubr.msk.f32.gmra.mrb[82].mxu0 %vm185_vm0, %v27635_v16 }
 0x324   :  { %19700 = vmatprep.mubr.msk.f32.mxu0 %vm26259_vm1, %v26258_v2 }
 0x327   :  { %19701 = vmatmul.mubr.msk.f32.gmra.mrb[84].mxu0 %vm185_vm0, %v27644_v17 }
 0x328   :  { %19703 = vmatprep.mubr.msk.f32.mxu0 %vm26259_vm1, %v26258_v2 }
 0x32b   :  { %19704 = vmatmul.mubr.msk.f32.gmra.mrb[86].mxu0 %vm185_vm0, %v27653_v18 }
 0x32c   :  { %19706 = vmatprep.mubr.msk.f32.mxu0 %vm26259_vm1, %v26258_v2 }
 0x32f   :  { %19707 = vmatmul.mubr.msk.f32.gmra.mrb[88].mxu0 %vm185_vm0, %v27662_v19 }
 0x330   :  { %19709 = vmatprep.mubr.msk.f32.mxu0 %vm26259_vm1, %v26258_v2 }
 0x333   :  { %19710 = vmatmul.mubr.msk.f32.gmra.mrb[90].mxu0 %vm185_vm0, %v27671_v20 }
 0x334   :  { %19712 = vmatprep.mubr.msk.f32.mxu0 %vm26259_vm1, %v26258_v2 }
 0x337   :  { %19713 = vmatmul.mubr.msk.f32.gmra.mrb[92].mxu0 %vm185_vm0, %v27680_v21 }
 0x338   :  { %19715 = vmatprep.mubr.msk.f32.mxu0 %vm26259_vm1, %v26258_v2 }
 0x33b   :  { %19716 = vmatmul.mubr.msk.f32.gmra.mrb[94].mxu0 %vm185_vm0, %v27689_v22 }
 0x33c   :  { %19718 = vmatprep.mubr.msk.f32.mxu0 %vm26259_vm1, %v26258_v2 }
 0x33f   :  { %19719 = vmatmul.mubr.msk.f32.gmra.mrb[96].mxu0 %vm185_vm0, %v27698_v23 }
 0x340   :  { %19721 = vmatprep.mubr.msk.f32.mxu0 %vm26259_vm1, %v26258_v2 }
 0x343   :  { %19722 = vmatmul.mubr.msk.f32.gmra.mrb[98].mxu0 %vm185_vm0, %v27707_v24 }
 0x344   :  { %19724 = vmatprep.mubr.msk.f32.mxu0 %vm26259_vm1, %v26258_v2 }
 0x347   :  { %19725 = vmatmul.mubr.msk.f32.gmra.mrb[100].mxu0 %vm185_vm0, %v27716_v25 }
 0x348   :  { %19727 = vmatprep.mubr.msk.f32.mxu0 %vm26259_vm1, %v26258_v2 }
 0x34b   :  { %19728 = vmatmul.mubr.msk.f32.gmra.mrb[102].mxu0 %vm185_vm0, %v27725_v26 }
 0x34c   :  { %19730 = vmatprep.mubr.msk.f32.mxu0 %vm26259_vm1, %v26258_v2 }
 0x34f   :  { %19731 = vmatmul.mubr.msk.f32.gmra.mrb[104].mxu0 %vm185_vm0, %v27734_v27 }
 0x350   :  { %19733 = vmatprep.mubr.msk.f32.mxu0 %vm26259_vm1, %v26258_v2 }
 0x353   :  { %19734 = vmatmul.mubr.msk.f32.gmra.mrb[106].mxu0 %vm185_vm0, %v27743_v28 }
 0x354   :  { %19736 = vmatprep.mubr.msk.f32.mxu0 %vm26259_vm1, %v26258_v2 }
 0x357   :  { %19737 = vmatmul.mubr.msk.f32.gmra.mrb[108].mxu0 %vm185_vm0, %v27752_v29 }
 0x358   :  { %19739 = vmatprep.mubr.msk.f32.mxu0 %vm26259_vm1, %v26258_v2 }
 0x35b   :  { %19740 = vmatmul.mubr.msk.f32.gmra.mrb[110].mxu0 %vm185_vm0, %v27761_v30 }
 0x35c   :  { %19742 = vmatprep.mubr.msk.f32.mxu0 %vm26259_vm1, %v26258_v2 }
 0x35f   :  { %19743 = vmatmul.mubr.msk.f32.gmra.mrb[112].mxu0 %vm185_vm0, %v27770_v31 }
 0x360   :  { %19745 = vmatprep.mubr.msk.f32.mxu0 %vm26259_vm1, %v26258_v2 }
 0x363   :  { %19746 = vmatmul.mubr.msk.f32.gmra.mrb[114].mxu0 %vm185_vm0, %v27779_v32 }
 0x364   :  { %19748 = vmatprep.mubr.msk.f32.mxu0 %vm26259_vm1, %v26258_v2 }
 0x367   :  { %19749 = vmatmul.mubr.msk.f32.gmra.mrb[116].mxu0 %vm185_vm0, %v27788_v33 }
 0x368   :  { %19751 = vmatprep.mubr.msk.f32.mxu0 %vm26259_vm1, %v26258_v2 }
 0x36b   :  { %19752 = vmatmul.mubr.msk.f32.gmra.mrb[118].mxu0 %vm185_vm0, %v27797_v34 }
 0x36c   :  { %19754 = vmatprep.mubr.msk.f32.mxu0 %vm26259_vm1, %v26258_v2 }
 0x36f   :  { %19755 = vmatmul.mubr.msk.f32.gmra.mrb[120].mxu0 %vm185_vm0, %v27806_v35 }
 0x370   :  { %19757 = vmatprep.mubr.msk.f32.mxu0 %vm26259_vm1, %v26258_v2 }
 0x373   :  { %19758 = vmatmul.mubr.msk.f32.gmra.mrb[122].mxu0 %vm185_vm0, %v27815_v36 }
 0x374   :  { %19760 = vmatprep.mubr.msk.f32.mxu0 %vm26259_vm1, %v26258_v2 }
 0x377   :  { %19761 = vmatmul.mubr.msk.f32.gmra.mrb[124].mxu0 %vm185_vm0, %v27824_v37  ;;  %v27851_v37 = vld [vmem:[%s33943_s0 + $0x20a] sm:$0xff] }
 0x378   :  { %19763 = vmatprep.mubr.msk.f32.mxu0 %vm26259_vm1, %v26258_v2  ;;  %34019 = vst [vmem:[#allocation9_spill] sm:$0xff] %v27851_v37 }
 0x37b   :  { %19764 = vmatmul.mubr.msk.f32.gmra.mrb[126].mxu0 %vm185_vm0, %v27833_v38  ;;  %v27860_v38 = vld [vmem:[%s33943_s0 + $0x212] sm:$0xff] }
 0x37c   :  { %19766 = vmatprep.mubr.msk.f32.mxu0 %vm26259_vm1, %v26258_v2  ;;  %34020 = vst [vmem:[#allocation10_spill] sm:$0xff] %v27860_v38 }
 0x37f   :  { %19767 = vmatmul.mubr.msk.f32.gmra.mrb[128].mxu0 %vm185_vm0, %v27842_v57  ;;  %v27869_v57 = vld [vmem:[%s33943_s0 + $0x21a] sm:$0xff] }
 0x380   :  { %19769 = vmatprep.mubr.msk.f32.mxu0 %vm26259_vm1, %v26258_v2  ;;  %34021 = vst [vmem:[#allocation11_spill] sm:$0xff] %v27869_v57 }
 0x383   :  { %19770 = vmatmul.mubr.msk.f32.gmra.mrb[130].mxu0 %vm185_vm0, %v27851_v37  ;;  %v27878_v37 = vld [vmem:[%s33943_s0 + $0x222] sm:$0xff] }
 0x384   :  { %19772 = vmatprep.mubr.msk.f32.mxu0 %vm26259_vm1, %v26258_v2  ;;  %34022 = vst [vmem:[#allocation12_spill] sm:$0xff] %v27878_v37 }
 0x387   :  { %19773 = vmatmul.mubr.msk.f32.gmra.mrb[132].mxu0 %vm185_vm0, %v27860_v38  ;;  %v27887_v38 = vld [vmem:[%s33943_s0 + $0x22a] sm:$0xff] }
 0x388   :  { %19775 = vmatprep.mubr.msk.f32.mxu0 %vm26259_vm1, %v26258_v2  ;;  %34023 = vst [vmem:[#allocation13_spill] sm:$0xff] %v27887_v38 }
 0x38b   :  { %19776 = vmatmul.mubr.msk.f32.gmra.mrb[134].mxu0 %vm185_vm0, %v27869_v57  ;;  %v27896_v57 = vld [vmem:[%s33943_s0 + $0x232] sm:$0xff] }
 0x38c   :  { %19778 = vmatprep.mubr.msk.f32.mxu0 %vm26259_vm1, %v26258_v2  ;;  %34024 = vst [vmem:[#allocation14_spill] sm:$0xff] %v27896_v57 }
 0x38f   :  { %19779 = vmatmul.mubr.msk.f32.gmra.mrb[136].mxu0 %vm185_vm0, %v27878_v37  ;;  %v27905_v37 = vld [vmem:[%s33943_s0 + $0x23a] sm:$0xff] }
 0x390   :  { %19781 = vmatprep.mubr.msk.f32.mxu0 %vm26259_vm1, %v26258_v2  ;;  %34025 = vst [vmem:[#allocation15_spill] sm:$0xff] %v27905_v37 }
 0x393   :  { %19782 = vmatmul.mubr.msk.f32.gmra.mrb[138].mxu0 %vm185_vm0, %v27887_v38  ;;  %v27914_v38 = vld [vmem:[%s33943_s0 + $0x242] sm:$0xff] }
 0x394   :  { %19784 = vmatprep.mubr.msk.f32.mxu0 %vm26259_vm1, %v26258_v2  ;;  %34026 = vst [vmem:[#allocation16_spill] sm:$0xff] %v27914_v38 }
 0x397   :  { %19785 = vmatmul.mubr.msk.f32.gmra.mrb[140].mxu0 %vm185_vm0, %v27896_v57  ;;  %v27923_v57 = vld [vmem:[%s33943_s0 + $0x24a] sm:$0xff] }
 0x398   :  { %19787 = vmatprep.mubr.msk.f32.mxu0 %vm26259_vm1, %v26258_v2  ;;  %34027 = vst [vmem:[#allocation17_spill] sm:$0xff] %v27923_v57 }
 0x39b   :  { %19788 = vmatmul.mubr.msk.f32.gmra.mrb[142].mxu0 %vm185_vm0, %v27905_v37  ;;  %v27932_v37 = vld [vmem:[%s33943_s0 + $0x252] sm:$0xff] }
 0x39c   :  { %19790 = vmatprep.mubr.msk.f32.mxu0 %vm26259_vm1, %v26258_v2  ;;  %34028 = vst [vmem:[#allocation18_spill] sm:$0xff] %v27932_v37 }
 0x39f   :  { %19791 = vmatmul.mubr.msk.f32.gmra.mrb[144].mxu0 %vm185_vm0, %v27914_v38  ;;  %v27941_v38 = vld [vmem:[%s33943_s0 + $0x25a] sm:$0xff] }
 0x3a0   :  { %19793 = vmatprep.mubr.msk.f32.mxu0 %vm26259_vm1, %v26258_v2  ;;  %34029 = vst [vmem:[#allocation19_spill] sm:$0xff] %v27941_v38 }
 0x3a3   :  { %19794 = vmatmul.mubr.msk.f32.gmra.mrb[146].mxu0 %vm185_vm0, %v27923_v57  ;;  %v27950_v57 = vld [vmem:[%s33943_s0 + $0x262] sm:$0xff] }
 0x3a4   :  { %19796 = vmatprep.mubr.msk.f32.mxu0 %vm26259_vm1, %v26258_v2  ;;  %34030 = vst [vmem:[#allocation20_spill] sm:$0xff] %v27950_v57 }
 0x3a7   :  { %19797 = vmatmul.mubr.msk.f32.gmra.mrb[148].mxu0 %vm185_vm0, %v27932_v37  ;;  %v27959_v37 = vld [vmem:[%s33943_s0 + $0x26a] sm:$0xff] }
 0x3a8   :  { %19799 = vmatprep.mubr.msk.f32.mxu0 %vm26259_vm1, %v26258_v2  ;;  %34031 = vst [vmem:[#allocation21_spill] sm:$0xff] %v27959_v37 }
 0x3ab   :  { %19800 = vmatmul.mubr.msk.f32.gmra.mrb[150].mxu0 %vm185_vm0, %v27941_v38  ;;  %v27968_v38 = vld [vmem:[%s33943_s0 + $0x272] sm:$0xff] }
 0x3ac   :  { %19802 = vmatprep.mubr.msk.f32.mxu0 %vm26259_vm1, %v26258_v2 }
 0x3af   :  { %19803 = vmatmul.mubr.msk.f32.gmra.mrb[152].mxu0 %vm185_vm0, %v27950_v57  ;;  %v27977_v57 = vld [vmem:[%s33943_s0 + $0x27a] sm:$0xff] }
 0x3b0   :  { %19805 = vmatprep.mubr.msk.f32.mxu0 %vm26259_vm1, %v26258_v2 }
 0x3b3   :  { %19806 = vmatmul.mubr.msk.f32.gmra.mrb[154].mxu0 %vm185_vm0, %v27959_v37  ;;  %v27986_v37 = vld [vmem:[%s33943_s0 + $0x282] sm:$0xff] }
 0x3b4   :  { %19808 = vmatprep.mubr.msk.f32.mxu0 %vm26259_vm1, %v26258_v2 }
 0x3b7   :  { %19809 = vmatmul.mubr.msk.f32.gmra.mrb[156].mxu0 %vm185_vm0, %v27968_v38 }
 0x3b8   :  { %19811 = vmatprep.mubr.msk.f32.mxu0 %vm26259_vm1, %v26258_v2 }
 0x3bb   :  { %19812 = vmatmul.mubr.msk.f32.gmra.mrb[158].mxu0 %vm185_vm0, %v27977_v57 }
 0x3bc   :  { %19814 = vmatprep.mubr.msk.f32.mxu0 %vm26259_vm1, %v26258_v2 }
 0x3bf   :  { %19815 = vmatmul.mubr.msk.f32.gmra.mrb[160].mxu0 %vm185_vm0, %v27986_v37 }
 0x3c0   :  { %19819 = vmatprep.mubr.msk.f32.mxu0 %vm26259_vm1, %v26258_v2 }
 0x3c3   :  { %19820 = vmatmul.mubr.msk.f32.vlgmr.msra.gmra.mrb[0].mxu0 %vm185_vm0, %v27280_v39  ;;  %v3445_v39 = vld [vmem:[%s33944_s1 + $0x20] sm:$0xff] }
 0x3c4   :  { %19822 = vmatprep.mubr.msk.f32.mxu0 %vm26259_vm1, %v26258_v2  ;;  %20063 = vmatpush3.msra.mxu0 %v3445_v39  ;;  %v3407_v39 = vld [vmem:[%s33943_s0 + $0x16b] sm:$0xff] }
 0x3c5   :  { %20307 = vmatprep.subr.mxu0 %v26258_v2 }
 0x3c7   :  { %19823 = vmatmul.mubr.msk.f32.gmra.mrb[2].mxu0 %vm185_vm0, %v27289_v40  ;;  %v34032_v40 = vld [vmem:[#allocation6_spill] sm:$0xff] }
 0x3c8   :  { %19825 = vmatprep.mubr.msk.f32.mxu0 %vm26259_vm1, %v26258_v2 }
 0x3cb   :  { %19826 = vmatmul.mubr.msk.f32.gmra.mrb[4].mxu0 %vm185_vm0, %v27298_v41  ;;  %v34033_v41 = vld [vmem:[#allocation7_spill] sm:$0xff] }
 0x3cc   :  { %19828 = vmatprep.mubr.msk.f32.mxu0 %vm26259_vm1, %v26258_v2 }
 0x3cf   :  { %19829 = vmatmul.mubr.msk.f32.gmra.mrb[6].mxu0 %vm185_vm0, %v27307_v42  ;;  %v34034_v42 = vld [vmem:[#allocation8_spill] sm:$0xff] }
 0x3d0   :  { %19831 = vmatprep.mubr.msk.f32.mxu0 %vm26259_vm1, %v26258_v2 }
 0x3d3   :  { %19832 = vmatmul.mubr.msk.f32.gmra.mrb[8].mxu0 %vm185_vm0, %v27316_v43  ;;  %v34035_v43 = vld [vmem:[#allocation9_spill] sm:$0xff] }
 0x3d4   :  { %19834 = vmatprep.mubr.msk.f32.mxu0 %vm26259_vm1, %v26258_v2 }
 0x3d7   :  { %19835 = vmatmul.mubr.msk.f32.gmra.mrb[10].mxu0 %vm185_vm0, %v27325_v44  ;;  %v34036_v44 = vld [vmem:[#allocation10_spill] sm:$0xff] }
 0x3d8   :  { %19837 = vmatprep.mubr.msk.f32.mxu0 %vm26259_vm1, %v26258_v2 }
 0x3db   :  { %19838 = vmatmul.mubr.msk.f32.gmra.mrb[12].mxu0 %vm185_vm0, %v27334_v45  ;;  %v34037_v45 = vld [vmem:[#allocation11_spill] sm:$0xff] }
 0x3dc   :  { %19840 = vmatprep.mubr.msk.f32.mxu0 %vm26259_vm1, %v26258_v2 }
 0x3df   :  { %19841 = vmatmul.mubr.msk.f32.gmra.mrb[14].mxu0 %vm185_vm0, %v27343_v46  ;;  %v34038_v46 = vld [vmem:[#allocation12_spill] sm:$0xff] }
 0x3e0   :  { %19843 = vmatprep.mubr.msk.f32.mxu0 %vm26259_vm1, %v26258_v2 }
 0x3e3   :  { %19844 = vmatmul.mubr.msk.f32.gmra.mrb[16].mxu0 %vm185_vm0, %v27352_v47  ;;  %v34039_v47 = vld [vmem:[#allocation13_spill] sm:$0xff] }
 0x3e4   :  { %19846 = vmatprep.mubr.msk.f32.mxu0 %vm26259_vm1, %v26258_v2 }
 0x3e7   :  { %19847 = vmatmul.mubr.msk.f32.gmra.mrb[18].mxu0 %vm185_vm0, %v27361_v48  ;;  %v34040_v48 = vld [vmem:[#allocation14_spill] sm:$0xff] }
 0x3e8   :  { %19849 = vmatprep.mubr.msk.f32.mxu0 %vm26259_vm1, %v26258_v2 }
 0x3eb   :  { %19850 = vmatmul.mubr.msk.f32.gmra.mrb[20].mxu0 %vm185_vm0, %v27370_v49  ;;  %v34041_v49 = vld [vmem:[#allocation15_spill] sm:$0xff] }
 0x3ec   :  { %19852 = vmatprep.mubr.msk.f32.mxu0 %vm26259_vm1, %v26258_v2 }
 0x3ef   :  { %19853 = vmatmul.mubr.msk.f32.gmra.mrb[22].mxu0 %vm185_vm0, %v27379_v50  ;;  %v34042_v50 = vld [vmem:[#allocation16_spill] sm:$0xff] }
 0x3f0   :  { %19855 = vmatprep.mubr.msk.f32.mxu0 %vm26259_vm1, %v26258_v2 }
 0x3f3   :  { %19856 = vmatmul.mubr.msk.f32.gmra.mrb[24].mxu0 %vm185_vm0, %v27388_v51  ;;  %v34043_v51 = vld [vmem:[#allocation17_spill] sm:$0xff] }
 0x3f4   :  { %19858 = vmatprep.mubr.msk.f32.mxu0 %vm26259_vm1, %v26258_v2 }
 0x3f7   :  { %19859 = vmatmul.mubr.msk.f32.gmra.mrb[26].mxu0 %vm185_vm0, %v27397_v52  ;;  %v34044_v52 = vld [vmem:[#allocation18_spill] sm:$0xff] }
 0x3f8   :  { %19861 = vmatprep.mubr.msk.f32.mxu0 %vm26259_vm1, %v26258_v2 }
 0x3fb   :  { %19862 = vmatmul.mubr.msk.f32.gmra.mrb[28].mxu0 %vm185_vm0, %v27406_v53  ;;  %v34045_v53 = vld [vmem:[#allocation19_spill] sm:$0xff] }
 0x3fc   :  { %19864 = vmatprep.mubr.msk.f32.mxu0 %vm26259_vm1, %v26258_v2 }
 0x3ff   :  { %19865 = vmatmul.mubr.msk.f32.gmra.mrb[30].mxu0 %vm185_vm0, %v27415_v54  ;;  %v34046_v54 = vld [vmem:[#allocation20_spill] sm:$0xff] }
 0x400   :  { %19867 = vmatprep.mubr.msk.f32.mxu0 %vm26259_vm1, %v26258_v2 }
 0x403   :  { %19868 = vmatmul.mubr.msk.f32.gmra.mrb[32].mxu0 %vm185_vm0, %v27424_v55  ;;  %v34047_v55 = vld [vmem:[#allocation21_spill] sm:$0xff] }
 0x404   :  { %19870 = vmatprep.mubr.msk.f32.mxu0 %vm26259_vm1, %v26258_v2 }
 0x407   :  { %19871 = vmatmul.mubr.msk.f32.gmra.mrb[34].mxu0 %vm185_vm0, %v27433_v56  ;;  %v2567_v56 = vld [vmem:[%s33943_s0 + $0x28a] sm:$0xff] }
 0x408   :  { %19873 = vmatprep.mubr.msk.f32.mxu0 %vm26259_vm1, %v26258_v2 }
 0x40b   :  { %19874 = vmatmul.mubr.msk.f32.gmra.mrb[36].mxu0 %vm185_vm0, %v27445_v58  ;;  %v2568_v58 = vld [vmem:[%s33943_s0 + $0x292] sm:$0xff] }
 0x40c   :  { %19876 = vmatprep.mubr.msk.f32.mxu0 %vm26259_vm1, %v26258_v2 }
 0x40f   :  { %19877 = vmatmul.mubr.msk.f32.gmra.mrb[38].mxu0 %vm185_vm0, %v27455_v59  ;;  %v3364_v59 = vld [vmem:[%s33943_s0 + $0x13] sm:$0xff] }
 0x410   :  { %19879 = vmatprep.mubr.msk.f32.mxu0 %vm26259_vm1, %v26258_v2 }
 0x413   :  { %19880 = vmatmul.mubr.msk.f32.gmra.mrb[40].mxu0 %vm185_vm0, %v27464_v60  ;;  %v3365_v60 = vld [vmem:[%s33943_s0 + $0x1b] sm:$0xff] }
 0x414   :  { %19882 = vmatprep.mubr.msk.f32.mxu0 %vm26259_vm1, %v26258_v2 }
 0x417   :  { %19883 = vmatmul.mubr.msk.f32.gmra.mrb[42].mxu0 %vm185_vm0, %v27473_v61  ;;  %v3366_v61 = vld [vmem:[%s33943_s0 + $0x23] sm:$0xff] }
 0x418   :  { %19885 = vmatprep.mubr.msk.f32.mxu0 %vm26259_vm1, %v26258_v2 }
 0x41b   :  { %19886 = vmatmul.mubr.msk.f32.gmra.mrb[44].mxu0 %vm185_vm0, %v27482_v62  ;;  %v3367_v62 = vld [vmem:[%s33943_s0 + $0x2b] sm:$0xff] }
 0x41c   :  { %19888 = vmatprep.mubr.msk.f32.mxu0 %vm26259_vm1, %v26258_v2 }
 0x41f   :  { %19889 = vmatmul.mubr.msk.f32.gmra.mrb[46].mxu0 %vm185_vm0, %v27491_v63  ;;  %v3368_v63 = vld [vmem:[%s33943_s0 + $0x33] sm:$0xff] }
 0x420   :  { %19891 = vmatprep.mubr.msk.f32.mxu0 %vm26259_vm1, %v26258_v2 }
 0x423   :  { %19892 = vmatmul.mubr.msk.f32.gmra.mrb[48].mxu0 %vm185_vm0, %v27500_v0  ;;  %v3369_v0 = vld [vmem:[%s33943_s0 + $0x3b] sm:$0xff] }
 0x424   :  { %19894 = vmatprep.mubr.msk.f32.mxu0 %vm26259_vm1, %v26258_v2 }
 0x427   :  { %19895 = vmatmul.mubr.msk.f32.gmra.mrb[50].mxu0 %vm185_vm0, %v27509_v1  ;;  %v3370_v1 = vld [vmem:[%s33943_s0 + $0x43] sm:$0xff] }
 0x428   :  { %19897 = vmatprep.mubr.msk.f32.mxu0 %vm26259_vm1, %v26258_v2 }
 0x42b   :  { %19898 = vmatmul.mubr.msk.f32.gmra.mrb[52].mxu0 %vm185_vm0, %v27518_v3  ;;  %v3371_v3 = vld [vmem:[%s33943_s0 + $0x4b] sm:$0xff] }
 0x42c   :  { %19900 = vmatprep.mubr.msk.f32.mxu0 %vm26259_vm1, %v26258_v2 }
 0x42f   :  { %19901 = vmatmul.mubr.msk.f32.gmra.mrb[54].mxu0 %vm185_vm0, %v27527_v4  ;;  %v3372_v4 = vld [vmem:[%s33943_s0 + $0x53] sm:$0xff] }
 0x430   :  { %19903 = vmatprep.mubr.msk.f32.mxu0 %vm26259_vm1, %v26258_v2 }
 0x433   :  { %19904 = vmatmul.mubr.msk.f32.gmra.mrb[56].mxu0 %vm185_vm0, %v27536_v5  ;;  %v3373_v5 = vld [vmem:[%s33943_s0 + $0x5b] sm:$0xff] }
 0x434   :  { %19906 = vmatprep.mubr.msk.f32.mxu0 %vm26259_vm1, %v26258_v2 }
 0x437   :  { %19907 = vmatmul.mubr.msk.f32.gmra.mrb[58].mxu0 %vm185_vm0, %v27545_v6  ;;  %v3374_v6 = vld [vmem:[%s33943_s0 + $0x63] sm:$0xff] }
 0x438   :  { %19909 = vmatprep.mubr.msk.f32.mxu0 %vm26259_vm1, %v26258_v2 }
 0x43b   :  { %19910 = vmatmul.mubr.msk.f32.gmra.mrb[60].mxu0 %vm185_vm0, %v27554_v7  ;;  %v3375_v7 = vld [vmem:[%s33943_s0 + $0x6b] sm:$0xff] }
 0x43c   :  { %19912 = vmatprep.mubr.msk.f32.mxu0 %vm26259_vm1, %v26258_v2 }
 0x43f   :  { %19913 = vmatmul.mubr.msk.f32.gmra.mrb[62].mxu0 %vm185_vm0, %v27563_v8  ;;  %v3376_v8 = vld [vmem:[%s33943_s0 + $0x73] sm:$0xff] }
 0x440   :  { %19915 = vmatprep.mubr.msk.f32.mxu0 %vm26259_vm1, %v26258_v2 }
 0x443   :  { %19916 = vmatmul.mubr.msk.f32.gmra.mrb[64].mxu0 %vm185_vm0, %v27572_v9  ;;  %v3377_v9 = vld [vmem:[%s33943_s0 + $0x7b] sm:$0xff] }
 0x444   :  { %19918 = vmatprep.mubr.msk.f32.mxu0 %vm26259_vm1, %v26258_v2 }
 0x447   :  { %19919 = vmatmul.mubr.msk.f32.gmra.mrb[66].mxu0 %vm185_vm0, %v27581_v10  ;;  %v3378_v10 = vld [vmem:[%s33943_s0 + $0x83] sm:$0xff] }
 0x448   :  { %19921 = vmatprep.mubr.msk.f32.mxu0 %vm26259_vm1, %v26258_v2 }
 0x44b   :  { %19922 = vmatmul.mubr.msk.f32.gmra.mrb[68].mxu0 %vm185_vm0, %v27590_v11  ;;  %v3379_v11 = vld [vmem:[%s33943_s0 + $0x8b] sm:$0xff] }
 0x44c   :  { %19924 = vmatprep.mubr.msk.f32.mxu0 %vm26259_vm1, %v26258_v2 }
 0x44f   :  { %19925 = vmatmul.mubr.msk.f32.gmra.mrb[70].mxu0 %vm185_vm0, %v27599_v12  ;;  %v3380_v12 = vld [vmem:[%s33943_s0 + $0x93] sm:$0xff] }
 0x450   :  { %19927 = vmatprep.mubr.msk.f32.mxu0 %vm26259_vm1, %v26258_v2 }
 0x453   :  { %19928 = vmatmul.mubr.msk.f32.gmra.mrb[72].mxu0 %vm185_vm0, %v27608_v13  ;;  %v3381_v13 = vld [vmem:[%s33943_s0 + $0x9b] sm:$0xff] }
 0x454   :  { %19930 = vmatprep.mubr.msk.f32.mxu0 %vm26259_vm1, %v26258_v2 }
 0x457   :  { %19931 = vmatmul.mubr.msk.f32.gmra.mrb[74].mxu0 %vm185_vm0, %v27617_v14  ;;  %v3382_v14 = vld [vmem:[%s33943_s0 + $0xa3] sm:$0xff] }
 0x458   :  { %19933 = vmatprep.mubr.msk.f32.mxu0 %vm26259_vm1, %v26258_v2 }
 0x45b   :  { %19934 = vmatmul.mubr.msk.f32.gmra.mrb[76].mxu0 %vm185_vm0, %v27626_v15  ;;  %v3383_v15 = vld [vmem:[%s33943_s0 + $0xab] sm:$0xff] }
 0x45c   :  { %19936 = vmatprep.mubr.msk.f32.mxu0 %vm26259_vm1, %v26258_v2 }
 0x45f   :  { %19937 = vmatmul.mubr.msk.f32.gmra.mrb[78].mxu0 %vm185_vm0, %v27635_v16  ;;  %v4321_v16 = vld [vmem:[%s33944_s1 + $0x28] sm:$0xff] }
 0x460   :  { %19939 = vmatprep.mubr.msk.f32.mxu0 %vm26259_vm1, %v26258_v2 }
 0x463   :  { %19940 = vmatmul.mubr.msk.f32.gmra.mrb[80].mxu0 %vm185_vm0, %v27644_v17  ;;  %v3384_v17 = vld [vmem:[%s33943_s0 + $0xb3] sm:$0xff] }
 0x464   :  { %19942 = vmatprep.mubr.msk.f32.mxu0 %vm26259_vm1, %v26258_v2 }
 0x467   :  { %19943 = vmatmul.mubr.msk.f32.gmra.mrb[82].mxu0 %vm185_vm0, %v27653_v18  ;;  %v3385_v18 = vld [vmem:[%s33943_s0 + $0xbb] sm:$0xff] }
 0x468   :  { %19945 = vmatprep.mubr.msk.f32.mxu0 %vm26259_vm1, %v26258_v2 }
 0x46b   :  { %19946 = vmatmul.mubr.msk.f32.gmra.mrb[84].mxu0 %vm185_vm0, %v27662_v19  ;;  %v3386_v19 = vld [vmem:[%s33943_s0 + $0xc3] sm:$0xff] }
 0x46c   :  { %19948 = vmatprep.mubr.msk.f32.mxu0 %vm26259_vm1, %v26258_v2 }
 0x46f   :  { %19949 = vmatmul.mubr.msk.f32.gmra.mrb[86].mxu0 %vm185_vm0, %v27671_v20  ;;  %v3387_v20 = vld [vmem:[%s33943_s0 + $0xcb] sm:$0xff] }
 0x470   :  { %19951 = vmatprep.mubr.msk.f32.mxu0 %vm26259_vm1, %v26258_v2 }
 0x473   :  { %19952 = vmatmul.mubr.msk.f32.gmra.mrb[88].mxu0 %vm185_vm0, %v27680_v21  ;;  %v3388_v21 = vld [vmem:[%s33943_s0 + $0xd3] sm:$0xff] }
 0x474   :  { %19954 = vmatprep.mubr.msk.f32.mxu0 %vm26259_vm1, %v26258_v2 }
 0x477   :  { %19955 = vmatmul.mubr.msk.f32.gmra.mrb[90].mxu0 %vm185_vm0, %v27689_v22  ;;  %v3389_v22 = vld [vmem:[%s33943_s0 + $0xdb] sm:$0xff] }
 0x478   :  { %19957 = vmatprep.mubr.msk.f32.mxu0 %vm26259_vm1, %v26258_v2 }
 0x47b   :  { %19958 = vmatmul.mubr.msk.f32.gmra.mrb[92].mxu0 %vm185_vm0, %v27698_v23  ;;  %v3390_v23 = vld [vmem:[%s33943_s0 + $0xe3] sm:$0xff] }
 0x47c   :  { %19960 = vmatprep.mubr.msk.f32.mxu0 %vm26259_vm1, %v26258_v2 }
 0x47f   :  { %19961 = vmatmul.mubr.msk.f32.gmra.mrb[94].mxu0 %vm185_vm0, %v27707_v24  ;;  %v3391_v24 = vld [vmem:[%s33943_s0 + $0xeb] sm:$0xff] }
 0x480   :  { %19963 = vmatprep.mubr.msk.f32.mxu0 %vm26259_vm1, %v26258_v2 }
 0x483   :  { %19964 = vmatmul.mubr.msk.f32.gmra.mrb[96].mxu0 %vm185_vm0, %v27716_v25  ;;  %v3392_v25 = vld [vmem:[%s33943_s0 + $0xf3] sm:$0xff] }
 0x484   :  { %19966 = vmatprep.mubr.msk.f32.mxu0 %vm26259_vm1, %v26258_v2 }
 0x487   :  { %19967 = vmatmul.mubr.msk.f32.gmra.mrb[98].mxu0 %vm185_vm0, %v27725_v26  ;;  %v3393_v26 = vld [vmem:[%s33943_s0 + $0xfb] sm:$0xff] }
 0x488   :  { %19969 = vmatprep.mubr.msk.f32.mxu0 %vm26259_vm1, %v26258_v2 }
 0x48b   :  { %19970 = vmatmul.mubr.msk.f32.gmra.mrb[100].mxu0 %vm185_vm0, %v27734_v27  ;;  %v3394_v27 = vld [vmem:[%s33943_s0 + $0x103] sm:$0xff] }
 0x48c   :  { %19972 = vmatprep.mubr.msk.f32.mxu0 %vm26259_vm1, %v26258_v2 }
 0x48f   :  { %19973 = vmatmul.mubr.msk.f32.gmra.mrb[102].mxu0 %vm185_vm0, %v27743_v28  ;;  %v3395_v28 = vld [vmem:[%s33943_s0 + $0x10b] sm:$0xff] }
 0x490   :  { %19975 = vmatprep.mubr.msk.f32.mxu0 %vm26259_vm1, %v26258_v2 }
 0x493   :  { %19976 = vmatmul.mubr.msk.f32.gmra.mrb[104].mxu0 %vm185_vm0, %v27752_v29  ;;  %v3396_v29 = vld [vmem:[%s33943_s0 + $0x113] sm:$0xff] }
 0x494   :  { %19978 = vmatprep.mubr.msk.f32.mxu0 %vm26259_vm1, %v26258_v2 }
 0x497   :  { %19979 = vmatmul.mubr.msk.f32.gmra.mrb[106].mxu0 %vm185_vm0, %v27761_v30  ;;  %v3397_v30 = vld [vmem:[%s33943_s0 + $0x11b] sm:$0xff] }
 0x498   :  { %19981 = vmatprep.mubr.msk.f32.mxu0 %vm26259_vm1, %v26258_v2 }
 0x49b   :  { %19982 = vmatmul.mubr.msk.f32.gmra.mrb[108].mxu0 %vm185_vm0, %v27770_v31  ;;  %v3398_v31 = vld [vmem:[%s33943_s0 + $0x123] sm:$0xff] }
 0x49c   :  { %19984 = vmatprep.mubr.msk.f32.mxu0 %vm26259_vm1, %v26258_v2 }
 0x49f   :  { %19985 = vmatmul.mubr.msk.f32.gmra.mrb[110].mxu0 %vm185_vm0, %v27779_v32  ;;  %v3399_v32 = vld [vmem:[%s33943_s0 + $0x12b] sm:$0xff] }
 0x4a0   :  { %19987 = vmatprep.mubr.msk.f32.mxu0 %vm26259_vm1, %v26258_v2 }
 0x4a3   :  { %19988 = vmatmul.mubr.msk.f32.gmra.mrb[112].mxu0 %vm185_vm0, %v27788_v33  ;;  %v3400_v33 = vld [vmem:[%s33943_s0 + $0x133] sm:$0xff] }
 0x4a4   :  { %19990 = vmatprep.mubr.msk.f32.mxu0 %vm26259_vm1, %v26258_v2 }
 0x4a7   :  { %19991 = vmatmul.mubr.msk.f32.gmra.mrb[114].mxu0 %vm185_vm0, %v27797_v34  ;;  %v3401_v34 = vld [vmem:[%s33943_s0 + $0x13b] sm:$0xff] }
 0x4a8   :  { %19993 = vmatprep.mubr.msk.f32.mxu0 %vm26259_vm1, %v26258_v2 }
 0x4ab   :  { %19994 = vmatmul.mubr.msk.f32.gmra.mrb[116].mxu0 %vm185_vm0, %v27806_v35  ;;  %v3402_v35 = vld [vmem:[%s33943_s0 + $0x143] sm:$0xff] }
 0x4ac   :  { %19996 = vmatprep.mubr.msk.f32.mxu0 %vm26259_vm1, %v26258_v2 }
 0x4af   :  { %19997 = vmatmul.mubr.msk.f32.gmra.mrb[118].mxu0 %vm185_vm0, %v27815_v36  ;;  %v3403_v36 = vld [vmem:[%s33943_s0 + $0x14b] sm:$0xff] }
 0x4b0   :  { %19999 = vmatprep.mubr.msk.f32.mxu0 %vm26259_vm1, %v26258_v2 }
 0x4b3   :  { %20000 = vmatmul.mubr.msk.f32.gmra.mrb[120].mxu0 %vm185_vm0, %v34032_v40  ;;  %v3408_v40 = vld [vmem:[%s33943_s0 + $0x173] sm:$0xff] }
 0x4b4   :  { %20002 = vmatprep.mubr.msk.f32.mxu0 %vm26259_vm1, %v26258_v2 }
 0x4b7   :  { %20003 = vmatmul.mubr.msk.f32.gmra.mrb[122].mxu0 %vm185_vm0, %v34033_v41  ;;  %v3409_v41 = vld [vmem:[%s33943_s0 + $0x17b] sm:$0xff] }
 0x4b8   :  { %20005 = vmatprep.mubr.msk.f32.mxu0 %vm26259_vm1, %v26258_v2 }
 0x4bb   :  { %20006 = vmatmul.mubr.msk.f32.gmra.mrb[124].mxu0 %vm185_vm0, %v34034_v42  ;;  %v3410_v42 = vld [vmem:[%s33943_s0 + $0x183] sm:$0xff] }
 0x4bc   :  { %20008 = vmatprep.mubr.msk.f32.mxu0 %vm26259_vm1, %v26258_v2 }
 0x4bf   :  { %20009 = vmatmul.mubr.msk.f32.gmra.mrb[126].mxu0 %vm185_vm0, %v34035_v43  ;;  %v3411_v43 = vld [vmem:[%s33943_s0 + $0x18b] sm:$0xff] }
 0x4c0   :  { %20011 = vmatprep.mubr.msk.f32.mxu0 %vm26259_vm1, %v26258_v2 }
 0x4c3   :  { %20012 = vmatmul.mubr.msk.f32.gmra.mrb[128].mxu0 %vm185_vm0, %v34036_v44  ;;  %v3412_v44 = vld [vmem:[%s33943_s0 + $0x193] sm:$0xff] }
 0x4c4   :  { %20014 = vmatprep.mubr.msk.f32.mxu0 %vm26259_vm1, %v26258_v2 }
 0x4c7   :  { %20015 = vmatmul.mubr.msk.f32.gmra.mrb[130].mxu0 %vm185_vm0, %v34037_v45  ;;  %v3413_v45 = vld [vmem:[%s33943_s0 + $0x19b] sm:$0xff] }
 0x4c8   :  { %20017 = vmatprep.mubr.msk.f32.mxu0 %vm26259_vm1, %v26258_v2 }
 0x4cb   :  { %20018 = vmatmul.mubr.msk.f32.gmra.mrb[132].mxu0 %vm185_vm0, %v34038_v46  ;;  %v3414_v46 = vld [vmem:[%s33943_s0 + $0x1a3] sm:$0xff] }
 0x4cc   :  { %20020 = vmatprep.mubr.msk.f32.mxu0 %vm26259_vm1, %v26258_v2 }
 0x4cf   :  { %20021 = vmatmul.mubr.msk.f32.gmra.mrb[134].mxu0 %vm185_vm0, %v34039_v47  ;;  %v3415_v47 = vld [vmem:[%s33943_s0 + $0x1ab] sm:$0xff] }
 0x4d0   :  { %20023 = vmatprep.mubr.msk.f32.mxu0 %vm26259_vm1, %v26258_v2 }
 0x4d3   :  { %20024 = vmatmul.mubr.msk.f32.gmra.mrb[136].mxu0 %vm185_vm0, %v34040_v48  ;;  %v3416_v48 = vld [vmem:[%s33943_s0 + $0x1b3] sm:$0xff] }
 0x4d4   :  { %20026 = vmatprep.mubr.msk.f32.mxu0 %vm26259_vm1, %v26258_v2 }
 0x4d7   :  { %20027 = vmatmul.mubr.msk.f32.gmra.mrb[138].mxu0 %vm185_vm0, %v34041_v49  ;;  %v3417_v49 = vld [vmem:[%s33943_s0 + $0x1bb] sm:$0xff] }
 0x4d8   :  { %20029 = vmatprep.mubr.msk.f32.mxu0 %vm26259_vm1, %v26258_v2 }
 0x4db   :  { %20030 = vmatmul.mubr.msk.f32.gmra.mrb[140].mxu0 %vm185_vm0, %v34042_v50  ;;  %v3418_v50 = vld [vmem:[%s33943_s0 + $0x1c3] sm:$0xff] }
 0x4dc   :  { %20032 = vmatprep.mubr.msk.f32.mxu0 %vm26259_vm1, %v26258_v2 }
 0x4df   :  { %20033 = vmatmul.mubr.msk.f32.gmra.mrb[142].mxu0 %vm185_vm0, %v34043_v51  ;;  %v3419_v51 = vld [vmem:[%s33943_s0 + $0x1cb] sm:$0xff] }
 0x4e0   :  { %20035 = vmatprep.mubr.msk.f32.mxu0 %vm26259_vm1, %v26258_v2 }
 0x4e3   :  { %20036 = vmatmul.mubr.msk.f32.gmra.mrb[144].mxu0 %vm185_vm0, %v34044_v52  ;;  %v3420_v52 = vld [vmem:[%s33943_s0 + $0x1d3] sm:$0xff] }
 0x4e4   :  { %20038 = vmatprep.mubr.msk.f32.mxu0 %vm26259_vm1, %v26258_v2 }
 0x4e7   :  { %20039 = vmatmul.mubr.msk.f32.gmra.mrb[146].mxu0 %vm185_vm0, %v34045_v53  ;;  %v3421_v53 = vld [vmem:[%s33943_s0 + $0x1db] sm:$0xff] }
 0x4e8   :  { %20041 = vmatprep.mubr.msk.f32.mxu0 %vm26259_vm1, %v26258_v2 }
 0x4eb   :  { %20042 = vmatmul.mubr.msk.f32.gmra.mrb[148].mxu0 %vm185_vm0, %v34046_v54  ;;  %v3422_v54 = vld [vmem:[%s33943_s0 + $0x1e3] sm:$0xff] }
 0x4ec   :  { %20044 = vmatprep.mubr.msk.f32.mxu0 %vm26259_vm1, %v26258_v2 }
 0x4ef   :  { %20045 = vmatmul.mubr.msk.f32.gmra.mrb[150].mxu0 %vm185_vm0, %v34047_v55  ;;  %v3423_v55 = vld [vmem:[%s33943_s0 + $0x1eb] sm:$0xff] }
 0x4f0   :  { %20047 = vmatprep.mubr.msk.f32.mxu0 %vm26259_vm1, %v26258_v2 }
 0x4f3   :  { %20048 = vmatmul.mubr.msk.f32.gmra.mrb[152].mxu0 %vm185_vm0, %v27968_v38  ;;  %v3405_v38 = vld [vmem:[%s33943_s0 + $0x15b] sm:$0xff] }
 0x4f4   :  { %20050 = vmatprep.mubr.msk.f32.mxu0 %vm26259_vm1, %v26258_v2 }
 0x4f7   :  { %20051 = vmatmul.mubr.msk.f32.gmra.mrb[154].mxu0 %vm185_vm0, %v27977_v57  ;;  %v3406_v57 = vld [vmem:[%s33943_s0 + $0x163] sm:$0xff] }
 0x4f8   :  { %20053 = vmatprep.mubr.msk.f32.mxu0 %vm26259_vm1, %v26258_v2 }
 0x4fb   :  { %20054 = vmatmul.mubr.msk.f32.gmra.mrb[156].mxu0 %vm185_vm0, %v27986_v37  ;;  %v3404_v37 = vld [vmem:[%s33943_s0 + $0x153] sm:$0xff] }
 0x4fc   :  { %20056 = vmatprep.mubr.msk.f32.mxu0 %vm26259_vm1, %v26258_v2 }
 0x4ff   :  { %20057 = vmatmul.mubr.msk.f32.gmra.mrb[158].mxu0 %vm185_vm0, %v2567_v56  ;;  %v3424_v56 = vld [vmem:[%s33943_s0 + $0x1f3] sm:$0xff] }
 0x500   :  { %20059 = vmatprep.mubr.msk.f32.mxu0 %vm26259_vm1, %v26258_v2 }
 0x503   :  { %20060 = vmatmul.mubr.msk.f32.gmra.mrb[160].mxu0 %vm185_vm0, %v2568_v58  ;;  %v3425_v58 = vld [vmem:[%s33943_s0 + $0x1fb] sm:$0xff] }
 0x504   :  { %20064 = vmatprep.mubr.msk.f32.mxu0 %vm26259_vm1, %v26258_v2 }
 0x507   :  { %20065 = vmatmul.mubr.msk.f32.vlgmr.msra.gmra.mrb[0].mxu0 %vm185_vm0, %v3364_v59  ;;  %v3426_v59 = vld [vmem:[%s33943_s0 + $0x203] sm:$0xff] }
 0x508   :  { %20067 = vmatprep.mubr.msk.f32.mxu0 %vm26259_vm1, %v26258_v2  ;;  %20308 = vmatpush3.msra.mxu0 %v4321_v16  ;;  %v4241_v16 = vld [vmem:[%s33943_s0 + $0x1c] sm:$0xff] }
 0x509   :  { %20552 = vmatprep.subr.mxu0 %v26258_v2 }
 0x50b   :  { %20068 = vmatmul.mubr.msk.f32.gmra.mrb[2].mxu0 %vm185_vm0, %v3365_v60  ;;  %v3427_v60 = vld [vmem:[%s33943_s0 + $0x20b] sm:$0xff] }
 0x50c   :  { %20070 = vmatprep.mubr.msk.f32.mxu0 %vm26259_vm1, %v26258_v2 }
 0x50f   :  { %20071 = vmatmul.mubr.msk.f32.gmra.mrb[4].mxu0 %vm185_vm0, %v3366_v61  ;;  %v3428_v61 = vld [vmem:[%s33943_s0 + $0x213] sm:$0xff] }
 0x510   :  { %20073 = vmatprep.mubr.msk.f32.mxu0 %vm26259_vm1, %v26258_v2 }
 0x513   :  { %20074 = vmatmul.mubr.msk.f32.gmra.mrb[6].mxu0 %vm185_vm0, %v3367_v62  ;;  %v3429_v62 = vld [vmem:[%s33943_s0 + $0x21b] sm:$0xff] }
 0x514   :  { %20076 = vmatprep.mubr.msk.f32.mxu0 %vm26259_vm1, %v26258_v2 }
 0x517   :  { %20077 = vmatmul.mubr.msk.f32.gmra.mrb[8].mxu0 %vm185_vm0, %v3368_v63  ;;  %v3430_v63 = vld [vmem:[%s33943_s0 + $0x223] sm:$0xff] }
 0x518   :  { %20079 = vmatprep.mubr.msk.f32.mxu0 %vm26259_vm1, %v26258_v2 }
 0x51b   :  { %20080 = vmatmul.mubr.msk.f32.gmra.mrb[10].mxu0 %vm185_vm0, %v3369_v0  ;;  %v3431_v0 = vld [vmem:[%s33943_s0 + $0x22b] sm:$0xff] }
 0x51c   :  { %20082 = vmatprep.mubr.msk.f32.mxu0 %vm26259_vm1, %v26258_v2 }
 0x51f   :  { %20083 = vmatmul.mubr.msk.f32.gmra.mrb[12].mxu0 %vm185_vm0, %v3370_v1  ;;  %v3432_v1 = vld [vmem:[%s33943_s0 + $0x233] sm:$0xff] }
 0x520   :  { %20085 = vmatprep.mubr.msk.f32.mxu0 %vm26259_vm1, %v26258_v2 }
 0x523   :  { %20086 = vmatmul.mubr.msk.f32.gmra.mrb[14].mxu0 %vm185_vm0, %v3371_v3  ;;  %v3433_v3 = vld [vmem:[%s33943_s0 + $0x23b] sm:$0xff] }
 0x524   :  { %20088 = vmatprep.mubr.msk.f32.mxu0 %vm26259_vm1, %v26258_v2 }
 0x527   :  { %20089 = vmatmul.mubr.msk.f32.gmra.mrb[16].mxu0 %vm185_vm0, %v3372_v4  ;;  %v3434_v4 = vld [vmem:[%s33943_s0 + $0x243] sm:$0xff] }
 0x528   :  { %20091 = vmatprep.mubr.msk.f32.mxu0 %vm26259_vm1, %v26258_v2 }
 0x52b   :  { %20092 = vmatmul.mubr.msk.f32.gmra.mrb[18].mxu0 %vm185_vm0, %v3373_v5  ;;  %v3435_v5 = vld [vmem:[%s33943_s0 + $0x24b] sm:$0xff] }
 0x52c   :  { %20094 = vmatprep.mubr.msk.f32.mxu0 %vm26259_vm1, %v26258_v2 }
 0x52f   :  { %20095 = vmatmul.mubr.msk.f32.gmra.mrb[20].mxu0 %vm185_vm0, %v3374_v6  ;;  %v3436_v6 = vld [vmem:[%s33943_s0 + $0x253] sm:$0xff] }
 0x530   :  { %20097 = vmatprep.mubr.msk.f32.mxu0 %vm26259_vm1, %v26258_v2 }
 0x533   :  { %20098 = vmatmul.mubr.msk.f32.gmra.mrb[22].mxu0 %vm185_vm0, %v3375_v7  ;;  %v3437_v7 = vld [vmem:[%s33943_s0 + $0x25b] sm:$0xff] }
 0x534   :  { %20100 = vmatprep.mubr.msk.f32.mxu0 %vm26259_vm1, %v26258_v2 }
 0x537   :  { %20101 = vmatmul.mubr.msk.f32.gmra.mrb[24].mxu0 %vm185_vm0, %v3376_v8  ;;  %v3438_v8 = vld [vmem:[%s33943_s0 + $0x263] sm:$0xff] }
 0x538   :  { %20103 = vmatprep.mubr.msk.f32.mxu0 %vm26259_vm1, %v26258_v2 }
 0x53b   :  { %20104 = vmatmul.mubr.msk.f32.gmra.mrb[26].mxu0 %vm185_vm0, %v3377_v9  ;;  %v3439_v9 = vld [vmem:[%s33943_s0 + $0x26b] sm:$0xff] }
 0x53c   :  { %20106 = vmatprep.mubr.msk.f32.mxu0 %vm26259_vm1, %v26258_v2 }
 0x53f   :  { %20107 = vmatmul.mubr.msk.f32.gmra.mrb[28].mxu0 %vm185_vm0, %v3378_v10  ;;  %v3440_v10 = vld [vmem:[%s33943_s0 + $0x273] sm:$0xff] }
 0x540   :  { %20109 = vmatprep.mubr.msk.f32.mxu0 %vm26259_vm1, %v26258_v2 }
 0x543   :  { %20110 = vmatmul.mubr.msk.f32.gmra.mrb[30].mxu0 %vm185_vm0, %v3379_v11  ;;  %v3441_v11 = vld [vmem:[%s33943_s0 + $0x27b] sm:$0xff] }
 0x544   :  { %20112 = vmatprep.mubr.msk.f32.mxu0 %vm26259_vm1, %v26258_v2 }
 0x547   :  { %20113 = vmatmul.mubr.msk.f32.gmra.mrb[32].mxu0 %vm185_vm0, %v3380_v12  ;;  %v3442_v12 = vld [vmem:[%s33943_s0 + $0x283] sm:$0xff] }
 0x548   :  { %20115 = vmatprep.mubr.msk.f32.mxu0 %vm26259_vm1, %v26258_v2 }
 0x54b   :  { %20116 = vmatmul.mubr.msk.f32.gmra.mrb[34].mxu0 %vm185_vm0, %v3381_v13  ;;  %v3443_v13 = vld [vmem:[%s33943_s0 + $0x28b] sm:$0xff] }
 0x54c   :  { %20118 = vmatprep.mubr.msk.f32.mxu0 %vm26259_vm1, %v26258_v2 }
 0x54f   :  { %20119 = vmatmul.mubr.msk.f32.gmra.mrb[36].mxu0 %vm185_vm0, %v3382_v14  ;;  %v3444_v14 = vld [vmem:[%s33943_s0 + $0x293] sm:$0xff] }
 0x550   :  { %20121 = vmatprep.mubr.msk.f32.mxu0 %vm26259_vm1, %v26258_v2 }
 0x553   :  { %20122 = vmatmul.mubr.msk.f32.gmra.mrb[38].mxu0 %vm185_vm0, %v3383_v15  ;;  %v4240_v15 = vld [vmem:[%s33943_s0 + $0x14] sm:$0xff] }
 0x554   :  { %20124 = vmatprep.mubr.msk.f32.mxu0 %vm26259_vm1, %v26258_v2 }
 0x557   :  { %20125 = vmatmul.mubr.msk.f32.gmra.mrb[40].mxu0 %vm185_vm0, %v3384_v17  ;;  %v28829_v17 = vld [vmem:[%s33943_s0 + $0x24] sm:$0xff] }
 0x558   :  { %20127 = vmatprep.mubr.msk.f32.mxu0 %vm26259_vm1, %v26258_v2 }
 0x55b   :  { %20128 = vmatmul.mubr.msk.f32.gmra.mrb[42].mxu0 %vm185_vm0, %v3385_v18  ;;  %v28838_v18 = vld [vmem:[%s33943_s0 + $0x2c] sm:$0xff] }
 0x55c   :  { %20130 = vmatprep.mubr.msk.f32.mxu0 %vm26259_vm1, %v26258_v2 }
 0x55f   :  { %20131 = vmatmul.mubr.msk.f32.gmra.mrb[44].mxu0 %vm185_vm0, %v3386_v19  ;;  %v28847_v19 = vld [vmem:[%s33943_s0 + $0x34] sm:$0xff] }
 0x560   :  { %20133 = vmatprep.mubr.msk.f32.mxu0 %vm26259_vm1, %v26258_v2 }
 0x563   :  { %20134 = vmatmul.mubr.msk.f32.gmra.mrb[46].mxu0 %vm185_vm0, %v3387_v20  ;;  %v28856_v20 = vld [vmem:[%s33943_s0 + $0x3c] sm:$0xff] }
 0x564   :  { %20136 = vmatprep.mubr.msk.f32.mxu0 %vm26259_vm1, %v26258_v2 }
 0x567   :  { %20137 = vmatmul.mubr.msk.f32.gmra.mrb[48].mxu0 %vm185_vm0, %v3388_v21  ;;  %v28865_v21 = vld [vmem:[%s33943_s0 + $0x44] sm:$0xff] }
 0x568   :  { %20139 = vmatprep.mubr.msk.f32.mxu0 %vm26259_vm1, %v26258_v2 }
 0x56b   :  { %20140 = vmatmul.mubr.msk.f32.gmra.mrb[50].mxu0 %vm185_vm0, %v3389_v22  ;;  %v28874_v22 = vld [vmem:[%s33943_s0 + $0x4c] sm:$0xff] }
 0x56c   :  { %20142 = vmatprep.mubr.msk.f32.mxu0 %vm26259_vm1, %v26258_v2 }
 0x56f   :  { %20143 = vmatmul.mubr.msk.f32.gmra.mrb[52].mxu0 %vm185_vm0, %v3390_v23  ;;  %v28883_v23 = vld [vmem:[%s33943_s0 + $0x54] sm:$0xff] }
 0x570   :  { %20145 = vmatprep.mubr.msk.f32.mxu0 %vm26259_vm1, %v26258_v2 }
 0x573   :  { %20146 = vmatmul.mubr.msk.f32.gmra.mrb[54].mxu0 %vm185_vm0, %v3391_v24  ;;  %v28892_v24 = vld [vmem:[%s33943_s0 + $0x5c] sm:$0xff] }
 0x574   :  { %20148 = vmatprep.mubr.msk.f32.mxu0 %vm26259_vm1, %v26258_v2 }
 0x577   :  { %20149 = vmatmul.mubr.msk.f32.gmra.mrb[56].mxu0 %vm185_vm0, %v3392_v25  ;;  %v28901_v25 = vld [vmem:[%s33943_s0 + $0x64] sm:$0xff] }
 0x578   :  { %20151 = vmatprep.mubr.msk.f32.mxu0 %vm26259_vm1, %v26258_v2 }
 0x57b   :  { %20152 = vmatmul.mubr.msk.f32.gmra.mrb[58].mxu0 %vm185_vm0, %v3393_v26  ;;  %v28910_v26 = vld [vmem:[%s33943_s0 + $0x6c] sm:$0xff] }
 0x57c   :  { %20154 = vmatprep.mubr.msk.f32.mxu0 %vm26259_vm1, %v26258_v2 }
 0x57f   :  { %20155 = vmatmul.mubr.msk.f32.gmra.mrb[60].mxu0 %vm185_vm0, %v3394_v27  ;;  %v28919_v27 = vld [vmem:[%s33943_s0 + $0x74] sm:$0xff] }
 0x580   :  { %20157 = vmatprep.mubr.msk.f32.mxu0 %vm26259_vm1, %v26258_v2 }
 0x583   :  { %20158 = vmatmul.mubr.msk.f32.gmra.mrb[62].mxu0 %vm185_vm0, %v3395_v28  ;;  %v28928_v28 = vld [vmem:[%s33943_s0 + $0x7c] sm:$0xff] }
 0x584   :  { %20160 = vmatprep.mubr.msk.f32.mxu0 %vm26259_vm1, %v26258_v2 }
 0x587   :  { %20161 = vmatmul.mubr.msk.f32.gmra.mrb[64].mxu0 %vm185_vm0, %v3396_v29  ;;  %v28937_v29 = vld [vmem:[%s33943_s0 + $0x84] sm:$0xff] }
 0x588   :  { %20163 = vmatprep.mubr.msk.f32.mxu0 %vm26259_vm1, %v26258_v2 }
 0x58b   :  { %20164 = vmatmul.mubr.msk.f32.gmra.mrb[66].mxu0 %vm185_vm0, %v3397_v30  ;;  %v28946_v30 = vld [vmem:[%s33943_s0 + $0x8c] sm:$0xff] }
 0x58c   :  { %20166 = vmatprep.mubr.msk.f32.mxu0 %vm26259_vm1, %v26258_v2 }
 0x58f   :  { %20167 = vmatmul.mubr.msk.f32.gmra.mrb[68].mxu0 %vm185_vm0, %v3398_v31  ;;  %v28955_v31 = vld [vmem:[%s33943_s0 + $0x94] sm:$0xff] }
 0x590   :  { %20169 = vmatprep.mubr.msk.f32.mxu0 %vm26259_vm1, %v26258_v2 }
 0x593   :  { %20170 = vmatmul.mubr.msk.f32.gmra.mrb[70].mxu0 %vm185_vm0, %v3399_v32  ;;  %v28964_v32 = vld [vmem:[%s33943_s0 + $0x9c] sm:$0xff] }
 0x594   :  { %20172 = vmatprep.mubr.msk.f32.mxu0 %vm26259_vm1, %v26258_v2 }
 0x597   :  { %20173 = vmatmul.mubr.msk.f32.gmra.mrb[72].mxu0 %vm185_vm0, %v3400_v33  ;;  %v28973_v33 = vld [vmem:[%s33943_s0 + $0xa4] sm:$0xff] }
 0x598   :  { %20175 = vmatprep.mubr.msk.f32.mxu0 %vm26259_vm1, %v26258_v2 }
 0x59b   :  { %20176 = vmatmul.mubr.msk.f32.gmra.mrb[74].mxu0 %vm185_vm0, %v3401_v34  ;;  %v28982_v34 = vld [vmem:[%s33943_s0 + $0xac] sm:$0xff] }
 0x59c   :  { %20178 = vmatprep.mubr.msk.f32.mxu0 %vm26259_vm1, %v26258_v2 }
 0x59f   :  { %20179 = vmatmul.mubr.msk.f32.gmra.mrb[76].mxu0 %vm185_vm0, %v3402_v35  ;;  %v5197_v35 = vld [vmem:[%s33944_s1 + $0x30] sm:$0xff] }
 0x5a0   :  { %20181 = vmatprep.mubr.msk.f32.mxu0 %vm26259_vm1, %v26258_v2 }
 0x5a3   :  { %20182 = vmatmul.mubr.msk.f32.gmra.mrb[78].mxu0 %vm185_vm0, %v3403_v36  ;;  %v28994_v36 = vld [vmem:[%s33943_s0 + $0xb4] sm:$0xff] }
 0x5a4   :  { %20184 = vmatprep.mubr.msk.f32.mxu0 %vm26259_vm1, %v26258_v2 }
 0x5a7   :  { %20185 = vmatmul.mubr.msk.f32.gmra.mrb[80].mxu0 %vm185_vm0, %v3404_v37  ;;  %v29004_v37 = vld [vmem:[%s33943_s0 + $0xbc] sm:$0xff] }
 0x5a8   :  { %20187 = vmatprep.mubr.msk.f32.mxu0 %vm26259_vm1, %v26258_v2 }
 0x5ab   :  { %20188 = vmatmul.mubr.msk.f32.gmra.mrb[82].mxu0 %vm185_vm0, %v3405_v38  ;;  %v29013_v38 = vld [vmem:[%s33943_s0 + $0xc4] sm:$0xff] }
 0x5ac   :  { %20190 = vmatprep.mubr.msk.f32.mxu0 %vm26259_vm1, %v26258_v2 }
 0x5af   :  { %20191 = vmatmul.mubr.msk.f32.gmra.mrb[84].mxu0 %vm185_vm0, %v3406_v57  ;;  %v29022_v57 = vld [vmem:[%s33943_s0 + $0xcc] sm:$0xff] }
 0x5b0   :  { %20193 = vmatprep.mubr.msk.f32.mxu0 %vm26259_vm1, %v26258_v2 }
 0x5b3   :  { %20194 = vmatmul.mubr.msk.f32.gmra.mrb[86].mxu0 %vm185_vm0, %v3407_v39  ;;  %v29031_v39 = vld [vmem:[%s33943_s0 + $0xd4] sm:$0xff] }
 0x5b4   :  { %20196 = vmatprep.mubr.msk.f32.mxu0 %vm26259_vm1, %v26258_v2 }
 0x5b7   :  { %20197 = vmatmul.mubr.msk.f32.gmra.mrb[88].mxu0 %vm185_vm0, %v3408_v40  ;;  %v29040_v40 = vld [vmem:[%s33943_s0 + $0xdc] sm:$0xff] }
 0x5b8   :  { %20199 = vmatprep.mubr.msk.f32.mxu0 %vm26259_vm1, %v26258_v2 }
 0x5bb   :  { %20200 = vmatmul.mubr.msk.f32.gmra.mrb[90].mxu0 %vm185_vm0, %v3409_v41  ;;  %v29049_v41 = vld [vmem:[%s33943_s0 + $0xe4] sm:$0xff] }
 0x5bc   :  { %20202 = vmatprep.mubr.msk.f32.mxu0 %vm26259_vm1, %v26258_v2 }
 0x5bf   :  { %20203 = vmatmul.mubr.msk.f32.gmra.mrb[92].mxu0 %vm185_vm0, %v3410_v42  ;;  %v29058_v42 = vld [vmem:[%s33943_s0 + $0xec] sm:$0xff] }
 0x5c0   :  { %20205 = vmatprep.mubr.msk.f32.mxu0 %vm26259_vm1, %v26258_v2 }
 0x5c3   :  { %20206 = vmatmul.mubr.msk.f32.gmra.mrb[94].mxu0 %vm185_vm0, %v3411_v43  ;;  %v29067_v43 = vld [vmem:[%s33943_s0 + $0xf4] sm:$0xff] }
 0x5c4   :  { %20208 = vmatprep.mubr.msk.f32.mxu0 %vm26259_vm1, %v26258_v2 }
 0x5c7   :  { %20209 = vmatmul.mubr.msk.f32.gmra.mrb[96].mxu0 %vm185_vm0, %v3412_v44  ;;  %v29076_v44 = vld [vmem:[%s33943_s0 + $0xfc] sm:$0xff] }
 0x5c8   :  { %20211 = vmatprep.mubr.msk.f32.mxu0 %vm26259_vm1, %v26258_v2 }
 0x5cb   :  { %20212 = vmatmul.mubr.msk.f32.gmra.mrb[98].mxu0 %vm185_vm0, %v3413_v45  ;;  %v29085_v45 = vld [vmem:[%s33943_s0 + $0x104] sm:$0xff] }
 0x5cc   :  { %20214 = vmatprep.mubr.msk.f32.mxu0 %vm26259_vm1, %v26258_v2 }
 0x5cf   :  { %20215 = vmatmul.mubr.msk.f32.gmra.mrb[100].mxu0 %vm185_vm0, %v3414_v46  ;;  %v29094_v46 = vld [vmem:[%s33943_s0 + $0x10c] sm:$0xff] }
 0x5d0   :  { %20217 = vmatprep.mubr.msk.f32.mxu0 %vm26259_vm1, %v26258_v2 }
 0x5d3   :  { %20218 = vmatmul.mubr.msk.f32.gmra.mrb[102].mxu0 %vm185_vm0, %v3415_v47  ;;  %v29103_v47 = vld [vmem:[%s33943_s0 + $0x114] sm:$0xff] }
 0x5d4   :  { %20220 = vmatprep.mubr.msk.f32.mxu0 %vm26259_vm1, %v26258_v2 }
 0x5d7   :  { %20221 = vmatmul.mubr.msk.f32.gmra.mrb[104].mxu0 %vm185_vm0, %v3416_v48  ;;  %v29112_v48 = vld [vmem:[%s33943_s0 + $0x11c] sm:$0xff] }
 0x5d8   :  { %20223 = vmatprep.mubr.msk.f32.mxu0 %vm26259_vm1, %v26258_v2 }
 0x5db   :  { %20224 = vmatmul.mubr.msk.f32.gmra.mrb[106].mxu0 %vm185_vm0, %v3417_v49  ;;  %v29121_v49 = vld [vmem:[%s33943_s0 + $0x124] sm:$0xff] }
 0x5dc   :  { %20226 = vmatprep.mubr.msk.f32.mxu0 %vm26259_vm1, %v26258_v2 }
 0x5df   :  { %20227 = vmatmul.mubr.msk.f32.gmra.mrb[108].mxu0 %vm185_vm0, %v3418_v50  ;;  %v29130_v50 = vld [vmem:[%s33943_s0 + $0x12c] sm:$0xff] }
 0x5e0   :  { %20229 = vmatprep.mubr.msk.f32.mxu0 %vm26259_vm1, %v26258_v2 }
 0x5e3   :  { %20230 = vmatmul.mubr.msk.f32.gmra.mrb[110].mxu0 %vm185_vm0, %v3419_v51  ;;  %v29139_v51 = vld [vmem:[%s33943_s0 + $0x134] sm:$0xff] }
 0x5e4   :  { %20232 = vmatprep.mubr.msk.f32.mxu0 %vm26259_vm1, %v26258_v2 }
 0x5e7   :  { %20233 = vmatmul.mubr.msk.f32.gmra.mrb[112].mxu0 %vm185_vm0, %v3420_v52  ;;  %v29148_v52 = vld [vmem:[%s33943_s0 + $0x13c] sm:$0xff] }
 0x5e8   :  { %20235 = vmatprep.mubr.msk.f32.mxu0 %vm26259_vm1, %v26258_v2 }
 0x5eb   :  { %20236 = vmatmul.mubr.msk.f32.gmra.mrb[114].mxu0 %vm185_vm0, %v3421_v53  ;;  %v29157_v53 = vld [vmem:[%s33943_s0 + $0x144] sm:$0xff] }
 0x5ec   :  { %20238 = vmatprep.mubr.msk.f32.mxu0 %vm26259_vm1, %v26258_v2 }
 0x5ef   :  { %20239 = vmatmul.mubr.msk.f32.gmra.mrb[116].mxu0 %vm185_vm0, %v3422_v54  ;;  %v29166_v54 = vld [vmem:[%s33943_s0 + $0x14c] sm:$0xff] }
 0x5f0   :  { %20241 = vmatprep.mubr.msk.f32.mxu0 %vm26259_vm1, %v26258_v2 }
 0x5f3   :  { %20242 = vmatmul.mubr.msk.f32.gmra.mrb[118].mxu0 %vm185_vm0, %v3423_v55  ;;  %v29175_v55 = vld [vmem:[%s33943_s0 + $0x154] sm:$0xff] }
 0x5f4   :  { %20244 = vmatprep.mubr.msk.f32.mxu0 %vm26259_vm1, %v26258_v2 }
 0x5f7   :  { %20245 = vmatmul.mubr.msk.f32.gmra.mrb[120].mxu0 %vm185_vm0, %v3424_v56  ;;  %v29184_v56 = vld [vmem:[%s33943_s0 + $0x15c] sm:$0xff] }
 0x5f8   :  { %20247 = vmatprep.mubr.msk.f32.mxu0 %vm26259_vm1, %v26258_v2 }
 0x5fb   :  { %20248 = vmatmul.mubr.msk.f32.gmra.mrb[122].mxu0 %vm185_vm0, %v3425_v58  ;;  %v29193_v58 = vld [vmem:[%s33943_s0 + $0x164] sm:$0xff] }
 0x5fc   :  { %20250 = vmatprep.mubr.msk.f32.mxu0 %vm26259_vm1, %v26258_v2 }
 0x5ff   :  { %20251 = vmatmul.mubr.msk.f32.gmra.mrb[124].mxu0 %vm185_vm0, %v3426_v59  ;;  %v29202_v59 = vld [vmem:[%s33943_s0 + $0x16c] sm:$0xff] }
 0x600   :  { %20253 = vmatprep.mubr.msk.f32.mxu0 %vm26259_vm1, %v26258_v2 }
 0x603   :  { %20254 = vmatmul.mubr.msk.f32.gmra.mrb[126].mxu0 %vm185_vm0, %v3427_v60  ;;  %v29211_v60 = vld [vmem:[%s33943_s0 + $0x174] sm:$0xff] }
 0x604   :  { %20256 = vmatprep.mubr.msk.f32.mxu0 %vm26259_vm1, %v26258_v2 }
 0x607   :  { %20257 = vmatmul.mubr.msk.f32.gmra.mrb[128].mxu0 %vm185_vm0, %v3428_v61  ;;  %v29220_v61 = vld [vmem:[%s33943_s0 + $0x17c] sm:$0xff] }
 0x608   :  { %20259 = vmatprep.mubr.msk.f32.mxu0 %vm26259_vm1, %v26258_v2 }
 0x60b   :  { %20260 = vmatmul.mubr.msk.f32.gmra.mrb[130].mxu0 %vm185_vm0, %v3429_v62  ;;  %v29229_v62 = vld [vmem:[%s33943_s0 + $0x184] sm:$0xff] }
 0x60c   :  { %20262 = vmatprep.mubr.msk.f32.mxu0 %vm26259_vm1, %v26258_v2 }
 0x60f   :  { %20263 = vmatmul.mubr.msk.f32.gmra.mrb[132].mxu0 %vm185_vm0, %v3430_v63  ;;  %v29238_v63 = vld [vmem:[%s33943_s0 + $0x18c] sm:$0xff] }
 0x610   :  { %20265 = vmatprep.mubr.msk.f32.mxu0 %vm26259_vm1, %v26258_v2 }
 0x613   :  { %20266 = vmatmul.mubr.msk.f32.gmra.mrb[134].mxu0 %vm185_vm0, %v3431_v0  ;;  %v29247_v0 = vld [vmem:[%s33943_s0 + $0x194] sm:$0xff] }
 0x614   :  { %20268 = vmatprep.mubr.msk.f32.mxu0 %vm26259_vm1, %v26258_v2 }
 0x617   :  { %20269 = vmatmul.mubr.msk.f32.gmra.mrb[136].mxu0 %vm185_vm0, %v3432_v1  ;;  %v29256_v1 = vld [vmem:[%s33943_s0 + $0x19c] sm:$0xff] }
 0x618   :  { %20271 = vmatprep.mubr.msk.f32.mxu0 %vm26259_vm1, %v26258_v2 }
 0x61b   :  { %20272 = vmatmul.mubr.msk.f32.gmra.mrb[138].mxu0 %vm185_vm0, %v3433_v3  ;;  %v29265_v3 = vld [vmem:[%s33943_s0 + $0x1a4] sm:$0xff] }
 0x61c   :  { %20274 = vmatprep.mubr.msk.f32.mxu0 %vm26259_vm1, %v26258_v2 }
 0x61f   :  { %20275 = vmatmul.mubr.msk.f32.gmra.mrb[140].mxu0 %vm185_vm0, %v3434_v4  ;;  %v29274_v4 = vld [vmem:[%s33943_s0 + $0x1ac] sm:$0xff] }
 0x620   :  { %20277 = vmatprep.mubr.msk.f32.mxu0 %vm26259_vm1, %v26258_v2 }
 0x623   :  { %20278 = vmatmul.mubr.msk.f32.gmra.mrb[142].mxu0 %vm185_vm0, %v3435_v5  ;;  %v29283_v5 = vld [vmem:[%s33943_s0 + $0x1b4] sm:$0xff] }
 0x624   :  { %20280 = vmatprep.mubr.msk.f32.mxu0 %vm26259_vm1, %v26258_v2 }
 0x627   :  { %20281 = vmatmul.mubr.msk.f32.gmra.mrb[144].mxu0 %vm185_vm0, %v3436_v6  ;;  %v29292_v6 = vld [vmem:[%s33943_s0 + $0x1bc] sm:$0xff] }
 0x628   :  { %20283 = vmatprep.mubr.msk.f32.mxu0 %vm26259_vm1, %v26258_v2 }
 0x62b   :  { %20284 = vmatmul.mubr.msk.f32.gmra.mrb[146].mxu0 %vm185_vm0, %v3437_v7  ;;  %v29301_v7 = vld [vmem:[%s33943_s0 + $0x1c4] sm:$0xff] }
 0x62c   :  { %20286 = vmatprep.mubr.msk.f32.mxu0 %vm26259_vm1, %v26258_v2 }
 0x62f   :  { %20287 = vmatmul.mubr.msk.f32.gmra.mrb[148].mxu0 %vm185_vm0, %v3438_v8  ;;  %v29310_v8 = vld [vmem:[%s33943_s0 + $0x1cc] sm:$0xff] }
 0x630   :  { %20289 = vmatprep.mubr.msk.f32.mxu0 %vm26259_vm1, %v26258_v2 }
 0x633   :  { %20290 = vmatmul.mubr.msk.f32.gmra.mrb[150].mxu0 %vm185_vm0, %v3439_v9  ;;  %v29319_v9 = vld [vmem:[%s33943_s0 + $0x1d4] sm:$0xff] }
 0x634   :  { %20292 = vmatprep.mubr.msk.f32.mxu0 %vm26259_vm1, %v26258_v2 }
 0x637   :  { %20293 = vmatmul.mubr.msk.f32.gmra.mrb[152].mxu0 %vm185_vm0, %v3440_v10  ;;  %v29328_v10 = vld [vmem:[%s33943_s0 + $0x1dc] sm:$0xff] }
 0x638   :  { %20295 = vmatprep.mubr.msk.f32.mxu0 %vm26259_vm1, %v26258_v2 }
 0x63b   :  { %20296 = vmatmul.mubr.msk.f32.gmra.mrb[154].mxu0 %vm185_vm0, %v3441_v11  ;;  %v29337_v11 = vld [vmem:[%s33943_s0 + $0x1e4] sm:$0xff] }
 0x63c   :  { %20298 = vmatprep.mubr.msk.f32.mxu0 %vm26259_vm1, %v26258_v2 }
 0x63f   :  { %20299 = vmatmul.mubr.msk.f32.gmra.mrb[156].mxu0 %vm185_vm0, %v3442_v12  ;;  %v29346_v12 = vld [vmem:[%s33943_s0 + $0x1ec] sm:$0xff] }
 0x640   :  { %20301 = vmatprep.mubr.msk.f32.mxu0 %vm26259_vm1, %v26258_v2 }
 0x643   :  { %20302 = vmatmul.mubr.msk.f32.gmra.mrb[158].mxu0 %vm185_vm0, %v3443_v13  ;;  %v29355_v13 = vld [vmem:[%s33943_s0 + $0x1f4] sm:$0xff] }
 0x644   :  { %20304 = vmatprep.mubr.msk.f32.mxu0 %vm26259_vm1, %v26258_v2 }
 0x647   :  { %20305 = vmatmul.mubr.msk.f32.gmra.mrb[160].mxu0 %vm185_vm0, %v3444_v14  ;;  %v29364_v14 = vld [vmem:[%s33943_s0 + $0x1fc] sm:$0xff] }
 0x648   :  { %20309 = vmatprep.mubr.msk.f32.mxu0 %vm26259_vm1, %v26258_v2 }
 0x64b   :  { %20310 = vmatmul.mubr.msk.f32.vlgmr.msra.gmra.mrb[0].mxu0 %vm185_vm0, %v4240_v15  ;;  %v29373_v15 = vld [vmem:[%s33943_s0 + $0x204] sm:$0xff] }
 0x64c   :  { %20312 = vmatprep.mubr.msk.f32.mxu0 %vm26259_vm1, %v26258_v2  ;;  %20553 = vmatpush3.msra.mxu0 %v5197_v35  ;;  %34048 = vst [vmem:[#allocation6_spill] sm:$0xff] %v29373_v15  ;;  %v29391_v35 = vld [vmem:[%s33943_s0 + $0x214] sm:$0xff] }
 0x64d   :  { %20797 = vmatprep.subr.mxu0 %v26258_v2  ;;  %34050 = vst [vmem:[#allocation8_spill] sm:$0xff] %v29391_v35 }
 0x64f   :  { %20313 = vmatmul.mubr.msk.f32.gmra.mrb[2].mxu0 %vm185_vm0, %v4241_v16  ;;  %v29382_v16 = vld [vmem:[%s33943_s0 + $0x20c] sm:$0xff] }
 0x650   :  { %20315 = vmatprep.mubr.msk.f32.mxu0 %vm26259_vm1, %v26258_v2  ;;  %34049 = vst [vmem:[#allocation7_spill] sm:$0xff] %v29382_v16 }
 0x653   :  { %20316 = vmatmul.mubr.msk.f32.gmra.mrb[4].mxu0 %vm185_vm0, %v28829_v17 }
 0x654   :  { %20318 = vmatprep.mubr.msk.f32.mxu0 %vm26259_vm1, %v26258_v2 }
 0x657   :  { %20319 = vmatmul.mubr.msk.f32.gmra.mrb[6].mxu0 %vm185_vm0, %v28838_v18 }
 0x658   :  { %20321 = vmatprep.mubr.msk.f32.mxu0 %vm26259_vm1, %v26258_v2 }
 0x65b   :  { %20322 = vmatmul.mubr.msk.f32.gmra.mrb[8].mxu0 %vm185_vm0, %v28847_v19 }
 0x65c   :  { %20324 = vmatprep.mubr.msk.f32.mxu0 %vm26259_vm1, %v26258_v2 }
 0x65f   :  { %20325 = vmatmul.mubr.msk.f32.gmra.mrb[10].mxu0 %vm185_vm0, %v28856_v20 }
 0x660   :  { %20327 = vmatprep.mubr.msk.f32.mxu0 %vm26259_vm1, %v26258_v2 }
 0x663   :  { %20328 = vmatmul.mubr.msk.f32.gmra.mrb[12].mxu0 %vm185_vm0, %v28865_v21 }
 0x664   :  { %20330 = vmatprep.mubr.msk.f32.mxu0 %vm26259_vm1, %v26258_v2 }
 0x667   :  { %20331 = vmatmul.mubr.msk.f32.gmra.mrb[14].mxu0 %vm185_vm0, %v28874_v22 }
 0x668   :  { %20333 = vmatprep.mubr.msk.f32.mxu0 %vm26259_vm1, %v26258_v2 }
 0x66b   :  { %20334 = vmatmul.mubr.msk.f32.gmra.mrb[16].mxu0 %vm185_vm0, %v28883_v23 }
 0x66c   :  { %20336 = vmatprep.mubr.msk.f32.mxu0 %vm26259_vm1, %v26258_v2 }
 0x66f   :  { %20337 = vmatmul.mubr.msk.f32.gmra.mrb[18].mxu0 %vm185_vm0, %v28892_v24 }
 0x670   :  { %20339 = vmatprep.mubr.msk.f32.mxu0 %vm26259_vm1, %v26258_v2 }
 0x673   :  { %20340 = vmatmul.mubr.msk.f32.gmra.mrb[20].mxu0 %vm185_vm0, %v28901_v25 }
 0x674   :  { %20342 = vmatprep.mubr.msk.f32.mxu0 %vm26259_vm1, %v26258_v2 }
 0x677   :  { %20343 = vmatmul.mubr.msk.f32.gmra.mrb[22].mxu0 %vm185_vm0, %v28910_v26 }
 0x678   :  { %20345 = vmatprep.mubr.msk.f32.mxu0 %vm26259_vm1, %v26258_v2 }
 0x67b   :  { %20346 = vmatmul.mubr.msk.f32.gmra.mrb[24].mxu0 %vm185_vm0, %v28919_v27 }
 0x67c   :  { %20348 = vmatprep.mubr.msk.f32.mxu0 %vm26259_vm1, %v26258_v2 }
 0x67f   :  { %20349 = vmatmul.mubr.msk.f32.gmra.mrb[26].mxu0 %vm185_vm0, %v28928_v28 }
 0x680   :  { %20351 = vmatprep.mubr.msk.f32.mxu0 %vm26259_vm1, %v26258_v2 }
 0x683   :  { %20352 = vmatmul.mubr.msk.f32.gmra.mrb[28].mxu0 %vm185_vm0, %v28937_v29 }
 0x684   :  { %20354 = vmatprep.mubr.msk.f32.mxu0 %vm26259_vm1, %v26258_v2 }
 0x687   :  { %20355 = vmatmul.mubr.msk.f32.gmra.mrb[30].mxu0 %vm185_vm0, %v28946_v30 }
 0x688   :  { %20357 = vmatprep.mubr.msk.f32.mxu0 %vm26259_vm1, %v26258_v2 }
 0x68b   :  { %20358 = vmatmul.mubr.msk.f32.gmra.mrb[32].mxu0 %vm185_vm0, %v28955_v31 }
 0x68c   :  { %20360 = vmatprep.mubr.msk.f32.mxu0 %vm26259_vm1, %v26258_v2 }
 0x68f   :  { %20361 = vmatmul.mubr.msk.f32.gmra.mrb[34].mxu0 %vm185_vm0, %v28964_v32 }
 0x690   :  { %20363 = vmatprep.mubr.msk.f32.mxu0 %vm26259_vm1, %v26258_v2 }
 0x693   :  { %20364 = vmatmul.mubr.msk.f32.gmra.mrb[36].mxu0 %vm185_vm0, %v28973_v33 }
 0x694   :  { %20366 = vmatprep.mubr.msk.f32.mxu0 %vm26259_vm1, %v26258_v2 }
 0x697   :  { %20367 = vmatmul.mubr.msk.f32.gmra.mrb[38].mxu0 %vm185_vm0, %v28982_v34 }
 0x698   :  { %20369 = vmatprep.mubr.msk.f32.mxu0 %vm26259_vm1, %v26258_v2 }
 0x69b   :  { %20370 = vmatmul.mubr.msk.f32.gmra.mrb[40].mxu0 %vm185_vm0, %v28994_v36 }
 0x69c   :  { %20372 = vmatprep.mubr.msk.f32.mxu0 %vm26259_vm1, %v26258_v2 }
 0x69f   :  { %20373 = vmatmul.mubr.msk.f32.gmra.mrb[42].mxu0 %vm185_vm0, %v29004_v37 }
 0x6a0   :  { %20375 = vmatprep.mubr.msk.f32.mxu0 %vm26259_vm1, %v26258_v2 }
 0x6a3   :  { %20376 = vmatmul.mubr.msk.f32.gmra.mrb[44].mxu0 %vm185_vm0, %v29013_v38 }
 0x6a4   :  { %20378 = vmatprep.mubr.msk.f32.mxu0 %vm26259_vm1, %v26258_v2 }
 0x6a7   :  { %20379 = vmatmul.mubr.msk.f32.gmra.mrb[46].mxu0 %vm185_vm0, %v29022_v57 }
 0x6a8   :  { %20381 = vmatprep.mubr.msk.f32.mxu0 %vm26259_vm1, %v26258_v2 }
 0x6ab   :  { %20382 = vmatmul.mubr.msk.f32.gmra.mrb[48].mxu0 %vm185_vm0, %v29031_v39 }
 0x6ac   :  { %20384 = vmatprep.mubr.msk.f32.mxu0 %vm26259_vm1, %v26258_v2 }
 0x6af   :  { %20385 = vmatmul.mubr.msk.f32.gmra.mrb[50].mxu0 %vm185_vm0, %v29040_v40 }
 0x6b0   :  { %20387 = vmatprep.mubr.msk.f32.mxu0 %vm26259_vm1, %v26258_v2 }
 0x6b3   :  { %20388 = vmatmul.mubr.msk.f32.gmra.mrb[52].mxu0 %vm185_vm0, %v29049_v41 }
 0x6b4   :  { %20390 = vmatprep.mubr.msk.f32.mxu0 %vm26259_vm1, %v26258_v2 }
 0x6b7   :  { %20391 = vmatmul.mubr.msk.f32.gmra.mrb[54].mxu0 %vm185_vm0, %v29058_v42 }
 0x6b8   :  { %20393 = vmatprep.mubr.msk.f32.mxu0 %vm26259_vm1, %v26258_v2 }
 0x6bb   :  { %20394 = vmatmul.mubr.msk.f32.gmra.mrb[56].mxu0 %vm185_vm0, %v29067_v43 }
 0x6bc   :  { %20396 = vmatprep.mubr.msk.f32.mxu0 %vm26259_vm1, %v26258_v2 }
 0x6bf   :  { %20397 = vmatmul.mubr.msk.f32.gmra.mrb[58].mxu0 %vm185_vm0, %v29076_v44 }
 0x6c0   :  { %20399 = vmatprep.mubr.msk.f32.mxu0 %vm26259_vm1, %v26258_v2 }
 0x6c3   :  { %20400 = vmatmul.mubr.msk.f32.gmra.mrb[60].mxu0 %vm185_vm0, %v29085_v45 }
 0x6c4   :  { %20402 = vmatprep.mubr.msk.f32.mxu0 %vm26259_vm1, %v26258_v2 }
 0x6c7   :  { %20403 = vmatmul.mubr.msk.f32.gmra.mrb[62].mxu0 %vm185_vm0, %v29094_v46 }
 0x6c8   :  { %20405 = vmatprep.mubr.msk.f32.mxu0 %vm26259_vm1, %v26258_v2 }
 0x6cb   :  { %20406 = vmatmul.mubr.msk.f32.gmra.mrb[64].mxu0 %vm185_vm0, %v29103_v47 }
 0x6cc   :  { %20408 = vmatprep.mubr.msk.f32.mxu0 %vm26259_vm1, %v26258_v2 }
 0x6cf   :  { %20409 = vmatmul.mubr.msk.f32.gmra.mrb[66].mxu0 %vm185_vm0, %v29112_v48 }
 0x6d0   :  { %20411 = vmatprep.mubr.msk.f32.mxu0 %vm26259_vm1, %v26258_v2 }
 0x6d3   :  { %20412 = vmatmul.mubr.msk.f32.gmra.mrb[68].mxu0 %vm185_vm0, %v29121_v49 }
 0x6d4   :  { %20414 = vmatprep.mubr.msk.f32.mxu0 %vm26259_vm1, %v26258_v2 }
 0x6d7   :  { %20415 = vmatmul.mubr.msk.f32.gmra.mrb[70].mxu0 %vm185_vm0, %v29130_v50 }
 0x6d8   :  { %20417 = vmatprep.mubr.msk.f32.mxu0 %vm26259_vm1, %v26258_v2 }
 0x6db   :  { %20418 = vmatmul.mubr.msk.f32.gmra.mrb[72].mxu0 %vm185_vm0, %v29139_v51 }
 0x6dc   :  { %20420 = vmatprep.mubr.msk.f32.mxu0 %vm26259_vm1, %v26258_v2 }
 0x6df   :  { %20421 = vmatmul.mubr.msk.f32.gmra.mrb[74].mxu0 %vm185_vm0, %v29148_v52 }
 0x6e0   :  { %20423 = vmatprep.mubr.msk.f32.mxu0 %vm26259_vm1, %v26258_v2 }
 0x6e3   :  { %20424 = vmatmul.mubr.msk.f32.gmra.mrb[76].mxu0 %vm185_vm0, %v29157_v53 }
 0x6e4   :  { %20426 = vmatprep.mubr.msk.f32.mxu0 %vm26259_vm1, %v26258_v2 }
 0x6e7   :  { %20427 = vmatmul.mubr.msk.f32.gmra.mrb[78].mxu0 %vm185_vm0, %v29166_v54 }
 0x6e8   :  { %20429 = vmatprep.mubr.msk.f32.mxu0 %vm26259_vm1, %v26258_v2 }
 0x6eb   :  { %20430 = vmatmul.mubr.msk.f32.gmra.mrb[80].mxu0 %vm185_vm0, %v29175_v55 }
 0x6ec   :  { %20432 = vmatprep.mubr.msk.f32.mxu0 %vm26259_vm1, %v26258_v2 }
 0x6ef   :  { %20433 = vmatmul.mubr.msk.f32.gmra.mrb[82].mxu0 %vm185_vm0, %v29184_v56 }
 0x6f0   :  { %20435 = vmatprep.mubr.msk.f32.mxu0 %vm26259_vm1, %v26258_v2 }
 0x6f3   :  { %20436 = vmatmul.mubr.msk.f32.gmra.mrb[84].mxu0 %vm185_vm0, %v29193_v58 }
 0x6f4   :  { %20438 = vmatprep.mubr.msk.f32.mxu0 %vm26259_vm1, %v26258_v2 }
 0x6f7   :  { %20439 = vmatmul.mubr.msk.f32.gmra.mrb[86].mxu0 %vm185_vm0, %v29202_v59 }
 0x6f8   :  { %20441 = vmatprep.mubr.msk.f32.mxu0 %vm26259_vm1, %v26258_v2 }
 0x6fb   :  { %20442 = vmatmul.mubr.msk.f32.gmra.mrb[88].mxu0 %vm185_vm0, %v29211_v60 }
 0x6fc   :  { %20444 = vmatprep.mubr.msk.f32.mxu0 %vm26259_vm1, %v26258_v2 }
 0x6ff   :  { %20445 = vmatmul.mubr.msk.f32.gmra.mrb[90].mxu0 %vm185_vm0, %v29220_v61 }
 0x700   :  { %20447 = vmatprep.mubr.msk.f32.mxu0 %vm26259_vm1, %v26258_v2 }
 0x703   :  { %20448 = vmatmul.mubr.msk.f32.gmra.mrb[92].mxu0 %vm185_vm0, %v29229_v62 }
 0x704   :  { %20450 = vmatprep.mubr.msk.f32.mxu0 %vm26259_vm1, %v26258_v2 }
 0x707   :  { %20451 = vmatmul.mubr.msk.f32.gmra.mrb[94].mxu0 %vm185_vm0, %v29238_v63 }
 0x708   :  { %20453 = vmatprep.mubr.msk.f32.mxu0 %vm26259_vm1, %v26258_v2 }
 0x70b   :  { %20454 = vmatmul.mubr.msk.f32.gmra.mrb[96].mxu0 %vm185_vm0, %v29247_v0 }
 0x70c   :  { %20456 = vmatprep.mubr.msk.f32.mxu0 %vm26259_vm1, %v26258_v2 }
 0x70f   :  { %20457 = vmatmul.mubr.msk.f32.gmra.mrb[98].mxu0 %vm185_vm0, %v29256_v1 }
 0x710   :  { %20459 = vmatprep.mubr.msk.f32.mxu0 %vm26259_vm1, %v26258_v2 }
 0x713   :  { %20460 = vmatmul.mubr.msk.f32.gmra.mrb[100].mxu0 %vm185_vm0, %v29265_v3 }
 0x714   :  { %20462 = vmatprep.mubr.msk.f32.mxu0 %vm26259_vm1, %v26258_v2 }
 0x717   :  { %20463 = vmatmul.mubr.msk.f32.gmra.mrb[102].mxu0 %vm185_vm0, %v29274_v4 }
 0x718   :  { %20465 = vmatprep.mubr.msk.f32.mxu0 %vm26259_vm1, %v26258_v2 }
 0x71b   :  { %20466 = vmatmul.mubr.msk.f32.gmra.mrb[104].mxu0 %vm185_vm0, %v29283_v5 }
 0x71c   :  { %20468 = vmatprep.mubr.msk.f32.mxu0 %vm26259_vm1, %v26258_v2 }
 0x71f   :  { %20469 = vmatmul.mubr.msk.f32.gmra.mrb[106].mxu0 %vm185_vm0, %v29292_v6 }
 0x720   :  { %20471 = vmatprep.mubr.msk.f32.mxu0 %vm26259_vm1, %v26258_v2 }
 0x723   :  { %20472 = vmatmul.mubr.msk.f32.gmra.mrb[108].mxu0 %vm185_vm0, %v29301_v7 }
 0x724   :  { %20474 = vmatprep.mubr.msk.f32.mxu0 %vm26259_vm1, %v26258_v2 }
 0x727   :  { %20475 = vmatmul.mubr.msk.f32.gmra.mrb[110].mxu0 %vm185_vm0, %v29310_v8 }
 0x728   :  { %20477 = vmatprep.mubr.msk.f32.mxu0 %vm26259_vm1, %v26258_v2 }
 0x72b   :  { %20478 = vmatmul.mubr.msk.f32.gmra.mrb[112].mxu0 %vm185_vm0, %v29319_v9 }
 0x72c   :  { %20480 = vmatprep.mubr.msk.f32.mxu0 %vm26259_vm1, %v26258_v2 }
 0x72f   :  { %20481 = vmatmul.mubr.msk.f32.gmra.mrb[114].mxu0 %vm185_vm0, %v29328_v10 }
 0x730   :  { %20483 = vmatprep.mubr.msk.f32.mxu0 %vm26259_vm1, %v26258_v2 }
 0x733   :  { %20484 = vmatmul.mubr.msk.f32.gmra.mrb[116].mxu0 %vm185_vm0, %v29337_v11 }
 0x734   :  { %20486 = vmatprep.mubr.msk.f32.mxu0 %vm26259_vm1, %v26258_v2 }
 0x737   :  { %20487 = vmatmul.mubr.msk.f32.gmra.mrb[118].mxu0 %vm185_vm0, %v29346_v12 }
 0x738   :  { %20489 = vmatprep.mubr.msk.f32.mxu0 %vm26259_vm1, %v26258_v2 }
 0x73b   :  { %20490 = vmatmul.mubr.msk.f32.gmra.mrb[120].mxu0 %vm185_vm0, %v29355_v13 }
 0x73c   :  { %20492 = vmatprep.mubr.msk.f32.mxu0 %vm26259_vm1, %v26258_v2 }
 0x73f   :  { %20493 = vmatmul.mubr.msk.f32.gmra.mrb[122].mxu0 %vm185_vm0, %v29364_v14 }
 0x740   :  { %20495 = vmatprep.mubr.msk.f32.mxu0 %vm26259_vm1, %v26258_v2 }
 0x743   :  { %20496 = vmatmul.mubr.msk.f32.gmra.mrb[124].mxu0 %vm185_vm0, %v29373_v15  ;;  %v29400_v15 = vld [vmem:[%s33943_s0 + $0x21c] sm:$0xff] }
 0x744   :  { %20498 = vmatprep.mubr.msk.f32.mxu0 %vm26259_vm1, %v26258_v2  ;;  %34051 = vst [vmem:[#allocation9_spill] sm:$0xff] %v29400_v15 }
 0x747   :  { %20499 = vmatmul.mubr.msk.f32.gmra.mrb[126].mxu0 %vm185_vm0, %v29382_v16  ;;  %v29409_v16 = vld [vmem:[%s33943_s0 + $0x224] sm:$0xff] }
 0x748   :  { %20501 = vmatprep.mubr.msk.f32.mxu0 %vm26259_vm1, %v26258_v2  ;;  %34052 = vst [vmem:[#allocation10_spill] sm:$0xff] %v29409_v16 }
 0x74b   :  { %20502 = vmatmul.mubr.msk.f32.gmra.mrb[128].mxu0 %vm185_vm0, %v29391_v35  ;;  %v29418_v35 = vld [vmem:[%s33943_s0 + $0x22c] sm:$0xff] }
 0x74c   :  { %20504 = vmatprep.mubr.msk.f32.mxu0 %vm26259_vm1, %v26258_v2  ;;  %34053 = vst [vmem:[#allocation11_spill] sm:$0xff] %v29418_v35 }
 0x74f   :  { %20505 = vmatmul.mubr.msk.f32.gmra.mrb[130].mxu0 %vm185_vm0, %v29400_v15  ;;  %v29427_v15 = vld [vmem:[%s33943_s0 + $0x234] sm:$0xff] }
 0x750   :  { %20507 = vmatprep.mubr.msk.f32.mxu0 %vm26259_vm1, %v26258_v2  ;;  %34054 = vst [vmem:[#allocation12_spill] sm:$0xff] %v29427_v15 }
 0x753   :  { %20508 = vmatmul.mubr.msk.f32.gmra.mrb[132].mxu0 %vm185_vm0, %v29409_v16  ;;  %v29436_v16 = vld [vmem:[%s33943_s0 + $0x23c] sm:$0xff] }
 0x754   :  { %20510 = vmatprep.mubr.msk.f32.mxu0 %vm26259_vm1, %v26258_v2  ;;  %34055 = vst [vmem:[#allocation13_spill] sm:$0xff] %v29436_v16 }
 0x757   :  { %20511 = vmatmul.mubr.msk.f32.gmra.mrb[134].mxu0 %vm185_vm0, %v29418_v35  ;;  %v29445_v35 = vld [vmem:[%s33943_s0 + $0x244] sm:$0xff] }
 0x758   :  { %20513 = vmatprep.mubr.msk.f32.mxu0 %vm26259_vm1, %v26258_v2  ;;  %34056 = vst [vmem:[#allocation14_spill] sm:$0xff] %v29445_v35 }
 0x75b   :  { %20514 = vmatmul.mubr.msk.f32.gmra.mrb[136].mxu0 %vm185_vm0, %v29427_v15  ;;  %v29454_v15 = vld [vmem:[%s33943_s0 + $0x24c] sm:$0xff] }
 0x75c   :  { %20516 = vmatprep.mubr.msk.f32.mxu0 %vm26259_vm1, %v26258_v2  ;;  %34057 = vst [vmem:[#allocation15_spill] sm:$0xff] %v29454_v15 }
 0x75f   :  { %20517 = vmatmul.mubr.msk.f32.gmra.mrb[138].mxu0 %vm185_vm0, %v29436_v16  ;;  %v29463_v16 = vld [vmem:[%s33943_s0 + $0x254] sm:$0xff] }
 0x760   :  { %20519 = vmatprep.mubr.msk.f32.mxu0 %vm26259_vm1, %v26258_v2  ;;  %34058 = vst [vmem:[#allocation16_spill] sm:$0xff] %v29463_v16 }
 0x763   :  { %20520 = vmatmul.mubr.msk.f32.gmra.mrb[140].mxu0 %vm185_vm0, %v29445_v35  ;;  %v29472_v35 = vld [vmem:[%s33943_s0 + $0x25c] sm:$0xff] }
 0x764   :  { %20522 = vmatprep.mubr.msk.f32.mxu0 %vm26259_vm1, %v26258_v2  ;;  %34059 = vst [vmem:[#allocation17_spill] sm:$0xff] %v29472_v35 }
 0x767   :  { %20523 = vmatmul.mubr.msk.f32.gmra.mrb[142].mxu0 %vm185_vm0, %v29454_v15  ;;  %v29481_v15 = vld [vmem:[%s33943_s0 + $0x264] sm:$0xff] }
 0x768   :  { %20525 = vmatprep.mubr.msk.f32.mxu0 %vm26259_vm1, %v26258_v2  ;;  %34060 = vst [vmem:[#allocation18_spill] sm:$0xff] %v29481_v15 }
 0x76b   :  { %20526 = vmatmul.mubr.msk.f32.gmra.mrb[144].mxu0 %vm185_vm0, %v29463_v16  ;;  %v29490_v16 = vld [vmem:[%s33943_s0 + $0x26c] sm:$0xff] }
 0x76c   :  { %20528 = vmatprep.mubr.msk.f32.mxu0 %vm26259_vm1, %v26258_v2  ;;  %34061 = vst [vmem:[#allocation19_spill] sm:$0xff] %v29490_v16 }
 0x76f   :  { %20529 = vmatmul.mubr.msk.f32.gmra.mrb[146].mxu0 %vm185_vm0, %v29472_v35  ;;  %v29499_v35 = vld [vmem:[%s33943_s0 + $0x274] sm:$0xff] }
 0x770   :  { %20531 = vmatprep.mubr.msk.f32.mxu0 %vm26259_vm1, %v26258_v2  ;;  %34062 = vst [vmem:[#allocation20_spill] sm:$0xff] %v29499_v35 }
 0x773   :  { %20532 = vmatmul.mubr.msk.f32.gmra.mrb[148].mxu0 %vm185_vm0, %v29481_v15  ;;  %v29508_v15 = vld [vmem:[%s33943_s0 + $0x27c] sm:$0xff] }
 0x774   :  { %20534 = vmatprep.mubr.msk.f32.mxu0 %vm26259_vm1, %v26258_v2  ;;  %34063 = vst [vmem:[#allocation21_spill] sm:$0xff] %v29508_v15 }
 0x777   :  { %20535 = vmatmul.mubr.msk.f32.gmra.mrb[150].mxu0 %vm185_vm0, %v29490_v16  ;;  %v29517_v16 = vld [vmem:[%s33943_s0 + $0x284] sm:$0xff] }
 0x778   :  { %20537 = vmatprep.mubr.msk.f32.mxu0 %vm26259_vm1, %v26258_v2 }
 0x77b   :  { %20538 = vmatmul.mubr.msk.f32.gmra.mrb[152].mxu0 %vm185_vm0, %v29499_v35  ;;  %v29526_v35 = vld [vmem:[%s33943_s0 + $0x28c] sm:$0xff] }
 0x77c   :  { %20540 = vmatprep.mubr.msk.f32.mxu0 %vm26259_vm1, %v26258_v2 }
 0x77f   :  { %20541 = vmatmul.mubr.msk.f32.gmra.mrb[154].mxu0 %vm185_vm0, %v29508_v15  ;;  %v29535_v15 = vld [vmem:[%s33943_s0 + $0x294] sm:$0xff] }
 0x780   :  { %20543 = vmatprep.mubr.msk.f32.mxu0 %vm26259_vm1, %v26258_v2 }
 0x783   :  { %20544 = vmatmul.mubr.msk.f32.gmra.mrb[156].mxu0 %vm185_vm0, %v29517_v16 }
 0x784   :  { %20546 = vmatprep.mubr.msk.f32.mxu0 %vm26259_vm1, %v26258_v2 }
 0x787   :  { %20547 = vmatmul.mubr.msk.f32.gmra.mrb[158].mxu0 %vm185_vm0, %v29526_v35 }
 0x788   :  { %20549 = vmatprep.mubr.msk.f32.mxu0 %vm26259_vm1, %v26258_v2 }
 0x78b   :  { %20550 = vmatmul.mubr.msk.f32.gmra.mrb[160].mxu0 %vm185_vm0, %v29535_v15 }
 0x78c   :  { %20554 = vmatprep.mubr.msk.f32.mxu0 %vm26259_vm1, %v26258_v2 }
 0x78f   :  { %20555 = vmatmul.mubr.msk.f32.vlgmr.msra.gmra.mrb[0].mxu0 %vm185_vm0, %v28829_v17  ;;  %v6073_v17 = vld [vmem:[%s33944_s1 + $0x38] sm:$0xff] }
 0x790   :  { %20557 = vmatprep.mubr.msk.f32.mxu0 %vm26259_vm1, %v26258_v2  ;;  %20798 = vmatpush3.msra.mxu0 %v6073_v17  ;;  %v6035_v17 = vld [vmem:[%s33943_s0 + $0x17d] sm:$0xff] }
 0x791   :  { %21042 = vmatprep.subr.mxu0 %v26258_v2 }
 0x793   :  { %20558 = vmatmul.mubr.msk.f32.gmra.mrb[2].mxu0 %vm185_vm0, %v28838_v18  ;;  %v34064_v18 = vld [vmem:[#allocation6_spill] sm:$0xff] }
 0x794   :  { %20560 = vmatprep.mubr.msk.f32.mxu0 %vm26259_vm1, %v26258_v2 }
 0x797   :  { %20561 = vmatmul.mubr.msk.f32.gmra.mrb[4].mxu0 %vm185_vm0, %v28847_v19  ;;  %v34065_v19 = vld [vmem:[#allocation7_spill] sm:$0xff] }
 0x798   :  { %20563 = vmatprep.mubr.msk.f32.mxu0 %vm26259_vm1, %v26258_v2 }
 0x79b   :  { %20564 = vmatmul.mubr.msk.f32.gmra.mrb[6].mxu0 %vm185_vm0, %v28856_v20  ;;  %v34066_v20 = vld [vmem:[#allocation8_spill] sm:$0xff] }
 0x79c   :  { %20566 = vmatprep.mubr.msk.f32.mxu0 %vm26259_vm1, %v26258_v2 }
 0x79f   :  { %20567 = vmatmul.mubr.msk.f32.gmra.mrb[8].mxu0 %vm185_vm0, %v28865_v21  ;;  %v34067_v21 = vld [vmem:[#allocation9_spill] sm:$0xff] }
 0x7a0   :  { %20569 = vmatprep.mubr.msk.f32.mxu0 %vm26259_vm1, %v26258_v2 }
 0x7a3   :  { %20570 = vmatmul.mubr.msk.f32.gmra.mrb[10].mxu0 %vm185_vm0, %v28874_v22  ;;  %v34068_v22 = vld [vmem:[#allocation10_spill] sm:$0xff] }
 0x7a4   :  { %20572 = vmatprep.mubr.msk.f32.mxu0 %vm26259_vm1, %v26258_v2 }
 0x7a7   :  { %20573 = vmatmul.mubr.msk.f32.gmra.mrb[12].mxu0 %vm185_vm0, %v28883_v23  ;;  %v34069_v23 = vld [vmem:[#allocation11_spill] sm:$0xff] }
 0x7a8   :  { %20575 = vmatprep.mubr.msk.f32.mxu0 %vm26259_vm1, %v26258_v2 }
 0x7ab   :  { %20576 = vmatmul.mubr.msk.f32.gmra.mrb[14].mxu0 %vm185_vm0, %v28892_v24  ;;  %v34070_v24 = vld [vmem:[#allocation12_spill] sm:$0xff] }
 0x7ac   :  { %20578 = vmatprep.mubr.msk.f32.mxu0 %vm26259_vm1, %v26258_v2 }
 0x7af   :  { %20579 = vmatmul.mubr.msk.f32.gmra.mrb[16].mxu0 %vm185_vm0, %v28901_v25  ;;  %v34071_v25 = vld [vmem:[#allocation13_spill] sm:$0xff] }
 0x7b0   :  { %20581 = vmatprep.mubr.msk.f32.mxu0 %vm26259_vm1, %v26258_v2 }
 0x7b3   :  { %20582 = vmatmul.mubr.msk.f32.gmra.mrb[18].mxu0 %vm185_vm0, %v28910_v26  ;;  %v34072_v26 = vld [vmem:[#allocation14_spill] sm:$0xff] }
 0x7b4   :  { %20584 = vmatprep.mubr.msk.f32.mxu0 %vm26259_vm1, %v26258_v2 }
 0x7b7   :  { %20585 = vmatmul.mubr.msk.f32.gmra.mrb[20].mxu0 %vm185_vm0, %v28919_v27  ;;  %v34073_v27 = vld [vmem:[#allocation15_spill] sm:$0xff] }
 0x7b8   :  { %20587 = vmatprep.mubr.msk.f32.mxu0 %vm26259_vm1, %v26258_v2 }
 0x7bb   :  { %20588 = vmatmul.mubr.msk.f32.gmra.mrb[22].mxu0 %vm185_vm0, %v28928_v28  ;;  %v34074_v28 = vld [vmem:[#allocation16_spill] sm:$0xff] }
 0x7bc   :  { %20590 = vmatprep.mubr.msk.f32.mxu0 %vm26259_vm1, %v26258_v2 }
 0x7bf   :  { %20591 = vmatmul.mubr.msk.f32.gmra.mrb[24].mxu0 %vm185_vm0, %v28937_v29  ;;  %v34075_v29 = vld [vmem:[#allocation17_spill] sm:$0xff] }
 0x7c0   :  { %20593 = vmatprep.mubr.msk.f32.mxu0 %vm26259_vm1, %v26258_v2 }
 0x7c3   :  { %20594 = vmatmul.mubr.msk.f32.gmra.mrb[26].mxu0 %vm185_vm0, %v28946_v30  ;;  %v34076_v30 = vld [vmem:[#allocation18_spill] sm:$0xff] }
 0x7c4   :  { %20596 = vmatprep.mubr.msk.f32.mxu0 %vm26259_vm1, %v26258_v2 }
 0x7c7   :  { %20597 = vmatmul.mubr.msk.f32.gmra.mrb[28].mxu0 %vm185_vm0, %v28955_v31  ;;  %v34077_v31 = vld [vmem:[#allocation19_spill] sm:$0xff] }
 0x7c8   :  { %20599 = vmatprep.mubr.msk.f32.mxu0 %vm26259_vm1, %v26258_v2 }
 0x7cb   :  { %20600 = vmatmul.mubr.msk.f32.gmra.mrb[30].mxu0 %vm185_vm0, %v28964_v32  ;;  %v34078_v32 = vld [vmem:[#allocation20_spill] sm:$0xff] }
 0x7cc   :  { %20602 = vmatprep.mubr.msk.f32.mxu0 %vm26259_vm1, %v26258_v2 }
 0x7cf   :  { %20603 = vmatmul.mubr.msk.f32.gmra.mrb[32].mxu0 %vm185_vm0, %v28973_v33  ;;  %v34079_v33 = vld [vmem:[#allocation21_spill] sm:$0xff] }
 0x7d0   :  { %20605 = vmatprep.mubr.msk.f32.mxu0 %vm26259_vm1, %v26258_v2 }
 0x7d3   :  { %20606 = vmatmul.mubr.msk.f32.gmra.mrb[34].mxu0 %vm185_vm0, %v28982_v34  ;;  %v5195_v34 = vld [vmem:[%s33943_s0 + $0x29c] sm:$0xff] }
 0x7d4   :  { %20608 = vmatprep.mubr.msk.f32.mxu0 %vm26259_vm1, %v26258_v2 }
 0x7d7   :  { %20609 = vmatmul.mubr.msk.f32.gmra.mrb[36].mxu0 %vm185_vm0, %v28994_v36  ;;  %v5196_v36 = vld [vmem:[%s33943_s0 + $0x2a4] sm:$0xff] }
 0x7d8   :  { %20611 = vmatprep.mubr.msk.f32.mxu0 %vm26259_vm1, %v26258_v2 }
 0x7db   :  { %20612 = vmatmul.mubr.msk.f32.gmra.mrb[38].mxu0 %vm185_vm0, %v29004_v37  ;;  %v5992_v37 = vld [vmem:[%s33943_s0 + $0x25] sm:$0xff] }
 0x7dc   :  { %20614 = vmatprep.mubr.msk.f32.mxu0 %vm26259_vm1, %v26258_v2 }
 0x7df   :  { %20615 = vmatmul.mubr.msk.f32.gmra.mrb[40].mxu0 %vm185_vm0, %v29013_v38  ;;  %v5993_v38 = vld [vmem:[%s33943_s0 + $0x2d] sm:$0xff] }
 0x7e0   :  { %20617 = vmatprep.mubr.msk.f32.mxu0 %vm26259_vm1, %v26258_v2 }
 0x7e3   :  { %20618 = vmatmul.mubr.msk.f32.gmra.mrb[42].mxu0 %vm185_vm0, %v29022_v57  ;;  %v5994_v57 = vld [vmem:[%s33943_s0 + $0x35] sm:$0xff] }
 0x7e4   :  { %20620 = vmatprep.mubr.msk.f32.mxu0 %vm26259_vm1, %v26258_v2 }
 0x7e7   :  { %20621 = vmatmul.mubr.msk.f32.gmra.mrb[44].mxu0 %vm185_vm0, %v29031_v39  ;;  %v5995_v39 = vld [vmem:[%s33943_s0 + $0x3d] sm:$0xff] }
 0x7e8   :  { %20623 = vmatprep.mubr.msk.f32.mxu0 %vm26259_vm1, %v26258_v2 }
 0x7eb   :  { %20624 = vmatmul.mubr.msk.f32.gmra.mrb[46].mxu0 %vm185_vm0, %v29040_v40  ;;  %v5996_v40 = vld [vmem:[%s33943_s0 + $0x45] sm:$0xff] }
 0x7ec   :  { %20626 = vmatprep.mubr.msk.f32.mxu0 %vm26259_vm1, %v26258_v2 }
 0x7ef   :  { %20627 = vmatmul.mubr.msk.f32.gmra.mrb[48].mxu0 %vm185_vm0, %v29049_v41  ;;  %v5997_v41 = vld [vmem:[%s33943_s0 + $0x4d] sm:$0xff] }
 0x7f0   :  { %20629 = vmatprep.mubr.msk.f32.mxu0 %vm26259_vm1, %v26258_v2 }
 0x7f3   :  { %20630 = vmatmul.mubr.msk.f32.gmra.mrb[50].mxu0 %vm185_vm0, %v29058_v42  ;;  %v5998_v42 = vld [vmem:[%s33943_s0 + $0x55] sm:$0xff] }
 0x7f4   :  { %20632 = vmatprep.mubr.msk.f32.mxu0 %vm26259_vm1, %v26258_v2 }
 0x7f7   :  { %20633 = vmatmul.mubr.msk.f32.gmra.mrb[52].mxu0 %vm185_vm0, %v29067_v43  ;;  %v5999_v43 = vld [vmem:[%s33943_s0 + $0x5d] sm:$0xff] }
 0x7f8   :  { %20635 = vmatprep.mubr.msk.f32.mxu0 %vm26259_vm1, %v26258_v2 }
 0x7fb   :  { %20636 = vmatmul.mubr.msk.f32.gmra.mrb[54].mxu0 %vm185_vm0, %v29076_v44  ;;  %v6000_v44 = vld [vmem:[%s33943_s0 + $0x65] sm:$0xff] }
 0x7fc   :  { %20638 = vmatprep.mubr.msk.f32.mxu0 %vm26259_vm1, %v26258_v2 }
 0x7ff   :  { %20639 = vmatmul.mubr.msk.f32.gmra.mrb[56].mxu0 %vm185_vm0, %v29085_v45  ;;  %v6001_v45 = vld [vmem:[%s33943_s0 + $0x6d] sm:$0xff] }
 0x800   :  { %20641 = vmatprep.mubr.msk.f32.mxu0 %vm26259_vm1, %v26258_v2 }
 0x803   :  { %20642 = vmatmul.mubr.msk.f32.gmra.mrb[58].mxu0 %vm185_vm0, %v29094_v46  ;;  %v6002_v46 = vld [vmem:[%s33943_s0 + $0x75] sm:$0xff] }
 0x804   :  { %20644 = vmatprep.mubr.msk.f32.mxu0 %vm26259_vm1, %v26258_v2 }
 0x807   :  { %20645 = vmatmul.mubr.msk.f32.gmra.mrb[60].mxu0 %vm185_vm0, %v29103_v47  ;;  %v6003_v47 = vld [vmem:[%s33943_s0 + $0x7d] sm:$0xff] }
 0x808   :  { %20647 = vmatprep.mubr.msk.f32.mxu0 %vm26259_vm1, %v26258_v2 }
 0x80b   :  { %20648 = vmatmul.mubr.msk.f32.gmra.mrb[62].mxu0 %vm185_vm0, %v29112_v48  ;;  %v6004_v48 = vld [vmem:[%s33943_s0 + $0x85] sm:$0xff] }
 0x80c   :  { %20650 = vmatprep.mubr.msk.f32.mxu0 %vm26259_vm1, %v26258_v2 }
 0x80f   :  { %20651 = vmatmul.mubr.msk.f32.gmra.mrb[64].mxu0 %vm185_vm0, %v29121_v49  ;;  %v6005_v49 = vld [vmem:[%s33943_s0 + $0x8d] sm:$0xff] }
 0x810   :  { %20653 = vmatprep.mubr.msk.f32.mxu0 %vm26259_vm1, %v26258_v2 }
 0x813   :  { %20654 = vmatmul.mubr.msk.f32.gmra.mrb[66].mxu0 %vm185_vm0, %v29130_v50  ;;  %v6006_v50 = vld [vmem:[%s33943_s0 + $0x95] sm:$0xff] }
 0x814   :  { %20656 = vmatprep.mubr.msk.f32.mxu0 %vm26259_vm1, %v26258_v2 }
 0x817   :  { %20657 = vmatmul.mubr.msk.f32.gmra.mrb[68].mxu0 %vm185_vm0, %v29139_v51  ;;  %v6007_v51 = vld [vmem:[%s33943_s0 + $0x9d] sm:$0xff] }
 0x818   :  { %20659 = vmatprep.mubr.msk.f32.mxu0 %vm26259_vm1, %v26258_v2 }
 0x81b   :  { %20660 = vmatmul.mubr.msk.f32.gmra.mrb[70].mxu0 %vm185_vm0, %v29148_v52  ;;  %v6008_v52 = vld [vmem:[%s33943_s0 + $0xa5] sm:$0xff] }
 0x81c   :  { %20662 = vmatprep.mubr.msk.f32.mxu0 %vm26259_vm1, %v26258_v2 }
 0x81f   :  { %20663 = vmatmul.mubr.msk.f32.gmra.mrb[72].mxu0 %vm185_vm0, %v29157_v53  ;;  %v6009_v53 = vld [vmem:[%s33943_s0 + $0xad] sm:$0xff] }
 0x820   :  { %20665 = vmatprep.mubr.msk.f32.mxu0 %vm26259_vm1, %v26258_v2 }
 0x823   :  { %20666 = vmatmul.mubr.msk.f32.gmra.mrb[74].mxu0 %vm185_vm0, %v29166_v54  ;;  %v6010_v54 = vld [vmem:[%s33943_s0 + $0xb5] sm:$0xff] }
 0x824   :  { %20668 = vmatprep.mubr.msk.f32.mxu0 %vm26259_vm1, %v26258_v2 }
 0x827   :  { %20669 = vmatmul.mubr.msk.f32.gmra.mrb[76].mxu0 %vm185_vm0, %v29175_v55  ;;  %v6011_v55 = vld [vmem:[%s33943_s0 + $0xbd] sm:$0xff] }
 0x828   :  { %20671 = vmatprep.mubr.msk.f32.mxu0 %vm26259_vm1, %v26258_v2 }
 0x82b   :  { %20672 = vmatmul.mubr.msk.f32.gmra.mrb[78].mxu0 %vm185_vm0, %v29184_v56  ;;  %v6949_v56 = vld [vmem:[%s33944_s1 + $0x40] sm:$0xff] }
 0x82c   :  { %20674 = vmatprep.mubr.msk.f32.mxu0 %vm26259_vm1, %v26258_v2 }
 0x82f   :  { %20675 = vmatmul.mubr.msk.f32.gmra.mrb[80].mxu0 %vm185_vm0, %v29193_v58  ;;  %v6012_v58 = vld [vmem:[%s33943_s0 + $0xc5] sm:$0xff] }
 0x830   :  { %20677 = vmatprep.mubr.msk.f32.mxu0 %vm26259_vm1, %v26258_v2 }
 0x833   :  { %20678 = vmatmul.mubr.msk.f32.gmra.mrb[82].mxu0 %vm185_vm0, %v29202_v59  ;;  %v6013_v59 = vld [vmem:[%s33943_s0 + $0xcd] sm:$0xff] }
 0x834   :  { %20680 = vmatprep.mubr.msk.f32.mxu0 %vm26259_vm1, %v26258_v2 }
 0x837   :  { %20681 = vmatmul.mubr.msk.f32.gmra.mrb[84].mxu0 %vm185_vm0, %v29211_v60  ;;  %v6014_v60 = vld [vmem:[%s33943_s0 + $0xd5] sm:$0xff] }
 0x838   :  { %20683 = vmatprep.mubr.msk.f32.mxu0 %vm26259_vm1, %v26258_v2 }
 0x83b   :  { %20684 = vmatmul.mubr.msk.f32.gmra.mrb[86].mxu0 %vm185_vm0, %v29220_v61  ;;  %v6015_v61 = vld [vmem:[%s33943_s0 + $0xdd] sm:$0xff] }
 0x83c   :  { %20686 = vmatprep.mubr.msk.f32.mxu0 %vm26259_vm1, %v26258_v2 }
 0x83f   :  { %20687 = vmatmul.mubr.msk.f32.gmra.mrb[88].mxu0 %vm185_vm0, %v29229_v62  ;;  %v6016_v62 = vld [vmem:[%s33943_s0 + $0xe5] sm:$0xff] }
 0x840   :  { %20689 = vmatprep.mubr.msk.f32.mxu0 %vm26259_vm1, %v26258_v2 }
 0x843   :  { %20690 = vmatmul.mubr.msk.f32.gmra.mrb[90].mxu0 %vm185_vm0, %v29238_v63  ;;  %v6017_v63 = vld [vmem:[%s33943_s0 + $0xed] sm:$0xff] }
 0x844   :  { %20692 = vmatprep.mubr.msk.f32.mxu0 %vm26259_vm1, %v26258_v2 }
 0x847   :  { %20693 = vmatmul.mubr.msk.f32.gmra.mrb[92].mxu0 %vm185_vm0, %v29247_v0  ;;  %v6018_v0 = vld [vmem:[%s33943_s0 + $0xf5] sm:$0xff] }
 0x848   :  { %20695 = vmatprep.mubr.msk.f32.mxu0 %vm26259_vm1, %v26258_v2 }
 0x84b   :  { %20696 = vmatmul.mubr.msk.f32.gmra.mrb[94].mxu0 %vm185_vm0, %v29256_v1  ;;  %v6019_v1 = vld [vmem:[%s33943_s0 + $0xfd] sm:$0xff] }
 0x84c   :  { %20698 = vmatprep.mubr.msk.f32.mxu0 %vm26259_vm1, %v26258_v2 }
 0x84f   :  { %20699 = vmatmul.mubr.msk.f32.gmra.mrb[96].mxu0 %vm185_vm0, %v29265_v3  ;;  %v6020_v3 = vld [vmem:[%s33943_s0 + $0x105] sm:$0xff] }
 0x850   :  { %20701 = vmatprep.mubr.msk.f32.mxu0 %vm26259_vm1, %v26258_v2 }
 0x853   :  { %20702 = vmatmul.mubr.msk.f32.gmra.mrb[98].mxu0 %vm185_vm0, %v29274_v4  ;;  %v6021_v4 = vld [vmem:[%s33943_s0 + $0x10d] sm:$0xff] }
 0x854   :  { %20704 = vmatprep.mubr.msk.f32.mxu0 %vm26259_vm1, %v26258_v2 }
 0x857   :  { %20705 = vmatmul.mubr.msk.f32.gmra.mrb[100].mxu0 %vm185_vm0, %v29283_v5  ;;  %v6022_v5 = vld [vmem:[%s33943_s0 + $0x115] sm:$0xff] }
 0x858   :  { %20707 = vmatprep.mubr.msk.f32.mxu0 %vm26259_vm1, %v26258_v2 }
 0x85b   :  { %20708 = vmatmul.mubr.msk.f32.gmra.mrb[102].mxu0 %vm185_vm0, %v29292_v6  ;;  %v6023_v6 = vld [vmem:[%s33943_s0 + $0x11d] sm:$0xff] }
 0x85c   :  { %20710 = vmatprep.mubr.msk.f32.mxu0 %vm26259_vm1, %v26258_v2 }
 0x85f   :  { %20711 = vmatmul.mubr.msk.f32.gmra.mrb[104].mxu0 %vm185_vm0, %v29301_v7  ;;  %v6024_v7 = vld [vmem:[%s33943_s0 + $0x125] sm:$0xff] }
 0x860   :  { %20713 = vmatprep.mubr.msk.f32.mxu0 %vm26259_vm1, %v26258_v2 }
 0x863   :  { %20714 = vmatmul.mubr.msk.f32.gmra.mrb[106].mxu0 %vm185_vm0, %v29310_v8  ;;  %v6025_v8 = vld [vmem:[%s33943_s0 + $0x12d] sm:$0xff] }
 0x864   :  { %20716 = vmatprep.mubr.msk.f32.mxu0 %vm26259_vm1, %v26258_v2 }
 0x867   :  { %20717 = vmatmul.mubr.msk.f32.gmra.mrb[108].mxu0 %vm185_vm0, %v29319_v9  ;;  %v6026_v9 = vld [vmem:[%s33943_s0 + $0x135] sm:$0xff] }
 0x868   :  { %20719 = vmatprep.mubr.msk.f32.mxu0 %vm26259_vm1, %v26258_v2 }
 0x86b   :  { %20720 = vmatmul.mubr.msk.f32.gmra.mrb[110].mxu0 %vm185_vm0, %v29328_v10  ;;  %v6027_v10 = vld [vmem:[%s33943_s0 + $0x13d] sm:$0xff] }
 0x86c   :  { %20722 = vmatprep.mubr.msk.f32.mxu0 %vm26259_vm1, %v26258_v2 }
 0x86f   :  { %20723 = vmatmul.mubr.msk.f32.gmra.mrb[112].mxu0 %vm185_vm0, %v29337_v11  ;;  %v6028_v11 = vld [vmem:[%s33943_s0 + $0x145] sm:$0xff] }
 0x870   :  { %20725 = vmatprep.mubr.msk.f32.mxu0 %vm26259_vm1, %v26258_v2 }
 0x873   :  { %20726 = vmatmul.mubr.msk.f32.gmra.mrb[114].mxu0 %vm185_vm0, %v29346_v12  ;;  %v6029_v12 = vld [vmem:[%s33943_s0 + $0x14d] sm:$0xff] }
 0x874   :  { %20728 = vmatprep.mubr.msk.f32.mxu0 %vm26259_vm1, %v26258_v2 }
 0x877   :  { %20729 = vmatmul.mubr.msk.f32.gmra.mrb[116].mxu0 %vm185_vm0, %v29355_v13  ;;  %v6030_v13 = vld [vmem:[%s33943_s0 + $0x155] sm:$0xff] }
 0x878   :  { %20731 = vmatprep.mubr.msk.f32.mxu0 %vm26259_vm1, %v26258_v2 }
 0x87b   :  { %20732 = vmatmul.mubr.msk.f32.gmra.mrb[118].mxu0 %vm185_vm0, %v29364_v14  ;;  %v6031_v14 = vld [vmem:[%s33943_s0 + $0x15d] sm:$0xff] }
 0x87c   :  { %20734 = vmatprep.mubr.msk.f32.mxu0 %vm26259_vm1, %v26258_v2 }
 0x87f   :  { %20735 = vmatmul.mubr.msk.f32.gmra.mrb[120].mxu0 %vm185_vm0, %v34064_v18  ;;  %v6036_v18 = vld [vmem:[%s33943_s0 + $0x185] sm:$0xff] }
 0x880   :  { %20737 = vmatprep.mubr.msk.f32.mxu0 %vm26259_vm1, %v26258_v2 }
 0x883   :  { %20738 = vmatmul.mubr.msk.f32.gmra.mrb[122].mxu0 %vm185_vm0, %v34065_v19  ;;  %v6037_v19 = vld [vmem:[%s33943_s0 + $0x18d] sm:$0xff] }
 0x884   :  { %20740 = vmatprep.mubr.msk.f32.mxu0 %vm26259_vm1, %v26258_v2 }
 0x887   :  { %20741 = vmatmul.mubr.msk.f32.gmra.mrb[124].mxu0 %vm185_vm0, %v34066_v20  ;;  %v6038_v20 = vld [vmem:[%s33943_s0 + $0x195] sm:$0xff] }
 0x888   :  { %20743 = vmatprep.mubr.msk.f32.mxu0 %vm26259_vm1, %v26258_v2 }
 0x88b   :  { %20744 = vmatmul.mubr.msk.f32.gmra.mrb[126].mxu0 %vm185_vm0, %v34067_v21  ;;  %v6039_v21 = vld [vmem:[%s33943_s0 + $0x19d] sm:$0xff] }
 0x88c   :  { %20746 = vmatprep.mubr.msk.f32.mxu0 %vm26259_vm1, %v26258_v2 }
 0x88f   :  { %20747 = vmatmul.mubr.msk.f32.gmra.mrb[128].mxu0 %vm185_vm0, %v34068_v22  ;;  %v6040_v22 = vld [vmem:[%s33943_s0 + $0x1a5] sm:$0xff] }
 0x890   :  { %20749 = vmatprep.mubr.msk.f32.mxu0 %vm26259_vm1, %v26258_v2 }
 0x893   :  { %20750 = vmatmul.mubr.msk.f32.gmra.mrb[130].mxu0 %vm185_vm0, %v34069_v23  ;;  %v6041_v23 = vld [vmem:[%s33943_s0 + $0x1ad] sm:$0xff] }
 0x894   :  { %20752 = vmatprep.mubr.msk.f32.mxu0 %vm26259_vm1, %v26258_v2 }
 0x897   :  { %20753 = vmatmul.mubr.msk.f32.gmra.mrb[132].mxu0 %vm185_vm0, %v34070_v24  ;;  %v6042_v24 = vld [vmem:[%s33943_s0 + $0x1b5] sm:$0xff] }
 0x898   :  { %20755 = vmatprep.mubr.msk.f32.mxu0 %vm26259_vm1, %v26258_v2 }
 0x89b   :  { %20756 = vmatmul.mubr.msk.f32.gmra.mrb[134].mxu0 %vm185_vm0, %v34071_v25  ;;  %v6043_v25 = vld [vmem:[%s33943_s0 + $0x1bd] sm:$0xff] }
 0x89c   :  { %20758 = vmatprep.mubr.msk.f32.mxu0 %vm26259_vm1, %v26258_v2 }
 0x89f   :  { %20759 = vmatmul.mubr.msk.f32.gmra.mrb[136].mxu0 %vm185_vm0, %v34072_v26  ;;  %v6044_v26 = vld [vmem:[%s33943_s0 + $0x1c5] sm:$0xff] }
 0x8a0   :  { %20761 = vmatprep.mubr.msk.f32.mxu0 %vm26259_vm1, %v26258_v2 }
 0x8a3   :  { %20762 = vmatmul.mubr.msk.f32.gmra.mrb[138].mxu0 %vm185_vm0, %v34073_v27  ;;  %v6045_v27 = vld [vmem:[%s33943_s0 + $0x1cd] sm:$0xff] }
 0x8a4   :  { %20764 = vmatprep.mubr.msk.f32.mxu0 %vm26259_vm1, %v26258_v2 }
 0x8a7   :  { %20765 = vmatmul.mubr.msk.f32.gmra.mrb[140].mxu0 %vm185_vm0, %v34074_v28  ;;  %v6046_v28 = vld [vmem:[%s33943_s0 + $0x1d5] sm:$0xff] }
 0x8a8   :  { %20767 = vmatprep.mubr.msk.f32.mxu0 %vm26259_vm1, %v26258_v2 }
 0x8ab   :  { %20768 = vmatmul.mubr.msk.f32.gmra.mrb[142].mxu0 %vm185_vm0, %v34075_v29  ;;  %v6047_v29 = vld [vmem:[%s33943_s0 + $0x1dd] sm:$0xff] }
 0x8ac   :  { %20770 = vmatprep.mubr.msk.f32.mxu0 %vm26259_vm1, %v26258_v2 }
 0x8af   :  { %20771 = vmatmul.mubr.msk.f32.gmra.mrb[144].mxu0 %vm185_vm0, %v34076_v30  ;;  %v6048_v30 = vld [vmem:[%s33943_s0 + $0x1e5] sm:$0xff] }
 0x8b0   :  { %20773 = vmatprep.mubr.msk.f32.mxu0 %vm26259_vm1, %v26258_v2 }
 0x8b3   :  { %20774 = vmatmul.mubr.msk.f32.gmra.mrb[146].mxu0 %vm185_vm0, %v34077_v31  ;;  %v6049_v31 = vld [vmem:[%s33943_s0 + $0x1ed] sm:$0xff] }
 0x8b4   :  { %20776 = vmatprep.mubr.msk.f32.mxu0 %vm26259_vm1, %v26258_v2 }
 0x8b7   :  { %20777 = vmatmul.mubr.msk.f32.gmra.mrb[148].mxu0 %vm185_vm0, %v34078_v32  ;;  %v6050_v32 = vld [vmem:[%s33943_s0 + $0x1f5] sm:$0xff] }
 0x8b8   :  { %20779 = vmatprep.mubr.msk.f32.mxu0 %vm26259_vm1, %v26258_v2 }
 0x8bb   :  { %20780 = vmatmul.mubr.msk.f32.gmra.mrb[150].mxu0 %vm185_vm0, %v34079_v33  ;;  %v6051_v33 = vld [vmem:[%s33943_s0 + $0x1fd] sm:$0xff] }
 0x8bc   :  { %20782 = vmatprep.mubr.msk.f32.mxu0 %vm26259_vm1, %v26258_v2 }
 0x8bf   :  { %20783 = vmatmul.mubr.msk.f32.gmra.mrb[152].mxu0 %vm185_vm0, %v29517_v16  ;;  %v6033_v16 = vld [vmem:[%s33943_s0 + $0x16d] sm:$0xff] }
 0x8c0   :  { %20785 = vmatprep.mubr.msk.f32.mxu0 %vm26259_vm1, %v26258_v2 }
 0x8c3   :  { %20786 = vmatmul.mubr.msk.f32.gmra.mrb[154].mxu0 %vm185_vm0, %v29526_v35  ;;  %v6034_v35 = vld [vmem:[%s33943_s0 + $0x175] sm:$0xff] }
 0x8c4   :  { %20788 = vmatprep.mubr.msk.f32.mxu0 %vm26259_vm1, %v26258_v2 }
 0x8c7   :  { %20789 = vmatmul.mubr.msk.f32.gmra.mrb[156].mxu0 %vm185_vm0, %v29535_v15  ;;  %v6032_v15 = vld [vmem:[%s33943_s0 + $0x165] sm:$0xff] }
 0x8c8   :  { %20791 = vmatprep.mubr.msk.f32.mxu0 %vm26259_vm1, %v26258_v2 }
 0x8cb   :  { %20792 = vmatmul.mubr.msk.f32.gmra.mrb[158].mxu0 %vm185_vm0, %v5195_v34  ;;  %v6052_v34 = vld [vmem:[%s33943_s0 + $0x205] sm:$0xff] }
 0x8cc   :  { %20794 = vmatprep.mubr.msk.f32.mxu0 %vm26259_vm1, %v26258_v2 }
 0x8cf   :  { %20795 = vmatmul.mubr.msk.f32.gmra.mrb[160].mxu0 %vm185_vm0, %v5196_v36  ;;  %v6053_v36 = vld [vmem:[%s33943_s0 + $0x20d] sm:$0xff] }
 0x8d0   :  { %20799 = vmatprep.mubr.msk.f32.mxu0 %vm26259_vm1, %v26258_v2 }
 0x8d3   :  { %20800 = vmatmul.mubr.msk.f32.vlgmr.msra.gmra.mrb[0].mxu0 %vm185_vm0, %v5992_v37  ;;  %v6054_v37 = vld [vmem:[%s33943_s0 + $0x215] sm:$0xff] }
 0x8d4   :  { %20802 = vmatprep.mubr.msk.f32.mxu0 %vm26259_vm1, %v26258_v2  ;;  %21043 = vmatpush3.msra.mxu0 %v6949_v56  ;;  %v6869_v56 = vld [vmem:[%s33943_s0 + $0x2e] sm:$0xff] }
 0x8d7   :  { %20803 = vmatmul.mubr.msk.f32.gmra.mrb[2].mxu0 %vm185_vm0, %v5993_v38  ;;  %v6055_v38 = vld [vmem:[%s33943_s0 + $0x21d] sm:$0xff] }
 0x8d8   :  { %20805 = vmatprep.mubr.msk.f32.mxu0 %vm26259_vm1, %v26258_v2 }
 0x8db   :  { %20806 = vmatmul.mubr.msk.f32.gmra.mrb[4].mxu0 %vm185_vm0, %v5994_v57  ;;  %v6056_v57 = vld [vmem:[%s33943_s0 + $0x225] sm:$0xff] }
 0x8dc   :  { %20808 = vmatprep.mubr.msk.f32.mxu0 %vm26259_vm1, %v26258_v2 }
 0x8df   :  { %20809 = vmatmul.mubr.msk.f32.gmra.mrb[6].mxu0 %vm185_vm0, %v5995_v39  ;;  %v6057_v39 = vld [vmem:[%s33943_s0 + $0x22d] sm:$0xff] }
 0x8e0   :  { %20811 = vmatprep.mubr.msk.f32.mxu0 %vm26259_vm1, %v26258_v2 }
 0x8e3   :  { %20812 = vmatmul.mubr.msk.f32.gmra.mrb[8].mxu0 %vm185_vm0, %v5996_v40  ;;  %v6058_v40 = vld [vmem:[%s33943_s0 + $0x235] sm:$0xff] }
 0x8e4   :  { %20814 = vmatprep.mubr.msk.f32.mxu0 %vm26259_vm1, %v26258_v2 }
 0x8e7   :  { %20815 = vmatmul.mubr.msk.f32.gmra.mrb[10].mxu0 %vm185_vm0, %v5997_v41  ;;  %v6059_v41 = vld [vmem:[%s33943_s0 + $0x23d] sm:$0xff] }
 0x8e8   :  { %20817 = vmatprep.mubr.msk.f32.mxu0 %vm26259_vm1, %v26258_v2 }
 0x8eb   :  { %20818 = vmatmul.mubr.msk.f32.gmra.mrb[12].mxu0 %vm185_vm0, %v5998_v42  ;;  %v6060_v42 = vld [vmem:[%s33943_s0 + $0x245] sm:$0xff] }
 0x8ec   :  { %20820 = vmatprep.mubr.msk.f32.mxu0 %vm26259_vm1, %v26258_v2 }
 0x8ef   :  { %20821 = vmatmul.mubr.msk.f32.gmra.mrb[14].mxu0 %vm185_vm0, %v5999_v43  ;;  %v6061_v43 = vld [vmem:[%s33943_s0 + $0x24d] sm:$0xff] }
 0x8f0   :  { %20823 = vmatprep.mubr.msk.f32.mxu0 %vm26259_vm1, %v26258_v2 }
 0x8f3   :  { %20824 = vmatmul.mubr.msk.f32.gmra.mrb[16].mxu0 %vm185_vm0, %v6000_v44  ;;  %v6062_v44 = vld [vmem:[%s33943_s0 + $0x255] sm:$0xff] }
 0x8f4   :  { %20826 = vmatprep.mubr.msk.f32.mxu0 %vm26259_vm1, %v26258_v2 }
 0x8f7   :  { %20827 = vmatmul.mubr.msk.f32.gmra.mrb[18].mxu0 %vm185_vm0, %v6001_v45  ;;  %v6063_v45 = vld [vmem:[%s33943_s0 + $0x25d] sm:$0xff] }
 0x8f8   :  { %20829 = vmatprep.mubr.msk.f32.mxu0 %vm26259_vm1, %v26258_v2 }
 0x8fb   :  { %20830 = vmatmul.mubr.msk.f32.gmra.mrb[20].mxu0 %vm185_vm0, %v6002_v46  ;;  %v6064_v46 = vld [vmem:[%s33943_s0 + $0x265] sm:$0xff] }
 0x8fc   :  { %20832 = vmatprep.mubr.msk.f32.mxu0 %vm26259_vm1, %v26258_v2 }
 0x8ff   :  { %20833 = vmatmul.mubr.msk.f32.gmra.mrb[22].mxu0 %vm185_vm0, %v6003_v47  ;;  %v6065_v47 = vld [vmem:[%s33943_s0 + $0x26d] sm:$0xff] }
 0x900   :  { %20835 = vmatprep.mubr.msk.f32.mxu0 %vm26259_vm1, %v26258_v2 }
 0x903   :  { %20836 = vmatmul.mubr.msk.f32.gmra.mrb[24].mxu0 %vm185_vm0, %v6004_v48  ;;  %v6066_v48 = vld [vmem:[%s33943_s0 + $0x275] sm:$0xff] }
 0x904   :  { %20838 = vmatprep.mubr.msk.f32.mxu0 %vm26259_vm1, %v26258_v2 }
 0x907   :  { %20839 = vmatmul.mubr.msk.f32.gmra.mrb[26].mxu0 %vm185_vm0, %v6005_v49  ;;  %v6067_v49 = vld [vmem:[%s33943_s0 + $0x27d] sm:$0xff] }
 0x908   :  { %20841 = vmatprep.mubr.msk.f32.mxu0 %vm26259_vm1, %v26258_v2 }
 0x90b   :  { %20842 = vmatmul.mubr.msk.f32.gmra.mrb[28].mxu0 %vm185_vm0, %v6006_v50  ;;  %v6068_v50 = vld [vmem:[%s33943_s0 + $0x285] sm:$0xff] }
 0x90c   :  { %20844 = vmatprep.mubr.msk.f32.mxu0 %vm26259_vm1, %v26258_v2 }
 0x90f   :  { %20845 = vmatmul.mubr.msk.f32.gmra.mrb[30].mxu0 %vm185_vm0, %v6007_v51  ;;  %v6069_v51 = vld [vmem:[%s33943_s0 + $0x28d] sm:$0xff] }
 0x910   :  { %20847 = vmatprep.mubr.msk.f32.mxu0 %vm26259_vm1, %v26258_v2 }
 0x913   :  { %20848 = vmatmul.mubr.msk.f32.gmra.mrb[32].mxu0 %vm185_vm0, %v6008_v52  ;;  %v6070_v52 = vld [vmem:[%s33943_s0 + $0x295] sm:$0xff] }
 0x914   :  { %20850 = vmatprep.mubr.msk.f32.mxu0 %vm26259_vm1, %v26258_v2 }
 0x917   :  { %20851 = vmatmul.mubr.msk.f32.gmra.mrb[34].mxu0 %vm185_vm0, %v6009_v53  ;;  %v6071_v53 = vld [vmem:[%s33943_s0 + $0x29d] sm:$0xff] }
 0x918   :  { %20853 = vmatprep.mubr.msk.f32.mxu0 %vm26259_vm1, %v26258_v2 }
 0x91b   :  { %20854 = vmatmul.mubr.msk.f32.gmra.mrb[36].mxu0 %vm185_vm0, %v6010_v54  ;;  %v6072_v54 = vld [vmem:[%s33943_s0 + $0x2a5] sm:$0xff] }
 0x91c   :  { %20856 = vmatprep.mubr.msk.f32.mxu0 %vm26259_vm1, %v26258_v2 }
 0x91f   :  { %20857 = vmatmul.mubr.msk.f32.gmra.mrb[38].mxu0 %vm185_vm0, %v6011_v55  ;;  %v6868_v55 = vld [vmem:[%s33943_s0 + $0x26] sm:$0xff] }
 0x920   :  { %20859 = vmatprep.mubr.msk.f32.mxu0 %vm26259_vm1, %v26258_v2 }
 0x923   :  { %20860 = vmatmul.mubr.msk.f32.gmra.mrb[40].mxu0 %vm185_vm0, %v6012_v58  ;;  %v6870_v58 = vld [vmem:[%s33943_s0 + $0x36] sm:$0xff] }
 0x924   :  { %20862 = vmatprep.mubr.msk.f32.mxu0 %vm26259_vm1, %v26258_v2 }
 0x927   :  { %20863 = vmatmul.mubr.msk.f32.gmra.mrb[42].mxu0 %vm185_vm0, %v6013_v59  ;;  %v6871_v59 = vld [vmem:[%s33943_s0 + $0x3e] sm:$0xff] }
 0x928   :  { %20865 = vmatprep.mubr.msk.f32.mxu0 %vm26259_vm1, %v26258_v2 }
 0x92b   :  { %20866 = vmatmul.mubr.msk.f32.gmra.mrb[44].mxu0 %vm185_vm0, %v6014_v60  ;;  %v6872_v60 = vld [vmem:[%s33943_s0 + $0x46] sm:$0xff] }
 0x92c   :  { %20868 = vmatprep.mubr.msk.f32.mxu0 %vm26259_vm1, %v26258_v2 }
 0x92f   :  { %20869 = vmatmul.mubr.msk.f32.gmra.mrb[46].mxu0 %vm185_vm0, %v6015_v61  ;;  %v6873_v61 = vld [vmem:[%s33943_s0 + $0x4e] sm:$0xff] }
 0x930   :  { %20871 = vmatprep.mubr.msk.f32.mxu0 %vm26259_vm1, %v26258_v2 }
 0x933   :  { %20872 = vmatmul.mubr.msk.f32.gmra.mrb[48].mxu0 %vm185_vm0, %v6016_v62  ;;  %v6874_v62 = vld [vmem:[%s33943_s0 + $0x56] sm:$0xff] }
 0x934   :  { %20874 = vmatprep.mubr.msk.f32.mxu0 %vm26259_vm1, %v26258_v2 }
 0x937   :  { %20875 = vmatmul.mubr.msk.f32.gmra.mrb[50].mxu0 %vm185_vm0, %v6017_v63  ;;  %v6875_v63 = vld [vmem:[%s33943_s0 + $0x5e] sm:$0xff] }
 0x938   :  { %20877 = vmatprep.mubr.msk.f32.mxu0 %vm26259_vm1, %v26258_v2 }
 0x93b   :  { %20878 = vmatmul.mubr.msk.f32.gmra.mrb[52].mxu0 %vm185_vm0, %v6018_v0  ;;  %v6876_v0 = vld [vmem:[%s33943_s0 + $0x66] sm:$0xff] }
 0x93c   :  { %20880 = vmatprep.mubr.msk.f32.mxu0 %vm26259_vm1, %v26258_v2 }
 0x93f   :  { %20881 = vmatmul.mubr.msk.f32.gmra.mrb[54].mxu0 %vm185_vm0, %v6019_v1  ;;  %v6877_v1 = vld [vmem:[%s33943_s0 + $0x6e] sm:$0xff] }
 0x940   :  { %20883 = vmatprep.mubr.msk.f32.mxu0 %vm26259_vm1, %v26258_v2 }
 0x943   :  { %20884 = vmatmul.mubr.msk.f32.gmra.mrb[56].mxu0 %vm185_vm0, %v6020_v3  ;;  %v6878_v3 = vld [vmem:[%s33943_s0 + $0x76] sm:$0xff] }
 0x944   :  { %20886 = vmatprep.mubr.msk.f32.mxu0 %vm26259_vm1, %v26258_v2 }
 0x947   :  { %20887 = vmatmul.mubr.msk.f32.gmra.mrb[58].mxu0 %vm185_vm0, %v6021_v4  ;;  %v6879_v4 = vld [vmem:[%s33943_s0 + $0x7e] sm:$0xff] }
 0x948   :  { %20889 = vmatprep.mubr.msk.f32.mxu0 %vm26259_vm1, %v26258_v2 }
 0x94b   :  { %20890 = vmatmul.mubr.msk.f32.gmra.mrb[60].mxu0 %vm185_vm0, %v6022_v5  ;;  %v6880_v5 = vld [vmem:[%s33943_s0 + $0x86] sm:$0xff] }
 0x94c   :  { %20892 = vmatprep.mubr.msk.f32.mxu0 %vm26259_vm1, %v26258_v2 }
 0x94f   :  { %20893 = vmatmul.mubr.msk.f32.gmra.mrb[62].mxu0 %vm185_vm0, %v6023_v6  ;;  %v6881_v6 = vld [vmem:[%s33943_s0 + $0x8e] sm:$0xff] }
 0x950   :  { %20895 = vmatprep.mubr.msk.f32.mxu0 %vm26259_vm1, %v26258_v2 }
 0x953   :  { %20896 = vmatmul.mubr.msk.f32.gmra.mrb[64].mxu0 %vm185_vm0, %v6024_v7  ;;  %v6882_v7 = vld [vmem:[%s33943_s0 + $0x96] sm:$0xff] }
 0x954   :  { %20898 = vmatprep.mubr.msk.f32.mxu0 %vm26259_vm1, %v26258_v2 }
 0x957   :  { %20899 = vmatmul.mubr.msk.f32.gmra.mrb[66].mxu0 %vm185_vm0, %v6025_v8  ;;  %v6883_v8 = vld [vmem:[%s33943_s0 + $0x9e] sm:$0xff] }
 0x958   :  { %20901 = vmatprep.mubr.msk.f32.mxu0 %vm26259_vm1, %v26258_v2 }
 0x95b   :  { %20902 = vmatmul.mubr.msk.f32.gmra.mrb[68].mxu0 %vm185_vm0, %v6026_v9  ;;  %v6884_v9 = vld [vmem:[%s33943_s0 + $0xa6] sm:$0xff] }
 0x95c   :  { %20904 = vmatprep.mubr.msk.f32.mxu0 %vm26259_vm1, %v26258_v2 }
 0x95f   :  { %20905 = vmatmul.mubr.msk.f32.gmra.mrb[70].mxu0 %vm185_vm0, %v6027_v10  ;;  %v6885_v10 = vld [vmem:[%s33943_s0 + $0xae] sm:$0xff] }
 0x960   :  { %20907 = vmatprep.mubr.msk.f32.mxu0 %vm26259_vm1, %v26258_v2 }
 0x963   :  { %20908 = vmatmul.mubr.msk.f32.gmra.mrb[72].mxu0 %vm185_vm0, %v6028_v11  ;;  %v6886_v11 = vld [vmem:[%s33943_s0 + $0xb6] sm:$0xff] }
 0x964   :  { %20910 = vmatprep.mubr.msk.f32.mxu0 %vm26259_vm1, %v26258_v2 }
 0x967   :  { %20911 = vmatmul.mubr.msk.f32.gmra.mrb[74].mxu0 %vm185_vm0, %v6029_v12  ;;  %v6887_v12 = vld [vmem:[%s33943_s0 + $0xbe] sm:$0xff] }
 0x968   :  { %20913 = vmatprep.mubr.msk.f32.mxu0 %vm26259_vm1, %v26258_v2 }
 0x96b   :  { %20914 = vmatmul.mubr.msk.f32.gmra.mrb[76].mxu0 %vm185_vm0, %v6030_v13  ;;  %v6888_v13 = vld [vmem:[%s33943_s0 + $0xc6] sm:$0xff] }
 0x96c   :  { %20916 = vmatprep.mubr.msk.f32.mxu0 %vm26259_vm1, %v26258_v2 }
 0x96f   :  { %20917 = vmatmul.mubr.msk.f32.gmra.mrb[78].mxu0 %vm185_vm0, %v6031_v14  ;;  %v6889_v14 = vld [vmem:[%s33943_s0 + $0xce] sm:$0xff] }
 0x970   :  { %20919 = vmatprep.mubr.msk.f32.mxu0 %vm26259_vm1, %v26258_v2 }
 0x973   :  { %20920 = vmatmul.mubr.msk.f32.gmra.mrb[80].mxu0 %vm185_vm0, %v6032_v15  ;;  %v6890_v15 = vld [vmem:[%s33943_s0 + $0xd6] sm:$0xff] }
 0x974   :  { %20922 = vmatprep.mubr.msk.f32.mxu0 %vm26259_vm1, %v26258_v2 }
 0x977   :  { %20923 = vmatmul.mubr.msk.f32.gmra.mrb[82].mxu0 %vm185_vm0, %v6033_v16  ;;  %v181_v16 = vld [vmem:[%s33943_s0 + $0x271] sm:$0xff] }
 0x978   :  { %20925 = vmatprep.mubr.msk.f32.mxu0 %vm26259_vm1, %v26258_v2  ;;  %19319 = vmatmul.mubr.msk.f32.vlgmr.msra.gmra.mrb[0].mxu1 %vm185_vm0, %v181_v16 }
 0x979   :  { %19321 = vmatprep.mubr.msk.f32.mxu1 %vm26259_vm1, %v26258_v2 }
 0x97b   :  { %20926 = vmatmul.mubr.msk.f32.gmra.mrb[84].mxu0 %vm185_vm0, %v6034_v35  ;;  %v6891_v35 = vld [vmem:[%s33943_s0 + $0xde] sm:$0xff] }
 0x97c   :  { %20928 = vmatprep.mubr.msk.f32.mxu0 %vm26259_vm1, %v26258_v2 }
 0x97f   :  { %20929 = vmatmul.mubr.msk.f32.gmra.mrb[86].mxu0 %vm185_vm0, %v6035_v17  ;;  %v182_v17 = vld [vmem:[%s33943_s0 + $0x279] sm:$0xff] }
 0x980   :  { %20931 = vmatprep.mubr.msk.f32.mxu0 %vm26259_vm1, %v26258_v2  ;;  %19322 = vmatmul.mubr.msk.f32.gmra.mrb[2].mxu1 %vm185_vm0, %v182_v17 }
 0x981   :  { %19324 = vmatprep.mubr.msk.f32.mxu1 %vm26259_vm1, %v26258_v2 }
 0x983   :  { %20932 = vmatmul.mubr.msk.f32.gmra.mrb[88].mxu0 %vm185_vm0, %v6036_v18  ;;  %v8076_v18 = vld [vmem:[%s33945_s2 + $0x10] sm:$0xff] }
 0x984   :  { %20934 = vmatprep.mubr.msk.f32.mxu0 %vm26259_vm1, %v26258_v2 }
 0x987   :  { %20935 = vmatmul.mubr.msk.f32.gmra.mrb[90].mxu0 %vm185_vm0, %v6037_v19  ;;  %v8077_v19 = vld [vmem:[%s33945_s2 + $0x18] sm:$0xff] }
 0x988   :  { %20937 = vmatprep.mubr.msk.f32.mxu0 %vm26259_vm1, %v26258_v2 }
 0x98b   :  { %20938 = vmatmul.mubr.msk.f32.gmra.mrb[92].mxu0 %vm185_vm0, %v6038_v20  ;;  %v6892_v20 = vld [vmem:[%s33943_s0 + $0xe6] sm:$0xff] }
 0x98c   :  { %20940 = vmatprep.mubr.msk.f32.mxu0 %vm26259_vm1, %v26258_v2 }
 0x98f   :  { %20941 = vmatmul.mubr.msk.f32.gmra.mrb[94].mxu0 %vm185_vm0, %v6039_v21  ;;  %v183_v21 = vld [vmem:[%s33943_s0 + $0x281] sm:$0xff] }
 0x990   :  { %20943 = vmatprep.mubr.msk.f32.mxu0 %vm26259_vm1, %v26258_v2  ;;  %19325 = vmatmul.mubr.msk.f32.gmra.mrb[4].mxu1 %vm185_vm0, %v183_v21  ;;  %v6928_v21 = vld [vmem:[%s33943_s0 + $0x206] sm:$0xff] }
 0x991   :  { %21291 = vmatprep.mubr.msk.f32.mxu1 %vm26259_vm1, %v26258_v2 }
 0x993   :  { %20944 = vmatmul.mubr.msk.f32.gmra.mrb[96].mxu0 %vm185_vm0, %v6040_v22  ;;  %v23520_v22 = vpack.c.bf16 %v8077_v19, %v8076_v18 }
 0x994   :  { %20946 = vmatprep.mubr.msk.f32.mxu0 %vm26259_vm1, %v26258_v2 }
 0x997   :  { %20947 = vmatmul.mubr.msk.f32.gmra.mrb[98].mxu0 %vm185_vm0, %v6041_v23  ;;  %v33981_v23 = vmov 0.0|0.0  }
 0x998   :  { %20949 = vmatprep.mubr.msk.f32.mxu0 %vm26259_vm1, %v26258_v2  ;;  %23519 = vmatprep.subr.bf16.mxu1 %v33981_v23 }
 0x999   :  { %23521 = vmatpush3.bf16.msra.mxu1 %v23520_v22 }
 0x99a   :  { %23522 = vmatprep.subr.bf16.mxu1 %v33981_v23 }
 0x99b   :  { %20950 = vmatmul.mubr.msk.f32.gmra.mrb[100].mxu0 %vm185_vm0, %v6042_v24  ;;  %v6893_v24 = vld [vmem:[%s33943_s0 + $0xee] sm:$0xff] }
 0x99c   :  { %20952 = vmatprep.mubr.msk.f32.mxu0 %vm26259_vm1, %v26258_v2 }
 0x99f   :  { %20953 = vmatmul.mubr.msk.f32.gmra.mrb[102].mxu0 %vm185_vm0, %v6043_v25  ;;  %v6894_v25 = vld [vmem:[%s33943_s0 + $0xf6] sm:$0xff] }
 0x9a0   :  { %20955 = vmatprep.mubr.msk.f32.mxu0 %vm26259_vm1, %v26258_v2 }
 0x9a3   :  { %20956 = vmatmul.mubr.msk.f32.gmra.mrb[104].mxu0 %vm185_vm0, %v6044_v26  ;;  %v6895_v26 = vld [vmem:[%s33943_s0 + $0xfe] sm:$0xff] }
 0x9a4   :  { %20958 = vmatprep.mubr.msk.f32.mxu0 %vm26259_vm1, %v26258_v2 }
 0x9a7   :  { %20959 = vmatmul.mubr.msk.f32.gmra.mrb[106].mxu0 %vm185_vm0, %v6045_v27  ;;  %v6896_v27 = vld [vmem:[%s33943_s0 + $0x106] sm:$0xff] }
 0x9a8   :  { %20961 = vmatprep.mubr.msk.f32.mxu0 %vm26259_vm1, %v26258_v2 }
 0x9ab   :  { %20962 = vmatmul.mubr.msk.f32.gmra.mrb[108].mxu0 %vm185_vm0, %v6046_v28  ;;  %v6897_v28 = vld [vmem:[%s33943_s0 + $0x10e] sm:$0xff] }
 0x9ac   :  { %20964 = vmatprep.mubr.msk.f32.mxu0 %vm26259_vm1, %v26258_v2 }
 0x9af   :  { %20965 = vmatmul.mubr.msk.f32.gmra.mrb[110].mxu0 %vm185_vm0, %v6047_v29  ;;  %v6898_v29 = vld [vmem:[%s33943_s0 + $0x116] sm:$0xff] }
 0x9b0   :  { %20967 = vmatprep.mubr.msk.f32.mxu0 %vm26259_vm1, %v26258_v2 }
 0x9b3   :  { %20968 = vmatmul.mubr.msk.f32.gmra.mrb[112].mxu0 %vm185_vm0, %v6048_v30  ;;  %v6899_v30 = vld [vmem:[%s33943_s0 + $0x11e] sm:$0xff] }
 0x9b4   :  { %20970 = vmatprep.mubr.msk.f32.mxu0 %vm26259_vm1, %v26258_v2 }
 0x9b7   :  { %20971 = vmatmul.mubr.msk.f32.gmra.mrb[114].mxu0 %vm185_vm0, %v6049_v31  ;;  %v6900_v31 = vld [vmem:[%s33943_s0 + $0x126] sm:$0xff] }
 0x9b8   :  { %20973 = vmatprep.mubr.msk.f32.mxu0 %vm26259_vm1, %v26258_v2 }
 0x9bb   :  { %20974 = vmatmul.mubr.msk.f32.gmra.mrb[116].mxu0 %vm185_vm0, %v6050_v32  ;;  %v6901_v32 = vld [vmem:[%s33943_s0 + $0x12e] sm:$0xff] }
 0x9bc   :  { %20976 = vmatprep.mubr.msk.f32.mxu0 %vm26259_vm1, %v26258_v2 }
 0x9bf   :  { %20977 = vmatmul.mubr.msk.f32.gmra.mrb[118].mxu0 %vm185_vm0, %v6051_v33  ;;  %v6902_v33 = vld [vmem:[%s33943_s0 + $0x136] sm:$0xff] }
 0x9c0   :  { %20979 = vmatprep.mubr.msk.f32.mxu0 %vm26259_vm1, %v26258_v2 }
 0x9c3   :  { %20980 = vmatmul.mubr.msk.f32.gmra.mrb[120].mxu0 %vm185_vm0, %v6052_v34  ;;  %v6903_v34 = vld [vmem:[%s33943_s0 + $0x13e] sm:$0xff] }
 0x9c4   :  { %20982 = vmatprep.mubr.msk.f32.mxu0 %vm26259_vm1, %v26258_v2 }
 0x9c7   :  { %20983 = vmatmul.mubr.msk.f32.gmra.mrb[122].mxu0 %vm185_vm0, %v6053_v36  ;;  %v6904_v36 = vld [vmem:[%s33943_s0 + $0x146] sm:$0xff] }
 0x9c8   :  { %20985 = vmatprep.mubr.msk.f32.mxu0 %vm26259_vm1, %v26258_v2 }
 0x9cb   :  { %20986 = vmatmul.mubr.msk.f32.gmra.mrb[124].mxu0 %vm185_vm0, %v6054_v37  ;;  %v6905_v37 = vld [vmem:[%s33943_s0 + $0x14e] sm:$0xff] }
 0x9cc   :  { %20988 = vmatprep.mubr.msk.f32.mxu0 %vm26259_vm1, %v26258_v2 }
 0x9cf   :  { %20989 = vmatmul.mubr.msk.f32.gmra.mrb[126].mxu0 %vm185_vm0, %v6055_v38  ;;  %v6906_v38 = vld [vmem:[%s33943_s0 + $0x156] sm:$0xff] }
 0x9d0   :  { %20991 = vmatprep.mubr.msk.f32.mxu0 %vm26259_vm1, %v26258_v2 }
 0x9d3   :  { %20992 = vmatmul.mubr.msk.f32.gmra.mrb[128].mxu0 %vm185_vm0, %v6056_v57  ;;  %v6907_v57 = vld [vmem:[%s33943_s0 + $0x15e] sm:$0xff] }
 0x9d4   :  { %20994 = vmatprep.mubr.msk.f32.mxu0 %vm26259_vm1, %v26258_v2 }
 0x9d7   :  { %20995 = vmatmul.mubr.msk.f32.gmra.mrb[130].mxu0 %vm185_vm0, %v6057_v39  ;;  %v6908_v39 = vld [vmem:[%s33943_s0 + $0x166] sm:$0xff] }
 0x9d8   :  { %20997 = vmatprep.mubr.msk.f32.mxu0 %vm26259_vm1, %v26258_v2 }
 0x9db   :  { %20998 = vmatmul.mubr.msk.f32.gmra.mrb[132].mxu0 %vm185_vm0, %v6058_v40  ;;  %v6909_v40 = vld [vmem:[%s33943_s0 + $0x16e] sm:$0xff] }
 0x9dc   :  { %21000 = vmatprep.mubr.msk.f32.mxu0 %vm26259_vm1, %v26258_v2 }
 0x9df   :  { %21001 = vmatmul.mubr.msk.f32.gmra.mrb[134].mxu0 %vm185_vm0, %v6059_v41  ;;  %v6910_v41 = vld [vmem:[%s33943_s0 + $0x176] sm:$0xff] }
 0x9e0   :  { %21003 = vmatprep.mubr.msk.f32.mxu0 %vm26259_vm1, %v26258_v2 }
 0x9e3   :  { %21004 = vmatmul.mubr.msk.f32.gmra.mrb[136].mxu0 %vm185_vm0, %v6060_v42  ;;  %v6911_v42 = vld [vmem:[%s33943_s0 + $0x17e] sm:$0xff] }
 0x9e4   :  { %21006 = vmatprep.mubr.msk.f32.mxu0 %vm26259_vm1, %v26258_v2 }
 0x9e7   :  { %21007 = vmatmul.mubr.msk.f32.gmra.mrb[138].mxu0 %vm185_vm0, %v6061_v43  ;;  %v6912_v43 = vld [vmem:[%s33943_s0 + $0x186] sm:$0xff] }
 0x9e8   :  { %21009 = vmatprep.mubr.msk.f32.mxu0 %vm26259_vm1, %v26258_v2 }
 0x9eb   :  { %21010 = vmatmul.mubr.msk.f32.gmra.mrb[140].mxu0 %vm185_vm0, %v6062_v44  ;;  %v6913_v44 = vld [vmem:[%s33943_s0 + $0x18e] sm:$0xff] }
 0x9ec   :  { %21012 = vmatprep.mubr.msk.f32.mxu0 %vm26259_vm1, %v26258_v2 }
 0x9ef   :  { %21013 = vmatmul.mubr.msk.f32.gmra.mrb[142].mxu0 %vm185_vm0, %v6063_v45  ;;  %v6914_v45 = vld [vmem:[%s33943_s0 + $0x196] sm:$0xff] }
 0x9f0   :  { %21015 = vmatprep.mubr.msk.f32.mxu0 %vm26259_vm1, %v26258_v2 }
 0x9f3   :  { %21016 = vmatmul.mubr.msk.f32.gmra.mrb[144].mxu0 %vm185_vm0, %v6064_v46  ;;  %v6915_v46 = vld [vmem:[%s33943_s0 + $0x19e] sm:$0xff] }
 0x9f4   :  { %21018 = vmatprep.mubr.msk.f32.mxu0 %vm26259_vm1, %v26258_v2 }
 0x9f7   :  { %21019 = vmatmul.mubr.msk.f32.gmra.mrb[146].mxu0 %vm185_vm0, %v6065_v47  ;;  %v6916_v47 = vld [vmem:[%s33943_s0 + $0x1a6] sm:$0xff] }
 0x9f8   :  { %21021 = vmatprep.mubr.msk.f32.mxu0 %vm26259_vm1, %v26258_v2 }
 0x9fb   :  { %21022 = vmatmul.mubr.msk.f32.gmra.mrb[148].mxu0 %vm185_vm0, %v6066_v48  ;;  %v6917_v48 = vld [vmem:[%s33943_s0 + $0x1ae] sm:$0xff] }
 0x9fc   :  { %21024 = vmatprep.mubr.msk.f32.mxu0 %vm26259_vm1, %v26258_v2 }
 0x9ff   :  { %21025 = vmatmul.mubr.msk.f32.gmra.mrb[150].mxu0 %vm185_vm0, %v6067_v49  ;;  %v6918_v49 = vld [vmem:[%s33943_s0 + $0x1b6] sm:$0xff] }
 0xa00   :  { %21027 = vmatprep.mubr.msk.f32.mxu0 %vm26259_vm1, %v26258_v2 }
 0xa03   :  { %21028 = vmatmul.mubr.msk.f32.gmra.mrb[152].mxu0 %vm185_vm0, %v6068_v50  ;;  %v6919_v50 = vld [vmem:[%s33943_s0 + $0x1be] sm:$0xff] }
 0xa04   :  { %21030 = vmatprep.mubr.msk.f32.mxu0 %vm26259_vm1, %v26258_v2 }
 0xa07   :  { %21031 = vmatmul.mubr.msk.f32.gmra.mrb[154].mxu0 %vm185_vm0, %v6069_v51  ;;  %v6920_v51 = vld [vmem:[%s33943_s0 + $0x1c6] sm:$0xff] }
 0xa08   :  { %21033 = vmatprep.mubr.msk.f32.mxu0 %vm26259_vm1, %v26258_v2 }
 0xa0b   :  { %21034 = vmatmul.mubr.msk.f32.gmra.mrb[156].mxu0 %vm185_vm0, %v6070_v52  ;;  %v6921_v52 = vld [vmem:[%s33943_s0 + $0x1ce] sm:$0xff] }
 0xa0c   :  { %21036 = vmatprep.mubr.msk.f32.mxu0 %vm26259_vm1, %v26258_v2 }
 0xa0f   :  { %21037 = vmatmul.mubr.msk.f32.gmra.mrb[158].mxu0 %vm185_vm0, %v6071_v53 }
 0xa10   :  { %21039 = vmatprep.mubr.msk.f32.mxu0 %vm26259_vm1, %v26258_v2 }
 0xa13   :  { %21040 = vmatmul.mubr.msk.f32.gmra.mrb[160].mxu0 %vm185_vm0, %v6072_v54 }
 0xa14   :  { %21044 = vmatprep.mubr.msk.f32.mxu0 %vm26259_vm1, %v26258_v2 }
 0xa17   :  { %21045 = vmatmul.mubr.msk.f32.vlgmr.msra.gmra.mrb[0].mxu0 %vm185_vm0, %v6868_v55 }
 0xa18   :  { %21047 = vmatprep.mubr.msk.f32.mxu0 %vm26259_vm1, %v26258_v2 }
 0xa1b   :  { %21048 = vmatmul.mubr.msk.f32.gmra.mrb[2].mxu0 %vm185_vm0, %v6869_v56  ;;  %v6922_v56 = vld [vmem:[%s33943_s0 + $0x1d6] sm:$0xff] }
 0xa1c   :  { %21050 = vmatprep.mubr.msk.f32.mxu0 %vm26259_vm1, %v26258_v2 }
 0xa1f   :  { %21051 = vmatmul.mubr.msk.f32.gmra.mrb[4].mxu0 %vm185_vm0, %v6870_v58 }
 0xa20   :  { %21053 = vmatprep.mubr.msk.f32.mxu0 %vm26259_vm1, %v26258_v2 }
 0xa23   :  { %21054 = vmatmul.mubr.msk.f32.gmra.mrb[6].mxu0 %vm185_vm0, %v6871_v59 }
 0xa24   :  { %21056 = vmatprep.mubr.msk.f32.mxu0 %vm26259_vm1, %v26258_v2 }
 0xa27   :  { %21057 = vmatmul.mubr.msk.f32.gmra.mrb[8].mxu0 %vm185_vm0, %v6872_v60 }
 0xa28   :  { %21059 = vmatprep.mubr.msk.f32.mxu0 %vm26259_vm1, %v26258_v2 }
 0xa2b   :  { %21060 = vmatmul.mubr.msk.f32.gmra.mrb[10].mxu0 %vm185_vm0, %v6873_v61  ;;  %v6923_v61 = vld [vmem:[%s33943_s0 + $0x1de] sm:$0xff] }
 0xa2c   :  { %21062 = vmatprep.mubr.msk.f32.mxu0 %vm26259_vm1, %v26258_v2 }
 0xa2f   :  { %21063 = vmatmul.mubr.msk.f32.gmra.mrb[12].mxu0 %vm185_vm0, %v6874_v62 }
 0xa30   :  { %21065 = vmatprep.mubr.msk.f32.mxu0 %vm26259_vm1, %v26258_v2 }
 0xa33   :  { %21066 = vmatmul.mubr.msk.f32.gmra.mrb[14].mxu0 %vm185_vm0, %v6875_v63 }
 0xa34   :  { %21068 = vmatprep.mubr.msk.f32.mxu0 %vm26259_vm1, %v26258_v2 }
 0xa37   :  { %21069 = vmatmul.mubr.msk.f32.gmra.mrb[16].mxu0 %vm185_vm0, %v6876_v0 }
 0xa38   :  { %21071 = vmatprep.mubr.msk.f32.mxu0 %vm26259_vm1, %v26258_v2 }
 0xa3b   :  { %21072 = vmatmul.mubr.msk.f32.gmra.mrb[18].mxu0 %vm185_vm0, %v6877_v1  ;;  %v6924_v1 = vld [vmem:[%s33943_s0 + $0x1e6] sm:$0xff] }
 0xa3c   :  { %21074 = vmatprep.mubr.msk.f32.mxu0 %vm26259_vm1, %v26258_v2 }
 0xa3f   :  { %21075 = vmatmul.mubr.msk.f32.gmra.mrb[20].mxu0 %vm185_vm0, %v6878_v3 }
 0xa40   :  { %21077 = vmatprep.mubr.msk.f32.mxu0 %vm26259_vm1, %v26258_v2 }
 0xa43   :  { %21078 = vmatmul.mubr.msk.f32.gmra.mrb[22].mxu0 %vm185_vm0, %v6879_v4 }
 0xa44   :  { %21080 = vmatprep.mubr.msk.f32.mxu0 %vm26259_vm1, %v26258_v2 }
 0xa47   :  { %21081 = vmatmul.mubr.msk.f32.gmra.mrb[24].mxu0 %vm185_vm0, %v6880_v5 }
 0xa48   :  { %21083 = vmatprep.mubr.msk.f32.mxu0 %vm26259_vm1, %v26258_v2 }
 0xa4b   :  { %21084 = vmatmul.mubr.msk.f32.gmra.mrb[26].mxu0 %vm185_vm0, %v6881_v6 }
 0xa4c   :  { %21086 = vmatprep.mubr.msk.f32.mxu0 %vm26259_vm1, %v26258_v2 }
 0xa4f   :  { %21087 = vmatmul.mubr.msk.f32.gmra.mrb[28].mxu0 %vm185_vm0, %v6882_v7  ;;  %v6925_v7 = vld [vmem:[%s33943_s0 + $0x1ee] sm:$0xff] }
 0xa50   :  { %21089 = vmatprep.mubr.msk.f32.mxu0 %vm26259_vm1, %v26258_v2 }
 0xa53   :  { %21090 = vmatmul.mubr.msk.f32.gmra.mrb[30].mxu0 %vm185_vm0, %v6883_v8 }
 0xa54   :  { %21092 = vmatprep.mubr.msk.f32.mxu0 %vm26259_vm1, %v26258_v2 }
 0xa57   :  { %21093 = vmatmul.mubr.msk.f32.gmra.mrb[32].mxu0 %vm185_vm0, %v6884_v9 }
 0xa58   :  { %21095 = vmatprep.mubr.msk.f32.mxu0 %vm26259_vm1, %v26258_v2 }
 0xa5b   :  { %21096 = vmatmul.mubr.msk.f32.gmra.mrb[34].mxu0 %vm185_vm0, %v6885_v10 }
 0xa5c   :  { %21098 = vmatprep.mubr.msk.f32.mxu0 %vm26259_vm1, %v26258_v2 }
 0xa5f   :  { %21099 = vmatmul.mubr.msk.f32.gmra.mrb[36].mxu0 %vm185_vm0, %v6886_v11 }
 0xa60   :  { %21101 = vmatprep.mubr.msk.f32.mxu0 %vm26259_vm1, %v26258_v2 }
 0xa63   :  { %21102 = vmatmul.mubr.msk.f32.gmra.mrb[38].mxu0 %vm185_vm0, %v6887_v12  ;;  %v6926_v12 = vld [vmem:[%s33943_s0 + $0x1f6] sm:$0xff] }
 0xa64   :  { %21104 = vmatprep.mubr.msk.f32.mxu0 %vm26259_vm1, %v26258_v2 }
 0xa67   :  { %21105 = vmatmul.mubr.msk.f32.gmra.mrb[40].mxu0 %vm185_vm0, %v6888_v13 }
 0xa68   :  { %21107 = vmatprep.mubr.msk.f32.mxu0 %vm26259_vm1, %v26258_v2 }
 0xa6b   :  { %21108 = vmatmul.mubr.msk.f32.gmra.mrb[42].mxu0 %vm185_vm0, %v6889_v14 }
 0xa6c   :  { %21110 = vmatprep.mubr.msk.f32.mxu0 %vm26259_vm1, %v26258_v2 }
 0xa6f   :  { %21111 = vmatmul.mubr.msk.f32.gmra.mrb[44].mxu0 %vm185_vm0, %v6890_v15 }
 0xa70   :  { %21113 = vmatprep.mubr.msk.f32.mxu0 %vm26259_vm1, %v26258_v2 }
 0xa73   :  { %21114 = vmatmul.mubr.msk.f32.gmra.mrb[46].mxu0 %vm185_vm0, %v6891_v35  ;;  %v6927_v35 = vld [vmem:[%s33943_s0 + $0x1fe] sm:$0xff] }
 0xa74   :  { %21116 = vmatprep.mubr.msk.f32.mxu0 %vm26259_vm1, %v26258_v2 }
 0xa77   :  { %21117 = vmatmul.mubr.msk.f32.gmra.mrb[48].mxu0 %vm185_vm0, %v6892_v20 }
 0xa78   :  { %21119 = vmatprep.mubr.msk.f32.mxu0 %vm26259_vm1, %v26258_v2 }
 0xa7b   :  { %21120 = vmatmul.mubr.msk.f32.gmra.mrb[50].mxu0 %vm185_vm0, %v6893_v24 }
 0xa7c   :  { %21122 = vmatprep.mubr.msk.f32.mxu0 %vm26259_vm1, %v26258_v2 }
 0xa7f   :  { %21123 = vmatmul.mubr.msk.f32.gmra.mrb[52].mxu0 %vm185_vm0, %v6894_v25 }
 0xa80   :  { %21125 = vmatprep.mubr.msk.f32.mxu0 %vm26259_vm1, %v26258_v2 }
 0xa83   :  { %21126 = vmatmul.mubr.msk.f32.gmra.mrb[54].mxu0 %vm185_vm0, %v6895_v26 }
 0xa84   :  { %21128 = vmatprep.mubr.msk.f32.mxu0 %vm26259_vm1, %v26258_v2 }
 0xa87   :  { %21129 = vmatmul.mubr.msk.f32.gmra.mrb[56].mxu0 %vm185_vm0, %v6896_v27  ;;  %v6929_v27 = vld [vmem:[%s33943_s0 + $0x20e] sm:$0xff] }
 0xa88   :  { %21131 = vmatprep.mubr.msk.f32.mxu0 %vm26259_vm1, %v26258_v2 }
 0xa8b   :  { %21132 = vmatmul.mubr.msk.f32.gmra.mrb[58].mxu0 %vm185_vm0, %v6897_v28 }
 0xa8c   :  { %21134 = vmatprep.mubr.msk.f32.mxu0 %vm26259_vm1, %v26258_v2 }
 0xa8f   :  { %21135 = vmatmul.mubr.msk.f32.gmra.mrb[60].mxu0 %vm185_vm0, %v6898_v29 }
 0xa90   :  { %21137 = vmatprep.mubr.msk.f32.mxu0 %vm26259_vm1, %v26258_v2 }
 0xa93   :  { %21138 = vmatmul.mubr.msk.f32.gmra.mrb[62].mxu0 %vm185_vm0, %v6899_v30 }
 0xa94   :  { %21140 = vmatprep.mubr.msk.f32.mxu0 %vm26259_vm1, %v26258_v2 }
 0xa97   :  { %21141 = vmatmul.mubr.msk.f32.gmra.mrb[64].mxu0 %vm185_vm0, %v6900_v31 }
 0xa98   :  { %21143 = vmatprep.mubr.msk.f32.mxu0 %vm26259_vm1, %v26258_v2 }
 0xa9b   :  { %21144 = vmatmul.mubr.msk.f32.gmra.mrb[66].mxu0 %vm185_vm0, %v6901_v32  ;;  %v6930_v32 = vld [vmem:[%s33943_s0 + $0x216] sm:$0xff] }
 0xa9c   :  { %21146 = vmatprep.mubr.msk.f32.mxu0 %vm26259_vm1, %v26258_v2 }
 0xa9f   :  { %21147 = vmatmul.mubr.msk.f32.gmra.mrb[68].mxu0 %vm185_vm0, %v6902_v33 }
 0xaa0   :  { %21149 = vmatprep.mubr.msk.f32.mxu0 %vm26259_vm1, %v26258_v2 }
 0xaa3   :  { %21150 = vmatmul.mubr.msk.f32.gmra.mrb[70].mxu0 %vm185_vm0, %v6903_v34 }
 0xaa4   :  { %21152 = vmatprep.mubr.msk.f32.mxu0 %vm26259_vm1, %v26258_v2 }
 0xaa7   :  { %21153 = vmatmul.mubr.msk.f32.gmra.mrb[72].mxu0 %vm185_vm0, %v6904_v36 }
 0xaa8   :  { %21155 = vmatprep.mubr.msk.f32.mxu0 %vm26259_vm1, %v26258_v2 }
 0xaab   :  { %21156 = vmatmul.mubr.msk.f32.gmra.mrb[74].mxu0 %vm185_vm0, %v6905_v37 }
 0xaac   :  { %21158 = vmatprep.mubr.msk.f32.mxu0 %vm26259_vm1, %v26258_v2 }
 0xaaf   :  { %21159 = vmatmul.mubr.msk.f32.gmra.mrb[76].mxu0 %vm185_vm0, %v6906_v38  ;;  %v6931_v38 = vld [vmem:[%s33943_s0 + $0x21e] sm:$0xff] }
 0xab0   :  { %21161 = vmatprep.mubr.msk.f32.mxu0 %vm26259_vm1, %v26258_v2 }
 0xab3   :  { %21162 = vmatmul.mubr.msk.f32.gmra.mrb[78].mxu0 %vm185_vm0, %v6907_v57 }
 0xab4   :  { %21164 = vmatprep.mubr.msk.f32.mxu0 %vm26259_vm1, %v26258_v2 }
 0xab7   :  { %21165 = vmatmul.mubr.msk.f32.gmra.mrb[80].mxu0 %vm185_vm0, %v6908_v39 }
 0xab8   :  { %21167 = vmatprep.mubr.msk.f32.mxu0 %vm26259_vm1, %v26258_v2 }
 0xabb   :  { %21168 = vmatmul.mubr.msk.f32.gmra.mrb[82].mxu0 %vm185_vm0, %v6909_v40 }
 0xabc   :  { %21170 = vmatprep.mubr.msk.f32.mxu0 %vm26259_vm1, %v26258_v2 }
 0xabf   :  { %21171 = vmatmul.mubr.msk.f32.gmra.mrb[84].mxu0 %vm185_vm0, %v6910_v41 }
 0xac0   :  { %21173 = vmatprep.mubr.msk.f32.mxu0 %vm26259_vm1, %v26258_v2 }
 0xac3   :  { %21174 = vmatmul.mubr.msk.f32.gmra.mrb[86].mxu0 %vm185_vm0, %v6911_v42  ;;  %v6932_v42 = vld [vmem:[%s33943_s0 + $0x226] sm:$0xff] }
 0xac4   :  { %21176 = vmatprep.mubr.msk.f32.mxu0 %vm26259_vm1, %v26258_v2 }
 0xac7   :  { %21177 = vmatmul.mubr.msk.f32.gmra.mrb[88].mxu0 %vm185_vm0, %v6912_v43 }
 0xac8   :  { %21179 = vmatprep.mubr.msk.f32.mxu0 %vm26259_vm1, %v26258_v2 }
 0xacb   :  { %21180 = vmatmul.mubr.msk.f32.gmra.mrb[90].mxu0 %vm185_vm0, %v6913_v44 }
 0xacc   :  { %21182 = vmatprep.mubr.msk.f32.mxu0 %vm26259_vm1, %v26258_v2 }
 0xacf   :  { %21183 = vmatmul.mubr.msk.f32.gmra.mrb[92].mxu0 %vm185_vm0, %v6914_v45 }
 0xad0   :  { %21185 = vmatprep.mubr.msk.f32.mxu0 %vm26259_vm1, %v26258_v2 }
 0xad3   :  { %21186 = vmatmul.mubr.msk.f32.gmra.mrb[94].mxu0 %vm185_vm0, %v6915_v46 }
 0xad4   :  { %21188 = vmatprep.mubr.msk.f32.mxu0 %vm26259_vm1, %v26258_v2 }
 0xad7   :  { %21189 = vmatmul.mubr.msk.f32.gmra.mrb[96].mxu0 %vm185_vm0, %v6916_v47  ;;  %v6933_v47 = vld [vmem:[%s33943_s0 + $0x22e] sm:$0xff] }
 0xad8   :  { %21191 = vmatprep.mubr.msk.f32.mxu0 %vm26259_vm1, %v26258_v2 }
 0xadb   :  { %21192 = vmatmul.mubr.msk.f32.gmra.mrb[98].mxu0 %vm185_vm0, %v6917_v48 }
 0xadc   :  { %21194 = vmatprep.mubr.msk.f32.mxu0 %vm26259_vm1, %v26258_v2 }
 0xadf   :  { %21195 = vmatmul.mubr.msk.f32.gmra.mrb[100].mxu0 %vm185_vm0, %v6918_v49 }
 0xae0   :  { %21197 = vmatprep.mubr.msk.f32.mxu0 %vm26259_vm1, %v26258_v2 }
 0xae3   :  { %21198 = vmatmul.mubr.msk.f32.gmra.mrb[102].mxu0 %vm185_vm0, %v6919_v50 }
 0xae4   :  { %21200 = vmatprep.mubr.msk.f32.mxu0 %vm26259_vm1, %v26258_v2 }
 0xae7   :  { %21201 = vmatmul.mubr.msk.f32.gmra.mrb[104].mxu0 %vm185_vm0, %v6920_v51 }
 0xae8   :  { %21203 = vmatprep.mubr.msk.f32.mxu0 %vm26259_vm1, %v26258_v2 }
 0xaea   :  { %v7259_v53 = vpop.f32.mrb[0].mxu0 }
 0xaeb   :  { %v7744_v54 = vmax.f32 %v7259_v53, 0.0  ;;  %v21046_v55 = vpop.f32.mrb[1].mxu0  ;;  %21204 = vmatmul.mubr.msk.f32.gmra.mrb[106].mxu0 %vm185_vm0, %v6921_v52  ;;  %v6934_v52 = vld [vmem:[%s33943_s0 + $0x236] sm:$0xff] }
 0xaec   :  { %21206 = vmatprep.mubr.msk.f32.mxu0 %vm26259_vm1, %v26258_v2 }
 0xaed   :  { %7826 = vst.msk [vmem:[#allocation2] sm:$0xff] %vm7825_vm2, %v7744_v54 }
 0xaee   :  { %v7264_v58 = vpop.f32.mrb[2].mxu0 }
 0xaef   :  { %v7745_v59 = vmax.f32 %v7264_v58, 0.0  ;;  %v21049_v60 = vpop.f32.mrb[3].mxu0  ;;  %21207 = vmatmul.mubr.msk.f32.gmra.mrb[108].mxu0 %vm185_vm0, %v6922_v56  ;;  %v6935_v58 = vld [vmem:[%s33943_s0 + $0x23e] sm:$0xff] }
 0xaf0   :  { %21209 = vmatprep.mubr.msk.f32.mxu0 %vm26259_vm1, %v26258_v2 }
 0xaf1   :  { %7827 = vst.msk [vmem:[#allocation2 + $0x8] sm:$0xff] %vm7825_vm2, %v7745_v59 }
 0xaf2   :  { %v7269_v62 = vpop.f32.mrb[4].mxu0 }
 0xaf3   :  { %v7746_v63 = vmax.f32 %v7269_v62, 0.0  ;;  %v21052_v0 = vpop.f32.mrb[5].mxu0  ;;  %21210 = vmatmul.mubr.msk.f32.gmra.mrb[110].mxu0 %vm185_vm0, %v6923_v61 }
 0xaf4   :  { %21212 = vmatprep.mubr.msk.f32.mxu0 %vm26259_vm1, %v26258_v2 }
 0xaf5   :  { %7828 = vst.msk [vmem:[#allocation2 + $0x10] sm:$0xff] %vm7825_vm2, %v7746_v63  ;;  %v6936_v63 = vld [vmem:[%s33943_s0 + $0x246] sm:$0xff] }
 0xaf6   :  { %v7274_v3 = vpop.f32.mrb[6].mxu0 }
 0xaf7   :  { %v7747_v4 = vmax.f32 %v7274_v3, 0.0  ;;  %v21055_v5 = vpop.f32.mrb[7].mxu0  ;;  %21213 = vmatmul.mubr.msk.f32.gmra.mrb[112].mxu0 %vm185_vm0, %v6924_v1 }
 0xaf8   :  { %v7995_v6 = vld [vmem:[#allocation2 + $0x1] sm:$0xff]  ;;  %21215 = vmatprep.mubr.msk.f32.mxu0 %vm26259_vm1, %v26258_v2  ;;  %v6937_v5 = vld [vmem:[%s33943_s0 + $0x24e] sm:$0xff] }
 0xaf9   :  { %7829 = vst.msk [vmem:[#allocation2 + $0x18] sm:$0xff] %vm7825_vm2, %v7747_v4  ;;  %21292 = vmatmul.mubr.msk.f32.vlgmr.msra.gmra.mrb[6].mxu1 %vm7825_vm2, %v7995_v6 }
 0xafa   :  { %v7279_v8 = vpop.f32.mrb[8].mxu0  ;;  %21294 = vmatprep.mubr.msk.f32.mxu1 %vm26259_vm1, %v26258_v2 }
 0xafb   :  { %v7748_v9 = vmax.f32 %v7279_v8, 0.0  ;;  %v21058_v10 = vpop.f32.mrb[9].mxu0  ;;  %21216 = vmatmul.mubr.msk.f32.gmra.mrb[114].mxu0 %vm185_vm0, %v6925_v7 }
 0xafc   :  { %v7996_v11 = vld [vmem:[#allocation2 + $0x9] sm:$0xff]  ;;  %21218 = vmatprep.mubr.msk.f32.mxu0 %vm26259_vm1, %v26258_v2  ;;  %v6938_v10 = vld [vmem:[%s33943_s0 + $0x256] sm:$0xff] }
 0xafd   :  { %7830 = vst.msk [vmem:[#allocation2 + $0x20] sm:$0xff] %vm7825_vm2, %v7748_v9  ;;  %21295 = vmatmul.mubr.msk.f32.gmra.mrb[8].mxu1 %vm7825_vm2, %v7996_v11 }
 0xafe   :  { %v7284_v13 = vpop.f32.mrb[10].mxu0  ;;  %21297 = vmatprep.mubr.msk.f32.mxu1 %vm26259_vm1, %v26258_v2 }
 0xaff   :  { %v7749_v14 = vmax.f32 %v7284_v13, 0.0  ;;  %v21061_v15 = vpop.f32.mrb[11].mxu0  ;;  %21219 = vmatmul.mubr.msk.f32.gmra.mrb[116].mxu0 %vm185_vm0, %v6926_v12 }
 0xb00   :  { %v7997_v16 = vld [vmem:[#allocation2 + $0x11] sm:$0xff]  ;;  %21221 = vmatprep.mubr.msk.f32.mxu0 %vm26259_vm1, %v26258_v2  ;;  %v6939_v15 = vld [vmem:[%s33943_s0 + $0x25e] sm:$0xff] }
 0xb01   :  { %7831 = vst.msk [vmem:[#allocation2 + $0x28] sm:$0xff] %vm7825_vm2, %v7749_v14  ;;  %21298 = vmatmul.mubr.msk.f32.gmra.mrb[10].mxu1 %vm7825_vm2, %v7997_v16 }
 0xb02   :  { %v7289_v17 = vpop.f32.mrb[12].mxu0  ;;  %21300 = vmatprep.mubr.msk.f32.mxu1 %vm26259_vm1, %v26258_v2 }
 0xb03   :  { %v7750_v18 = vmax.f32 %v7289_v17, 0.0  ;;  %v21064_v19 = vpop.f32.mrb[13].mxu0  ;;  %21222 = vmatmul.mubr.msk.f32.gmra.mrb[118].mxu0 %vm185_vm0, %v6927_v35 }
 0xb04   :  { %v7998_v20 = vld [vmem:[#allocation2 + $0x19] sm:$0xff]  ;;  %21224 = vmatprep.mubr.msk.f32.mxu0 %vm26259_vm1, %v26258_v2  ;;  %v6940_v19 = vld [vmem:[%s33943_s0 + $0x266] sm:$0xff] }
 0xb05   :  { %7832 = vst.msk [vmem:[#allocation2 + $0x30] sm:$0xff] %vm7825_vm2, %v7750_v18  ;;  %21301 = vmatmul.mubr.msk.f32.gmra.mrb[12].mxu1 %vm7825_vm2, %v7998_v20 }
 0xb06   :  { %v7294_v22 = vpop.f32.mrb[14].mxu0  ;;  %21303 = vmatprep.mubr.msk.f32.mxu1 %vm26259_vm1, %v26258_v2 }
 0xb07   :  { %v7751_v24 = vmax.f32 %v7294_v22, 0.0  ;;  %v21067_v25 = vpop.f32.mrb[15].mxu0  ;;  %21225 = vmatmul.mubr.msk.f32.gmra.mrb[120].mxu0 %vm185_vm0, %v6928_v21 }
 0xb08   :  { %v7999_v26 = vld [vmem:[#allocation2 + $0x21] sm:$0xff]  ;;  %21227 = vmatprep.mubr.msk.f32.mxu0 %vm26259_vm1, %v26258_v2  ;;  %v6941_v25 = vld [vmem:[%s33943_s0 + $0x26e] sm:$0xff] }
 0xb09   :  { %7833 = vst.msk [vmem:[#allocation2 + $0x38] sm:$0xff] %vm7825_vm2, %v7751_v24  ;;  %21304 = vmatmul.mubr.msk.f32.gmra.mrb[14].mxu1 %vm7825_vm2, %v7999_v26 }
 0xb0a   :  { %v7299_v28 = vpop.f32.mrb[16].mxu0  ;;  %21306 = vmatprep.mubr.msk.f32.mxu1 %vm26259_vm1, %v26258_v2 }
 0xb0b   :  { %v7752_v29 = vmax.f32 %v7299_v28, 0.0  ;;  %v21070_v30 = vpop.f32.mrb[17].mxu0  ;;  %21228 = vmatmul.mubr.msk.f32.gmra.mrb[122].mxu0 %vm185_vm0, %v6929_v27 }
 0xb0c   :  { %v8000_v31 = vld [vmem:[#allocation2 + $0x29] sm:$0xff]  ;;  %21230 = vmatprep.mubr.msk.f32.mxu0 %vm26259_vm1, %v26258_v2  ;;  %v6942_v30 = vld [vmem:[%s33943_s0 + $0x276] sm:$0xff] }
 0xb0d   :  { %7834 = vst.msk [vmem:[#allocation2 + $0x40] sm:$0xff] %vm7825_vm2, %v7752_v29  ;;  %21307 = vmatmul.mubr.msk.f32.gmra.mrb[16].mxu1 %vm7825_vm2, %v8000_v31 }
 0xb0e   :  { %v7304_v33 = vpop.f32.mrb[18].mxu0  ;;  %21309 = vmatprep.mubr.msk.f32.mxu1 %vm26259_vm1, %v26258_v2 }
 0xb0f   :  { %v7753_v34 = vmax.f32 %v7304_v33, 0.0  ;;  %v21073_v36 = vpop.f32.mrb[19].mxu0  ;;  %21231 = vmatmul.mubr.msk.f32.gmra.mrb[124].mxu0 %vm185_vm0, %v6930_v32 }
 0xb10   :  { %v8001_v37 = vld [vmem:[#allocation2 + $0x31] sm:$0xff]  ;;  %21233 = vmatprep.mubr.msk.f32.mxu0 %vm26259_vm1, %v26258_v2  ;;  %v6943_v36 = vld [vmem:[%s33943_s0 + $0x27e] sm:$0xff] }
 0xb11   :  { %7835 = vst.msk [vmem:[#allocation2 + $0x48] sm:$0xff] %vm7825_vm2, %v7753_v34  ;;  %21310 = vmatmul.mubr.msk.f32.gmra.mrb[18].mxu1 %vm7825_vm2, %v8001_v37  ;;  %v30928_v37 = vpop.f32.mrb[0].mxu1 }
 0xb12   :  { %v7309_v57 = vpop.f32.mrb[20].mxu0  ;;  %21312 = vmatprep.mubr.msk.f32.mxu1 %vm26259_vm1, %v26258_v2 }
 0xb13   :  { %v7754_v39 = vmax.f32 %v7309_v57, 0.0  ;;  %v21076_v40 = vpop.f32.mrb[21].mxu0  ;;  %21234 = vmatmul.mubr.msk.f32.gmra.mrb[126].mxu0 %vm185_vm0, %v6931_v38  ;;  %v19320_v57 = vpop.f32.mrb[1].mxu1 }
 0xb14   :  { %v8002_v41 = vld [vmem:[#allocation2 + $0x39] sm:$0xff]  ;;  %21236 = vmatprep.mubr.msk.f32.mxu0 %vm26259_vm1, %v26258_v2 }
 0xb15   :  { %7836 = vst.msk [vmem:[#allocation2 + $0x50] sm:$0xff] %vm7825_vm2, %v7754_v39  ;;  %21313 = vmatmul.mubr.msk.f32.gmra.mrb[20].mxu1 %vm7825_vm2, %v8002_v41 }
 0xb16   :  { %v7314_v43 = vpop.f32.mrb[22].mxu0  ;;  %21315 = vmatprep.mubr.msk.f32.mxu1 %vm26259_vm1, %v26258_v2 }
 0xb17   :  { %v7755_v44 = vmax.f32 %v7314_v43, 0.0  ;;  %v21079_v45 = vpop.f32.mrb[23].mxu0  ;;  %21237 = vmatmul.mubr.msk.f32.gmra.mrb[128].mxu0 %vm185_vm0, %v6932_v42  ;;  %v6944_v42 = vld [vmem:[%s33943_s0 + $0x286] sm:$0xff]  ;;  %v30940_v43 = vpop.f32.mrb[2].mxu1 }
 0xb18   :  { %v8003_v46 = vld [vmem:[#allocation2 + $0x41] sm:$0xff]  ;;  %21239 = vmatprep.mubr.msk.f32.mxu0 %vm26259_vm1, %v26258_v2  ;;  %v19323_v45 = vpop.f32.mrb[3].mxu1 }
 0xb19   :  { %7837 = vst.msk [vmem:[#allocation2 + $0x58] sm:$0xff] %vm7825_vm2, %v7755_v44  ;;  %21316 = vmatmul.mubr.msk.f32.gmra.mrb[22].mxu1 %vm7825_vm2, %v8003_v46 }
 0xb1a   :  { %v7319_v48 = vpop.f32.mrb[24].mxu0  ;;  %21318 = vmatprep.mubr.msk.f32.mxu1 %vm26259_vm1, %v26258_v2 }
 0xb1b   :  { %v7756_v49 = vmax.f32 %v7319_v48, 0.0  ;;  %v21082_v50 = vpop.f32.mrb[25].mxu0  ;;  %21240 = vmatmul.mubr.msk.f32.gmra.mrb[130].mxu0 %vm185_vm0, %v6933_v47 }
 0xb1c   :  { %v8004_v51 = vld [vmem:[#allocation2 + $0x49] sm:$0xff]  ;;  %21242 = vmatprep.mubr.msk.f32.mxu0 %vm26259_vm1, %v26258_v2  ;;  %v7993_v50 = vld [vmem:[%s33945_s2] sm:$0xff] }
 0xb1d   :  { %7838 = vst.msk [vmem:[#allocation2 + $0x60] sm:$0xff] %vm7825_vm2, %v7756_v49  ;;  %21319 = vmatmul.mubr.msk.f32.gmra.mrb[24].mxu1 %vm7825_vm2, %v8004_v51  ;;  %v6945_v49 = vld [vmem:[%s33943_s0 + $0x28e] sm:$0xff] }
 0xb1e   :  { %v7324_v53 = vpop.f32.mrb[26].mxu0  ;;  %21321 = vmatprep.mubr.msk.f32.mxu1 %vm26259_vm1, %v26258_v2  ;;  %v7994_v51 = vld [vmem:[%s33945_s2 + $0x8] sm:$0xff] }
 0xb1f   :  { %v7757_v54 = vmax.f32 %v7324_v53, 0.0  ;;  %v21085_v55 = vpop.f32.mrb[27].mxu0  ;;  %21243 = vmatmul.mubr.msk.f32.gmra.mrb[132].mxu0 %vm185_vm0, %v6934_v52  ;;  %v30958_v52 = vpop.f32.mrb[4].mxu1 }
 0xb20   :  { %v8005_v56 = vld [vmem:[#allocation2 + $0x51] sm:$0xff]  ;;  %21245 = vmatprep.mubr.msk.f32.mxu0 %vm26259_vm1, %v26258_v2  ;;  %v19326_v55 = vpop.f32.mrb[5].mxu1 }
 0xb21   :  { %7839 = vst.msk [vmem:[#allocation2 + $0x68] sm:$0xff] %vm7825_vm2, %v7757_v54  ;;  %21322 = vmatmul.mubr.msk.f32.gmra.mrb[26].mxu1 %vm7825_vm2, %v8005_v56  ;;  %v23523_v54 = vpack.c.bf16 %v7994_v51, %v7993_v50 }
 0xb22   :  { %v7329_v59 = vpop.f32.mrb[28].mxu0  ;;  %21324 = vmatprep.mubr.msk.f32.mxu1 %vm26259_vm1, %v26258_v2 }
 0xb23   :  { %v7758_v60 = vmax.f32 %v7329_v59, 0.0  ;;  %v21088_v61 = vpop.f32.mrb[29].mxu0  ;;  %21246 = vmatmul.mubr.msk.f32.gmra.mrb[134].mxu0 %vm185_vm0, %v6935_v58  ;;  %23524 = vmatpush3.bf16.msra.mxu1 %v23523_v54 }
 0xb24   :  { %v8006_v62 = vld [vmem:[#allocation2 + $0x59] sm:$0xff]  ;;  %21248 = vmatprep.mubr.msk.f32.mxu0 %vm26259_vm1, %v26258_v2  ;;  %23525 = vmatprep.subr.bf16.mxu1 %v33981_v23 }
 0xb25   :  { %7840 = vst.msk [vmem:[#allocation2 + $0x70] sm:$0xff] %vm7825_vm2, %v7758_v60  ;;  %21325 = vmatmul.mubr.msk.f32.gmra.mrb[28].mxu1 %vm7825_vm2, %v8006_v62  ;;  %v6946_v60 = vld [vmem:[%s33943_s0 + $0x296] sm:$0xff] }
 0xb26   :  { %v7334_v0 = vpop.f32.mrb[30].mxu0  ;;  %21327 = vmatprep.mubr.msk.f32.mxu1 %vm26259_vm1, %v26258_v2 }
 0xb27   :  { %v7759_v1 = vmax.f32 %v7334_v0, 0.0  ;;  %v21091_v3 = vpop.f32.mrb[31].mxu0  ;;  %21249 = vmatmul.mubr.msk.f32.gmra.mrb[136].mxu0 %vm185_vm0, %v6936_v63 }
 0xb28   :  { %v8007_v4 = vld [vmem:[#allocation2 + $0x61] sm:$0xff]  ;;  %21251 = vmatprep.mubr.msk.f32.mxu0 %vm26259_vm1, %v26258_v2 }
 0xb29   :  { %7841 = vst.msk [vmem:[#allocation2 + $0x78] sm:$0xff] %vm7825_vm2, %v7759_v1  ;;  %21328 = vmatmul.mubr.msk.f32.gmra.mrb[30].mxu1 %vm7825_vm2, %v8007_v4  ;;  %v6947_v1 = vld [vmem:[%s33943_s0 + $0x29e] sm:$0xff] }
 0xb2a   :  { %v7339_v6 = vpop.f32.mrb[32].mxu0  ;;  %21330 = vmatprep.mubr.msk.f32.mxu1 %vm26259_vm1, %v26258_v2 }
 0xb2b   :  { %v7760_v7 = vmax.f32 %v7339_v6, 0.0  ;;  %v21094_v8 = vpop.f32.mrb[33].mxu0  ;;  %21252 = vmatmul.mubr.msk.f32.gmra.mrb[138].mxu0 %vm185_vm0, %v6937_v5 }
 0xb2c   :  { %v8008_v9 = vld [vmem:[#allocation2 + $0x69] sm:$0xff]  ;;  %21254 = vmatprep.mubr.msk.f32.mxu0 %vm26259_vm1, %v26258_v2 }
 0xb2d   :  { %7842 = vst.msk [vmem:[#allocation2 + $0x80] sm:$0xff] %vm7825_vm2, %v7760_v7  ;;  %21331 = vmatmul.mubr.msk.f32.gmra.mrb[32].mxu1 %vm7825_vm2, %v8008_v9  ;;  %v6948_v7 = vld [vmem:[%s33943_s0 + $0x2a6] sm:$0xff] }
 0xb2e   :  { %v7344_v11 = vpop.f32.mrb[34].mxu0  ;;  %21333 = vmatprep.mubr.msk.f32.mxu1 %vm26259_vm1, %v26258_v2 }
 0xb2f   :  { %v7761_v12 = vmax.f32 %v7344_v11, 0.0  ;;  %v21097_v13 = vpop.f32.mrb[35].mxu0  ;;  %21255 = vmatmul.mubr.msk.f32.gmra.mrb[140].mxu0 %vm185_vm0, %v6938_v10 }
 0xb30   :  { %v8009_v14 = vld [vmem:[#allocation2 + $0x71] sm:$0xff]  ;;  %21257 = vmatprep.mubr.msk.f32.mxu0 %vm26259_vm1, %v26258_v2 }
 0xb31   :  { %7843 = vst.msk [vmem:[#allocation2 + $0x88] sm:$0xff] %vm7825_vm2, %v7761_v12  ;;  %21334 = vmatmul.mubr.msk.f32.gmra.mrb[34].mxu1 %vm7825_vm2, %v8009_v14 }
 0xb32   :  { %v7349_v16 = vpop.f32.mrb[36].mxu0  ;;  %21336 = vmatprep.mubr.msk.f32.mxu1 %vm26259_vm1, %v26258_v2 }
 0xb33   :  { %v7762_v35 = vmax.f32 %v7349_v16, 0.0  ;;  %v21100_v17 = vpop.f32.mrb[37].mxu0  ;;  %21258 = vmatmul.mubr.msk.f32.gmra.mrb[142].mxu0 %vm185_vm0, %v6939_v15 }
 0xb34   :  { %v8010_v18 = vld [vmem:[#allocation2 + $0x79] sm:$0xff]  ;;  %21260 = vmatprep.mubr.msk.f32.mxu0 %vm26259_vm1, %v26258_v2 }
 0xb35   :  { %7844 = vst.msk [vmem:[#allocation2 + $0x90] sm:$0xff] %vm7825_vm2, %v7762_v35  ;;  %21337 = vmatmul.mubr.msk.f32.gmra.mrb[36].mxu1 %vm7825_vm2, %v8010_v18 }
 0xb36   :  { %v7354_v20 = vpop.f32.mrb[38].mxu0  ;;  %21339 = vmatprep.mubr.msk.f32.mxu1 %vm26259_vm1, %v26258_v2 }
 0xb37   :  { %v7763_v21 = vmax.f32 %v7354_v20, 0.0  ;;  %v21103_v22 = vpop.f32.mrb[39].mxu0  ;;  %21261 = vmatmul.mubr.msk.f32.gmra.mrb[144].mxu0 %vm185_vm0, %v6940_v19 }
 0xb38   :  { %v8011_v24 = vld [vmem:[#allocation2 + $0x81] sm:$0xff]  ;;  %21263 = vmatprep.mubr.msk.f32.mxu0 %vm26259_vm1, %v26258_v2 }
 0xb39   :  { %7845 = vst.msk [vmem:[#allocation2 + $0x98] sm:$0xff] %vm7825_vm2, %v7763_v21  ;;  %21340 = vmatmul.mubr.msk.f32.gmra.mrb[38].mxu1 %vm7825_vm2, %v8011_v24 }
 0xb3a   :  { %v7359_v26 = vpop.f32.mrb[40].mxu0  ;;  %21342 = vmatprep.mubr.msk.f32.mxu1 %vm26259_vm1, %v26258_v2 }
 0xb3b   :  { %v7764_v27 = vmax.f32 %v7359_v26, 0.0  ;;  %v21106_v28 = vpop.f32.mrb[41].mxu0  ;;  %21264 = vmatmul.mubr.msk.f32.gmra.mrb[146].mxu0 %vm185_vm0, %v6941_v25 }
 0xb3c   :  { %v8012_v29 = vld [vmem:[#allocation2 + $0x89] sm:$0xff]  ;;  %21266 = vmatprep.mubr.msk.f32.mxu0 %vm26259_vm1, %v26258_v2 }
 0xb3d   :  { %7846 = vst.msk [vmem:[#allocation2 + $0xa0] sm:$0xff] %vm7825_vm2, %v7764_v27  ;;  %21343 = vmatmul.mubr.msk.f32.gmra.mrb[40].mxu1 %vm7825_vm2, %v8012_v29 }
 0xb3e   :  { %v7364_v31 = vpop.f32.mrb[42].mxu0  ;;  %21345 = vmatprep.mubr.msk.f32.mxu1 %vm26259_vm1, %v26258_v2 }
 0xb3f   :  { %v7765_v32 = vmax.f32 %v7364_v31, 0.0  ;;  %v21109_v33 = vpop.f32.mrb[43].mxu0  ;;  %21267 = vmatmul.mubr.msk.f32.gmra.mrb[148].mxu0 %vm185_vm0, %v6942_v30 }
 0xb40   :  { %v8013_v34 = vld [vmem:[#allocation2 + $0x91] sm:$0xff]  ;;  %21269 = vmatprep.mubr.msk.f32.mxu0 %vm26259_vm1, %v26258_v2 }
 0xb41   :  { %7847 = vst.msk [vmem:[#allocation2 + $0xa8] sm:$0xff] %vm7825_vm2, %v7765_v32  ;;  %21346 = vmatmul.mubr.msk.f32.gmra.mrb[42].mxu1 %vm7825_vm2, %v8013_v34 }
 0xb42   :  { %v7369_v38 = vpop.f32.mrb[44].mxu0  ;;  %21348 = vmatprep.mubr.msk.f32.mxu1 %vm26259_vm1, %v26258_v2 }
 0xb43   :  { %v7766_v39 = vmax.f32 %v7369_v38, 0.0  ;;  %v21112_v40 = vpop.f32.mrb[45].mxu0  ;;  %21270 = vmatmul.mubr.msk.f32.gmra.mrb[150].mxu0 %vm185_vm0, %v6943_v36 }
 0xb44   :  { %v8014_v41 = vld [vmem:[#allocation2 + $0x99] sm:$0xff]  ;;  %21272 = vmatprep.mubr.msk.f32.mxu0 %vm26259_vm1, %v26258_v2 }
 0xb45   :  { %7848 = vst.msk [vmem:[#allocation2 + $0xb0] sm:$0xff] %vm7825_vm2, %v7766_v39  ;;  %21349 = vmatmul.mubr.msk.f32.gmra.mrb[44].mxu1 %vm7825_vm2, %v8014_v41 }
 0xb46   :  { %v7374_v44 = vpop.f32.mrb[46].mxu0  ;;  %21351 = vmatprep.mubr.msk.f32.mxu1 %vm26259_vm1, %v26258_v2 }
 0xb47   :  { %v7767_v46 = vmax.f32 %v7374_v44, 0.0  ;;  %v21115_v47 = vpop.f32.mrb[47].mxu0  ;;  %21273 = vmatmul.mubr.msk.f32.gmra.mrb[152].mxu0 %vm185_vm0, %v6944_v42 }
 0xb48   :  { %v8015_v48 = vld [vmem:[#allocation2 + $0xa1] sm:$0xff]  ;;  %21275 = vmatprep.mubr.msk.f32.mxu0 %vm26259_vm1, %v26258_v2 }
 0xb49   :  { %7849 = vst.msk [vmem:[#allocation2 + $0xb8] sm:$0xff] %vm7825_vm2, %v7767_v46  ;;  %21352 = vmatmul.mubr.msk.f32.gmra.mrb[46].mxu1 %vm7825_vm2, %v8015_v48 }
 0xb4a   :  { %v7379_v53 = vpop.f32.mrb[48].mxu0  ;;  %21354 = vmatprep.mubr.msk.f32.mxu1 %vm26259_vm1, %v26258_v2 }
 0xb4b   :  { %v7768_v56 = vmax.f32 %v7379_v53, 0.0  ;;  %v21118_v58 = vpop.f32.mrb[49].mxu0  ;;  %21276 = vmatmul.mubr.msk.f32.gmra.mrb[154].mxu0 %vm185_vm0, %v6945_v49 }
 0xb4c   :  { %v8016_v59 = vld [vmem:[#allocation2 + $0xa9] sm:$0xff]  ;;  %21278 = vmatprep.mubr.msk.f32.mxu0 %vm26259_vm1, %v26258_v2 }
 0xb4d   :  { %7850 = vst.msk [vmem:[#allocation2 + $0xc0] sm:$0xff] %vm7825_vm2, %v7768_v56  ;;  %21355 = vmatmul.mubr.msk.f32.gmra.mrb[48].mxu1 %vm7825_vm2, %v8016_v59 }
 0xb4e   :  { %v7384_v61 = vpop.f32.mrb[50].mxu0  ;;  %21357 = vmatprep.mubr.msk.f32.mxu1 %vm26259_vm1, %v26258_v2 }
 0xb4f   :  { %v7769_v62 = vmax.f32 %v7384_v61, 0.0  ;;  %v21121_v63 = vpop.f32.mrb[51].mxu0  ;;  %21279 = vmatmul.mubr.msk.f32.gmra.mrb[156].mxu0 %vm185_vm0, %v6946_v60 }
 0xb50   :  { %v8017_v0 = vld [vmem:[#allocation2 + $0xb1] sm:$0xff]  ;;  %21281 = vmatprep.mubr.msk.f32.mxu0 %vm26259_vm1, %v26258_v2 }
 0xb51   :  { %7851 = vst.msk [vmem:[#allocation2 + $0xc8] sm:$0xff] %vm7825_vm2, %v7769_v62  ;;  %21358 = vmatmul.mubr.msk.f32.gmra.mrb[50].mxu1 %vm7825_vm2, %v8017_v0 }
 0xb52   :  { %v7389_v3 = vpop.f32.mrb[52].mxu0  ;;  %21360 = vmatprep.mubr.msk.f32.mxu1 %vm26259_vm1, %v26258_v2 }
 0xb53   :  { %v7770_v4 = vmax.f32 %v7389_v3, 0.0  ;;  %v21124_v5 = vpop.f32.mrb[53].mxu0  ;;  %21282 = vmatmul.mubr.msk.f32.gmra.mrb[158].mxu0 %vm185_vm0, %v6947_v1 }
 0xb54   :  { %v8018_v6 = vld [vmem:[#allocation2 + $0xb9] sm:$0xff]  ;;  %21284 = vmatprep.mubr.msk.f32.mxu0 %vm26259_vm1, %v26258_v2 }
 0xb55   :  { %7852 = vst.msk [vmem:[#allocation2 + $0xd0] sm:$0xff] %vm7825_vm2, %v7770_v4  ;;  %21361 = vmatmul.mubr.msk.f32.gmra.mrb[52].mxu1 %vm7825_vm2, %v8018_v6 }
 0xb56   :  { %v7394_v8 = vpop.f32.mrb[54].mxu0  ;;  %21363 = vmatprep.mubr.msk.f32.mxu1 %vm26259_vm1, %v26258_v2 }
 0xb57   :  { %v7771_v9 = vmax.f32 %v7394_v8, 0.0  ;;  %v21127_v10 = vpop.f32.mrb[55].mxu0  ;;  %21285 = vmatmul.mubr.msk.f32.gmra.mrb[160].mxu0 %vm185_vm0, %v6948_v7 }
 0xb58   :  { %v8019_v11 = vld [vmem:[#allocation2 + $0xc1] sm:$0xff] }
 0xb59   :  { %7853 = vst.msk [vmem:[#allocation2 + $0xd8] sm:$0xff] %vm7825_vm2, %v7771_v9  ;;  %21364 = vmatmul.mubr.msk.f32.gmra.mrb[54].mxu1 %vm7825_vm2, %v8019_v11 }
 0xb5a   :  { %v7399_v12 = vpop.f32.mrb[56].mxu0  ;;  %21366 = vmatprep.mubr.msk.f32.mxu1 %vm26259_vm1, %v26258_v2 }
 0xb5b   :  { %v7772_v13 = vmax.f32 %v7399_v12, 0.0  ;;  %v21130_v14 = vpop.f32.mrb[57].mxu0 }
 0xb5c   :  { %v8020_v15 = vld [vmem:[#allocation2 + $0xc9] sm:$0xff] }
 0xb5d   :  { %7854 = vst.msk [vmem:[#allocation2 + $0xe0] sm:$0xff] %vm7825_vm2, %v7772_v13  ;;  %21367 = vmatmul.mubr.msk.f32.gmra.mrb[56].mxu1 %vm7825_vm2, %v8020_v15 }
 0xb5e   :  { %v7404_v16 = vpop.f32.mrb[58].mxu0  ;;  %21369 = vmatprep.mubr.msk.f32.mxu1 %vm26259_vm1, %v26258_v2 }
 0xb5f   :  { %v7773_v35 = vmax.f32 %v7404_v16, 0.0  ;;  %v21133_v17 = vpop.f32.mrb[59].mxu0 }
 0xb60   :  { %v8021_v18 = vld [vmem:[#allocation2 + $0xd1] sm:$0xff] }
 0xb61   :  { %7855 = vst.msk [vmem:[#allocation2 + $0xe8] sm:$0xff] %vm7825_vm2, %v7773_v35  ;;  %21370 = vmatmul.mubr.msk.f32.gmra.mrb[58].mxu1 %vm7825_vm2, %v8021_v18 }
 0xb62   :  { %v7409_v19 = vpop.f32.mrb[60].mxu0  ;;  %21372 = vmatprep.mubr.msk.f32.mxu1 %vm26259_vm1, %v26258_v2 }
 0xb63   :  { %v7774_v20 = vmax.f32 %v7409_v19, 0.0  ;;  %v21136_v21 = vpop.f32.mrb[61].mxu0 }
 0xb64   :  { %v8022_v22 = vld [vmem:[#allocation2 + $0xd9] sm:$0xff] }
 0xb65   :  { %7856 = vst.msk [vmem:[#allocation2 + $0xf0] sm:$0xff] %vm7825_vm2, %v7774_v20  ;;  %21373 = vmatmul.mubr.msk.f32.gmra.mrb[60].mxu1 %vm7825_vm2, %v8022_v22 }
 0xb66   :  { %v7414_v24 = vpop.f32.mrb[62].mxu0  ;;  %21375 = vmatprep.mubr.msk.f32.mxu1 %vm26259_vm1, %v26258_v2 }
 0xb67   :  { %v7775_v25 = vmax.f32 %v7414_v24, 0.0  ;;  %v21139_v26 = vpop.f32.mrb[63].mxu0 }
 0xb68   :  { %v8023_v27 = vld [vmem:[#allocation2 + $0xe1] sm:$0xff] }
 0xb69   :  { %7857 = vst.msk [vmem:[#allocation2 + $0xf8] sm:$0xff] %vm7825_vm2, %v7775_v25  ;;  %21376 = vmatmul.mubr.msk.f32.gmra.mrb[62].mxu1 %vm7825_vm2, %v8023_v27 }
 0xb6a   :  { %v7419_v28 = vpop.f32.mrb[64].mxu0  ;;  %21378 = vmatprep.mubr.msk.f32.mxu1 %vm26259_vm1, %v26258_v2 }
 0xb6b   :  { %v7776_v29 = vmax.f32 %v7419_v28, 0.0  ;;  %v21142_v30 = vpop.f32.mrb[65].mxu0 }
 0xb6c   :  { %v8024_v31 = vld [vmem:[#allocation2 + $0xe9] sm:$0xff] }
 0xb6d   :  { %7858 = vst.msk [vmem:[#allocation2 + $0x100] sm:$0xff] %vm7825_vm2, %v7776_v29  ;;  %21379 = vmatmul.mubr.msk.f32.gmra.mrb[64].mxu1 %vm7825_vm2, %v8024_v31 }
 0xb6e   :  { %v7424_v32 = vpop.f32.mrb[66].mxu0  ;;  %21381 = vmatprep.mubr.msk.f32.mxu1 %vm26259_vm1, %v26258_v2 }
 0xb6f   :  { %v7777_v33 = vmax.f32 %v7424_v32, 0.0  ;;  %v21145_v34 = vpop.f32.mrb[67].mxu0 }
 0xb70   :  { %v8025_v36 = vld [vmem:[#allocation2 + $0xf1] sm:$0xff] }
 0xb71   :  { %7859 = vst.msk [vmem:[#allocation2 + $0x108] sm:$0xff] %vm7825_vm2, %v7777_v33  ;;  %21382 = vmatmul.mubr.msk.f32.gmra.mrb[66].mxu1 %vm7825_vm2, %v8025_v36 }
 0xb72   :  { %v7429_v38 = vpop.f32.mrb[68].mxu0  ;;  %21384 = vmatprep.mubr.msk.f32.mxu1 %vm26259_vm1, %v26258_v2 }
 0xb73   :  { %v7778_v57 = vmax.f32 %v7429_v38, 0.0  ;;  %v21148_v39 = vpop.f32.mrb[69].mxu0 }
 0xb74   :  { %v8026_v40 = vld [vmem:[#allocation2 + $0xf9] sm:$0xff] }
 0xb75   :  { %7860 = vst.msk [vmem:[#allocation2 + $0x110] sm:$0xff] %vm7825_vm2, %v7778_v57  ;;  %21385 = vmatmul.mubr.msk.f32.gmra.mrb[68].mxu1 %vm7825_vm2, %v8026_v40 }
 0xb76   :  { %v7434_v41 = vpop.f32.mrb[70].mxu0  ;;  %21387 = vmatprep.mubr.msk.f32.mxu1 %vm26259_vm1, %v26258_v2 }
 0xb77   :  { %v7779_v42 = vmax.f32 %v7434_v41, 0.0  ;;  %v21151_v44 = vpop.f32.mrb[71].mxu0 }
 0xb78   :  { %v8027_v45 = vld [vmem:[#allocation2 + $0x101] sm:$0xff] }
 0xb79   :  { %7861 = vst.msk [vmem:[#allocation2 + $0x118] sm:$0xff] %vm7825_vm2, %v7779_v42  ;;  %21388 = vmatmul.mubr.msk.f32.gmra.mrb[70].mxu1 %vm7825_vm2, %v8027_v45 }
 0xb7a   :  { %v7439_v46 = vpop.f32.mrb[72].mxu0  ;;  %21390 = vmatprep.mubr.msk.f32.mxu1 %vm26259_vm1, %v26258_v2 }
 0xb7b   :  { %v7780_v47 = vmax.f32 %v7439_v46, 0.0  ;;  %v21154_v48 = vpop.f32.mrb[73].mxu0 }
 0xb7c   :  { %v8028_v49 = vld [vmem:[#allocation2 + $0x109] sm:$0xff] }
 0xb7d   :  { %7862 = vst.msk [vmem:[#allocation2 + $0x120] sm:$0xff] %vm7825_vm2, %v7780_v47  ;;  %21391 = vmatmul.mubr.msk.f32.gmra.mrb[72].mxu1 %vm7825_vm2, %v8028_v49 }
 0xb7e   :  { %v7444_v50 = vpop.f32.mrb[74].mxu0  ;;  %21393 = vmatprep.mubr.msk.f32.mxu1 %vm26259_vm1, %v26258_v2 }
 0xb7f   :  { %v7781_v51 = vmax.f32 %v7444_v50, 0.0  ;;  %v21157_v53 = vpop.f32.mrb[75].mxu0 }
 0xb80   :  { %v8029_v54 = vld [vmem:[#allocation2 + $0x111] sm:$0xff] }
 0xb81   :  { %7863 = vst.msk [vmem:[#allocation2 + $0x128] sm:$0xff] %vm7825_vm2, %v7781_v51  ;;  %21394 = vmatmul.mubr.msk.f32.gmra.mrb[74].mxu1 %vm7825_vm2, %v8029_v54 }
 0xb82   :  { %v7449_v55 = vpop.f32.mrb[76].mxu0  ;;  %21396 = vmatprep.mubr.msk.f32.mxu1 %vm26259_vm1, %v26258_v2 }
 0xb83   :  { %v7782_v56 = vmax.f32 %v7449_v55, 0.0  ;;  %v21160_v58 = vpop.f32.mrb[77].mxu0 }
 0xb84   :  { %v8030_v59 = vld [vmem:[#allocation2 + $0x119] sm:$0xff] }
 0xb85   :  { %7864 = vst.msk [vmem:[#allocation2 + $0x130] sm:$0xff] %vm7825_vm2, %v7782_v56  ;;  %21397 = vmatmul.mubr.msk.f32.gmra.mrb[76].mxu1 %vm7825_vm2, %v8030_v59 }
 0xb86   :  { %v7454_v60 = vpop.f32.mrb[78].mxu0  ;;  %21399 = vmatprep.mubr.msk.f32.mxu1 %vm26259_vm1, %v26258_v2 }
 0xb87   :  { %v7783_v61 = vmax.f32 %v7454_v60, 0.0  ;;  %v21163_v62 = vpop.f32.mrb[79].mxu0 }
 0xb88   :  { %v8031_v63 = vld [vmem:[#allocation2 + $0x121] sm:$0xff] }
 0xb89   :  { %7865 = vst.msk [vmem:[#allocation2 + $0x138] sm:$0xff] %vm7825_vm2, %v7783_v61  ;;  %21400 = vmatmul.mubr.msk.f32.gmra.mrb[78].mxu1 %vm7825_vm2, %v8031_v63 }
 0xb8a   :  { %v7459_v0 = vpop.f32.mrb[80].mxu0  ;;  %21402 = vmatprep.mubr.msk.f32.mxu1 %vm26259_vm1, %v26258_v2 }
 0xb8b   :  { %v7784_v1 = vmax.f32 %v7459_v0, 0.0  ;;  %v21166_v3 = vpop.f32.mrb[81].mxu0 }
 0xb8c   :  { %v8032_v4 = vld [vmem:[#allocation2 + $0x129] sm:$0xff] }
 0xb8d   :  { %7866 = vst.msk [vmem:[#allocation2 + $0x140] sm:$0xff] %vm7825_vm2, %v7784_v1  ;;  %21403 = vmatmul.mubr.msk.f32.gmra.mrb[80].mxu1 %vm7825_vm2, %v8032_v4 }
 0xb8e   :  { %v7464_v5 = vpop.f32.mrb[82].mxu0  ;;  %21405 = vmatprep.mubr.msk.f32.mxu1 %vm26259_vm1, %v26258_v2 }
 0xb8f   :  { %v7785_v6 = vmax.f32 %v7464_v5, 0.0  ;;  %v21169_v7 = vpop.f32.mrb[83].mxu0 }
 0xb90   :  { %v8033_v8 = vld [vmem:[#allocation2 + $0x131] sm:$0xff] }
 0xb91   :  { %7867 = vst.msk [vmem:[#allocation2 + $0x148] sm:$0xff] %vm7825_vm2, %v7785_v6  ;;  %21406 = vmatmul.mubr.msk.f32.gmra.mrb[82].mxu1 %vm7825_vm2, %v8033_v8 }
 0xb92   :  { %v7469_v9 = vpop.f32.mrb[84].mxu0  ;;  %21408 = vmatprep.mubr.msk.f32.mxu1 %vm26259_vm1, %v26258_v2 }
 0xb93   :  { %v7786_v10 = vmax.f32 %v7469_v9, 0.0  ;;  %v21172_v11 = vpop.f32.mrb[85].mxu0 }
 0xb94   :  { %v8034_v12 = vld [vmem:[#allocation2 + $0x139] sm:$0xff] }
 0xb95   :  { %7868 = vst.msk [vmem:[#allocation2 + $0x150] sm:$0xff] %vm7825_vm2, %v7786_v10  ;;  %21409 = vmatmul.mubr.msk.f32.gmra.mrb[84].mxu1 %vm7825_vm2, %v8034_v12 }
 0xb96   :  { %v7474_v13 = vpop.f32.mrb[86].mxu0  ;;  %21411 = vmatprep.mubr.msk.f32.mxu1 %vm26259_vm1, %v26258_v2 }
 0xb97   :  { %v7787_v14 = vmax.f32 %v7474_v13, 0.0  ;;  %v21175_v15 = vpop.f32.mrb[87].mxu0 }
 0xb98   :  { %v8035_v16 = vld [vmem:[#allocation2 + $0x141] sm:$0xff] }
 0xb99   :  { %7869 = vst.msk [vmem:[#allocation2 + $0x158] sm:$0xff] %vm7825_vm2, %v7787_v14  ;;  %21412 = vmatmul.mubr.msk.f32.gmra.mrb[86].mxu1 %vm7825_vm2, %v8035_v16 }
 0xb9a   :  { %v7479_v35 = vpop.f32.mrb[88].mxu0  ;;  %21414 = vmatprep.mubr.msk.f32.mxu1 %vm26259_vm1, %v26258_v2 }
 0xb9b   :  { %v7788_v17 = vmax.f32 %v7479_v35, 0.0  ;;  %v21178_v18 = vpop.f32.mrb[89].mxu0 }
 0xb9c   :  { %v8036_v19 = vld [vmem:[#allocation2 + $0x149] sm:$0xff] }
 0xb9d   :  { %7870 = vst.msk [vmem:[#allocation2 + $0x160] sm:$0xff] %vm7825_vm2, %v7788_v17  ;;  %21415 = vmatmul.mubr.msk.f32.gmra.mrb[88].mxu1 %vm7825_vm2, %v8036_v19 }
 0xb9e   :  { %v7484_v20 = vpop.f32.mrb[90].mxu0  ;;  %21417 = vmatprep.mubr.msk.f32.mxu1 %vm26259_vm1, %v26258_v2 }
 0xb9f   :  { %v7789_v21 = vmax.f32 %v7484_v20, 0.0  ;;  %v21181_v22 = vpop.f32.mrb[91].mxu0 }
 0xba0   :  { %v8037_v24 = vld [vmem:[#allocation2 + $0x151] sm:$0xff] }
 0xba1   :  { %7871 = vst.msk [vmem:[#allocation2 + $0x168] sm:$0xff] %vm7825_vm2, %v7789_v21  ;;  %21418 = vmatmul.mubr.msk.f32.gmra.mrb[90].mxu1 %vm7825_vm2, %v8037_v24 }
 0xba2   :  { %v7489_v25 = vpop.f32.mrb[92].mxu0  ;;  %21420 = vmatprep.mubr.msk.f32.mxu1 %vm26259_vm1, %v26258_v2 }
 0xba3   :  { %v7790_v26 = vmax.f32 %v7489_v25, 0.0  ;;  %v21184_v27 = vpop.f32.mrb[93].mxu0 }
 0xba4   :  { %v8038_v28 = vld [vmem:[#allocation2 + $0x159] sm:$0xff] }
 0xba5   :  { %7872 = vst.msk [vmem:[#allocation2 + $0x170] sm:$0xff] %vm7825_vm2, %v7790_v26  ;;  %21421 = vmatmul.mubr.msk.f32.gmra.mrb[92].mxu1 %vm7825_vm2, %v8038_v28 }
 0xba6   :  { %v7494_v29 = vpop.f32.mrb[94].mxu0  ;;  %21423 = vmatprep.mubr.msk.f32.mxu1 %vm26259_vm1, %v26258_v2 }
 0xba7   :  { %v7791_v30 = vmax.f32 %v7494_v29, 0.0  ;;  %v21187_v31 = vpop.f32.mrb[95].mxu0 }
 0xba8   :  { %v8039_v32 = vld [vmem:[#allocation2 + $0x161] sm:$0xff] }
 0xba9   :  { %7873 = vst.msk [vmem:[#allocation2 + $0x178] sm:$0xff] %vm7825_vm2, %v7791_v30  ;;  %21424 = vmatmul.mubr.msk.f32.gmra.mrb[94].mxu1 %vm7825_vm2, %v8039_v32 }
 0xbaa   :  { %v7499_v33 = vpop.f32.mrb[96].mxu0  ;;  %21426 = vmatprep.mubr.msk.f32.mxu1 %vm26259_vm1, %v26258_v2 }
 0xbab   :  { %v7792_v34 = vmax.f32 %v7499_v33, 0.0  ;;  %v21190_v36 = vpop.f32.mrb[97].mxu0 }
 0xbac   :  { %v8040_v38 = vld [vmem:[#allocation2 + $0x169] sm:$0xff] }
 0xbad   :  { %7874 = vst.msk [vmem:[#allocation2 + $0x180] sm:$0xff] %vm7825_vm2, %v7792_v34  ;;  %21427 = vmatmul.mubr.msk.f32.gmra.mrb[96].mxu1 %vm7825_vm2, %v8040_v38 }
 0xbae   :  { %v7504_v57 = vpop.f32.mrb[98].mxu0  ;;  %21429 = vmatprep.mubr.msk.f32.mxu1 %vm26259_vm1, %v26258_v2 }
 0xbaf   :  { %v7793_v39 = vmax.f32 %v7504_v57, 0.0  ;;  %v21193_v40 = vpop.f32.mrb[99].mxu0 }
 0xbb0   :  { %v8041_v41 = vld [vmem:[#allocation2 + $0x171] sm:$0xff] }
 0xbb1   :  { %7875 = vst.msk [vmem:[#allocation2 + $0x188] sm:$0xff] %vm7825_vm2, %v7793_v39  ;;  %21430 = vmatmul.mubr.msk.f32.gmra.mrb[98].mxu1 %vm7825_vm2, %v8041_v41 }
 0xbb2   :  { %v7509_v42 = vpop.f32.mrb[100].mxu0  ;;  %21432 = vmatprep.mubr.msk.f32.mxu1 %vm26259_vm1, %v26258_v2 }
 0xbb3   :  { %v7794_v44 = vmax.f32 %v7509_v42, 0.0  ;;  %v21196_v45 = vpop.f32.mrb[101].mxu0 }
 0xbb4   :  { %v8042_v46 = vld [vmem:[#allocation2 + $0x179] sm:$0xff] }
 0xbb5   :  { %7876 = vst.msk [vmem:[#allocation2 + $0x190] sm:$0xff] %vm7825_vm2, %v7794_v44  ;;  %21433 = vmatmul.mubr.msk.f32.gmra.mrb[100].mxu1 %vm7825_vm2, %v8042_v46 }
 0xbb6   :  { %v7514_v47 = vpop.f32.mrb[102].mxu0  ;;  %21435 = vmatprep.mubr.msk.f32.mxu1 %vm26259_vm1, %v26258_v2 }
 0xbb7   :  { %v7795_v48 = vmax.f32 %v7514_v47, 0.0  ;;  %v21199_v49 = vpop.f32.mrb[103].mxu0 }
 0xbb8   :  { %v8043_v50 = vld [vmem:[#allocation2 + $0x181] sm:$0xff] }
 0xbb9   :  { %7877 = vst.msk [vmem:[#allocation2 + $0x198] sm:$0xff] %vm7825_vm2, %v7795_v48  ;;  %21436 = vmatmul.mubr.msk.f32.gmra.mrb[102].mxu1 %vm7825_vm2, %v8043_v50 }
 0xbba   :  { %v7519_v51 = vpop.f32.mrb[104].mxu0  ;;  %21438 = vmatprep.mubr.msk.f32.mxu1 %vm26259_vm1, %v26258_v2 }
 0xbbb   :  { %v7796_v53 = vmax.f32 %v7519_v51, 0.0  ;;  %v21202_v54 = vpop.f32.mrb[105].mxu0 }
 0xbbc   :  { %v8044_v55 = vld [vmem:[#allocation2 + $0x189] sm:$0xff] }
 0xbbd   :  { %7878 = vst.msk [vmem:[#allocation2 + $0x1a0] sm:$0xff] %vm7825_vm2, %v7796_v53  ;;  %21439 = vmatmul.mubr.msk.f32.gmra.mrb[104].mxu1 %vm7825_vm2, %v8044_v55 }
 0xbbe   :  { %v7524_v56 = vpop.f32.mrb[106].mxu0  ;;  %21441 = vmatprep.mubr.msk.f32.mxu1 %vm26259_vm1, %v26258_v2 }
 0xbbf   :  { %v7797_v58 = vmax.f32 %v7524_v56, 0.0  ;;  %v21205_v59 = vpop.f32.mrb[107].mxu0 }
 0xbc0   :  { %v8045_v60 = vld [vmem:[#allocation2 + $0x191] sm:$0xff] }
 0xbc1   :  { %7879 = vst.msk [vmem:[#allocation2 + $0x1a8] sm:$0xff] %vm7825_vm2, %v7797_v58  ;;  %21442 = vmatmul.mubr.msk.f32.gmra.mrb[106].mxu1 %vm7825_vm2, %v8045_v60 }
 0xbc2   :  { %v7529_v61 = vpop.f32.mrb[108].mxu0  ;;  %21444 = vmatprep.mubr.msk.f32.mxu1 %vm26259_vm1, %v26258_v2 }
 0xbc3   :  { %v7798_v62 = vmax.f32 %v7529_v61, 0.0  ;;  %v21208_v63 = vpop.f32.mrb[109].mxu0 }
 0xbc4   :  { %v8046_v0 = vld [vmem:[#allocation2 + $0x199] sm:$0xff] }
 0xbc5   :  { %7880 = vst.msk [vmem:[#allocation2 + $0x1b0] sm:$0xff] %vm7825_vm2, %v7798_v62  ;;  %21445 = vmatmul.mubr.msk.f32.gmra.mrb[108].mxu1 %vm7825_vm2, %v8046_v0 }
 0xbc6   :  { %v7534_v1 = vpop.f32.mrb[110].mxu0  ;;  %21447 = vmatprep.mubr.msk.f32.mxu1 %vm26259_vm1, %v26258_v2 }
 0xbc7   :  { %v7799_v3 = vmax.f32 %v7534_v1, 0.0  ;;  %v21211_v4 = vpop.f32.mrb[111].mxu0 }
 0xbc8   :  { %v8047_v5 = vld [vmem:[#allocation2 + $0x1a1] sm:$0xff] }
 0xbc9   :  { %7881 = vst.msk [vmem:[#allocation2 + $0x1b8] sm:$0xff] %vm7825_vm2, %v7799_v3  ;;  %21448 = vmatmul.mubr.msk.f32.gmra.mrb[110].mxu1 %vm7825_vm2, %v8047_v5 }
 0xbca   :  { %v7539_v6 = vpop.f32.mrb[112].mxu0  ;;  %21450 = vmatprep.mubr.msk.f32.mxu1 %vm26259_vm1, %v26258_v2 }
 0xbcb   :  { %v7800_v7 = vmax.f32 %v7539_v6, 0.0  ;;  %v21214_v8 = vpop.f32.mrb[113].mxu0 }
 0xbcc   :  { %v8048_v9 = vld [vmem:[#allocation2 + $0x1a9] sm:$0xff] }
 0xbcd   :  { %7882 = vst.msk [vmem:[#allocation2 + $0x1c0] sm:$0xff] %vm7825_vm2, %v7800_v7  ;;  %21451 = vmatmul.mubr.msk.f32.gmra.mrb[112].mxu1 %vm7825_vm2, %v8048_v9 }
 0xbce   :  { %v7544_v10 = vpop.f32.mrb[114].mxu0  ;;  %21453 = vmatprep.mubr.msk.f32.mxu1 %vm26259_vm1, %v26258_v2 }
 0xbcf   :  { %v7801_v11 = vmax.f32 %v7544_v10, 0.0  ;;  %v21217_v12 = vpop.f32.mrb[115].mxu0 }
 0xbd0   :  { %v8049_v13 = vld [vmem:[#allocation2 + $0x1b1] sm:$0xff] }
 0xbd1   :  { %7883 = vst.msk [vmem:[#allocation2 + $0x1c8] sm:$0xff] %vm7825_vm2, %v7801_v11  ;;  %21454 = vmatmul.mubr.msk.f32.gmra.mrb[114].mxu1 %vm7825_vm2, %v8049_v13 }
 0xbd2   :  { %v7549_v14 = vpop.f32.mrb[116].mxu0  ;;  %21456 = vmatprep.mubr.msk.f32.mxu1 %vm26259_vm1, %v26258_v2 }
 0xbd3   :  { %v7802_v15 = vmax.f32 %v7549_v14, 0.0  ;;  %v21220_v16 = vpop.f32.mrb[117].mxu0 }
 0xbd4   :  { %v8050_v35 = vld [vmem:[#allocation2 + $0x1b9] sm:$0xff] }
 0xbd5   :  { %7884 = vst.msk [vmem:[#allocation2 + $0x1d0] sm:$0xff] %vm7825_vm2, %v7802_v15  ;;  %21457 = vmatmul.mubr.msk.f32.gmra.mrb[116].mxu1 %vm7825_vm2, %v8050_v35 }
 0xbd6   :  { %v7554_v17 = vpop.f32.mrb[118].mxu0  ;;  %21459 = vmatprep.mubr.msk.f32.mxu1 %vm26259_vm1, %v26258_v2 }
 0xbd7   :  { %v7803_v18 = vmax.f32 %v7554_v17, 0.0  ;;  %v21223_v19 = vpop.f32.mrb[119].mxu0 }
 0xbd8   :  { %v8051_v20 = vld [vmem:[#allocation2 + $0x1c1] sm:$0xff] }
 0xbd9   :  { %7885 = vst.msk [vmem:[#allocation2 + $0x1d8] sm:$0xff] %vm7825_vm2, %v7803_v18  ;;  %21460 = vmatmul.mubr.msk.f32.gmra.mrb[118].mxu1 %vm7825_vm2, %v8051_v20 }
 0xbda   :  { %v7559_v21 = vpop.f32.mrb[120].mxu0  ;;  %21462 = vmatprep.mubr.msk.f32.mxu1 %vm26259_vm1, %v26258_v2 }
 0xbdb   :  { %v7804_v22 = vmax.f32 %v7559_v21, 0.0  ;;  %v21226_v24 = vpop.f32.mrb[121].mxu0 }
 0xbdc   :  { %v8052_v25 = vld [vmem:[#allocation2 + $0x1c9] sm:$0xff] }
 0xbdd   :  { %7886 = vst.msk [vmem:[#allocation2 + $0x1e0] sm:$0xff] %vm7825_vm2, %v7804_v22  ;;  %21463 = vmatmul.mubr.msk.f32.gmra.mrb[120].mxu1 %vm7825_vm2, %v8052_v25 }
 0xbde   :  { %v7564_v26 = vpop.f32.mrb[122].mxu0  ;;  %21465 = vmatprep.mubr.msk.f32.mxu1 %vm26259_vm1, %v26258_v2 }
 0xbdf   :  { %v7805_v27 = vmax.f32 %v7564_v26, 0.0  ;;  %v21229_v28 = vpop.f32.mrb[123].mxu0 }
 0xbe0   :  { %v8053_v29 = vld [vmem:[#allocation2 + $0x1d1] sm:$0xff] }
 0xbe1   :  { %7887 = vst.msk [vmem:[#allocation2 + $0x1e8] sm:$0xff] %vm7825_vm2, %v7805_v27  ;;  %21466 = vmatmul.mubr.msk.f32.gmra.mrb[122].mxu1 %vm7825_vm2, %v8053_v29 }
 0xbe2   :  { %v7569_v30 = vpop.f32.mrb[124].mxu0  ;;  %21468 = vmatprep.mubr.msk.f32.mxu1 %vm26259_vm1, %v26258_v2 }
 0xbe3   :  { %v7806_v31 = vmax.f32 %v7569_v30, 0.0  ;;  %v21232_v32 = vpop.f32.mrb[125].mxu0 }
 0xbe4   :  { %v8054_v33 = vld [vmem:[#allocation2 + $0x1d9] sm:$0xff] }
 0xbe5   :  { %7888 = vst.msk [vmem:[#allocation2 + $0x1f0] sm:$0xff] %vm7825_vm2, %v7806_v31  ;;  %21469 = vmatmul.mubr.msk.f32.gmra.mrb[124].mxu1 %vm7825_vm2, %v8054_v33 }
 0xbe6   :  { %v7574_v34 = vpop.f32.mrb[126].mxu0  ;;  %21471 = vmatprep.mubr.msk.f32.mxu1 %vm26259_vm1, %v26258_v2 }
 0xbe7   :  { %v7807_v36 = vmax.f32 %v7574_v34, 0.0  ;;  %v21235_v38 = vpop.f32.mrb[127].mxu0 }
 0xbe8   :  { %v8055_v57 = vld [vmem:[#allocation2 + $0x1e1] sm:$0xff] }
 0xbe9   :  { %7889 = vst.msk [vmem:[#allocation2 + $0x1f8] sm:$0xff] %vm7825_vm2, %v7807_v36  ;;  %21472 = vmatmul.mubr.msk.f32.gmra.mrb[126].mxu1 %vm7825_vm2, %v8055_v57 }
 0xbea   :  { %v7579_v39 = vpop.f32.mrb[128].mxu0  ;;  %21474 = vmatprep.mubr.msk.f32.mxu1 %vm26259_vm1, %v26258_v2 }
 0xbeb   :  { %v7808_v40 = vmax.f32 %v7579_v39, 0.0  ;;  %v21238_v41 = vpop.f32.mrb[129].mxu0 }
 0xbec   :  { %v8056_v42 = vld [vmem:[#allocation2 + $0x1e9] sm:$0xff] }
 0xbed   :  { %7890 = vst.msk [vmem:[#allocation2 + $0x200] sm:$0xff] %vm7825_vm2, %v7808_v40  ;;  %21475 = vmatmul.mubr.msk.f32.gmra.mrb[128].mxu1 %vm7825_vm2, %v8056_v42 }
 0xbee   :  { %v7584_v44 = vpop.f32.mrb[130].mxu0  ;;  %21477 = vmatprep.mubr.msk.f32.mxu1 %vm26259_vm1, %v26258_v2 }
 0xbef   :  { %v7809_v45 = vmax.f32 %v7584_v44, 0.0  ;;  %v21241_v46 = vpop.f32.mrb[131].mxu0 }
 0xbf0   :  { %v8057_v47 = vld [vmem:[#allocation2 + $0x1f1] sm:$0xff] }
 0xbf1   :  { %7891 = vst.msk [vmem:[#allocation2 + $0x208] sm:$0xff] %vm7825_vm2, %v7809_v45  ;;  %21478 = vmatmul.mubr.msk.f32.gmra.mrb[130].mxu1 %vm7825_vm2, %v8057_v47 }
 0xbf2   :  { %v7589_v48 = vpop.f32.mrb[132].mxu0  ;;  %21480 = vmatprep.mubr.msk.f32.mxu1 %vm26259_vm1, %v26258_v2 }
 0xbf3   :  { %v7810_v49 = vmax.f32 %v7589_v48, 0.0  ;;  %v21244_v50 = vpop.f32.mrb[133].mxu0 }
 0xbf4   :  { %v8058_v51 = vld [vmem:[#allocation2 + $0x1f9] sm:$0xff] }
 0xbf5   :  { %7892 = vst.msk [vmem:[#allocation2 + $0x210] sm:$0xff] %vm7825_vm2, %v7810_v49  ;;  %21481 = vmatmul.mubr.msk.f32.gmra.mrb[132].mxu1 %vm7825_vm2, %v8058_v51 }
 0xbf6   :  { %v7594_v53 = vpop.f32.mrb[134].mxu0  ;;  %21483 = vmatprep.mubr.msk.f32.mxu1 %vm26259_vm1, %v26258_v2 }
 0xbf7   :  { %v7811_v54 = vmax.f32 %v7594_v53, 0.0  ;;  %v21247_v55 = vpop.f32.mrb[135].mxu0  ;;  %v7912_v53 = vld [vmem:[#allocation2] sm:$0xff] }
 0xbf8   :  { %v8059_v56 = vld [vmem:[#allocation2 + $0x201] sm:$0xff]  ;;  %v7914_v55 = vld [vmem:[#allocation2 + $0x10] sm:$0xff] }
 0xbf9   :  { %7893 = vst.msk [vmem:[#allocation2 + $0x218] sm:$0xff] %vm7825_vm2, %v7811_v54  ;;  %21484 = vmatmul.mubr.msk.f32.gmra.mrb[134].mxu1 %vm7825_vm2, %v8059_v56  ;;  %v7913_v54 = vld [vmem:[#allocation2 + $0x8] sm:$0xff]  ;;  %v7915_v56 = vld [vmem:[#allocation2 + $0x18] sm:$0xff] }
 0xbfa   :  { %v7599_v58 = vpop.f32.mrb[136].mxu0  ;;  %21486 = vmatprep.mubr.msk.f32.mxu1 %vm26259_vm1, %v26258_v2 }
 0xbfb   :  { %v7812_v59 = vmax.f32 %v7599_v58, 0.0  ;;  %v21250_v60 = vpop.f32.mrb[137].mxu0  ;;  %v7916_v58 = vld [vmem:[#allocation2 + $0x20] sm:$0xff] }
 0xbfc   :  { %v8060_v61 = vld [vmem:[#allocation2 + $0x209] sm:$0xff] }
 0xbfd   :  { %7894 = vst.msk [vmem:[#allocation2 + $0x220] sm:$0xff] %vm7825_vm2, %v7812_v59  ;;  %21487 = vmatmul.mubr.msk.f32.gmra.mrb[136].mxu1 %vm7825_vm2, %v8060_v61  ;;  %v7917_v59 = vld [vmem:[#allocation2 + $0x28] sm:$0xff]  ;;  %v7918_v60 = vld [vmem:[#allocation2 + $0x30] sm:$0xff]  ;;  %v7919_v61 = vld [vmem:[#allocation2 + $0x38] sm:$0xff] }
 0xbfe   :  { %v7604_v62 = vpop.f32.mrb[138].mxu0  ;;  %21489 = vmatprep.mubr.msk.f32.mxu1 %vm26259_vm1, %v26258_v2 }
 0xbff   :  { %v7813_v63 = vmax.f32 %v7604_v62, 0.0  ;;  %v21253_v0 = vpop.f32.mrb[139].mxu0  ;;  %v7920_v62 = vld [vmem:[#allocation2 + $0x40] sm:$0xff] }
 0xc00   :  { %v8061_v1 = vld [vmem:[#allocation2 + $0x211] sm:$0xff] }
 0xc01   :  { %7895 = vst.msk [vmem:[#allocation2 + $0x228] sm:$0xff] %vm7825_vm2, %v7813_v63  ;;  %21490 = vmatmul.mubr.msk.f32.gmra.mrb[138].mxu1 %vm7825_vm2, %v8061_v1  ;;  %v7921_v63 = vld [vmem:[#allocation2 + $0x48] sm:$0xff]  ;;  %v7922_v0 = vld [vmem:[#allocation2 + $0x50] sm:$0xff]  ;;  %v7923_v1 = vld [vmem:[#allocation2 + $0x58] sm:$0xff] }
 0xc02   :  { %v7609_v3 = vpop.f32.mrb[140].mxu0  ;;  %21492 = vmatprep.mubr.msk.f32.mxu1 %vm26259_vm1, %v26258_v2 }
 0xc03   :  { %v7814_v4 = vmax.f32 %v7609_v3, 0.0  ;;  %v21256_v5 = vpop.f32.mrb[141].mxu0  ;;  %v7924_v3 = vld [vmem:[#allocation2 + $0x60] sm:$0xff] }
 0xc04   :  { %v8062_v6 = vld [vmem:[#allocation2 + $0x219] sm:$0xff]  ;;  %v7926_v5 = vld [vmem:[#allocation2 + $0x70] sm:$0xff] }
 0xc05   :  { %7896 = vst.msk [vmem:[#allocation2 + $0x230] sm:$0xff] %vm7825_vm2, %v7814_v4  ;;  %21493 = vmatmul.mubr.msk.f32.gmra.mrb[140].mxu1 %vm7825_vm2, %v8062_v6  ;;  %v7925_v4 = vld [vmem:[#allocation2 + $0x68] sm:$0xff]  ;;  %v7927_v6 = vld [vmem:[#allocation2 + $0x78] sm:$0xff] }
 0xc06   :  { %v7614_v7 = vpop.f32.mrb[142].mxu0  ;;  %21495 = vmatprep.mubr.msk.f32.mxu1 %vm26259_vm1, %v26258_v2 }
 0xc07   :  { %v7815_v8 = vmax.f32 %v7614_v7, 0.0  ;;  %v21259_v9 = vpop.f32.mrb[143].mxu0  ;;  %v7928_v7 = vld [vmem:[#allocation2 + $0x80] sm:$0xff] }
 0xc08   :  { %v8063_v10 = vld [vmem:[#allocation2 + $0x221] sm:$0xff]  ;;  %v7930_v9 = vld [vmem:[#allocation2 + $0x90] sm:$0xff] }
 0xc09   :  { %7897 = vst.msk [vmem:[#allocation2 + $0x238] sm:$0xff] %vm7825_vm2, %v7815_v8  ;;  %21496 = vmatmul.mubr.msk.f32.gmra.mrb[142].mxu1 %vm7825_vm2, %v8063_v10  ;;  %v7929_v8 = vld [vmem:[#allocation2 + $0x88] sm:$0xff]  ;;  %v7931_v10 = vld [vmem:[#allocation2 + $0x98] sm:$0xff] }
 0xc0a   :  { %v7619_v11 = vpop.f32.mrb[144].mxu0  ;;  %21498 = vmatprep.mubr.msk.f32.mxu1 %vm26259_vm1, %v26258_v2 }
 0xc0b   :  { %v7816_v12 = vmax.f32 %v7619_v11, 0.0  ;;  %v21262_v13 = vpop.f32.mrb[145].mxu0  ;;  %v9585_v11 = vld [vmem:[%s33945_s2 + $0x20] sm:$0xff] }
 0xc0c   :  { %v8064_v14 = vld [vmem:[#allocation2 + $0x229] sm:$0xff] }
 0xc0d   :  { %7898 = vst.msk [vmem:[#allocation2 + $0x240] sm:$0xff] %vm7825_vm2, %v7816_v12  ;;  %21499 = vmatmul.mubr.msk.f32.gmra.mrb[144].mxu1 %vm7825_vm2, %v8064_v14  ;;  %v9586_v12 = vld [vmem:[%s33945_s2 + $0x28] sm:$0xff]  ;;  %v7932_v14 = vld [vmem:[#allocation2 + $0xa0] sm:$0xff] }
 0xc0e   :  { %v7624_v15 = vpop.f32.mrb[146].mxu0  ;;  %21501 = vmatprep.mubr.msk.f32.mxu1 %vm26259_vm1, %v26258_v2  ;;  %v23526_v13 = vpack.c.bf16 %v9586_v12, %v9585_v11 }
 0xc0f   :  { %v7817_v16 = vmax.f32 %v7624_v15, 0.0  ;;  %v21265_v35 = vpop.f32.mrb[147].mxu0  ;;  %v7933_v15 = vld [vmem:[#allocation2 + $0xa8] sm:$0xff] }
 0xc10   :  { %v8065_v17 = vld [vmem:[#allocation2 + $0x231] sm:$0xff] }
 0xc11   :  { %7899 = vst.msk [vmem:[#allocation2 + $0x248] sm:$0xff] %vm7825_vm2, %v7817_v16  ;;  %21502 = vmatmul.mubr.msk.f32.gmra.mrb[146].mxu1 %vm7825_vm2, %v8065_v17  ;;  %v7934_v16 = vld [vmem:[#allocation2 + $0xb0] sm:$0xff]  ;;  %v7935_v35 = vld [vmem:[#allocation2 + $0xb8] sm:$0xff]  ;;  %v7936_v17 = vld [vmem:[#allocation2 + $0xc0] sm:$0xff] }
 0xc12   :  { %v7629_v18 = vpop.f32.mrb[148].mxu0  ;;  %21504 = vmatprep.mubr.msk.f32.mxu1 %vm26259_vm1, %v26258_v2 }
 0xc13   :  { %v7818_v19 = vmax.f32 %v7629_v18, 0.0  ;;  %v21268_v20 = vpop.f32.mrb[149].mxu0  ;;  %v7937_v18 = vld [vmem:[#allocation2 + $0xc8] sm:$0xff] }
 0xc14   :  { %v8066_v21 = vld [vmem:[#allocation2 + $0x239] sm:$0xff] }
 0xc15   :  { %7900 = vst.msk [vmem:[#allocation2 + $0x250] sm:$0xff] %vm7825_vm2, %v7818_v19  ;;  %21505 = vmatmul.mubr.msk.f32.gmra.mrb[148].mxu1 %vm7825_vm2, %v8066_v21  ;;  %v7938_v19 = vld [vmem:[#allocation2 + $0xd0] sm:$0xff]  ;;  %v7939_v20 = vld [vmem:[#allocation2 + $0xd8] sm:$0xff]  ;;  %v7940_v21 = vld [vmem:[#allocation2 + $0xe0] sm:$0xff] }
 0xc16   :  { %v7634_v22 = vpop.f32.mrb[150].mxu0  ;;  %21507 = vmatprep.mubr.msk.f32.mxu1 %vm26259_vm1, %v26258_v2 }
 0xc17   :  { %v7819_v24 = vmax.f32 %v7634_v22, 0.0  ;;  %v21271_v25 = vpop.f32.mrb[151].mxu0  ;;  %v7941_v22 = vld [vmem:[#allocation2 + $0xe8] sm:$0xff] }
 0xc18   :  { %v8067_v26 = vld [vmem:[#allocation2 + $0x241] sm:$0xff]  ;;  %v7943_v25 = vld [vmem:[#allocation2 + $0xf8] sm:$0xff] }
 0xc19   :  { %7901 = vst.msk [vmem:[#allocation2 + $0x258] sm:$0xff] %vm7825_vm2, %v7819_v24  ;;  %21508 = vmatmul.mubr.msk.f32.gmra.mrb[150].mxu1 %vm7825_vm2, %v8067_v26  ;;  %v7942_v24 = vld [vmem:[#allocation2 + $0xf0] sm:$0xff]  ;;  %v7944_v26 = vld [vmem:[#allocation2 + $0x100] sm:$0xff] }
 0xc1a   :  { %v7639_v27 = vpop.f32.mrb[152].mxu0  ;;  %21510 = vmatprep.mubr.msk.f32.mxu1 %vm26259_vm1, %v26258_v2 }
 0xc1b   :  { %v7820_v28 = vmax.f32 %v7639_v27, 0.0  ;;  %v21274_v29 = vpop.f32.mrb[153].mxu0  ;;  %v7945_v27 = vld [vmem:[#allocation2 + $0x108] sm:$0xff] }
 0xc1c   :  { %v8068_v30 = vld [vmem:[#allocation2 + $0x249] sm:$0xff]  ;;  %v7947_v29 = vld [vmem:[#allocation2 + $0x118] sm:$0xff] }
 0xc1d   :  { %7902 = vst.msk [vmem:[#allocation2 + $0x260] sm:$0xff] %vm7825_vm2, %v7820_v28  ;;  %21511 = vmatmul.mubr.msk.f32.gmra.mrb[152].mxu1 %vm7825_vm2, %v8068_v30  ;;  %v7946_v28 = vld [vmem:[#allocation2 + $0x110] sm:$0xff]  ;;  %v7948_v30 = vld [vmem:[#allocation2 + $0x120] sm:$0xff] }
 0xc1e   :  { %v7644_v31 = vpop.f32.mrb[154].mxu0  ;;  %21513 = vmatprep.mubr.msk.f32.mxu1 %vm26259_vm1, %v26258_v2 }
 0xc1f   :  { %v7821_v32 = vmax.f32 %v7644_v31, 0.0  ;;  %v21277_v33 = vpop.f32.mrb[155].mxu0  ;;  %v7949_v31 = vld [vmem:[#allocation2 + $0x128] sm:$0xff] }
 0xc20   :  { %v8069_v34 = vld [vmem:[#allocation2 + $0x251] sm:$0xff] }
 0xc21   :  { %7903 = vst.msk [vmem:[#allocation2 + $0x268] sm:$0xff] %vm7825_vm2, %v7821_v32  ;;  %21514 = vmatmul.mubr.msk.f32.gmra.mrb[154].mxu1 %vm7825_vm2, %v8069_v34  ;;  %v7950_v32 = vld [vmem:[#allocation2 + $0x130] sm:$0xff]  ;;  %v7951_v33 = vld [vmem:[#allocation2 + $0x138] sm:$0xff]  ;;  %v7952_v34 = vld [vmem:[#allocation2 + $0x140] sm:$0xff] }
 0xc22   :  { %v7649_v36 = vpop.f32.mrb[156].mxu0  ;;  %21516 = vmatprep.mubr.msk.f32.mxu1 %vm26259_vm1, %v26258_v2 }
 0xc23   :  { %v23639_v38 = vadd.f32 %v7649_v36, %v30928_v37  ;;  %v21280_v57 = vpop.f32.mrb[157].mxu0  ;;  %v7953_v36 = vld [vmem:[#allocation2 + $0x148] sm:$0xff] }
 0xc24   :  { %v8070_v39 = vld [vmem:[#allocation2 + $0x259] sm:$0xff] }
 0xc25   :  { %v7822_v40 = vmax.f32 %v23639_v38, 0.0  ;;  %21517 = vmatmul.mubr.msk.f32.gmra.mrb[156].mxu1 %vm7825_vm2, %v8070_v39  ;;  %v7954_v38 = vld [vmem:[#allocation2 + $0x150] sm:$0xff]  ;;  %v7955_v57 = vld [vmem:[#allocation2 + $0x158] sm:$0xff]  ;;  %v7956_v39 = vld [vmem:[#allocation2 + $0x160] sm:$0xff] }
 0xc26   :  { %v7654_v41 = vpop.f32.mrb[158].mxu0  ;;  %21519 = vmatprep.mubr.msk.f32.mxu1 %vm26259_vm1, %v26258_v2 }
 0xc27   :  { %7904 = vst.msk [vmem:[#allocation2 + $0x270] sm:$0xff] %vm7825_vm2, %v7822_v40  ;;  %v23640_v42 = vadd.f32 %v7654_v41, %v30940_v43  ;;  %v21283_v44 = vpop.f32.mrb[159].mxu0  ;;  %v7957_v40 = vld [vmem:[#allocation2 + $0x168] sm:$0xff]  ;;  %v7958_v41 = vld [vmem:[#allocation2 + $0x170] sm:$0xff] }
 0xc28   :  { %v8071_v45 = vld [vmem:[#allocation2 + $0x261] sm:$0xff] }
 0xc29   :  { %v7823_v46 = vmax.f32 %v23640_v42, 0.0  ;;  %21520 = vmatmul.mubr.msk.f32.gmra.mrb[158].mxu1 %vm7825_vm2, %v8071_v45  ;;  %v7959_v42 = vld [vmem:[#allocation2 + $0x178] sm:$0xff]  ;;  %v7960_v44 = vld [vmem:[#allocation2 + $0x180] sm:$0xff]  ;;  %v7961_v45 = vld [vmem:[#allocation2 + $0x188] sm:$0xff] }
 0xc2a   :  { %v7659_v47 = vpop.f32.mrb[160].mxu0  ;;  %21522 = vmatprep.mubr.msk.f32.mxu1 %vm26259_vm1, %v26258_v2 }
 0xc2b   :  { %7905 = vst.msk [vmem:[#allocation2 + $0x278] sm:$0xff] %vm7825_vm2, %v7823_v46  ;;  %v23641_v37 = vadd.f32 %v7659_v47, %v30958_v52  ;;  %v21286_v48 = vpop.f32.mrb[161].mxu0  ;;  %v7962_v46 = vld [vmem:[#allocation2 + $0x190] sm:$0xff]  ;;  %v7963_v47 = vld [vmem:[#allocation2 + $0x198] sm:$0xff] }
 0xc2c   :  { %v7965_v48 = vld [vmem:[#allocation2 + $0x1a8] sm:$0xff] }
 0xc2d   :  { %v7824_v49 = vmax.f32 %v23641_v37, 0.0  ;;  %v7964_v37 = vld [vmem:[#allocation2 + $0x1a0] sm:$0xff] }
 0xc2e   :  { %v8072_v50 = vld [vmem:[#allocation2 + $0x269] sm:$0xff] }
 0xc2f   :  { %7906 = vst.msk [vmem:[#allocation2 + $0x280] sm:$0xff] %vm7825_vm2, %v7824_v49  ;;  %21523 = vmatmul.mubr.msk.f32.gmra.mrb[160].mxu1 %vm7825_vm2, %v8072_v50  ;;  %v7966_v49 = vld [vmem:[#allocation2 + $0x1b0] sm:$0xff]  ;;  %v7967_v50 = vld [vmem:[#allocation2 + $0x1b8] sm:$0xff] }
 0xc30   :  { %21525 = vmatprep.mubr.msk.f32.mxu1 %vm26259_vm1, %v26258_v2 }
 0xc32   :  { %v8073_v43 = vld [vmem:[#allocation2 + $0x271] sm:$0xff] }
 0xc33   :  { %21526 = vmatmul.mubr.msk.f32.gmra.mrb[162].mxu1 %vm7825_vm2, %v8073_v43  ;;  %v7968_v43 = vld [vmem:[#allocation2 + $0x1c0] sm:$0xff]  ;;  %v7991_v11 = vld [vmem:[#allocation2 + $0x278] sm:$0xff] }
 0xc34   :  { %21528 = vmatprep.mubr.msk.f32.mxu1 %vm26259_vm1, %v26258_v2 }
 0xc36   :  { %v8074_v51 = vld [vmem:[#allocation2 + $0x279] sm:$0xff]  ;;  %v8075_v52 = vld [vmem:[#allocation2 + $0x281] sm:$0xff] }
 0xc37   :  { %21529 = vmatmul.mubr.msk.f32.gmra.mrb[164].mxu1 %vm7825_vm2, %v8074_v51  ;;  %v7969_v51 = vld [vmem:[#allocation2 + $0x1c8] sm:$0xff]  ;;  %v7992_v12 = vld [vmem:[#allocation2 + $0x280] sm:$0xff] }
 0xc38   :  { %21531 = vmatprep.mubr.msk.f32.mxu1 %vm26259_vm1, %v26258_v2 }
 0xc3b   :  { %21532 = vmatmul.mubr.msk.f32.gmra.mrb[166].mxu1 %vm7825_vm2, %v8075_v52  ;;  %v7970_v52 = vld [vmem:[#allocation2 + $0x1d0] sm:$0xff] }
 0xc3c   :  { %21538 = vmatprep.mubr.msk.f32.mxu1 %vm26259_vm1, %v26258_v2 }
 0xc3f   :  { %21539 = vmatmul.mubr.msk.f32.vlgmr.msra.gmra.mrb[6].mxu1 %vm7825_vm2, %v7912_v53  ;;  %v7971_v53 = vld [vmem:[#allocation2 + $0x1d8] sm:$0xff] }
 0xc40   :  { %21541 = vmatprep.mubr.msk.f32.mxu1 %vm26259_vm1, %v26258_v2  ;;  %23527 = vmatpush3.bf16.msra.mxu1 %v23526_v13  ;;  %v9504_v13 = vld [vmem:[#allocation2 + $0x2] sm:$0xff] }
 0xc41   :  { %23528 = vmatprep.subr.bf16.mxu1 %v33981_v23 }
 0xc43   :  { %21542 = vmatmul.mubr.msk.f32.gmra.mrb[8].mxu1 %vm7825_vm2, %v7913_v54  ;;  %v7972_v54 = vld [vmem:[#allocation2 + $0x1e0] sm:$0xff] }
 0xc44   :  { %21544 = vmatprep.mubr.msk.f32.mxu1 %vm26259_vm1, %v26258_v2 }
 0xc47   :  { %21545 = vmatmul.mubr.msk.f32.gmra.mrb[10].mxu1 %vm7825_vm2, %v7914_v55  ;;  %v7973_v55 = vld [vmem:[#allocation2 + $0x1e8] sm:$0xff] }
 0xc48   :  { %21547 = vmatprep.mubr.msk.f32.mxu1 %vm26259_vm1, %v26258_v2 }
 0xc4b   :  { %21548 = vmatmul.mubr.msk.f32.gmra.mrb[12].mxu1 %vm7825_vm2, %v7915_v56  ;;  %v7974_v56 = vld [vmem:[#allocation2 + $0x1f0] sm:$0xff] }
 0xc4c   :  { %21550 = vmatprep.mubr.msk.f32.mxu1 %vm26259_vm1, %v26258_v2 }
 0xc4f   :  { %21551 = vmatmul.mubr.msk.f32.gmra.mrb[14].mxu1 %vm7825_vm2, %v7916_v58  ;;  %v7975_v58 = vld [vmem:[#allocation2 + $0x1f8] sm:$0xff] }
 0xc50   :  { %21553 = vmatprep.mubr.msk.f32.mxu1 %vm26259_vm1, %v26258_v2 }
 0xc53   :  { %21554 = vmatmul.mubr.msk.f32.gmra.mrb[16].mxu1 %vm7825_vm2, %v7917_v59  ;;  %v7976_v59 = vld [vmem:[#allocation2 + $0x200] sm:$0xff] }
 0xc54   :  { %21556 = vmatprep.mubr.msk.f32.mxu1 %vm26259_vm1, %v26258_v2 }
 0xc57   :  { %21557 = vmatmul.mubr.msk.f32.gmra.mrb[18].mxu1 %vm7825_vm2, %v7918_v60  ;;  %v7977_v60 = vld [vmem:[#allocation2 + $0x208] sm:$0xff] }
 0xc58   :  { %21559 = vmatprep.mubr.msk.f32.mxu1 %vm26259_vm1, %v26258_v2 }
 0xc5b   :  { %21560 = vmatmul.mubr.msk.f32.gmra.mrb[20].mxu1 %vm7825_vm2, %v7919_v61  ;;  %v7978_v61 = vld [vmem:[#allocation2 + $0x210] sm:$0xff] }
 0xc5c   :  { %21562 = vmatprep.mubr.msk.f32.mxu1 %vm26259_vm1, %v26258_v2 }
 0xc5f   :  { %21563 = vmatmul.mubr.msk.f32.gmra.mrb[22].mxu1 %vm7825_vm2, %v7920_v62  ;;  %v7979_v62 = vld [vmem:[#allocation2 + $0x218] sm:$0xff] }
 0xc60   :  { %21565 = vmatprep.mubr.msk.f32.mxu1 %vm26259_vm1, %v26258_v2 }
 0xc63   :  { %21566 = vmatmul.mubr.msk.f32.gmra.mrb[24].mxu1 %vm7825_vm2, %v7921_v63  ;;  %v7980_v63 = vld [vmem:[#allocation2 + $0x220] sm:$0xff] }
 0xc64   :  { %21568 = vmatprep.mubr.msk.f32.mxu1 %vm26259_vm1, %v26258_v2 }
 0xc67   :  { %21569 = vmatmul.mubr.msk.f32.gmra.mrb[26].mxu1 %vm7825_vm2, %v7922_v0  ;;  %v7981_v0 = vld [vmem:[#allocation2 + $0x228] sm:$0xff] }
 0xc68   :  { %21571 = vmatprep.mubr.msk.f32.mxu1 %vm26259_vm1, %v26258_v2 }
 0xc6b   :  { %21572 = vmatmul.mubr.msk.f32.gmra.mrb[28].mxu1 %vm7825_vm2, %v7923_v1  ;;  %v7982_v1 = vld [vmem:[#allocation2 + $0x230] sm:$0xff] }
 0xc6c   :  { %21574 = vmatprep.mubr.msk.f32.mxu1 %vm26259_vm1, %v26258_v2 }
 0xc6f   :  { %21575 = vmatmul.mubr.msk.f32.gmra.mrb[30].mxu1 %vm7825_vm2, %v7924_v3  ;;  %v7983_v3 = vld [vmem:[#allocation2 + $0x238] sm:$0xff] }
 0xc70   :  { %21577 = vmatprep.mubr.msk.f32.mxu1 %vm26259_vm1, %v26258_v2 }
 0xc73   :  { %21578 = vmatmul.mubr.msk.f32.gmra.mrb[32].mxu1 %vm7825_vm2, %v7925_v4  ;;  %v7984_v4 = vld [vmem:[#allocation2 + $0x240] sm:$0xff] }
 0xc74   :  { %21580 = vmatprep.mubr.msk.f32.mxu1 %vm26259_vm1, %v26258_v2 }
 0xc77   :  { %21581 = vmatmul.mubr.msk.f32.gmra.mrb[34].mxu1 %vm7825_vm2, %v7926_v5  ;;  %v7985_v5 = vld [vmem:[#allocation2 + $0x248] sm:$0xff] }
 0xc78   :  { %21583 = vmatprep.mubr.msk.f32.mxu1 %vm26259_vm1, %v26258_v2 }
 0xc7b   :  { %21584 = vmatmul.mubr.msk.f32.gmra.mrb[36].mxu1 %vm7825_vm2, %v7927_v6  ;;  %v7986_v6 = vld [vmem:[#allocation2 + $0x250] sm:$0xff] }
 0xc7c   :  { %21586 = vmatprep.mubr.msk.f32.mxu1 %vm26259_vm1, %v26258_v2 }
 0xc7f   :  { %21587 = vmatmul.mubr.msk.f32.gmra.mrb[38].mxu1 %vm7825_vm2, %v7928_v7  ;;  %v7987_v7 = vld [vmem:[#allocation2 + $0x258] sm:$0xff] }
 0xc80   :  { %21589 = vmatprep.mubr.msk.f32.mxu1 %vm26259_vm1, %v26258_v2 }
 0xc83   :  { %21590 = vmatmul.mubr.msk.f32.gmra.mrb[40].mxu1 %vm7825_vm2, %v7929_v8  ;;  %v7988_v8 = vld [vmem:[#allocation2 + $0x260] sm:$0xff] }
 0xc84   :  { %21592 = vmatprep.mubr.msk.f32.mxu1 %vm26259_vm1, %v26258_v2 }
 0xc87   :  { %21593 = vmatmul.mubr.msk.f32.gmra.mrb[42].mxu1 %vm7825_vm2, %v7930_v9  ;;  %v7989_v9 = vld [vmem:[#allocation2 + $0x268] sm:$0xff] }
 0xc88   :  { %21595 = vmatprep.mubr.msk.f32.mxu1 %vm26259_vm1, %v26258_v2 }
 0xc8b   :  { %21596 = vmatmul.mubr.msk.f32.gmra.mrb[44].mxu1 %vm7825_vm2, %v7931_v10  ;;  %v7990_v10 = vld [vmem:[#allocation2 + $0x270] sm:$0xff] }
 0xc8c   :  { %21598 = vmatprep.mubr.msk.f32.mxu1 %vm26259_vm1, %v26258_v2 }
 0xc8f   :  { %21599 = vmatmul.mubr.msk.f32.gmra.mrb[46].mxu1 %vm7825_vm2, %v7932_v14  ;;  %v9505_v14 = vld [vmem:[#allocation2 + $0xa] sm:$0xff] }
 0xc90   :  { %21601 = vmatprep.mubr.msk.f32.mxu1 %vm26259_vm1, %v26258_v2 }
 0xc93   :  { %21602 = vmatmul.mubr.msk.f32.gmra.mrb[48].mxu1 %vm7825_vm2, %v7933_v15  ;;  %v31478_v15 = vld [vmem:[#allocation2 + $0x12] sm:$0xff] }
 0xc94   :  { %21604 = vmatprep.mubr.msk.f32.mxu1 %vm26259_vm1, %v26258_v2 }
 0xc97   :  { %21605 = vmatmul.mubr.msk.f32.gmra.mrb[50].mxu1 %vm7825_vm2, %v7934_v16  ;;  %v31484_v16 = vld [vmem:[#allocation2 + $0x1a] sm:$0xff] }
 0xc98   :  { %21607 = vmatprep.mubr.msk.f32.mxu1 %vm26259_vm1, %v26258_v2 }
 0xc9b   :  { %21608 = vmatmul.mubr.msk.f32.gmra.mrb[52].mxu1 %vm7825_vm2, %v7935_v35  ;;  %v31490_v35 = vld [vmem:[#allocation2 + $0x22] sm:$0xff] }
 0xc9c   :  { %21610 = vmatprep.mubr.msk.f32.mxu1 %vm26259_vm1, %v26258_v2 }
 0xc9f   :  { %21611 = vmatmul.mubr.msk.f32.gmra.mrb[54].mxu1 %vm7825_vm2, %v7936_v17  ;;  %v31496_v17 = vld [vmem:[#allocation2 + $0x2a] sm:$0xff] }
 0xca0   :  { %21613 = vmatprep.mubr.msk.f32.mxu1 %vm26259_vm1, %v26258_v2 }
 0xca3   :  { %21614 = vmatmul.mubr.msk.f32.gmra.mrb[56].mxu1 %vm7825_vm2, %v7937_v18  ;;  %v31502_v18 = vld [vmem:[#allocation2 + $0x32] sm:$0xff] }
 0xca4   :  { %21616 = vmatprep.mubr.msk.f32.mxu1 %vm26259_vm1, %v26258_v2 }
 0xca7   :  { %21617 = vmatmul.mubr.msk.f32.gmra.mrb[58].mxu1 %vm7825_vm2, %v7938_v19  ;;  %v31508_v19 = vld [vmem:[#allocation2 + $0x3a] sm:$0xff] }
 0xca8   :  { %21619 = vmatprep.mubr.msk.f32.mxu1 %vm26259_vm1, %v26258_v2 }
 0xcab   :  { %21620 = vmatmul.mubr.msk.f32.gmra.mrb[60].mxu1 %vm7825_vm2, %v7939_v20  ;;  %v31514_v20 = vld [vmem:[#allocation2 + $0x42] sm:$0xff] }
 0xcac   :  { %21622 = vmatprep.mubr.msk.f32.mxu1 %vm26259_vm1, %v26258_v2 }
 0xcaf   :  { %21623 = vmatmul.mubr.msk.f32.gmra.mrb[62].mxu1 %vm7825_vm2, %v7940_v21  ;;  %v31520_v21 = vld [vmem:[#allocation2 + $0x4a] sm:$0xff] }
 0xcb0   :  { %21625 = vmatprep.mubr.msk.f32.mxu1 %vm26259_vm1, %v26258_v2 }
 0xcb3   :  { %21626 = vmatmul.mubr.msk.f32.gmra.mrb[64].mxu1 %vm7825_vm2, %v7941_v22  ;;  %v31526_v22 = vld [vmem:[#allocation2 + $0x52] sm:$0xff] }
 0xcb4   :  { %21628 = vmatprep.mubr.msk.f32.mxu1 %vm26259_vm1, %v26258_v2 }
 0xcb7   :  { %21629 = vmatmul.mubr.msk.f32.gmra.mrb[66].mxu1 %vm7825_vm2, %v7942_v24  ;;  %v31532_v24 = vld [vmem:[#allocation2 + $0x5a] sm:$0xff] }
 0xcb8   :  { %21631 = vmatprep.mubr.msk.f32.mxu1 %vm26259_vm1, %v26258_v2 }
 0xcbb   :  { %21632 = vmatmul.mubr.msk.f32.gmra.mrb[68].mxu1 %vm7825_vm2, %v7943_v25  ;;  %v31538_v25 = vld [vmem:[#allocation2 + $0x62] sm:$0xff] }
 0xcbc   :  { %21634 = vmatprep.mubr.msk.f32.mxu1 %vm26259_vm1, %v26258_v2 }
 0xcbf   :  { %21635 = vmatmul.mubr.msk.f32.gmra.mrb[70].mxu1 %vm7825_vm2, %v7944_v26  ;;  %v31544_v26 = vld [vmem:[#allocation2 + $0x6a] sm:$0xff] }
 0xcc0   :  { %21637 = vmatprep.mubr.msk.f32.mxu1 %vm26259_vm1, %v26258_v2 }
 0xcc3   :  { %21638 = vmatmul.mubr.msk.f32.gmra.mrb[72].mxu1 %vm7825_vm2, %v7945_v27  ;;  %v31550_v27 = vld [vmem:[#allocation2 + $0x72] sm:$0xff] }
 0xcc4   :  { %21640 = vmatprep.mubr.msk.f32.mxu1 %vm26259_vm1, %v26258_v2 }
 0xcc7   :  { %21641 = vmatmul.mubr.msk.f32.gmra.mrb[74].mxu1 %vm7825_vm2, %v7946_v28  ;;  %v31556_v28 = vld [vmem:[#allocation2 + $0x7a] sm:$0xff] }
 0xcc8   :  { %21643 = vmatprep.mubr.msk.f32.mxu1 %vm26259_vm1, %v26258_v2 }
 0xccb   :  { %21644 = vmatmul.mubr.msk.f32.gmra.mrb[76].mxu1 %vm7825_vm2, %v7947_v29  ;;  %v31562_v29 = vld [vmem:[#allocation2 + $0x82] sm:$0xff] }
 0xccc   :  { %21646 = vmatprep.mubr.msk.f32.mxu1 %vm26259_vm1, %v26258_v2 }
 0xccf   :  { %21647 = vmatmul.mubr.msk.f32.gmra.mrb[78].mxu1 %vm7825_vm2, %v7948_v30  ;;  %v31568_v30 = vld [vmem:[#allocation2 + $0x8a] sm:$0xff] }
 0xcd0   :  { %21649 = vmatprep.mubr.msk.f32.mxu1 %vm26259_vm1, %v26258_v2 }
 0xcd3   :  { %21650 = vmatmul.mubr.msk.f32.gmra.mrb[80].mxu1 %vm7825_vm2, %v7949_v31  ;;  %v31574_v31 = vld [vmem:[#allocation2 + $0x92] sm:$0xff] }
 0xcd4   :  { %21652 = vmatprep.mubr.msk.f32.mxu1 %vm26259_vm1, %v26258_v2 }
 0xcd7   :  { %21653 = vmatmul.mubr.msk.f32.gmra.mrb[82].mxu1 %vm7825_vm2, %v7950_v32  ;;  %v31580_v32 = vld [vmem:[#allocation2 + $0x9a] sm:$0xff] }
 0xcd8   :  { %21655 = vmatprep.mubr.msk.f32.mxu1 %vm26259_vm1, %v26258_v2 }
 0xcdb   :  { %21656 = vmatmul.mubr.msk.f32.gmra.mrb[84].mxu1 %vm7825_vm2, %v7951_v33  ;;  %v10462_v33 = vld [vmem:[%s33945_s2 + $0x30] sm:$0xff] }
 0xcdc   :  { %21658 = vmatprep.mubr.msk.f32.mxu1 %vm26259_vm1, %v26258_v2 }
 0xcdf   :  { %21659 = vmatmul.mubr.msk.f32.gmra.mrb[86].mxu1 %vm7825_vm2, %v7952_v34  ;;  %v10463_v34 = vld [vmem:[%s33945_s2 + $0x38] sm:$0xff] }
 0xce0   :  { %21661 = vmatprep.mubr.msk.f32.mxu1 %vm26259_vm1, %v26258_v2 }
 0xce3   :  { %21662 = vmatmul.mubr.msk.f32.gmra.mrb[88].mxu1 %vm7825_vm2, %v7953_v36  ;;  %v23529_v36 = vpack.c.bf16 %v10463_v34, %v10462_v33  ;;  %v31839_v33 = vld [vmem:[#allocation2 + $0x1ea] sm:$0xff]  ;;  %v31845_v34 = vld [vmem:[#allocation2 + $0x1f2] sm:$0xff] }
 0xce4   :  { %21664 = vmatprep.mubr.msk.f32.mxu1 %vm26259_vm1, %v26258_v2  ;;  %34080 = vst [vmem:[#allocation6_spill] sm:$0xff] %v31845_v34 }
 0xce7   :  { %21665 = vmatmul.mubr.msk.f32.gmra.mrb[90].mxu1 %vm7825_vm2, %v7954_v38  ;;  %v31592_v38 = vld [vmem:[#allocation2 + $0xa2] sm:$0xff] }
 0xce8   :  { %21667 = vmatprep.mubr.msk.f32.mxu1 %vm26259_vm1, %v26258_v2 }
 0xceb   :  { %21668 = vmatmul.mubr.msk.f32.gmra.mrb[92].mxu1 %vm7825_vm2, %v7955_v57  ;;  %v31599_v57 = vld [vmem:[#allocation2 + $0xaa] sm:$0xff] }
 0xcec   :  { %21670 = vmatprep.mubr.msk.f32.mxu1 %vm26259_vm1, %v26258_v2 }
 0xcef   :  { %21671 = vmatmul.mubr.msk.f32.gmra.mrb[94].mxu1 %vm7825_vm2, %v7956_v39  ;;  %v31605_v39 = vld [vmem:[#allocation2 + $0xb2] sm:$0xff] }
 0xcf0   :  { %21673 = vmatprep.mubr.msk.f32.mxu1 %vm26259_vm1, %v26258_v2 }
 0xcf3   :  { %21674 = vmatmul.mubr.msk.f32.gmra.mrb[96].mxu1 %vm7825_vm2, %v7957_v40  ;;  %v31611_v40 = vld [vmem:[#allocation2 + $0xba] sm:$0xff] }
 0xcf4   :  { %21676 = vmatprep.mubr.msk.f32.mxu1 %vm26259_vm1, %v26258_v2 }
 0xcf7   :  { %21677 = vmatmul.mubr.msk.f32.gmra.mrb[98].mxu1 %vm7825_vm2, %v7958_v41  ;;  %v31617_v41 = vld [vmem:[#allocation2 + $0xc2] sm:$0xff] }
 0xcf8   :  { %21679 = vmatprep.mubr.msk.f32.mxu1 %vm26259_vm1, %v26258_v2 }
 0xcfb   :  { %21680 = vmatmul.mubr.msk.f32.gmra.mrb[100].mxu1 %vm7825_vm2, %v7959_v42  ;;  %v31623_v42 = vld [vmem:[#allocation2 + $0xca] sm:$0xff] }
 0xcfc   :  { %21682 = vmatprep.mubr.msk.f32.mxu1 %vm26259_vm1, %v26258_v2 }
 0xcff   :  { %21683 = vmatmul.mubr.msk.f32.gmra.mrb[102].mxu1 %vm7825_vm2, %v7960_v44  ;;  %v31629_v44 = vld [vmem:[#allocation2 + $0xd2] sm:$0xff] }
 0xd00   :  { %21685 = vmatprep.mubr.msk.f32.mxu1 %vm26259_vm1, %v26258_v2 }
 0xd03   :  { %21686 = vmatmul.mubr.msk.f32.gmra.mrb[104].mxu1 %vm7825_vm2, %v7961_v45  ;;  %v31635_v45 = vld [vmem:[#allocation2 + $0xda] sm:$0xff] }
 0xd04   :  { %21688 = vmatprep.mubr.msk.f32.mxu1 %vm26259_vm1, %v26258_v2 }
 0xd07   :  { %21689 = vmatmul.mubr.msk.f32.gmra.mrb[106].mxu1 %vm7825_vm2, %v7962_v46  ;;  %v31641_v46 = vld [vmem:[#allocation2 + $0xe2] sm:$0xff] }
 0xd08   :  { %21691 = vmatprep.mubr.msk.f32.mxu1 %vm26259_vm1, %v26258_v2 }
 0xd0b   :  { %21692 = vmatmul.mubr.msk.f32.gmra.mrb[108].mxu1 %vm7825_vm2, %v7963_v47  ;;  %v31647_v47 = vld [vmem:[#allocation2 + $0xea] sm:$0xff] }
 0xd0c   :  { %21694 = vmatprep.mubr.msk.f32.mxu1 %vm26259_vm1, %v26258_v2 }
 0xd0f   :  { %21695 = vmatmul.mubr.msk.f32.gmra.mrb[110].mxu1 %vm7825_vm2, %v7964_v37  ;;  %v31653_v37 = vld [vmem:[#allocation2 + $0xf2] sm:$0xff] }
 0xd10   :  { %21697 = vmatprep.mubr.msk.f32.mxu1 %vm26259_vm1, %v26258_v2 }
 0xd13   :  { %21698 = vmatmul.mubr.msk.f32.gmra.mrb[112].mxu1 %vm7825_vm2, %v7965_v48  ;;  %v31659_v48 = vld [vmem:[#allocation2 + $0xfa] sm:$0xff] }
 0xd14   :  { %21700 = vmatprep.mubr.msk.f32.mxu1 %vm26259_vm1, %v26258_v2 }
 0xd17   :  { %21701 = vmatmul.mubr.msk.f32.gmra.mrb[114].mxu1 %vm7825_vm2, %v7966_v49  ;;  %v31665_v49 = vld [vmem:[#allocation2 + $0x102] sm:$0xff] }
 0xd18   :  { %21703 = vmatprep.mubr.msk.f32.mxu1 %vm26259_vm1, %v26258_v2 }
 0xd1b   :  { %21704 = vmatmul.mubr.msk.f32.gmra.mrb[116].mxu1 %vm7825_vm2, %v7967_v50  ;;  %v31671_v50 = vld [vmem:[#allocation2 + $0x10a] sm:$0xff] }
 0xd1c   :  { %21706 = vmatprep.mubr.msk.f32.mxu1 %vm26259_vm1, %v26258_v2 }
 0xd1f   :  { %21707 = vmatmul.mubr.msk.f32.gmra.mrb[118].mxu1 %vm7825_vm2, %v7968_v43  ;;  %v31677_v43 = vld [vmem:[#allocation2 + $0x112] sm:$0xff] }
 0xd20   :  { %21709 = vmatprep.mubr.msk.f32.mxu1 %vm26259_vm1, %v26258_v2 }
 0xd23   :  { %21710 = vmatmul.mubr.msk.f32.gmra.mrb[120].mxu1 %vm7825_vm2, %v7969_v51  ;;  %v31683_v51 = vld [vmem:[#allocation2 + $0x11a] sm:$0xff] }
 0xd24   :  { %21712 = vmatprep.mubr.msk.f32.mxu1 %vm26259_vm1, %v26258_v2 }
 0xd27   :  { %21713 = vmatmul.mubr.msk.f32.gmra.mrb[122].mxu1 %vm7825_vm2, %v7970_v52  ;;  %v31689_v52 = vld [vmem:[#allocation2 + $0x122] sm:$0xff] }
 0xd28   :  { %21715 = vmatprep.mubr.msk.f32.mxu1 %vm26259_vm1, %v26258_v2 }
 0xd2b   :  { %21716 = vmatmul.mubr.msk.f32.gmra.mrb[124].mxu1 %vm7825_vm2, %v7971_v53  ;;  %v31695_v53 = vld [vmem:[#allocation2 + $0x12a] sm:$0xff] }
 0xd2c   :  { %21718 = vmatprep.mubr.msk.f32.mxu1 %vm26259_vm1, %v26258_v2 }
 0xd2f   :  { %21719 = vmatmul.mubr.msk.f32.gmra.mrb[126].mxu1 %vm7825_vm2, %v7972_v54  ;;  %v31701_v54 = vld [vmem:[#allocation2 + $0x132] sm:$0xff] }
 0xd30   :  { %21721 = vmatprep.mubr.msk.f32.mxu1 %vm26259_vm1, %v26258_v2 }
 0xd33   :  { %21722 = vmatmul.mubr.msk.f32.gmra.mrb[128].mxu1 %vm7825_vm2, %v7973_v55  ;;  %v31707_v55 = vld [vmem:[#allocation2 + $0x13a] sm:$0xff] }
 0xd34   :  { %21724 = vmatprep.mubr.msk.f32.mxu1 %vm26259_vm1, %v26258_v2 }
 0xd37   :  { %21725 = vmatmul.mubr.msk.f32.gmra.mrb[130].mxu1 %vm7825_vm2, %v7974_v56  ;;  %v31713_v56 = vld [vmem:[#allocation2 + $0x142] sm:$0xff] }
 0xd38   :  { %21727 = vmatprep.mubr.msk.f32.mxu1 %vm26259_vm1, %v26258_v2 }
 0xd3b   :  { %21728 = vmatmul.mubr.msk.f32.gmra.mrb[132].mxu1 %vm7825_vm2, %v7975_v58  ;;  %v31719_v58 = vld [vmem:[#allocation2 + $0x14a] sm:$0xff] }
 0xd3c   :  { %21730 = vmatprep.mubr.msk.f32.mxu1 %vm26259_vm1, %v26258_v2 }
 0xd3f   :  { %21731 = vmatmul.mubr.msk.f32.gmra.mrb[134].mxu1 %vm7825_vm2, %v7976_v59  ;;  %v31725_v59 = vld [vmem:[#allocation2 + $0x152] sm:$0xff] }
 0xd40   :  { %21733 = vmatprep.mubr.msk.f32.mxu1 %vm26259_vm1, %v26258_v2 }
 0xd43   :  { %21734 = vmatmul.mubr.msk.f32.gmra.mrb[136].mxu1 %vm7825_vm2, %v7977_v60  ;;  %v31731_v60 = vld [vmem:[#allocation2 + $0x15a] sm:$0xff] }
 0xd44   :  { %21736 = vmatprep.mubr.msk.f32.mxu1 %vm26259_vm1, %v26258_v2 }
 0xd47   :  { %21737 = vmatmul.mubr.msk.f32.gmra.mrb[138].mxu1 %vm7825_vm2, %v7978_v61  ;;  %v31737_v61 = vld [vmem:[#allocation2 + $0x162] sm:$0xff] }
 0xd48   :  { %21739 = vmatprep.mubr.msk.f32.mxu1 %vm26259_vm1, %v26258_v2 }
 0xd4b   :  { %21740 = vmatmul.mubr.msk.f32.gmra.mrb[140].mxu1 %vm7825_vm2, %v7979_v62  ;;  %v31743_v62 = vld [vmem:[#allocation2 + $0x16a] sm:$0xff] }
 0xd4c   :  { %21742 = vmatprep.mubr.msk.f32.mxu1 %vm26259_vm1, %v26258_v2 }
 0xd4f   :  { %21743 = vmatmul.mubr.msk.f32.gmra.mrb[142].mxu1 %vm7825_vm2, %v7980_v63  ;;  %v31749_v63 = vld [vmem:[#allocation2 + $0x172] sm:$0xff] }
 0xd50   :  { %21745 = vmatprep.mubr.msk.f32.mxu1 %vm26259_vm1, %v26258_v2 }
 0xd53   :  { %21746 = vmatmul.mubr.msk.f32.gmra.mrb[144].mxu1 %vm7825_vm2, %v7981_v0  ;;  %v31755_v0 = vld [vmem:[#allocation2 + $0x17a] sm:$0xff] }
 0xd54   :  { %21748 = vmatprep.mubr.msk.f32.mxu1 %vm26259_vm1, %v26258_v2 }
 0xd57   :  { %21749 = vmatmul.mubr.msk.f32.gmra.mrb[146].mxu1 %vm7825_vm2, %v7982_v1  ;;  %v31761_v1 = vld [vmem:[#allocation2 + $0x182] sm:$0xff] }
 0xd58   :  { %21751 = vmatprep.mubr.msk.f32.mxu1 %vm26259_vm1, %v26258_v2 }
 0xd5b   :  { %21752 = vmatmul.mubr.msk.f32.gmra.mrb[148].mxu1 %vm7825_vm2, %v7983_v3  ;;  %v31767_v3 = vld [vmem:[#allocation2 + $0x18a] sm:$0xff] }
 0xd5c   :  { %21754 = vmatprep.mubr.msk.f32.mxu1 %vm26259_vm1, %v26258_v2 }
 0xd5f   :  { %21755 = vmatmul.mubr.msk.f32.gmra.mrb[150].mxu1 %vm7825_vm2, %v7984_v4  ;;  %v31773_v4 = vld [vmem:[#allocation2 + $0x192] sm:$0xff] }
 0xd60   :  { %21757 = vmatprep.mubr.msk.f32.mxu1 %vm26259_vm1, %v26258_v2 }
 0xd63   :  { %21758 = vmatmul.mubr.msk.f32.gmra.mrb[152].mxu1 %vm7825_vm2, %v7985_v5  ;;  %v31779_v5 = vld [vmem:[#allocation2 + $0x19a] sm:$0xff] }
 0xd64   :  { %21760 = vmatprep.mubr.msk.f32.mxu1 %vm26259_vm1, %v26258_v2 }
 0xd67   :  { %21761 = vmatmul.mubr.msk.f32.gmra.mrb[154].mxu1 %vm7825_vm2, %v7986_v6  ;;  %v31785_v6 = vld [vmem:[#allocation2 + $0x1a2] sm:$0xff] }
 0xd68   :  { %21763 = vmatprep.mubr.msk.f32.mxu1 %vm26259_vm1, %v26258_v2 }
 0xd6b   :  { %21764 = vmatmul.mubr.msk.f32.gmra.mrb[156].mxu1 %vm7825_vm2, %v7987_v7  ;;  %v31791_v7 = vld [vmem:[#allocation2 + $0x1aa] sm:$0xff] }
 0xd6c   :  { %21766 = vmatprep.mubr.msk.f32.mxu1 %vm26259_vm1, %v26258_v2 }
 0xd6f   :  { %21767 = vmatmul.mubr.msk.f32.gmra.mrb[158].mxu1 %vm7825_vm2, %v7988_v8  ;;  %v31797_v8 = vld [vmem:[#allocation2 + $0x1b2] sm:$0xff] }
 0xd70   :  { %21769 = vmatprep.mubr.msk.f32.mxu1 %vm26259_vm1, %v26258_v2 }
 0xd73   :  { %21770 = vmatmul.mubr.msk.f32.gmra.mrb[160].mxu1 %vm7825_vm2, %v7989_v9  ;;  %v31803_v9 = vld [vmem:[#allocation2 + $0x1ba] sm:$0xff] }
 0xd74   :  { %21772 = vmatprep.mubr.msk.f32.mxu1 %vm26259_vm1, %v26258_v2 }
 0xd77   :  { %21773 = vmatmul.mubr.msk.f32.gmra.mrb[162].mxu1 %vm7825_vm2, %v7990_v10  ;;  %v31809_v10 = vld [vmem:[#allocation2 + $0x1c2] sm:$0xff] }
 0xd78   :  { %21775 = vmatprep.mubr.msk.f32.mxu1 %vm26259_vm1, %v26258_v2 }
 0xd7b   :  { %21776 = vmatmul.mubr.msk.f32.gmra.mrb[164].mxu1 %vm7825_vm2, %v7991_v11  ;;  %v31815_v11 = vld [vmem:[#allocation2 + $0x1ca] sm:$0xff] }
 0xd7c   :  { %21778 = vmatprep.mubr.msk.f32.mxu1 %vm26259_vm1, %v26258_v2 }
 0xd7f   :  { %21779 = vmatmul.mubr.msk.f32.gmra.mrb[166].mxu1 %vm7825_vm2, %v7992_v12  ;;  %v31821_v12 = vld [vmem:[#allocation2 + $0x1d2] sm:$0xff] }
 0xd80   :  { %21785 = vmatprep.mubr.msk.f32.mxu1 %vm26259_vm1, %v26258_v2 }
 0xd83   :  { %21786 = vmatmul.mubr.msk.f32.vlgmr.msra.gmra.mrb[6].mxu1 %vm7825_vm2, %v9504_v13  ;;  %v31827_v13 = vld [vmem:[#allocation2 + $0x1da] sm:$0xff] }
 0xd84   :  { %21788 = vmatprep.mubr.msk.f32.mxu1 %vm26259_vm1, %v26258_v2  ;;  %23530 = vmatpush3.bf16.msra.mxu1 %v23529_v36  ;;  %v31851_v36 = vld [vmem:[#allocation2 + $0x1fa] sm:$0xff] }
 0xd85   :  { %23531 = vmatprep.subr.bf16.mxu1 %v33981_v23  ;;  %34081 = vst [vmem:[#allocation7_spill] sm:$0xff] %v31851_v36  ;;  %v31857_v23 = vld [vmem:[#allocation2 + $0x202] sm:$0xff] }
 0xd86   :  { %34082 = vst [vmem:[#allocation8_spill] sm:$0xff] %v31857_v23 }
 0xd87   :  { %21789 = vmatmul.mubr.msk.f32.gmra.mrb[8].mxu1 %vm7825_vm2, %v9505_v14  ;;  %v31833_v14 = vld [vmem:[#allocation2 + $0x1e2] sm:$0xff] }
 0xd88   :  { %21791 = vmatprep.mubr.msk.f32.mxu1 %vm26259_vm1, %v26258_v2 }
 0xd8b   :  { %21792 = vmatmul.mubr.msk.f32.gmra.mrb[10].mxu1 %vm7825_vm2, %v31478_v15 }
 0xd8c   :  { %21794 = vmatprep.mubr.msk.f32.mxu1 %vm26259_vm1, %v26258_v2 }
 0xd8f   :  { %21795 = vmatmul.mubr.msk.f32.gmra.mrb[12].mxu1 %vm7825_vm2, %v31484_v16 }
 0xd90   :  { %21797 = vmatprep.mubr.msk.f32.mxu1 %vm26259_vm1, %v26258_v2 }
 0xd93   :  { %21798 = vmatmul.mubr.msk.f32.gmra.mrb[14].mxu1 %vm7825_vm2, %v31490_v35 }
 0xd94   :  { %21800 = vmatprep.mubr.msk.f32.mxu1 %vm26259_vm1, %v26258_v2 }
 0xd97   :  { %21801 = vmatmul.mubr.msk.f32.gmra.mrb[16].mxu1 %vm7825_vm2, %v31496_v17 }
 0xd98   :  { %21803 = vmatprep.mubr.msk.f32.mxu1 %vm26259_vm1, %v26258_v2 }
 0xd9b   :  { %21804 = vmatmul.mubr.msk.f32.gmra.mrb[18].mxu1 %vm7825_vm2, %v31502_v18 }
 0xd9c   :  { %21806 = vmatprep.mubr.msk.f32.mxu1 %vm26259_vm1, %v26258_v2 }
 0xd9f   :  { %21807 = vmatmul.mubr.msk.f32.gmra.mrb[20].mxu1 %vm7825_vm2, %v31508_v19 }
 0xda0   :  { %21809 = vmatprep.mubr.msk.f32.mxu1 %vm26259_vm1, %v26258_v2 }
 0xda3   :  { %21810 = vmatmul.mubr.msk.f32.gmra.mrb[22].mxu1 %vm7825_vm2, %v31514_v20 }
 0xda4   :  { %21812 = vmatprep.mubr.msk.f32.mxu1 %vm26259_vm1, %v26258_v2 }
 0xda7   :  { %21813 = vmatmul.mubr.msk.f32.gmra.mrb[24].mxu1 %vm7825_vm2, %v31520_v21 }
 0xda8   :  { %21815 = vmatprep.mubr.msk.f32.mxu1 %vm26259_vm1, %v26258_v2 }
 0xdab   :  { %21816 = vmatmul.mubr.msk.f32.gmra.mrb[26].mxu1 %vm7825_vm2, %v31526_v22 }
 0xdac   :  { %21818 = vmatprep.mubr.msk.f32.mxu1 %vm26259_vm1, %v26258_v2 }
 0xdaf   :  { %21819 = vmatmul.mubr.msk.f32.gmra.mrb[28].mxu1 %vm7825_vm2, %v31532_v24 }
 0xdb0   :  { %21821 = vmatprep.mubr.msk.f32.mxu1 %vm26259_vm1, %v26258_v2 }
 0xdb3   :  { %21822 = vmatmul.mubr.msk.f32.gmra.mrb[30].mxu1 %vm7825_vm2, %v31538_v25 }
 0xdb4   :  { %21824 = vmatprep.mubr.msk.f32.mxu1 %vm26259_vm1, %v26258_v2 }
 0xdb7   :  { %21825 = vmatmul.mubr.msk.f32.gmra.mrb[32].mxu1 %vm7825_vm2, %v31544_v26 }
 0xdb8   :  { %21827 = vmatprep.mubr.msk.f32.mxu1 %vm26259_vm1, %v26258_v2 }
 0xdbb   :  { %21828 = vmatmul.mubr.msk.f32.gmra.mrb[34].mxu1 %vm7825_vm2, %v31550_v27 }
 0xdbc   :  { %21830 = vmatprep.mubr.msk.f32.mxu1 %vm26259_vm1, %v26258_v2 }
 0xdbf   :  { %21831 = vmatmul.mubr.msk.f32.gmra.mrb[36].mxu1 %vm7825_vm2, %v31556_v28 }
 0xdc0   :  { %21833 = vmatprep.mubr.msk.f32.mxu1 %vm26259_vm1, %v26258_v2 }
 0xdc3   :  { %21834 = vmatmul.mubr.msk.f32.gmra.mrb[38].mxu1 %vm7825_vm2, %v31562_v29 }
 0xdc4   :  { %21836 = vmatprep.mubr.msk.f32.mxu1 %vm26259_vm1, %v26258_v2 }
 0xdc7   :  { %21837 = vmatmul.mubr.msk.f32.gmra.mrb[40].mxu1 %vm7825_vm2, %v31568_v30 }
 0xdc8   :  { %21839 = vmatprep.mubr.msk.f32.mxu1 %vm26259_vm1, %v26258_v2 }
 0xdcb   :  { %21840 = vmatmul.mubr.msk.f32.gmra.mrb[42].mxu1 %vm7825_vm2, %v31574_v31 }
 0xdcc   :  { %21842 = vmatprep.mubr.msk.f32.mxu1 %vm26259_vm1, %v26258_v2 }
 0xdcf   :  { %21843 = vmatmul.mubr.msk.f32.gmra.mrb[44].mxu1 %vm7825_vm2, %v31580_v32 }
 0xdd0   :  { %21845 = vmatprep.mubr.msk.f32.mxu1 %vm26259_vm1, %v26258_v2 }
 0xdd3   :  { %21846 = vmatmul.mubr.msk.f32.gmra.mrb[46].mxu1 %vm7825_vm2, %v31592_v38 }
 0xdd4   :  { %21848 = vmatprep.mubr.msk.f32.mxu1 %vm26259_vm1, %v26258_v2 }
 0xdd7   :  { %21849 = vmatmul.mubr.msk.f32.gmra.mrb[48].mxu1 %vm7825_vm2, %v31599_v57 }
 0xdd8   :  { %21851 = vmatprep.mubr.msk.f32.mxu1 %vm26259_vm1, %v26258_v2 }
 0xddb   :  { %21852 = vmatmul.mubr.msk.f32.gmra.mrb[50].mxu1 %vm7825_vm2, %v31605_v39 }
 0xddc   :  { %21854 = vmatprep.mubr.msk.f32.mxu1 %vm26259_vm1, %v26258_v2 }
 0xddf   :  { %21855 = vmatmul.mubr.msk.f32.gmra.mrb[52].mxu1 %vm7825_vm2, %v31611_v40 }
 0xde0   :  { %21857 = vmatprep.mubr.msk.f32.mxu1 %vm26259_vm1, %v26258_v2 }
 0xde3   :  { %21858 = vmatmul.mubr.msk.f32.gmra.mrb[54].mxu1 %vm7825_vm2, %v31617_v41 }
 0xde4   :  { %21860 = vmatprep.mubr.msk.f32.mxu1 %vm26259_vm1, %v26258_v2 }
 0xde7   :  { %21861 = vmatmul.mubr.msk.f32.gmra.mrb[56].mxu1 %vm7825_vm2, %v31623_v42 }
 0xde8   :  { %21863 = vmatprep.mubr.msk.f32.mxu1 %vm26259_vm1, %v26258_v2 }
 0xdeb   :  { %21864 = vmatmul.mubr.msk.f32.gmra.mrb[58].mxu1 %vm7825_vm2, %v31629_v44 }
 0xdec   :  { %21866 = vmatprep.mubr.msk.f32.mxu1 %vm26259_vm1, %v26258_v2 }
 0xdef   :  { %21867 = vmatmul.mubr.msk.f32.gmra.mrb[60].mxu1 %vm7825_vm2, %v31635_v45 }
 0xdf0   :  { %21869 = vmatprep.mubr.msk.f32.mxu1 %vm26259_vm1, %v26258_v2 }
 0xdf3   :  { %21870 = vmatmul.mubr.msk.f32.gmra.mrb[62].mxu1 %vm7825_vm2, %v31641_v46 }
 0xdf4   :  { %21872 = vmatprep.mubr.msk.f32.mxu1 %vm26259_vm1, %v26258_v2 }
 0xdf7   :  { %21873 = vmatmul.mubr.msk.f32.gmra.mrb[64].mxu1 %vm7825_vm2, %v31647_v47 }
 0xdf8   :  { %21875 = vmatprep.mubr.msk.f32.mxu1 %vm26259_vm1, %v26258_v2 }
 0xdfb   :  { %21876 = vmatmul.mubr.msk.f32.gmra.mrb[66].mxu1 %vm7825_vm2, %v31653_v37 }
 0xdfc   :  { %21878 = vmatprep.mubr.msk.f32.mxu1 %vm26259_vm1, %v26258_v2 }
 0xdff   :  { %21879 = vmatmul.mubr.msk.f32.gmra.mrb[68].mxu1 %vm7825_vm2, %v31659_v48 }
 0xe00   :  { %21881 = vmatprep.mubr.msk.f32.mxu1 %vm26259_vm1, %v26258_v2 }
 0xe03   :  { %21882 = vmatmul.mubr.msk.f32.gmra.mrb[70].mxu1 %vm7825_vm2, %v31665_v49 }
 0xe04   :  { %21884 = vmatprep.mubr.msk.f32.mxu1 %vm26259_vm1, %v26258_v2 }
 0xe07   :  { %21885 = vmatmul.mubr.msk.f32.gmra.mrb[72].mxu1 %vm7825_vm2, %v31671_v50 }
 0xe08   :  { %21887 = vmatprep.mubr.msk.f32.mxu1 %vm26259_vm1, %v26258_v2 }
 0xe0b   :  { %21888 = vmatmul.mubr.msk.f32.gmra.mrb[74].mxu1 %vm7825_vm2, %v31677_v43 }
 0xe0c   :  { %21890 = vmatprep.mubr.msk.f32.mxu1 %vm26259_vm1, %v26258_v2 }
 0xe0f   :  { %21891 = vmatmul.mubr.msk.f32.gmra.mrb[76].mxu1 %vm7825_vm2, %v31683_v51 }
 0xe10   :  { %21893 = vmatprep.mubr.msk.f32.mxu1 %vm26259_vm1, %v26258_v2 }
 0xe13   :  { %21894 = vmatmul.mubr.msk.f32.gmra.mrb[78].mxu1 %vm7825_vm2, %v31689_v52 }
 0xe14   :  { %21896 = vmatprep.mubr.msk.f32.mxu1 %vm26259_vm1, %v26258_v2 }
 0xe17   :  { %21897 = vmatmul.mubr.msk.f32.gmra.mrb[80].mxu1 %vm7825_vm2, %v31695_v53 }
 0xe18   :  { %21899 = vmatprep.mubr.msk.f32.mxu1 %vm26259_vm1, %v26258_v2 }
 0xe1b   :  { %21900 = vmatmul.mubr.msk.f32.gmra.mrb[82].mxu1 %vm7825_vm2, %v31701_v54 }
 0xe1c   :  { %21902 = vmatprep.mubr.msk.f32.mxu1 %vm26259_vm1, %v26258_v2 }
 0xe1f   :  { %21903 = vmatmul.mubr.msk.f32.gmra.mrb[84].mxu1 %vm7825_vm2, %v31707_v55 }
 0xe20   :  { %21905 = vmatprep.mubr.msk.f32.mxu1 %vm26259_vm1, %v26258_v2 }
 0xe23   :  { %21906 = vmatmul.mubr.msk.f32.gmra.mrb[86].mxu1 %vm7825_vm2, %v31713_v56 }
 0xe24   :  { %21908 = vmatprep.mubr.msk.f32.mxu1 %vm26259_vm1, %v26258_v2 }
 0xe27   :  { %21909 = vmatmul.mubr.msk.f32.gmra.mrb[88].mxu1 %vm7825_vm2, %v31719_v58 }
 0xe28   :  { %21911 = vmatprep.mubr.msk.f32.mxu1 %vm26259_vm1, %v26258_v2 }
 0xe2b   :  { %21912 = vmatmul.mubr.msk.f32.gmra.mrb[90].mxu1 %vm7825_vm2, %v31725_v59 }
 0xe2c   :  { %21914 = vmatprep.mubr.msk.f32.mxu1 %vm26259_vm1, %v26258_v2 }
 0xe2f   :  { %21915 = vmatmul.mubr.msk.f32.gmra.mrb[92].mxu1 %vm7825_vm2, %v31731_v60 }
 0xe30   :  { %21917 = vmatprep.mubr.msk.f32.mxu1 %vm26259_vm1, %v26258_v2 }
 0xe33   :  { %21918 = vmatmul.mubr.msk.f32.gmra.mrb[94].mxu1 %vm7825_vm2, %v31737_v61 }
 0xe34   :  { %21920 = vmatprep.mubr.msk.f32.mxu1 %vm26259_vm1, %v26258_v2 }
 0xe37   :  { %21921 = vmatmul.mubr.msk.f32.gmra.mrb[96].mxu1 %vm7825_vm2, %v31743_v62 }
 0xe38   :  { %21923 = vmatprep.mubr.msk.f32.mxu1 %vm26259_vm1, %v26258_v2 }
 0xe3b   :  { %21924 = vmatmul.mubr.msk.f32.gmra.mrb[98].mxu1 %vm7825_vm2, %v31749_v63 }
 0xe3c   :  { %21926 = vmatprep.mubr.msk.f32.mxu1 %vm26259_vm1, %v26258_v2 }
 0xe3f   :  { %21927 = vmatmul.mubr.msk.f32.gmra.mrb[100].mxu1 %vm7825_vm2, %v31755_v0 }
 0xe40   :  { %21929 = vmatprep.mubr.msk.f32.mxu1 %vm26259_vm1, %v26258_v2 }
 0xe43   :  { %21930 = vmatmul.mubr.msk.f32.gmra.mrb[102].mxu1 %vm7825_vm2, %v31761_v1 }
 0xe44   :  { %21932 = vmatprep.mubr.msk.f32.mxu1 %vm26259_vm1, %v26258_v2 }
 0xe47   :  { %21933 = vmatmul.mubr.msk.f32.gmra.mrb[104].mxu1 %vm7825_vm2, %v31767_v3 }
 0xe48   :  { %21935 = vmatprep.mubr.msk.f32.mxu1 %vm26259_vm1, %v26258_v2 }
 0xe4b   :  { %21936 = vmatmul.mubr.msk.f32.gmra.mrb[106].mxu1 %vm7825_vm2, %v31773_v4 }
 0xe4c   :  { %21938 = vmatprep.mubr.msk.f32.mxu1 %vm26259_vm1, %v26258_v2 }
 0xe4f   :  { %21939 = vmatmul.mubr.msk.f32.gmra.mrb[108].mxu1 %vm7825_vm2, %v31779_v5 }
 0xe50   :  { %21941 = vmatprep.mubr.msk.f32.mxu1 %vm26259_vm1, %v26258_v2 }
 0xe53   :  { %21942 = vmatmul.mubr.msk.f32.gmra.mrb[110].mxu1 %vm7825_vm2, %v31785_v6 }
 0xe54   :  { %21944 = vmatprep.mubr.msk.f32.mxu1 %vm26259_vm1, %v26258_v2 }
 0xe57   :  { %21945 = vmatmul.mubr.msk.f32.gmra.mrb[112].mxu1 %vm7825_vm2, %v31791_v7 }
 0xe58   :  { %21947 = vmatprep.mubr.msk.f32.mxu1 %vm26259_vm1, %v26258_v2 }
 0xe5b   :  { %21948 = vmatmul.mubr.msk.f32.gmra.mrb[114].mxu1 %vm7825_vm2, %v31797_v8 }
 0xe5c   :  { %21950 = vmatprep.mubr.msk.f32.mxu1 %vm26259_vm1, %v26258_v2 }
 0xe5f   :  { %21951 = vmatmul.mubr.msk.f32.gmra.mrb[116].mxu1 %vm7825_vm2, %v31803_v9 }
 0xe60   :  { %21953 = vmatprep.mubr.msk.f32.mxu1 %vm26259_vm1, %v26258_v2 }
 0xe63   :  { %21954 = vmatmul.mubr.msk.f32.gmra.mrb[118].mxu1 %vm7825_vm2, %v31809_v10 }
 0xe64   :  { %21956 = vmatprep.mubr.msk.f32.mxu1 %vm26259_vm1, %v26258_v2 }
 0xe67   :  { %21957 = vmatmul.mubr.msk.f32.gmra.mrb[120].mxu1 %vm7825_vm2, %v31815_v11 }
 0xe68   :  { %21959 = vmatprep.mubr.msk.f32.mxu1 %vm26259_vm1, %v26258_v2 }
 0xe6b   :  { %21960 = vmatmul.mubr.msk.f32.gmra.mrb[122].mxu1 %vm7825_vm2, %v31821_v12 }
 0xe6c   :  { %21962 = vmatprep.mubr.msk.f32.mxu1 %vm26259_vm1, %v26258_v2 }
 0xe6f   :  { %21963 = vmatmul.mubr.msk.f32.gmra.mrb[124].mxu1 %vm7825_vm2, %v31827_v13 }
 0xe70   :  { %21965 = vmatprep.mubr.msk.f32.mxu1 %vm26259_vm1, %v26258_v2 }
 0xe73   :  { %21966 = vmatmul.mubr.msk.f32.gmra.mrb[126].mxu1 %vm7825_vm2, %v31833_v14 }
 0xe74   :  { %21968 = vmatprep.mubr.msk.f32.mxu1 %vm26259_vm1, %v26258_v2 }
 0xe77   :  { %21969 = vmatmul.mubr.msk.f32.gmra.mrb[128].mxu1 %vm7825_vm2, %v31839_v33 }
 0xe78   :  { %21971 = vmatprep.mubr.msk.f32.mxu1 %vm26259_vm1, %v26258_v2 }
 0xe7b   :  { %21972 = vmatmul.mubr.msk.f32.gmra.mrb[130].mxu1 %vm7825_vm2, %v31845_v34  ;;  %v31863_v34 = vld [vmem:[#allocation2 + $0x20a] sm:$0xff] }
 0xe7c   :  { %21974 = vmatprep.mubr.msk.f32.mxu1 %vm26259_vm1, %v26258_v2  ;;  %34083 = vst [vmem:[#allocation9_spill] sm:$0xff] %v31863_v34 }
 0xe7f   :  { %21975 = vmatmul.mubr.msk.f32.gmra.mrb[132].mxu1 %vm7825_vm2, %v31851_v36  ;;  %v31869_v36 = vld [vmem:[#allocation2 + $0x212] sm:$0xff] }
 0xe80   :  { %21977 = vmatprep.mubr.msk.f32.mxu1 %vm26259_vm1, %v26258_v2  ;;  %34084 = vst [vmem:[#allocation10_spill] sm:$0xff] %v31869_v36 }
 0xe83   :  { %21978 = vmatmul.mubr.msk.f32.gmra.mrb[134].mxu1 %vm7825_vm2, %v31857_v23  ;;  %v31875_v23 = vld [vmem:[#allocation2 + $0x21a] sm:$0xff] }
 0xe84   :  { %21980 = vmatprep.mubr.msk.f32.mxu1 %vm26259_vm1, %v26258_v2  ;;  %34085 = vst [vmem:[#allocation11_spill] sm:$0xff] %v31875_v23 }
 0xe87   :  { %21981 = vmatmul.mubr.msk.f32.gmra.mrb[136].mxu1 %vm7825_vm2, %v31863_v34  ;;  %v31881_v34 = vld [vmem:[#allocation2 + $0x222] sm:$0xff] }
 0xe88   :  { %21983 = vmatprep.mubr.msk.f32.mxu1 %vm26259_vm1, %v26258_v2  ;;  %34086 = vst [vmem:[#allocation12_spill] sm:$0xff] %v31881_v34 }
 0xe8b   :  { %21984 = vmatmul.mubr.msk.f32.gmra.mrb[138].mxu1 %vm7825_vm2, %v31869_v36  ;;  %v31887_v36 = vld [vmem:[#allocation2 + $0x22a] sm:$0xff] }
 0xe8c   :  { %21986 = vmatprep.mubr.msk.f32.mxu1 %vm26259_vm1, %v26258_v2  ;;  %34087 = vst [vmem:[#allocation13_spill] sm:$0xff] %v31887_v36 }
 0xe8f   :  { %21987 = vmatmul.mubr.msk.f32.gmra.mrb[140].mxu1 %vm7825_vm2, %v31875_v23  ;;  %v31893_v23 = vld [vmem:[#allocation2 + $0x232] sm:$0xff] }
 0xe90   :  { %21989 = vmatprep.mubr.msk.f32.mxu1 %vm26259_vm1, %v26258_v2  ;;  %34088 = vst [vmem:[#allocation14_spill] sm:$0xff] %v31893_v23 }
 0xe93   :  { %21990 = vmatmul.mubr.msk.f32.gmra.mrb[142].mxu1 %vm7825_vm2, %v31881_v34  ;;  %v31899_v34 = vld [vmem:[#allocation2 + $0x23a] sm:$0xff] }
 0xe94   :  { %21992 = vmatprep.mubr.msk.f32.mxu1 %vm26259_vm1, %v26258_v2  ;;  %34089 = vst [vmem:[#allocation15_spill] sm:$0xff] %v31899_v34 }
 0xe97   :  { %21993 = vmatmul.mubr.msk.f32.gmra.mrb[144].mxu1 %vm7825_vm2, %v31887_v36  ;;  %v31905_v36 = vld [vmem:[#allocation2 + $0x242] sm:$0xff] }
 0xe98   :  { %21995 = vmatprep.mubr.msk.f32.mxu1 %vm26259_vm1, %v26258_v2  ;;  %34090 = vst [vmem:[#allocation16_spill] sm:$0xff] %v31905_v36 }
 0xe9b   :  { %21996 = vmatmul.mubr.msk.f32.gmra.mrb[146].mxu1 %vm7825_vm2, %v31893_v23  ;;  %v31911_v23 = vld [vmem:[#allocation2 + $0x24a] sm:$0xff] }
 0xe9c   :  { %21998 = vmatprep.mubr.msk.f32.mxu1 %vm26259_vm1, %v26258_v2  ;;  %34091 = vst [vmem:[#allocation17_spill] sm:$0xff] %v31911_v23 }
 0xe9f   :  { %21999 = vmatmul.mubr.msk.f32.gmra.mrb[148].mxu1 %vm7825_vm2, %v31899_v34  ;;  %v31917_v34 = vld [vmem:[#allocation2 + $0x252] sm:$0xff] }
 0xea0   :  { %22001 = vmatprep.mubr.msk.f32.mxu1 %vm26259_vm1, %v26258_v2  ;;  %34092 = vst [vmem:[#allocation18_spill] sm:$0xff] %v31917_v34 }
 0xea3   :  { %22002 = vmatmul.mubr.msk.f32.gmra.mrb[150].mxu1 %vm7825_vm2, %v31905_v36  ;;  %v31923_v36 = vld [vmem:[#allocation2 + $0x25a] sm:$0xff] }
 0xea4   :  { %22004 = vmatprep.mubr.msk.f32.mxu1 %vm26259_vm1, %v26258_v2  ;;  %34093 = vst [vmem:[#allocation19_spill] sm:$0xff] %v31923_v36 }
 0xea7   :  { %22005 = vmatmul.mubr.msk.f32.gmra.mrb[152].mxu1 %vm7825_vm2, %v31911_v23  ;;  %v31929_v23 = vld [vmem:[#allocation2 + $0x262] sm:$0xff] }
 0xea8   :  { %22007 = vmatprep.mubr.msk.f32.mxu1 %vm26259_vm1, %v26258_v2  ;;  %34094 = vst [vmem:[#allocation20_spill] sm:$0xff] %v31929_v23 }
 0xeab   :  { %22008 = vmatmul.mubr.msk.f32.gmra.mrb[154].mxu1 %vm7825_vm2, %v31917_v34  ;;  %v31935_v34 = vld [vmem:[#allocation2 + $0x26a] sm:$0xff] }
 0xeac   :  { %22010 = vmatprep.mubr.msk.f32.mxu1 %vm26259_vm1, %v26258_v2  ;;  %34095 = vst [vmem:[#allocation21_spill] sm:$0xff] %v31935_v34 }
 0xeaf   :  { %22011 = vmatmul.mubr.msk.f32.gmra.mrb[156].mxu1 %vm7825_vm2, %v31923_v36  ;;  %v31941_v36 = vld [vmem:[#allocation2 + $0x272] sm:$0xff] }
 0xeb0   :  { %22013 = vmatprep.mubr.msk.f32.mxu1 %vm26259_vm1, %v26258_v2 }
 0xeb3   :  { %22014 = vmatmul.mubr.msk.f32.gmra.mrb[158].mxu1 %vm7825_vm2, %v31929_v23  ;;  %v31947_v23 = vld [vmem:[#allocation2 + $0x27a] sm:$0xff] }
 0xeb4   :  { %22016 = vmatprep.mubr.msk.f32.mxu1 %vm26259_vm1, %v26258_v2 }
 0xeb7   :  { %22017 = vmatmul.mubr.msk.f32.gmra.mrb[160].mxu1 %vm7825_vm2, %v31935_v34  ;;  %v31953_v34 = vld [vmem:[#allocation2 + $0x282] sm:$0xff] }
 0xeb8   :  { %22019 = vmatprep.mubr.msk.f32.mxu1 %vm26259_vm1, %v26258_v2 }
 0xebb   :  { %22020 = vmatmul.mubr.msk.f32.gmra.mrb[162].mxu1 %vm7825_vm2, %v31941_v36 }
 0xebc   :  { %22022 = vmatprep.mubr.msk.f32.mxu1 %vm26259_vm1, %v26258_v2 }
 0xebf   :  { %22023 = vmatmul.mubr.msk.f32.gmra.mrb[164].mxu1 %vm7825_vm2, %v31947_v23 }
 0xec0   :  { %22025 = vmatprep.mubr.msk.f32.mxu1 %vm26259_vm1, %v26258_v2 }
 0xec3   :  { %22026 = vmatmul.mubr.msk.f32.gmra.mrb[166].mxu1 %vm7825_vm2, %v31953_v34 }
 0xec4   :  { %22032 = vmatprep.mubr.msk.f32.mxu1 %vm26259_vm1, %v26258_v2 }
 0xec7   :  { %22033 = vmatmul.mubr.msk.f32.vlgmr.msra.gmra.mrb[6].mxu1 %vm7825_vm2, %v31478_v15  ;;  %v11339_v15 = vld [vmem:[%s33945_s2 + $0x40] sm:$0xff] }
 0xec8   :  { %22035 = vmatprep.mubr.msk.f32.mxu1 %vm26259_vm1, %v26258_v2 }
 0xecb   :  { %22036 = vmatmul.mubr.msk.f32.gmra.mrb[8].mxu1 %vm7825_vm2, %v31484_v16  ;;  %v11340_v16 = vld [vmem:[%s33945_s2 + $0x48] sm:$0xff] }
 0xecc   :  { %22038 = vmatprep.mubr.msk.f32.mxu1 %vm26259_vm1, %v26258_v2 }
 0xecf   :  { %22039 = vmatmul.mubr.msk.f32.gmra.mrb[10].mxu1 %vm7825_vm2, %v31490_v35  ;;  %v23532_v35 = vpack.c.bf16 %v11340_v16, %v11339_v15  ;;  %v11296_v15 = vld [vmem:[#allocation2 + $0x143] sm:$0xff]  ;;  %v11297_v16 = vld [vmem:[#allocation2 + $0x14b] sm:$0xff] }
 0xed0   :  { %22041 = vmatprep.mubr.msk.f32.mxu1 %vm26259_vm1, %v26258_v2 }
 0xed1   :  { %23533 = vmatpush3.bf16.msra.mxu1 %v23532_v35  ;;  %v11298_v35 = vld [vmem:[#allocation2 + $0x153] sm:$0xff] }
 0xed3   :  { %22042 = vmatmul.mubr.msk.f32.gmra.mrb[12].mxu1 %vm7825_vm2, %v31496_v17  ;;  %v34096_v17 = vmov 0.0|0.0  }
 0xed4   :  { %22044 = vmatprep.mubr.msk.f32.mxu1 %vm26259_vm1, %v26258_v2  ;;  %23534 = vmatprep.subr.bf16.mxu1 %v34096_v17 }
 0xed7   :  { %22045 = vmatmul.mubr.msk.f32.gmra.mrb[14].mxu1 %vm7825_vm2, %v31502_v18  ;;  %v34097_v18 = vld [vmem:[#allocation6_spill] sm:$0xff] }
 0xed8   :  { %22047 = vmatprep.mubr.msk.f32.mxu1 %vm26259_vm1, %v26258_v2 }
 0xedb   :  { %22048 = vmatmul.mubr.msk.f32.gmra.mrb[16].mxu1 %vm7825_vm2, %v31508_v19  ;;  %v34098_v19 = vld [vmem:[#allocation7_spill] sm:$0xff] }
 0xedc   :  { %22050 = vmatprep.mubr.msk.f32.mxu1 %vm26259_vm1, %v26258_v2 }
 0xedf   :  { %22051 = vmatmul.mubr.msk.f32.gmra.mrb[18].mxu1 %vm7825_vm2, %v31514_v20  ;;  %v34099_v20 = vld [vmem:[#allocation8_spill] sm:$0xff] }
 0xee0   :  { %22053 = vmatprep.mubr.msk.f32.mxu1 %vm26259_vm1, %v26258_v2 }
 0xee3   :  { %22054 = vmatmul.mubr.msk.f32.gmra.mrb[20].mxu1 %vm7825_vm2, %v31520_v21  ;;  %v34100_v21 = vld [vmem:[#allocation9_spill] sm:$0xff] }
 0xee4   :  { %22056 = vmatprep.mubr.msk.f32.mxu1 %vm26259_vm1, %v26258_v2 }
 0xee7   :  { %22057 = vmatmul.mubr.msk.f32.gmra.mrb[22].mxu1 %vm7825_vm2, %v31526_v22  ;;  %v34101_v22 = vld [vmem:[#allocation10_spill] sm:$0xff] }
 0xee8   :  { %22059 = vmatprep.mubr.msk.f32.mxu1 %vm26259_vm1, %v26258_v2 }
 0xeeb   :  { %22060 = vmatmul.mubr.msk.f32.gmra.mrb[24].mxu1 %vm7825_vm2, %v31532_v24  ;;  %v34102_v24 = vld [vmem:[#allocation11_spill] sm:$0xff] }
 0xeec   :  { %22062 = vmatprep.mubr.msk.f32.mxu1 %vm26259_vm1, %v26258_v2 }
 0xeef   :  { %22063 = vmatmul.mubr.msk.f32.gmra.mrb[26].mxu1 %vm7825_vm2, %v31538_v25  ;;  %v34103_v25 = vld [vmem:[#allocation12_spill] sm:$0xff] }
 0xef0   :  { %22065 = vmatprep.mubr.msk.f32.mxu1 %vm26259_vm1, %v26258_v2 }
 0xef3   :  { %22066 = vmatmul.mubr.msk.f32.gmra.mrb[28].mxu1 %vm7825_vm2, %v31544_v26  ;;  %v34104_v26 = vld [vmem:[#allocation13_spill] sm:$0xff] }
 0xef4   :  { %22068 = vmatprep.mubr.msk.f32.mxu1 %vm26259_vm1, %v26258_v2 }
 0xef7   :  { %22069 = vmatmul.mubr.msk.f32.gmra.mrb[30].mxu1 %vm7825_vm2, %v31550_v27  ;;  %v34105_v27 = vld [vmem:[#allocation14_spill] sm:$0xff] }
 0xef8   :  { %22071 = vmatprep.mubr.msk.f32.mxu1 %vm26259_vm1, %v26258_v2 }
 0xefb   :  { %22072 = vmatmul.mubr.msk.f32.gmra.mrb[32].mxu1 %vm7825_vm2, %v31556_v28  ;;  %v34106_v28 = vld [vmem:[#allocation15_spill] sm:$0xff] }
 0xefc   :  { %22074 = vmatprep.mubr.msk.f32.mxu1 %vm26259_vm1, %v26258_v2 }
 0xeff   :  { %22075 = vmatmul.mubr.msk.f32.gmra.mrb[34].mxu1 %vm7825_vm2, %v31562_v29  ;;  %v34107_v29 = vld [vmem:[#allocation16_spill] sm:$0xff] }
 0xf00   :  { %22077 = vmatprep.mubr.msk.f32.mxu1 %vm26259_vm1, %v26258_v2 }
 0xf03   :  { %22078 = vmatmul.mubr.msk.f32.gmra.mrb[36].mxu1 %vm7825_vm2, %v31568_v30  ;;  %v34108_v30 = vld [vmem:[#allocation17_spill] sm:$0xff] }
 0xf04   :  { %22080 = vmatprep.mubr.msk.f32.mxu1 %vm26259_vm1, %v26258_v2 }
 0xf07   :  { %22081 = vmatmul.mubr.msk.f32.gmra.mrb[38].mxu1 %vm7825_vm2, %v31574_v31  ;;  %v34109_v31 = vld [vmem:[#allocation18_spill] sm:$0xff] }
 0xf08   :  { %22083 = vmatprep.mubr.msk.f32.mxu1 %vm26259_vm1, %v26258_v2 }
 0xf0b   :  { %22084 = vmatmul.mubr.msk.f32.gmra.mrb[40].mxu1 %vm7825_vm2, %v31580_v32  ;;  %v34110_v32 = vld [vmem:[#allocation19_spill] sm:$0xff] }
 0xf0c   :  { %22086 = vmatprep.mubr.msk.f32.mxu1 %vm26259_vm1, %v26258_v2 }
 0xf0f   :  { %22087 = vmatmul.mubr.msk.f32.gmra.mrb[42].mxu1 %vm7825_vm2, %v31592_v38  ;;  %v34111_v38 = vld [vmem:[#allocation20_spill] sm:$0xff] }
 0xf10   :  { %22089 = vmatprep.mubr.msk.f32.mxu1 %vm26259_vm1, %v26258_v2 }
 0xf13   :  { %22090 = vmatmul.mubr.msk.f32.gmra.mrb[44].mxu1 %vm7825_vm2, %v31599_v57  ;;  %v34112_v57 = vld [vmem:[#allocation21_spill] sm:$0xff] }
 0xf14   :  { %22092 = vmatprep.mubr.msk.f32.mxu1 %vm26259_vm1, %v26258_v2 }
 0xf17   :  { %22093 = vmatmul.mubr.msk.f32.gmra.mrb[46].mxu1 %vm7825_vm2, %v31605_v39  ;;  %v10460_v39 = vld [vmem:[#allocation2 + $0x28a] sm:$0xff] }
 0xf18   :  { %22095 = vmatprep.mubr.msk.f32.mxu1 %vm26259_vm1, %v26258_v2 }
 0xf1b   :  { %22096 = vmatmul.mubr.msk.f32.gmra.mrb[48].mxu1 %vm7825_vm2, %v31611_v40  ;;  %v10461_v40 = vld [vmem:[#allocation2 + $0x292] sm:$0xff] }
 0xf1c   :  { %22098 = vmatprep.mubr.msk.f32.mxu1 %vm26259_vm1, %v26258_v2 }
 0xf1f   :  { %22099 = vmatmul.mubr.msk.f32.gmra.mrb[50].mxu1 %vm7825_vm2, %v31617_v41  ;;  %v11259_v41 = vld [vmem:[#allocation2 + $0x1b] sm:$0xff] }
 0xf20   :  { %22101 = vmatprep.mubr.msk.f32.mxu1 %vm26259_vm1, %v26258_v2 }
 0xf23   :  { %22102 = vmatmul.mubr.msk.f32.gmra.mrb[52].mxu1 %vm7825_vm2, %v31623_v42  ;;  %v11260_v42 = vld [vmem:[#allocation2 + $0x23] sm:$0xff] }
 0xf24   :  { %22104 = vmatprep.mubr.msk.f32.mxu1 %vm26259_vm1, %v26258_v2 }
 0xf27   :  { %22105 = vmatmul.mubr.msk.f32.gmra.mrb[54].mxu1 %vm7825_vm2, %v31629_v44  ;;  %v11261_v44 = vld [vmem:[#allocation2 + $0x2b] sm:$0xff] }
 0xf28   :  { %22107 = vmatprep.mubr.msk.f32.mxu1 %vm26259_vm1, %v26258_v2 }
 0xf2b   :  { %22108 = vmatmul.mubr.msk.f32.gmra.mrb[56].mxu1 %vm7825_vm2, %v31635_v45  ;;  %v11262_v45 = vld [vmem:[#allocation2 + $0x33] sm:$0xff] }
 0xf2c   :  { %22110 = vmatprep.mubr.msk.f32.mxu1 %vm26259_vm1, %v26258_v2 }
 0xf2f   :  { %22111 = vmatmul.mubr.msk.f32.gmra.mrb[58].mxu1 %vm7825_vm2, %v31641_v46  ;;  %v11263_v46 = vld [vmem:[#allocation2 + $0x3b] sm:$0xff] }
 0xf30   :  { %22113 = vmatprep.mubr.msk.f32.mxu1 %vm26259_vm1, %v26258_v2 }
 0xf33   :  { %22114 = vmatmul.mubr.msk.f32.gmra.mrb[60].mxu1 %vm7825_vm2, %v31647_v47  ;;  %v11264_v47 = vld [vmem:[#allocation2 + $0x43] sm:$0xff] }
 0xf34   :  { %22116 = vmatprep.mubr.msk.f32.mxu1 %vm26259_vm1, %v26258_v2 }
 0xf37   :  { %22117 = vmatmul.mubr.msk.f32.gmra.mrb[62].mxu1 %vm7825_vm2, %v31653_v37  ;;  %v11265_v37 = vld [vmem:[#allocation2 + $0x4b] sm:$0xff] }
 0xf38   :  { %22119 = vmatprep.mubr.msk.f32.mxu1 %vm26259_vm1, %v26258_v2 }
 0xf3b   :  { %22120 = vmatmul.mubr.msk.f32.gmra.mrb[64].mxu1 %vm7825_vm2, %v31659_v48  ;;  %v11266_v48 = vld [vmem:[#allocation2 + $0x53] sm:$0xff] }
 0xf3c   :  { %22122 = vmatprep.mubr.msk.f32.mxu1 %vm26259_vm1, %v26258_v2 }
 0xf3f   :  { %22123 = vmatmul.mubr.msk.f32.gmra.mrb[66].mxu1 %vm7825_vm2, %v31665_v49  ;;  %v11267_v49 = vld [vmem:[#allocation2 + $0x5b] sm:$0xff] }
 0xf40   :  { %22125 = vmatprep.mubr.msk.f32.mxu1 %vm26259_vm1, %v26258_v2 }
 0xf43   :  { %22126 = vmatmul.mubr.msk.f32.gmra.mrb[68].mxu1 %vm7825_vm2, %v31671_v50  ;;  %v11268_v50 = vld [vmem:[#allocation2 + $0x63] sm:$0xff] }
 0xf44   :  { %22128 = vmatprep.mubr.msk.f32.mxu1 %vm26259_vm1, %v26258_v2 }
 0xf47   :  { %22129 = vmatmul.mubr.msk.f32.gmra.mrb[70].mxu1 %vm7825_vm2, %v31677_v43  ;;  %v11269_v43 = vld [vmem:[#allocation2 + $0x6b] sm:$0xff] }
 0xf48   :  { %22131 = vmatprep.mubr.msk.f32.mxu1 %vm26259_vm1, %v26258_v2 }
 0xf4b   :  { %22132 = vmatmul.mubr.msk.f32.gmra.mrb[72].mxu1 %vm7825_vm2, %v31683_v51  ;;  %v11270_v51 = vld [vmem:[#allocation2 + $0x73] sm:$0xff] }
 0xf4c   :  { %22134 = vmatprep.mubr.msk.f32.mxu1 %vm26259_vm1, %v26258_v2 }
 0xf4f   :  { %22135 = vmatmul.mubr.msk.f32.gmra.mrb[74].mxu1 %vm7825_vm2, %v31689_v52  ;;  %v11271_v52 = vld [vmem:[#allocation2 + $0x7b] sm:$0xff] }
 0xf50   :  { %22137 = vmatprep.mubr.msk.f32.mxu1 %vm26259_vm1, %v26258_v2 }
 0xf53   :  { %22138 = vmatmul.mubr.msk.f32.gmra.mrb[76].mxu1 %vm7825_vm2, %v31695_v53  ;;  %v11272_v53 = vld [vmem:[#allocation2 + $0x83] sm:$0xff] }
 0xf54   :  { %22140 = vmatprep.mubr.msk.f32.mxu1 %vm26259_vm1, %v26258_v2 }
 0xf57   :  { %22141 = vmatmul.mubr.msk.f32.gmra.mrb[78].mxu1 %vm7825_vm2, %v31701_v54  ;;  %v11273_v54 = vld [vmem:[#allocation2 + $0x8b] sm:$0xff] }
 0xf58   :  { %22143 = vmatprep.mubr.msk.f32.mxu1 %vm26259_vm1, %v26258_v2 }
 0xf5b   :  { %22144 = vmatmul.mubr.msk.f32.gmra.mrb[80].mxu1 %vm7825_vm2, %v31707_v55  ;;  %v11274_v55 = vld [vmem:[#allocation2 + $0x93] sm:$0xff] }
 0xf5c   :  { %22146 = vmatprep.mubr.msk.f32.mxu1 %vm26259_vm1, %v26258_v2 }
 0xf5f   :  { %22147 = vmatmul.mubr.msk.f32.gmra.mrb[82].mxu1 %vm7825_vm2, %v31713_v56  ;;  %v11275_v56 = vld [vmem:[#allocation2 + $0x9b] sm:$0xff] }
 0xf60   :  { %22149 = vmatprep.mubr.msk.f32.mxu1 %vm26259_vm1, %v26258_v2 }
 0xf63   :  { %22150 = vmatmul.mubr.msk.f32.gmra.mrb[84].mxu1 %vm7825_vm2, %v31719_v58  ;;  %v11276_v58 = vld [vmem:[#allocation2 + $0xa3] sm:$0xff] }
 0xf64   :  { %22152 = vmatprep.mubr.msk.f32.mxu1 %vm26259_vm1, %v26258_v2 }
 0xf67   :  { %22153 = vmatmul.mubr.msk.f32.gmra.mrb[86].mxu1 %vm7825_vm2, %v31725_v59  ;;  %v11277_v59 = vld [vmem:[#allocation2 + $0xab] sm:$0xff] }
 0xf68   :  { %22155 = vmatprep.mubr.msk.f32.mxu1 %vm26259_vm1, %v26258_v2 }
 0xf6b   :  { %22156 = vmatmul.mubr.msk.f32.gmra.mrb[88].mxu1 %vm7825_vm2, %v31731_v60  ;;  %v12216_v60 = vld [vmem:[%s33945_s2 + $0x50] sm:$0xff] }
 0xf6c   :  { %22158 = vmatprep.mubr.msk.f32.mxu1 %vm26259_vm1, %v26258_v2 }
 0xf6f   :  { %22159 = vmatmul.mubr.msk.f32.gmra.mrb[90].mxu1 %vm7825_vm2, %v31737_v61  ;;  %v12217_v61 = vld [vmem:[%s33945_s2 + $0x58] sm:$0xff] }
 0xf70   :  { %22161 = vmatprep.mubr.msk.f32.mxu1 %vm26259_vm1, %v26258_v2 }
 0xf73   :  { %22162 = vmatmul.mubr.msk.f32.gmra.mrb[92].mxu1 %vm7825_vm2, %v31743_v62  ;;  %v23535_v62 = vpack.c.bf16 %v12217_v61, %v12216_v60  ;;  %v11337_v60 = vld [vmem:[#allocation2 + $0x28b] sm:$0xff]  ;;  %v11338_v61 = vld [vmem:[#allocation2 + $0x293] sm:$0xff] }
 0xf74   :  { %22164 = vmatprep.mubr.msk.f32.mxu1 %vm26259_vm1, %v26258_v2 }
 0xf77   :  { %22165 = vmatmul.mubr.msk.f32.gmra.mrb[94].mxu1 %vm7825_vm2, %v31749_v63  ;;  %v11278_v63 = vld [vmem:[#allocation2 + $0xb3] sm:$0xff] }
 0xf78   :  { %22167 = vmatprep.mubr.msk.f32.mxu1 %vm26259_vm1, %v26258_v2 }
 0xf7b   :  { %22168 = vmatmul.mubr.msk.f32.gmra.mrb[96].mxu1 %vm7825_vm2, %v31755_v0  ;;  %v11279_v0 = vld [vmem:[#allocation2 + $0xbb] sm:$0xff] }
 0xf7c   :  { %22170 = vmatprep.mubr.msk.f32.mxu1 %vm26259_vm1, %v26258_v2 }
 0xf7f   :  { %22171 = vmatmul.mubr.msk.f32.gmra.mrb[98].mxu1 %vm7825_vm2, %v31761_v1  ;;  %v11280_v1 = vld [vmem:[#allocation2 + $0xc3] sm:$0xff] }
 0xf80   :  { %22173 = vmatprep.mubr.msk.f32.mxu1 %vm26259_vm1, %v26258_v2 }
 0xf83   :  { %22174 = vmatmul.mubr.msk.f32.gmra.mrb[100].mxu1 %vm7825_vm2, %v31767_v3  ;;  %v11281_v3 = vld [vmem:[#allocation2 + $0xcb] sm:$0xff] }
 0xf84   :  { %22176 = vmatprep.mubr.msk.f32.mxu1 %vm26259_vm1, %v26258_v2 }
 0xf87   :  { %22177 = vmatmul.mubr.msk.f32.gmra.mrb[102].mxu1 %vm7825_vm2, %v31773_v4  ;;  %v11282_v4 = vld [vmem:[#allocation2 + $0xd3] sm:$0xff] }
 0xf88   :  { %22179 = vmatprep.mubr.msk.f32.mxu1 %vm26259_vm1, %v26258_v2 }
 0xf8b   :  { %22180 = vmatmul.mubr.msk.f32.gmra.mrb[104].mxu1 %vm7825_vm2, %v31779_v5  ;;  %v11283_v5 = vld [vmem:[#allocation2 + $0xdb] sm:$0xff] }
 0xf8c   :  { %22182 = vmatprep.mubr.msk.f32.mxu1 %vm26259_vm1, %v26258_v2 }
 0xf8f   :  { %22183 = vmatmul.mubr.msk.f32.gmra.mrb[106].mxu1 %vm7825_vm2, %v31785_v6  ;;  %v11284_v6 = vld [vmem:[#allocation2 + $0xe3] sm:$0xff] }
 0xf90   :  { %22185 = vmatprep.mubr.msk.f32.mxu1 %vm26259_vm1, %v26258_v2 }
 0xf93   :  { %22186 = vmatmul.mubr.msk.f32.gmra.mrb[108].mxu1 %vm7825_vm2, %v31791_v7  ;;  %v11285_v7 = vld [vmem:[#allocation2 + $0xeb] sm:$0xff] }
 0xf94   :  { %22188 = vmatprep.mubr.msk.f32.mxu1 %vm26259_vm1, %v26258_v2 }
 0xf97   :  { %22189 = vmatmul.mubr.msk.f32.gmra.mrb[110].mxu1 %vm7825_vm2, %v31797_v8  ;;  %v11286_v8 = vld [vmem:[#allocation2 + $0xf3] sm:$0xff] }
 0xf98   :  { %22191 = vmatprep.mubr.msk.f32.mxu1 %vm26259_vm1, %v26258_v2 }
 0xf9b   :  { %22192 = vmatmul.mubr.msk.f32.gmra.mrb[112].mxu1 %vm7825_vm2, %v31803_v9  ;;  %v11287_v9 = vld [vmem:[#allocation2 + $0xfb] sm:$0xff] }
 0xf9c   :  { %22194 = vmatprep.mubr.msk.f32.mxu1 %vm26259_vm1, %v26258_v2 }
 0xf9f   :  { %22195 = vmatmul.mubr.msk.f32.gmra.mrb[114].mxu1 %vm7825_vm2, %v31809_v10  ;;  %v11288_v10 = vld [vmem:[#allocation2 + $0x103] sm:$0xff] }
 0xfa0   :  { %22197 = vmatprep.mubr.msk.f32.mxu1 %vm26259_vm1, %v26258_v2 }
 0xfa3   :  { %22198 = vmatmul.mubr.msk.f32.gmra.mrb[116].mxu1 %vm7825_vm2, %v31815_v11  ;;  %v11289_v11 = vld [vmem:[#allocation2 + $0x10b] sm:$0xff] }
 0xfa4   :  { %22200 = vmatprep.mubr.msk.f32.mxu1 %vm26259_vm1, %v26258_v2 }
 0xfa7   :  { %22201 = vmatmul.mubr.msk.f32.gmra.mrb[118].mxu1 %vm7825_vm2, %v31821_v12  ;;  %v11290_v12 = vld [vmem:[#allocation2 + $0x113] sm:$0xff] }
 0xfa8   :  { %22203 = vmatprep.mubr.msk.f32.mxu1 %vm26259_vm1, %v26258_v2 }
 0xfab   :  { %22204 = vmatmul.mubr.msk.f32.gmra.mrb[120].mxu1 %vm7825_vm2, %v31827_v13  ;;  %v11291_v13 = vld [vmem:[#allocation2 + $0x11b] sm:$0xff] }
 0xfac   :  { %22206 = vmatprep.mubr.msk.f32.mxu1 %vm26259_vm1, %v26258_v2 }
 0xfaf   :  { %22207 = vmatmul.mubr.msk.f32.gmra.mrb[122].mxu1 %vm7825_vm2, %v31833_v14  ;;  %v11292_v14 = vld [vmem:[#allocation2 + $0x123] sm:$0xff] }
 0xfb0   :  { %22209 = vmatprep.mubr.msk.f32.mxu1 %vm26259_vm1, %v26258_v2 }
 0xfb3   :  { %22210 = vmatmul.mubr.msk.f32.gmra.mrb[124].mxu1 %vm7825_vm2, %v31839_v33  ;;  %v11293_v33 = vld [vmem:[#allocation2 + $0x12b] sm:$0xff] }
 0xfb4   :  { %22212 = vmatprep.mubr.msk.f32.mxu1 %vm26259_vm1, %v26258_v2 }
 0xfb7   :  { %22213 = vmatmul.mubr.msk.f32.gmra.mrb[126].mxu1 %vm7825_vm2, %v34097_v18  ;;  %v11299_v18 = vld [vmem:[#allocation2 + $0x15b] sm:$0xff] }
 0xfb8   :  { %22215 = vmatprep.mubr.msk.f32.mxu1 %vm26259_vm1, %v26258_v2 }
 0xfbb   :  { %22216 = vmatmul.mubr.msk.f32.gmra.mrb[128].mxu1 %vm7825_vm2, %v34098_v19  ;;  %v11300_v19 = vld [vmem:[#allocation2 + $0x163] sm:$0xff] }
 0xfbc   :  { %22218 = vmatprep.mubr.msk.f32.mxu1 %vm26259_vm1, %v26258_v2 }
 0xfbf   :  { %22219 = vmatmul.mubr.msk.f32.gmra.mrb[130].mxu1 %vm7825_vm2, %v34099_v20  ;;  %v11301_v20 = vld [vmem:[#allocation2 + $0x16b] sm:$0xff] }
 0xfc0   :  { %22221 = vmatprep.mubr.msk.f32.mxu1 %vm26259_vm1, %v26258_v2 }
 0xfc3   :  { %22222 = vmatmul.mubr.msk.f32.gmra.mrb[132].mxu1 %vm7825_vm2, %v34100_v21  ;;  %v11302_v21 = vld [vmem:[#allocation2 + $0x173] sm:$0xff] }
 0xfc4   :  { %22224 = vmatprep.mubr.msk.f32.mxu1 %vm26259_vm1, %v26258_v2 }
 0xfc7   :  { %22225 = vmatmul.mubr.msk.f32.gmra.mrb[134].mxu1 %vm7825_vm2, %v34101_v22  ;;  %v11303_v22 = vld [vmem:[#allocation2 + $0x17b] sm:$0xff] }
 0xfc8   :  { %22227 = vmatprep.mubr.msk.f32.mxu1 %vm26259_vm1, %v26258_v2 }
 0xfcb   :  { %22228 = vmatmul.mubr.msk.f32.gmra.mrb[136].mxu1 %vm7825_vm2, %v34102_v24  ;;  %v11304_v24 = vld [vmem:[#allocation2 + $0x183] sm:$0xff] }
 0xfcc   :  { %22230 = vmatprep.mubr.msk.f32.mxu1 %vm26259_vm1, %v26258_v2 }
 0xfcf   :  { %22231 = vmatmul.mubr.msk.f32.gmra.mrb[138].mxu1 %vm7825_vm2, %v34103_v25  ;;  %v11305_v25 = vld [vmem:[#allocation2 + $0x18b] sm:$0xff] }
 0xfd0   :  { %22233 = vmatprep.mubr.msk.f32.mxu1 %vm26259_vm1, %v26258_v2 }
 0xfd3   :  { %22234 = vmatmul.mubr.msk.f32.gmra.mrb[140].mxu1 %vm7825_vm2, %v34104_v26  ;;  %v11306_v26 = vld [vmem:[#allocation2 + $0x193] sm:$0xff] }
 0xfd4   :  { %22236 = vmatprep.mubr.msk.f32.mxu1 %vm26259_vm1, %v26258_v2 }
 0xfd7   :  { %22237 = vmatmul.mubr.msk.f32.gmra.mrb[142].mxu1 %vm7825_vm2, %v34105_v27  ;;  %v11307_v27 = vld [vmem:[#allocation2 + $0x19b] sm:$0xff] }
 0xfd8   :  { %22239 = vmatprep.mubr.msk.f32.mxu1 %vm26259_vm1, %v26258_v2 }
 0xfdb   :  { %22240 = vmatmul.mubr.msk.f32.gmra.mrb[144].mxu1 %vm7825_vm2, %v34106_v28  ;;  %v11308_v28 = vld [vmem:[#allocation2 + $0x1a3] sm:$0xff] }
 0xfdc   :  { %22242 = vmatprep.mubr.msk.f32.mxu1 %vm26259_vm1, %v26258_v2 }
 0xfdf   :  { %22243 = vmatmul.mubr.msk.f32.gmra.mrb[146].mxu1 %vm7825_vm2, %v34107_v29  ;;  %v11309_v29 = vld [vmem:[#allocation2 + $0x1ab] sm:$0xff] }
 0xfe0   :  { %22245 = vmatprep.mubr.msk.f32.mxu1 %vm26259_vm1, %v26258_v2 }
 0xfe3   :  { %22246 = vmatmul.mubr.msk.f32.gmra.mrb[148].mxu1 %vm7825_vm2, %v34108_v30  ;;  %v11310_v30 = vld [vmem:[#allocation2 + $0x1b3] sm:$0xff] }
 0xfe4   :  { %22248 = vmatprep.mubr.msk.f32.mxu1 %vm26259_vm1, %v26258_v2 }
 0xfe7   :  { %22249 = vmatmul.mubr.msk.f32.gmra.mrb[150].mxu1 %vm7825_vm2, %v34109_v31  ;;  %v11311_v31 = vld [vmem:[#allocation2 + $0x1bb] sm:$0xff] }
 0xfe8   :  { %22251 = vmatprep.mubr.msk.f32.mxu1 %vm26259_vm1, %v26258_v2 }
 0xfeb   :  { %22252 = vmatmul.mubr.msk.f32.gmra.mrb[152].mxu1 %vm7825_vm2, %v34110_v32  ;;  %v11312_v32 = vld [vmem:[#allocation2 + $0x1c3] sm:$0xff] }
 0xfec   :  { %22254 = vmatprep.mubr.msk.f32.mxu1 %vm26259_vm1, %v26258_v2 }
 0xfef   :  { %22255 = vmatmul.mubr.msk.f32.gmra.mrb[154].mxu1 %vm7825_vm2, %v34111_v38  ;;  %v11313_v38 = vld [vmem:[#allocation2 + $0x1cb] sm:$0xff] }
 0xff0   :  { %22257 = vmatprep.mubr.msk.f32.mxu1 %vm26259_vm1, %v26258_v2 }
 0xff3   :  { %22258 = vmatmul.mubr.msk.f32.gmra.mrb[156].mxu1 %vm7825_vm2, %v34112_v57  ;;  %v11314_v57 = vld [vmem:[#allocation2 + $0x1d3] sm:$0xff] }
 0xff4   :  { %22260 = vmatprep.mubr.msk.f32.mxu1 %vm26259_vm1, %v26258_v2 }
 0xff7   :  { %22261 = vmatmul.mubr.msk.f32.gmra.mrb[158].mxu1 %vm7825_vm2, %v31941_v36  ;;  %v11295_v36 = vld [vmem:[#allocation2 + $0x13b] sm:$0xff] }
 0xff8   :  { %22263 = vmatprep.mubr.msk.f32.mxu1 %vm26259_vm1, %v26258_v2 }
 0xffb   :  { %22264 = vmatmul.mubr.msk.f32.gmra.mrb[160].mxu1 %vm7825_vm2, %v31947_v23  ;;  %v11258_v23 = vld [vmem:[#allocation2 + $0x13] sm:$0xff] }
 0xffc   :  { %22266 = vmatprep.mubr.msk.f32.mxu1 %vm26259_vm1, %v26258_v2 }
 0xfff   :  { %22267 = vmatmul.mubr.msk.f32.gmra.mrb[162].mxu1 %vm7825_vm2, %v31953_v34  ;;  %v11294_v34 = vld [vmem:[#allocation2 + $0x133] sm:$0xff] }
0x1000   :  { %22269 = vmatprep.mubr.msk.f32.mxu1 %vm26259_vm1, %v26258_v2 }
0x1003   :  { %22270 = vmatmul.mubr.msk.f32.gmra.mrb[164].mxu1 %vm7825_vm2, %v10460_v39  ;;  %v11315_v39 = vld [vmem:[#allocation2 + $0x1db] sm:$0xff] }
0x1004   :  { %22272 = vmatprep.mubr.msk.f32.mxu1 %vm26259_vm1, %v26258_v2 }
0x1007   :  { %22273 = vmatmul.mubr.msk.f32.gmra.mrb[166].mxu1 %vm7825_vm2, %v10461_v40  ;;  %v11316_v40 = vld [vmem:[#allocation2 + $0x1e3] sm:$0xff] }
0x1008   :  { %22279 = vmatprep.mubr.msk.f32.mxu1 %vm26259_vm1, %v26258_v2 }
0x100b   :  { %22280 = vmatmul.mubr.msk.f32.vlgmr.msra.gmra.mrb[6].mxu1 %vm7825_vm2, %v11258_v23  ;;  %v11317_v23 = vld [vmem:[#allocation2 + $0x1eb] sm:$0xff] }
0x100c   :  { %22282 = vmatprep.mubr.msk.f32.mxu1 %vm26259_vm1, %v26258_v2  ;;  %23536 = vmatpush3.bf16.msra.mxu1 %v23535_v62  ;;  %v12135_v62 = vld [vmem:[#allocation2 + $0x14] sm:$0xff] }
0x100d   :  { %23537 = vmatprep.subr.bf16.mxu1 %v34096_v17 }
0x100f   :  { %22283 = vmatmul.mubr.msk.f32.gmra.mrb[8].mxu1 %vm7825_vm2, %v11259_v41  ;;  %v11318_v41 = vld [vmem:[#allocation2 + $0x1f3] sm:$0xff] }
0x1010   :  { %22285 = vmatprep.mubr.msk.f32.mxu1 %vm26259_vm1, %v26258_v2 }
0x1013   :  { %22286 = vmatmul.mubr.msk.f32.gmra.mrb[10].mxu1 %vm7825_vm2, %v11260_v42  ;;  %v11319_v42 = vld [vmem:[#allocation2 + $0x1fb] sm:$0xff] }
0x1014   :  { %22288 = vmatprep.mubr.msk.f32.mxu1 %vm26259_vm1, %v26258_v2 }
0x1017   :  { %22289 = vmatmul.mubr.msk.f32.gmra.mrb[12].mxu1 %vm7825_vm2, %v11261_v44  ;;  %v11320_v44 = vld [vmem:[#allocation2 + $0x203] sm:$0xff] }
0x1018   :  { %22291 = vmatprep.mubr.msk.f32.mxu1 %vm26259_vm1, %v26258_v2 }
0x101b   :  { %22292 = vmatmul.mubr.msk.f32.gmra.mrb[14].mxu1 %vm7825_vm2, %v11262_v45  ;;  %v11321_v45 = vld [vmem:[#allocation2 + $0x20b] sm:$0xff] }
0x101c   :  { %22294 = vmatprep.mubr.msk.f32.mxu1 %vm26259_vm1, %v26258_v2 }
0x101f   :  { %22295 = vmatmul.mubr.msk.f32.gmra.mrb[16].mxu1 %vm7825_vm2, %v11263_v46  ;;  %v11322_v46 = vld [vmem:[#allocation2 + $0x213] sm:$0xff] }
0x1020   :  { %22297 = vmatprep.mubr.msk.f32.mxu1 %vm26259_vm1, %v26258_v2 }
0x1023   :  { %22298 = vmatmul.mubr.msk.f32.gmra.mrb[18].mxu1 %vm7825_vm2, %v11264_v47  ;;  %v11323_v47 = vld [vmem:[#allocation2 + $0x21b] sm:$0xff] }
0x1024   :  { %22300 = vmatprep.mubr.msk.f32.mxu1 %vm26259_vm1, %v26258_v2 }
0x1027   :  { %22301 = vmatmul.mubr.msk.f32.gmra.mrb[20].mxu1 %vm7825_vm2, %v11265_v37  ;;  %v11324_v37 = vld [vmem:[#allocation2 + $0x223] sm:$0xff] }
0x1028   :  { %22303 = vmatprep.mubr.msk.f32.mxu1 %vm26259_vm1, %v26258_v2 }
0x102b   :  { %22304 = vmatmul.mubr.msk.f32.gmra.mrb[22].mxu1 %vm7825_vm2, %v11266_v48  ;;  %v11325_v48 = vld [vmem:[#allocation2 + $0x22b] sm:$0xff] }
0x102c   :  { %22306 = vmatprep.mubr.msk.f32.mxu1 %vm26259_vm1, %v26258_v2 }
0x102f   :  { %22307 = vmatmul.mubr.msk.f32.gmra.mrb[24].mxu1 %vm7825_vm2, %v11267_v49  ;;  %v11326_v49 = vld [vmem:[#allocation2 + $0x233] sm:$0xff] }
0x1030   :  { %22309 = vmatprep.mubr.msk.f32.mxu1 %vm26259_vm1, %v26258_v2 }
0x1033   :  { %22310 = vmatmul.mubr.msk.f32.gmra.mrb[26].mxu1 %vm7825_vm2, %v11268_v50  ;;  %v11327_v50 = vld [vmem:[#allocation2 + $0x23b] sm:$0xff] }
0x1034   :  { %22312 = vmatprep.mubr.msk.f32.mxu1 %vm26259_vm1, %v26258_v2 }
0x1037   :  { %22313 = vmatmul.mubr.msk.f32.gmra.mrb[28].mxu1 %vm7825_vm2, %v11269_v43  ;;  %v11328_v43 = vld [vmem:[#allocation2 + $0x243] sm:$0xff] }
0x1038   :  { %22315 = vmatprep.mubr.msk.f32.mxu1 %vm26259_vm1, %v26258_v2 }
0x103b   :  { %22316 = vmatmul.mubr.msk.f32.gmra.mrb[30].mxu1 %vm7825_vm2, %v11270_v51  ;;  %v11329_v51 = vld [vmem:[#allocation2 + $0x24b] sm:$0xff] }
0x103c   :  { %22318 = vmatprep.mubr.msk.f32.mxu1 %vm26259_vm1, %v26258_v2 }
0x103f   :  { %22319 = vmatmul.mubr.msk.f32.gmra.mrb[32].mxu1 %vm7825_vm2, %v11271_v52  ;;  %v11330_v52 = vld [vmem:[#allocation2 + $0x253] sm:$0xff] }
0x1040   :  { %22321 = vmatprep.mubr.msk.f32.mxu1 %vm26259_vm1, %v26258_v2 }
0x1043   :  { %22322 = vmatmul.mubr.msk.f32.gmra.mrb[34].mxu1 %vm7825_vm2, %v11272_v53  ;;  %v11331_v53 = vld [vmem:[#allocation2 + $0x25b] sm:$0xff] }
0x1044   :  { %22324 = vmatprep.mubr.msk.f32.mxu1 %vm26259_vm1, %v26258_v2 }
0x1047   :  { %22325 = vmatmul.mubr.msk.f32.gmra.mrb[36].mxu1 %vm7825_vm2, %v11273_v54  ;;  %v11332_v54 = vld [vmem:[#allocation2 + $0x263] sm:$0xff] }
0x1048   :  { %22327 = vmatprep.mubr.msk.f32.mxu1 %vm26259_vm1, %v26258_v2 }
0x104b   :  { %22328 = vmatmul.mubr.msk.f32.gmra.mrb[38].mxu1 %vm7825_vm2, %v11274_v55  ;;  %v11333_v55 = vld [vmem:[#allocation2 + $0x26b] sm:$0xff] }
0x104c   :  { %22330 = vmatprep.mubr.msk.f32.mxu1 %vm26259_vm1, %v26258_v2 }
0x104f   :  { %22331 = vmatmul.mubr.msk.f32.gmra.mrb[40].mxu1 %vm7825_vm2, %v11275_v56  ;;  %v11334_v56 = vld [vmem:[#allocation2 + $0x273] sm:$0xff] }
0x1050   :  { %22333 = vmatprep.mubr.msk.f32.mxu1 %vm26259_vm1, %v26258_v2 }
0x1053   :  { %22334 = vmatmul.mubr.msk.f32.gmra.mrb[42].mxu1 %vm7825_vm2, %v11276_v58  ;;  %v11335_v58 = vld [vmem:[#allocation2 + $0x27b] sm:$0xff] }
0x1054   :  { %22336 = vmatprep.mubr.msk.f32.mxu1 %vm26259_vm1, %v26258_v2 }
0x1057   :  { %22337 = vmatmul.mubr.msk.f32.gmra.mrb[44].mxu1 %vm7825_vm2, %v11277_v59  ;;  %v11336_v59 = vld [vmem:[#allocation2 + $0x283] sm:$0xff] }
0x1058   :  { %22339 = vmatprep.mubr.msk.f32.mxu1 %vm26259_vm1, %v26258_v2 }
0x105b   :  { %22340 = vmatmul.mubr.msk.f32.gmra.mrb[46].mxu1 %vm7825_vm2, %v11278_v63  ;;  %v12136_v63 = vld [vmem:[#allocation2 + $0x1c] sm:$0xff] }
0x105c   :  { %22342 = vmatprep.mubr.msk.f32.mxu1 %vm26259_vm1, %v26258_v2 }
0x105f   :  { %22343 = vmatmul.mubr.msk.f32.gmra.mrb[48].mxu1 %vm7825_vm2, %v11279_v0  ;;  %v32544_v0 = vld [vmem:[#allocation2 + $0x24] sm:$0xff] }
0x1060   :  { %22345 = vmatprep.mubr.msk.f32.mxu1 %vm26259_vm1, %v26258_v2 }
0x1063   :  { %22346 = vmatmul.mubr.msk.f32.gmra.mrb[50].mxu1 %vm7825_vm2, %v11280_v1  ;;  %v32550_v1 = vld [vmem:[#allocation2 + $0x2c] sm:$0xff] }
0x1064   :  { %22348 = vmatprep.mubr.msk.f32.mxu1 %vm26259_vm1, %v26258_v2 }
0x1067   :  { %22349 = vmatmul.mubr.msk.f32.gmra.mrb[52].mxu1 %vm7825_vm2, %v11281_v3  ;;  %v32556_v3 = vld [vmem:[#allocation2 + $0x34] sm:$0xff] }
0x1068   :  { %22351 = vmatprep.mubr.msk.f32.mxu1 %vm26259_vm1, %v26258_v2 }
0x106b   :  { %22352 = vmatmul.mubr.msk.f32.gmra.mrb[54].mxu1 %vm7825_vm2, %v11282_v4  ;;  %v32562_v4 = vld [vmem:[#allocation2 + $0x3c] sm:$0xff] }
0x106c   :  { %22354 = vmatprep.mubr.msk.f32.mxu1 %vm26259_vm1, %v26258_v2 }
0x106f   :  { %22355 = vmatmul.mubr.msk.f32.gmra.mrb[56].mxu1 %vm7825_vm2, %v11283_v5  ;;  %v32568_v5 = vld [vmem:[#allocation2 + $0x44] sm:$0xff] }
0x1070   :  { %22357 = vmatprep.mubr.msk.f32.mxu1 %vm26259_vm1, %v26258_v2 }
0x1073   :  { %22358 = vmatmul.mubr.msk.f32.gmra.mrb[58].mxu1 %vm7825_vm2, %v11284_v6  ;;  %v32574_v6 = vld [vmem:[#allocation2 + $0x4c] sm:$0xff] }
0x1074   :  { %22360 = vmatprep.mubr.msk.f32.mxu1 %vm26259_vm1, %v26258_v2 }
0x1077   :  { %22361 = vmatmul.mubr.msk.f32.gmra.mrb[60].mxu1 %vm7825_vm2, %v11285_v7  ;;  %v32580_v7 = vld [vmem:[#allocation2 + $0x54] sm:$0xff] }
0x1078   :  { %22363 = vmatprep.mubr.msk.f32.mxu1 %vm26259_vm1, %v26258_v2 }
0x107b   :  { %22364 = vmatmul.mubr.msk.f32.gmra.mrb[62].mxu1 %vm7825_vm2, %v11286_v8  ;;  %v32586_v8 = vld [vmem:[#allocation2 + $0x5c] sm:$0xff] }
0x107c   :  { %22366 = vmatprep.mubr.msk.f32.mxu1 %vm26259_vm1, %v26258_v2 }
0x107f   :  { %22367 = vmatmul.mubr.msk.f32.gmra.mrb[64].mxu1 %vm7825_vm2, %v11287_v9  ;;  %v32592_v9 = vld [vmem:[#allocation2 + $0x64] sm:$0xff] }
0x1080   :  { %22369 = vmatprep.mubr.msk.f32.mxu1 %vm26259_vm1, %v26258_v2 }
0x1083   :  { %22370 = vmatmul.mubr.msk.f32.gmra.mrb[66].mxu1 %vm7825_vm2, %v11288_v10  ;;  %v32598_v10 = vld [vmem:[#allocation2 + $0x6c] sm:$0xff] }
0x1084   :  { %22372 = vmatprep.mubr.msk.f32.mxu1 %vm26259_vm1, %v26258_v2 }
0x1087   :  { %22373 = vmatmul.mubr.msk.f32.gmra.mrb[68].mxu1 %vm7825_vm2, %v11289_v11  ;;  %v32604_v11 = vld [vmem:[#allocation2 + $0x74] sm:$0xff] }
0x1088   :  { %22375 = vmatprep.mubr.msk.f32.mxu1 %vm26259_vm1, %v26258_v2 }
0x108b   :  { %22376 = vmatmul.mubr.msk.f32.gmra.mrb[70].mxu1 %vm7825_vm2, %v11290_v12  ;;  %v32610_v12 = vld [vmem:[#allocation2 + $0x7c] sm:$0xff] }
0x108c   :  { %22378 = vmatprep.mubr.msk.f32.mxu1 %vm26259_vm1, %v26258_v2 }
0x108f   :  { %22379 = vmatmul.mubr.msk.f32.gmra.mrb[72].mxu1 %vm7825_vm2, %v11291_v13  ;;  %v32616_v13 = vld [vmem:[#allocation2 + $0x84] sm:$0xff] }
0x1090   :  { %22381 = vmatprep.mubr.msk.f32.mxu1 %vm26259_vm1, %v26258_v2 }
0x1093   :  { %22382 = vmatmul.mubr.msk.f32.gmra.mrb[74].mxu1 %vm7825_vm2, %v11292_v14  ;;  %v32622_v14 = vld [vmem:[#allocation2 + $0x8c] sm:$0xff] }
0x1094   :  { %22384 = vmatprep.mubr.msk.f32.mxu1 %vm26259_vm1, %v26258_v2 }
0x1097   :  { %22385 = vmatmul.mubr.msk.f32.gmra.mrb[76].mxu1 %vm7825_vm2, %v11293_v33  ;;  %v32628_v33 = vld [vmem:[#allocation2 + $0x94] sm:$0xff] }
0x1098   :  { %22387 = vmatprep.mubr.msk.f32.mxu1 %vm26259_vm1, %v26258_v2 }
0x109b   :  { %22388 = vmatmul.mubr.msk.f32.gmra.mrb[78].mxu1 %vm7825_vm2, %v11294_v34  ;;  %v32634_v34 = vld [vmem:[#allocation2 + $0x9c] sm:$0xff] }
0x109c   :  { %22390 = vmatprep.mubr.msk.f32.mxu1 %vm26259_vm1, %v26258_v2 }
0x109f   :  { %22391 = vmatmul.mubr.msk.f32.gmra.mrb[80].mxu1 %vm7825_vm2, %v11295_v36  ;;  %v32640_v36 = vld [vmem:[#allocation2 + $0xa4] sm:$0xff] }
0x10a0   :  { %22393 = vmatprep.mubr.msk.f32.mxu1 %vm26259_vm1, %v26258_v2 }
0x10a3   :  { %22394 = vmatmul.mubr.msk.f32.gmra.mrb[82].mxu1 %vm7825_vm2, %v11296_v15  ;;  %v32646_v15 = vld [vmem:[#allocation2 + $0xac] sm:$0xff] }
0x10a4   :  { %22396 = vmatprep.mubr.msk.f32.mxu1 %vm26259_vm1, %v26258_v2 }
0x10a7   :  { %22397 = vmatmul.mubr.msk.f32.gmra.mrb[84].mxu1 %vm7825_vm2, %v11297_v16  ;;  %v13093_v16 = vld [vmem:[%s33945_s2 + $0x60] sm:$0xff] }
0x10a8   :  { %22399 = vmatprep.mubr.msk.f32.mxu1 %vm26259_vm1, %v26258_v2 }
0x10ab   :  { %22400 = vmatmul.mubr.msk.f32.gmra.mrb[86].mxu1 %vm7825_vm2, %v11298_v35  ;;  %v13094_v35 = vld [vmem:[%s33945_s2 + $0x68] sm:$0xff] }
0x10ac   :  { %22402 = vmatprep.mubr.msk.f32.mxu1 %vm26259_vm1, %v26258_v2 }
0x10af   :  { %22403 = vmatmul.mubr.msk.f32.gmra.mrb[88].mxu1 %vm7825_vm2, %v11299_v18  ;;  %v23538_v18 = vpack.c.bf16 %v13094_v35, %v13093_v16  ;;  %v32905_v16 = vld [vmem:[#allocation2 + $0x1fc] sm:$0xff]  ;;  %v32911_v35 = vld [vmem:[#allocation2 + $0x204] sm:$0xff] }
0x10b0   :  { %22405 = vmatprep.mubr.msk.f32.mxu1 %vm26259_vm1, %v26258_v2  ;;  %34113 = vst [vmem:[#allocation6_spill] sm:$0xff] %v32905_v16  ;;  %34114 = vst [vmem:[#allocation7_spill] sm:$0xff] %v32911_v35 }
0x10b3   :  { %22406 = vmatmul.mubr.msk.f32.gmra.mrb[90].mxu1 %vm7825_vm2, %v11300_v19  ;;  %v32658_v19 = vld [vmem:[#allocation2 + $0xb4] sm:$0xff] }
0x10b4   :  { %22408 = vmatprep.mubr.msk.f32.mxu1 %vm26259_vm1, %v26258_v2 }
0x10b7   :  { %22409 = vmatmul.mubr.msk.f32.gmra.mrb[92].mxu1 %vm7825_vm2, %v11301_v20  ;;  %v32665_v20 = vld [vmem:[#allocation2 + $0xbc] sm:$0xff] }
0x10b8   :  { %22411 = vmatprep.mubr.msk.f32.mxu1 %vm26259_vm1, %v26258_v2 }
0x10bb   :  { %22412 = vmatmul.mubr.msk.f32.gmra.mrb[94].mxu1 %vm7825_vm2, %v11302_v21  ;;  %v32671_v21 = vld [vmem:[#allocation2 + $0xc4] sm:$0xff] }
0x10bc   :  { %22414 = vmatprep.mubr.msk.f32.mxu1 %vm26259_vm1, %v26258_v2 }
0x10bf   :  { %22415 = vmatmul.mubr.msk.f32.gmra.mrb[96].mxu1 %vm7825_vm2, %v11303_v22  ;;  %v32677_v22 = vld [vmem:[#allocation2 + $0xcc] sm:$0xff] }
0x10c0   :  { %22417 = vmatprep.mubr.msk.f32.mxu1 %vm26259_vm1, %v26258_v2 }
0x10c3   :  { %22418 = vmatmul.mubr.msk.f32.gmra.mrb[98].mxu1 %vm7825_vm2, %v11304_v24  ;;  %v32683_v24 = vld [vmem:[#allocation2 + $0xd4] sm:$0xff] }
0x10c4   :  { %22420 = vmatprep.mubr.msk.f32.mxu1 %vm26259_vm1, %v26258_v2 }
0x10c7   :  { %22421 = vmatmul.mubr.msk.f32.gmra.mrb[100].mxu1 %vm7825_vm2, %v11305_v25  ;;  %v32689_v25 = vld [vmem:[#allocation2 + $0xdc] sm:$0xff] }
0x10c8   :  { %22423 = vmatprep.mubr.msk.f32.mxu1 %vm26259_vm1, %v26258_v2 }
0x10cb   :  { %22424 = vmatmul.mubr.msk.f32.gmra.mrb[102].mxu1 %vm7825_vm2, %v11306_v26  ;;  %v32695_v26 = vld [vmem:[#allocation2 + $0xe4] sm:$0xff] }
0x10cc   :  { %22426 = vmatprep.mubr.msk.f32.mxu1 %vm26259_vm1, %v26258_v2 }
0x10cf   :  { %22427 = vmatmul.mubr.msk.f32.gmra.mrb[104].mxu1 %vm7825_vm2, %v11307_v27  ;;  %v32701_v27 = vld [vmem:[#allocation2 + $0xec] sm:$0xff] }
0x10d0   :  { %22429 = vmatprep.mubr.msk.f32.mxu1 %vm26259_vm1, %v26258_v2 }
0x10d3   :  { %22430 = vmatmul.mubr.msk.f32.gmra.mrb[106].mxu1 %vm7825_vm2, %v11308_v28  ;;  %v32707_v28 = vld [vmem:[#allocation2 + $0xf4] sm:$0xff] }
0x10d4   :  { %22432 = vmatprep.mubr.msk.f32.mxu1 %vm26259_vm1, %v26258_v2 }
0x10d7   :  { %22433 = vmatmul.mubr.msk.f32.gmra.mrb[108].mxu1 %vm7825_vm2, %v11309_v29  ;;  %v32713_v29 = vld [vmem:[#allocation2 + $0xfc] sm:$0xff] }
0x10d8   :  { %22435 = vmatprep.mubr.msk.f32.mxu1 %vm26259_vm1, %v26258_v2 }
0x10db   :  { %22436 = vmatmul.mubr.msk.f32.gmra.mrb[110].mxu1 %vm7825_vm2, %v11310_v30  ;;  %v32719_v30 = vld [vmem:[#allocation2 + $0x104] sm:$0xff] }
0x10dc   :  { %22438 = vmatprep.mubr.msk.f32.mxu1 %vm26259_vm1, %v26258_v2 }
0x10df   :  { %22439 = vmatmul.mubr.msk.f32.gmra.mrb[112].mxu1 %vm7825_vm2, %v11311_v31  ;;  %v32725_v31 = vld [vmem:[#allocation2 + $0x10c] sm:$0xff] }
0x10e0   :  { %22441 = vmatprep.mubr.msk.f32.mxu1 %vm26259_vm1, %v26258_v2 }
0x10e3   :  { %22442 = vmatmul.mubr.msk.f32.gmra.mrb[114].mxu1 %vm7825_vm2, %v11312_v32  ;;  %v32731_v32 = vld [vmem:[#allocation2 + $0x114] sm:$0xff] }
0x10e4   :  { %22444 = vmatprep.mubr.msk.f32.mxu1 %vm26259_vm1, %v26258_v2 }
0x10e7   :  { %22445 = vmatmul.mubr.msk.f32.gmra.mrb[116].mxu1 %vm7825_vm2, %v11313_v38  ;;  %v32737_v38 = vld [vmem:[#allocation2 + $0x11c] sm:$0xff] }
0x10e8   :  { %22447 = vmatprep.mubr.msk.f32.mxu1 %vm26259_vm1, %v26258_v2 }
0x10eb   :  { %22448 = vmatmul.mubr.msk.f32.gmra.mrb[118].mxu1 %vm7825_vm2, %v11314_v57  ;;  %v32743_v57 = vld [vmem:[#allocation2 + $0x124] sm:$0xff] }
0x10ec   :  { %22450 = vmatprep.mubr.msk.f32.mxu1 %vm26259_vm1, %v26258_v2 }
0x10ef   :  { %22451 = vmatmul.mubr.msk.f32.gmra.mrb[120].mxu1 %vm7825_vm2, %v11315_v39  ;;  %v32749_v39 = vld [vmem:[#allocation2 + $0x12c] sm:$0xff] }
0x10f0   :  { %22453 = vmatprep.mubr.msk.f32.mxu1 %vm26259_vm1, %v26258_v2 }
0x10f3   :  { %22454 = vmatmul.mubr.msk.f32.gmra.mrb[122].mxu1 %vm7825_vm2, %v11316_v40  ;;  %v32755_v40 = vld [vmem:[#allocation2 + $0x134] sm:$0xff] }
0x10f4   :  { %22456 = vmatprep.mubr.msk.f32.mxu1 %vm26259_vm1, %v26258_v2 }
0x10f7   :  { %22457 = vmatmul.mubr.msk.f32.gmra.mrb[124].mxu1 %vm7825_vm2, %v11317_v23  ;;  %v32761_v23 = vld [vmem:[#allocation2 + $0x13c] sm:$0xff] }
0x10f8   :  { %22459 = vmatprep.mubr.msk.f32.mxu1 %vm26259_vm1, %v26258_v2 }
0x10fb   :  { %22460 = vmatmul.mubr.msk.f32.gmra.mrb[126].mxu1 %vm7825_vm2, %v11318_v41  ;;  %v32767_v41 = vld [vmem:[#allocation2 + $0x144] sm:$0xff] }
0x10fc   :  { %22462 = vmatprep.mubr.msk.f32.mxu1 %vm26259_vm1, %v26258_v2 }
0x10ff   :  { %22463 = vmatmul.mubr.msk.f32.gmra.mrb[128].mxu1 %vm7825_vm2, %v11319_v42  ;;  %v32773_v42 = vld [vmem:[#allocation2 + $0x14c] sm:$0xff] }
0x1100   :  { %22465 = vmatprep.mubr.msk.f32.mxu1 %vm26259_vm1, %v26258_v2 }
0x1103   :  { %22466 = vmatmul.mubr.msk.f32.gmra.mrb[130].mxu1 %vm7825_vm2, %v11320_v44  ;;  %v32779_v44 = vld [vmem:[#allocation2 + $0x154] sm:$0xff] }
0x1104   :  { %22468 = vmatprep.mubr.msk.f32.mxu1 %vm26259_vm1, %v26258_v2 }
0x1107   :  { %22469 = vmatmul.mubr.msk.f32.gmra.mrb[132].mxu1 %vm7825_vm2, %v11321_v45  ;;  %v32785_v45 = vld [vmem:[#allocation2 + $0x15c] sm:$0xff] }
0x1108   :  { %22471 = vmatprep.mubr.msk.f32.mxu1 %vm26259_vm1, %v26258_v2 }
0x110b   :  { %22472 = vmatmul.mubr.msk.f32.gmra.mrb[134].mxu1 %vm7825_vm2, %v11322_v46  ;;  %v32791_v46 = vld [vmem:[#allocation2 + $0x164] sm:$0xff] }
0x110c   :  { %22474 = vmatprep.mubr.msk.f32.mxu1 %vm26259_vm1, %v26258_v2 }
0x110f   :  { %22475 = vmatmul.mubr.msk.f32.gmra.mrb[136].mxu1 %vm7825_vm2, %v11323_v47  ;;  %v32797_v47 = vld [vmem:[#allocation2 + $0x16c] sm:$0xff] }
0x1110   :  { %22477 = vmatprep.mubr.msk.f32.mxu1 %vm26259_vm1, %v26258_v2 }
0x1113   :  { %22478 = vmatmul.mubr.msk.f32.gmra.mrb[138].mxu1 %vm7825_vm2, %v11324_v37  ;;  %v32803_v37 = vld [vmem:[#allocation2 + $0x174] sm:$0xff] }
0x1114   :  { %22480 = vmatprep.mubr.msk.f32.mxu1 %vm26259_vm1, %v26258_v2 }
0x1117   :  { %22481 = vmatmul.mubr.msk.f32.gmra.mrb[140].mxu1 %vm7825_vm2, %v11325_v48  ;;  %v32809_v48 = vld [vmem:[#allocation2 + $0x17c] sm:$0xff] }
0x1118   :  { %22483 = vmatprep.mubr.msk.f32.mxu1 %vm26259_vm1, %v26258_v2 }
0x111b   :  { %22484 = vmatmul.mubr.msk.f32.gmra.mrb[142].mxu1 %vm7825_vm2, %v11326_v49  ;;  %v32815_v49 = vld [vmem:[#allocation2 + $0x184] sm:$0xff] }
0x111c   :  { %22486 = vmatprep.mubr.msk.f32.mxu1 %vm26259_vm1, %v26258_v2 }
0x111f   :  { %22487 = vmatmul.mubr.msk.f32.gmra.mrb[144].mxu1 %vm7825_vm2, %v11327_v50  ;;  %v32821_v50 = vld [vmem:[#allocation2 + $0x18c] sm:$0xff] }
0x1120   :  { %22489 = vmatprep.mubr.msk.f32.mxu1 %vm26259_vm1, %v26258_v2 }
0x1123   :  { %22490 = vmatmul.mubr.msk.f32.gmra.mrb[146].mxu1 %vm7825_vm2, %v11328_v43  ;;  %v32827_v43 = vld [vmem:[#allocation2 + $0x194] sm:$0xff] }
0x1124   :  { %22492 = vmatprep.mubr.msk.f32.mxu1 %vm26259_vm1, %v26258_v2 }
0x1127   :  { %22493 = vmatmul.mubr.msk.f32.gmra.mrb[148].mxu1 %vm7825_vm2, %v11329_v51  ;;  %v32833_v51 = vld [vmem:[#allocation2 + $0x19c] sm:$0xff] }
0x1128   :  { %22495 = vmatprep.mubr.msk.f32.mxu1 %vm26259_vm1, %v26258_v2 }
0x112b   :  { %22496 = vmatmul.mubr.msk.f32.gmra.mrb[150].mxu1 %vm7825_vm2, %v11330_v52  ;;  %v32839_v52 = vld [vmem:[#allocation2 + $0x1a4] sm:$0xff] }
0x112c   :  { %22498 = vmatprep.mubr.msk.f32.mxu1 %vm26259_vm1, %v26258_v2 }
0x112f   :  { %22499 = vmatmul.mubr.msk.f32.gmra.mrb[152].mxu1 %vm7825_vm2, %v11331_v53  ;;  %v32845_v53 = vld [vmem:[#allocation2 + $0x1ac] sm:$0xff] }
0x1130   :  { %22501 = vmatprep.mubr.msk.f32.mxu1 %vm26259_vm1, %v26258_v2 }
0x1133   :  { %22502 = vmatmul.mubr.msk.f32.gmra.mrb[154].mxu1 %vm7825_vm2, %v11332_v54  ;;  %v32851_v54 = vld [vmem:[#allocation2 + $0x1b4] sm:$0xff] }
0x1134   :  { %22504 = vmatprep.mubr.msk.f32.mxu1 %vm26259_vm1, %v26258_v2 }
0x1137   :  { %22505 = vmatmul.mubr.msk.f32.gmra.mrb[156].mxu1 %vm7825_vm2, %v11333_v55  ;;  %v32857_v55 = vld [vmem:[#allocation2 + $0x1bc] sm:$0xff] }
0x1138   :  { %22507 = vmatprep.mubr.msk.f32.mxu1 %vm26259_vm1, %v26258_v2 }
0x113b   :  { %22508 = vmatmul.mubr.msk.f32.gmra.mrb[158].mxu1 %vm7825_vm2, %v11334_v56  ;;  %v32863_v56 = vld [vmem:[#allocation2 + $0x1c4] sm:$0xff] }
0x113c   :  { %22510 = vmatprep.mubr.msk.f32.mxu1 %vm26259_vm1, %v26258_v2 }
0x113f   :  { %22511 = vmatmul.mubr.msk.f32.gmra.mrb[160].mxu1 %vm7825_vm2, %v11335_v58  ;;  %v32869_v58 = vld [vmem:[#allocation2 + $0x1cc] sm:$0xff] }
0x1140   :  { %22513 = vmatprep.mubr.msk.f32.mxu1 %vm26259_vm1, %v26258_v2 }
0x1143   :  { %22514 = vmatmul.mubr.msk.f32.gmra.mrb[162].mxu1 %vm7825_vm2, %v11336_v59  ;;  %v32875_v59 = vld [vmem:[#allocation2 + $0x1d4] sm:$0xff] }
0x1144   :  { %22516 = vmatprep.mubr.msk.f32.mxu1 %vm26259_vm1, %v26258_v2 }
0x1147   :  { %22517 = vmatmul.mubr.msk.f32.gmra.mrb[164].mxu1 %vm7825_vm2, %v11337_v60  ;;  %v32881_v60 = vld [vmem:[#allocation2 + $0x1dc] sm:$0xff] }
0x1148   :  { %22519 = vmatprep.mubr.msk.f32.mxu1 %vm26259_vm1, %v26258_v2 }
0x114b   :  { %22520 = vmatmul.mubr.msk.f32.gmra.mrb[166].mxu1 %vm7825_vm2, %v11338_v61  ;;  %v32887_v61 = vld [vmem:[#allocation2 + $0x1e4] sm:$0xff] }
0x114c   :  { %22526 = vmatprep.mubr.msk.f32.mxu1 %vm26259_vm1, %v26258_v2 }
0x114f   :  { %22527 = vmatmul.mubr.msk.f32.vlgmr.msra.gmra.mrb[6].mxu1 %vm7825_vm2, %v12135_v62  ;;  %v32893_v62 = vld [vmem:[#allocation2 + $0x1ec] sm:$0xff] }
0x1150   :  { %22529 = vmatprep.mubr.msk.f32.mxu1 %vm26259_vm1, %v26258_v2  ;;  %23539 = vmatpush3.bf16.msra.mxu1 %v23538_v18  ;;  %v32917_v18 = vld [vmem:[#allocation2 + $0x20c] sm:$0xff] }
0x1151   :  { %23540 = vmatprep.subr.bf16.mxu1 %v34096_v17  ;;  %34115 = vst [vmem:[#allocation8_spill] sm:$0xff] %v32917_v18 }
0x1153   :  { %22530 = vmatmul.mubr.msk.f32.gmra.mrb[8].mxu1 %vm7825_vm2, %v12136_v63  ;;  %v32899_v63 = vld [vmem:[#allocation2 + $0x1f4] sm:$0xff] }
0x1154   :  { %22532 = vmatprep.mubr.msk.f32.mxu1 %vm26259_vm1, %v26258_v2 }
0x1157   :  { %22533 = vmatmul.mubr.msk.f32.gmra.mrb[10].mxu1 %vm7825_vm2, %v32544_v0 }
0x1158   :  { %22535 = vmatprep.mubr.msk.f32.mxu1 %vm26259_vm1, %v26258_v2 }
0x115b   :  { %22536 = vmatmul.mubr.msk.f32.gmra.mrb[12].mxu1 %vm7825_vm2, %v32550_v1 }
0x115c   :  { %22538 = vmatprep.mubr.msk.f32.mxu1 %vm26259_vm1, %v26258_v2 }
0x115f   :  { %22539 = vmatmul.mubr.msk.f32.gmra.mrb[14].mxu1 %vm7825_vm2, %v32556_v3 }
0x1160   :  { %22541 = vmatprep.mubr.msk.f32.mxu1 %vm26259_vm1, %v26258_v2 }
0x1163   :  { %22542 = vmatmul.mubr.msk.f32.gmra.mrb[16].mxu1 %vm7825_vm2, %v32562_v4 }
0x1164   :  { %22544 = vmatprep.mubr.msk.f32.mxu1 %vm26259_vm1, %v26258_v2 }
0x1167   :  { %22545 = vmatmul.mubr.msk.f32.gmra.mrb[18].mxu1 %vm7825_vm2, %v32568_v5 }
0x1168   :  { %22547 = vmatprep.mubr.msk.f32.mxu1 %vm26259_vm1, %v26258_v2 }
0x116b   :  { %22548 = vmatmul.mubr.msk.f32.gmra.mrb[20].mxu1 %vm7825_vm2, %v32574_v6 }
0x116c   :  { %22550 = vmatprep.mubr.msk.f32.mxu1 %vm26259_vm1, %v26258_v2 }
0x116f   :  { %22551 = vmatmul.mubr.msk.f32.gmra.mrb[22].mxu1 %vm7825_vm2, %v32580_v7 }
0x1170   :  { %22553 = vmatprep.mubr.msk.f32.mxu1 %vm26259_vm1, %v26258_v2 }
0x1173   :  { %22554 = vmatmul.mubr.msk.f32.gmra.mrb[24].mxu1 %vm7825_vm2, %v32586_v8 }
0x1174   :  { %22556 = vmatprep.mubr.msk.f32.mxu1 %vm26259_vm1, %v26258_v2 }
0x1177   :  { %22557 = vmatmul.mubr.msk.f32.gmra.mrb[26].mxu1 %vm7825_vm2, %v32592_v9 }
0x1178   :  { %22559 = vmatprep.mubr.msk.f32.mxu1 %vm26259_vm1, %v26258_v2 }
0x117b   :  { %22560 = vmatmul.mubr.msk.f32.gmra.mrb[28].mxu1 %vm7825_vm2, %v32598_v10 }
0x117c   :  { %22562 = vmatprep.mubr.msk.f32.mxu1 %vm26259_vm1, %v26258_v2 }
0x117f   :  { %22563 = vmatmul.mubr.msk.f32.gmra.mrb[30].mxu1 %vm7825_vm2, %v32604_v11 }
0x1180   :  { %22565 = vmatprep.mubr.msk.f32.mxu1 %vm26259_vm1, %v26258_v2 }
0x1183   :  { %22566 = vmatmul.mubr.msk.f32.gmra.mrb[32].mxu1 %vm7825_vm2, %v32610_v12 }
0x1184   :  { %22568 = vmatprep.mubr.msk.f32.mxu1 %vm26259_vm1, %v26258_v2 }
0x1187   :  { %22569 = vmatmul.mubr.msk.f32.gmra.mrb[34].mxu1 %vm7825_vm2, %v32616_v13 }
0x1188   :  { %22571 = vmatprep.mubr.msk.f32.mxu1 %vm26259_vm1, %v26258_v2 }
0x118b   :  { %22572 = vmatmul.mubr.msk.f32.gmra.mrb[36].mxu1 %vm7825_vm2, %v32622_v14 }
0x118c   :  { %22574 = vmatprep.mubr.msk.f32.mxu1 %vm26259_vm1, %v26258_v2 }
0x118f   :  { %22575 = vmatmul.mubr.msk.f32.gmra.mrb[38].mxu1 %vm7825_vm2, %v32628_v33 }
0x1190   :  { %22577 = vmatprep.mubr.msk.f32.mxu1 %vm26259_vm1, %v26258_v2 }
0x1193   :  { %22578 = vmatmul.mubr.msk.f32.gmra.mrb[40].mxu1 %vm7825_vm2, %v32634_v34 }
0x1194   :  { %22580 = vmatprep.mubr.msk.f32.mxu1 %vm26259_vm1, %v26258_v2 }
0x1197   :  { %22581 = vmatmul.mubr.msk.f32.gmra.mrb[42].mxu1 %vm7825_vm2, %v32640_v36 }
0x1198   :  { %22583 = vmatprep.mubr.msk.f32.mxu1 %vm26259_vm1, %v26258_v2 }
0x119b   :  { %22584 = vmatmul.mubr.msk.f32.gmra.mrb[44].mxu1 %vm7825_vm2, %v32646_v15 }
0x119c   :  { %22586 = vmatprep.mubr.msk.f32.mxu1 %vm26259_vm1, %v26258_v2 }
0x119f   :  { %22587 = vmatmul.mubr.msk.f32.gmra.mrb[46].mxu1 %vm7825_vm2, %v32658_v19 }
0x11a0   :  { %22589 = vmatprep.mubr.msk.f32.mxu1 %vm26259_vm1, %v26258_v2 }
0x11a3   :  { %22590 = vmatmul.mubr.msk.f32.gmra.mrb[48].mxu1 %vm7825_vm2, %v32665_v20 }
0x11a4   :  { %22592 = vmatprep.mubr.msk.f32.mxu1 %vm26259_vm1, %v26258_v2 }
0x11a7   :  { %22593 = vmatmul.mubr.msk.f32.gmra.mrb[50].mxu1 %vm7825_vm2, %v32671_v21 }
0x11a8   :  { %22595 = vmatprep.mubr.msk.f32.mxu1 %vm26259_vm1, %v26258_v2 }
0x11ab   :  { %22596 = vmatmul.mubr.msk.f32.gmra.mrb[52].mxu1 %vm7825_vm2, %v32677_v22 }
0x11ac   :  { %22598 = vmatprep.mubr.msk.f32.mxu1 %vm26259_vm1, %v26258_v2 }
0x11af   :  { %22599 = vmatmul.mubr.msk.f32.gmra.mrb[54].mxu1 %vm7825_vm2, %v32683_v24 }
0x11b0   :  { %22601 = vmatprep.mubr.msk.f32.mxu1 %vm26259_vm1, %v26258_v2 }
0x11b3   :  { %22602 = vmatmul.mubr.msk.f32.gmra.mrb[56].mxu1 %vm7825_vm2, %v32689_v25 }
0x11b4   :  { %22604 = vmatprep.mubr.msk.f32.mxu1 %vm26259_vm1, %v26258_v2 }
0x11b7   :  { %22605 = vmatmul.mubr.msk.f32.gmra.mrb[58].mxu1 %vm7825_vm2, %v32695_v26 }
0x11b8   :  { %22607 = vmatprep.mubr.msk.f32.mxu1 %vm26259_vm1, %v26258_v2 }
0x11bb   :  { %22608 = vmatmul.mubr.msk.f32.gmra.mrb[60].mxu1 %vm7825_vm2, %v32701_v27 }
0x11bc   :  { %22610 = vmatprep.mubr.msk.f32.mxu1 %vm26259_vm1, %v26258_v2 }
0x11bf   :  { %22611 = vmatmul.mubr.msk.f32.gmra.mrb[62].mxu1 %vm7825_vm2, %v32707_v28 }
0x11c0   :  { %22613 = vmatprep.mubr.msk.f32.mxu1 %vm26259_vm1, %v26258_v2 }
0x11c3   :  { %22614 = vmatmul.mubr.msk.f32.gmra.mrb[64].mxu1 %vm7825_vm2, %v32713_v29 }
0x11c4   :  { %22616 = vmatprep.mubr.msk.f32.mxu1 %vm26259_vm1, %v26258_v2 }
0x11c7   :  { %22617 = vmatmul.mubr.msk.f32.gmra.mrb[66].mxu1 %vm7825_vm2, %v32719_v30 }
0x11c8   :  { %22619 = vmatprep.mubr.msk.f32.mxu1 %vm26259_vm1, %v26258_v2 }
0x11cb   :  { %22620 = vmatmul.mubr.msk.f32.gmra.mrb[68].mxu1 %vm7825_vm2, %v32725_v31 }
0x11cc   :  { %22622 = vmatprep.mubr.msk.f32.mxu1 %vm26259_vm1, %v26258_v2 }
0x11cf   :  { %22623 = vmatmul.mubr.msk.f32.gmra.mrb[70].mxu1 %vm7825_vm2, %v32731_v32 }
0x11d0   :  { %22625 = vmatprep.mubr.msk.f32.mxu1 %vm26259_vm1, %v26258_v2 }
0x11d3   :  { %22626 = vmatmul.mubr.msk.f32.gmra.mrb[72].mxu1 %vm7825_vm2, %v32737_v38 }
0x11d4   :  { %22628 = vmatprep.mubr.msk.f32.mxu1 %vm26259_vm1, %v26258_v2 }
0x11d7   :  { %22629 = vmatmul.mubr.msk.f32.gmra.mrb[74].mxu1 %vm7825_vm2, %v32743_v57 }
0x11d8   :  { %22631 = vmatprep.mubr.msk.f32.mxu1 %vm26259_vm1, %v26258_v2 }
0x11db   :  { %22632 = vmatmul.mubr.msk.f32.gmra.mrb[76].mxu1 %vm7825_vm2, %v32749_v39 }
0x11dc   :  { %22634 = vmatprep.mubr.msk.f32.mxu1 %vm26259_vm1, %v26258_v2 }
0x11df   :  { %22635 = vmatmul.mubr.msk.f32.gmra.mrb[78].mxu1 %vm7825_vm2, %v32755_v40 }
0x11e0   :  { %22637 = vmatprep.mubr.msk.f32.mxu1 %vm26259_vm1, %v26258_v2 }
0x11e3   :  { %22638 = vmatmul.mubr.msk.f32.gmra.mrb[80].mxu1 %vm7825_vm2, %v32761_v23 }
0x11e4   :  { %22640 = vmatprep.mubr.msk.f32.mxu1 %vm26259_vm1, %v26258_v2 }
0x11e7   :  { %22641 = vmatmul.mubr.msk.f32.gmra.mrb[82].mxu1 %vm7825_vm2, %v32767_v41 }
0x11e8   :  { %22643 = vmatprep.mubr.msk.f32.mxu1 %vm26259_vm1, %v26258_v2 }
0x11eb   :  { %22644 = vmatmul.mubr.msk.f32.gmra.mrb[84].mxu1 %vm7825_vm2, %v32773_v42 }
0x11ec   :  { %22646 = vmatprep.mubr.msk.f32.mxu1 %vm26259_vm1, %v26258_v2 }
0x11ef   :  { %22647 = vmatmul.mubr.msk.f32.gmra.mrb[86].mxu1 %vm7825_vm2, %v32779_v44 }
0x11f0   :  { %22649 = vmatprep.mubr.msk.f32.mxu1 %vm26259_vm1, %v26258_v2 }
0x11f3   :  { %22650 = vmatmul.mubr.msk.f32.gmra.mrb[88].mxu1 %vm7825_vm2, %v32785_v45 }
0x11f4   :  { %22652 = vmatprep.mubr.msk.f32.mxu1 %vm26259_vm1, %v26258_v2 }
0x11f7   :  { %22653 = vmatmul.mubr.msk.f32.gmra.mrb[90].mxu1 %vm7825_vm2, %v32791_v46 }
0x11f8   :  { %22655 = vmatprep.mubr.msk.f32.mxu1 %vm26259_vm1, %v26258_v2 }
0x11fb   :  { %22656 = vmatmul.mubr.msk.f32.gmra.mrb[92].mxu1 %vm7825_vm2, %v32797_v47 }
0x11fc   :  { %22658 = vmatprep.mubr.msk.f32.mxu1 %vm26259_vm1, %v26258_v2 }
0x11ff   :  { %22659 = vmatmul.mubr.msk.f32.gmra.mrb[94].mxu1 %vm7825_vm2, %v32803_v37 }
0x1200   :  { %22661 = vmatprep.mubr.msk.f32.mxu1 %vm26259_vm1, %v26258_v2 }
0x1203   :  { %22662 = vmatmul.mubr.msk.f32.gmra.mrb[96].mxu1 %vm7825_vm2, %v32809_v48 }
0x1204   :  { %22664 = vmatprep.mubr.msk.f32.mxu1 %vm26259_vm1, %v26258_v2 }
0x1207   :  { %22665 = vmatmul.mubr.msk.f32.gmra.mrb[98].mxu1 %vm7825_vm2, %v32815_v49 }
0x1208   :  { %22667 = vmatprep.mubr.msk.f32.mxu1 %vm26259_vm1, %v26258_v2 }
0x120b   :  { %22668 = vmatmul.mubr.msk.f32.gmra.mrb[100].mxu1 %vm7825_vm2, %v32821_v50 }
0x120c   :  { %22670 = vmatprep.mubr.msk.f32.mxu1 %vm26259_vm1, %v26258_v2 }
0x120f   :  { %22671 = vmatmul.mubr.msk.f32.gmra.mrb[102].mxu1 %vm7825_vm2, %v32827_v43 }
0x1210   :  { %22673 = vmatprep.mubr.msk.f32.mxu1 %vm26259_vm1, %v26258_v2 }
0x1213   :  { %22674 = vmatmul.mubr.msk.f32.gmra.mrb[104].mxu1 %vm7825_vm2, %v32833_v51 }
0x1214   :  { %22676 = vmatprep.mubr.msk.f32.mxu1 %vm26259_vm1, %v26258_v2 }
0x1217   :  { %22677 = vmatmul.mubr.msk.f32.gmra.mrb[106].mxu1 %vm7825_vm2, %v32839_v52 }
0x1218   :  { %22679 = vmatprep.mubr.msk.f32.mxu1 %vm26259_vm1, %v26258_v2 }
0x121b   :  { %22680 = vmatmul.mubr.msk.f32.gmra.mrb[108].mxu1 %vm7825_vm2, %v32845_v53 }
0x121c   :  { %22682 = vmatprep.mubr.msk.f32.mxu1 %vm26259_vm1, %v26258_v2 }
0x121f   :  { %22683 = vmatmul.mubr.msk.f32.gmra.mrb[110].mxu1 %vm7825_vm2, %v32851_v54 }
0x1220   :  { %22685 = vmatprep.mubr.msk.f32.mxu1 %vm26259_vm1, %v26258_v2 }
0x1223   :  { %22686 = vmatmul.mubr.msk.f32.gmra.mrb[112].mxu1 %vm7825_vm2, %v32857_v55 }
0x1224   :  { %22688 = vmatprep.mubr.msk.f32.mxu1 %vm26259_vm1, %v26258_v2 }
0x1227   :  { %22689 = vmatmul.mubr.msk.f32.gmra.mrb[114].mxu1 %vm7825_vm2, %v32863_v56 }
0x1228   :  { %22691 = vmatprep.mubr.msk.f32.mxu1 %vm26259_vm1, %v26258_v2 }
0x122b   :  { %22692 = vmatmul.mubr.msk.f32.gmra.mrb[116].mxu1 %vm7825_vm2, %v32869_v58 }
0x122c   :  { %22694 = vmatprep.mubr.msk.f32.mxu1 %vm26259_vm1, %v26258_v2 }
0x122f   :  { %22695 = vmatmul.mubr.msk.f32.gmra.mrb[118].mxu1 %vm7825_vm2, %v32875_v59 }
0x1230   :  { %22697 = vmatprep.mubr.msk.f32.mxu1 %vm26259_vm1, %v26258_v2 }
0x1233   :  { %22698 = vmatmul.mubr.msk.f32.gmra.mrb[120].mxu1 %vm7825_vm2, %v32881_v60 }
0x1234   :  { %22700 = vmatprep.mubr.msk.f32.mxu1 %vm26259_vm1, %v26258_v2 }
0x1237   :  { %22701 = vmatmul.mubr.msk.f32.gmra.mrb[122].mxu1 %vm7825_vm2, %v32887_v61 }
0x1238   :  { %22703 = vmatprep.mubr.msk.f32.mxu1 %vm26259_vm1, %v26258_v2 }
0x123b   :  { %22704 = vmatmul.mubr.msk.f32.gmra.mrb[124].mxu1 %vm7825_vm2, %v32893_v62 }
0x123c   :  { %22706 = vmatprep.mubr.msk.f32.mxu1 %vm26259_vm1, %v26258_v2 }
0x123f   :  { %22707 = vmatmul.mubr.msk.f32.gmra.mrb[126].mxu1 %vm7825_vm2, %v32899_v63 }
0x1240   :  { %22709 = vmatprep.mubr.msk.f32.mxu1 %vm26259_vm1, %v26258_v2 }
0x1243   :  { %22710 = vmatmul.mubr.msk.f32.gmra.mrb[128].mxu1 %vm7825_vm2, %v32905_v16  ;;  %v32923_v16 = vld [vmem:[#allocation2 + $0x214] sm:$0xff] }
0x1244   :  { %22712 = vmatprep.mubr.msk.f32.mxu1 %vm26259_vm1, %v26258_v2  ;;  %34116 = vst [vmem:[#allocation9_spill] sm:$0xff] %v32923_v16 }
0x1247   :  { %22713 = vmatmul.mubr.msk.f32.gmra.mrb[130].mxu1 %vm7825_vm2, %v32911_v35  ;;  %v32929_v35 = vld [vmem:[#allocation2 + $0x21c] sm:$0xff] }
0x1248   :  { %22715 = vmatprep.mubr.msk.f32.mxu1 %vm26259_vm1, %v26258_v2  ;;  %34117 = vst [vmem:[#allocation10_spill] sm:$0xff] %v32929_v35 }
0x124b   :  { %22716 = vmatmul.mubr.msk.f32.gmra.mrb[132].mxu1 %vm7825_vm2, %v32917_v18  ;;  %v32935_v18 = vld [vmem:[#allocation2 + $0x224] sm:$0xff] }
0x124c   :  { %22718 = vmatprep.mubr.msk.f32.mxu1 %vm26259_vm1, %v26258_v2  ;;  %34118 = vst [vmem:[#allocation11_spill] sm:$0xff] %v32935_v18 }
0x124f   :  { %22719 = vmatmul.mubr.msk.f32.gmra.mrb[134].mxu1 %vm7825_vm2, %v32923_v16  ;;  %v32941_v16 = vld [vmem:[#allocation2 + $0x22c] sm:$0xff] }
0x1250   :  { %22721 = vmatprep.mubr.msk.f32.mxu1 %vm26259_vm1, %v26258_v2  ;;  %34119 = vst [vmem:[#allocation12_spill] sm:$0xff] %v32941_v16 }
0x1253   :  { %22722 = vmatmul.mubr.msk.f32.gmra.mrb[136].mxu1 %vm7825_vm2, %v32929_v35  ;;  %v32947_v35 = vld [vmem:[#allocation2 + $0x234] sm:$0xff] }
0x1254   :  { %22724 = vmatprep.mubr.msk.f32.mxu1 %vm26259_vm1, %v26258_v2  ;;  %34120 = vst [vmem:[#allocation13_spill] sm:$0xff] %v32947_v35 }
0x1257   :  { %22725 = vmatmul.mubr.msk.f32.gmra.mrb[138].mxu1 %vm7825_vm2, %v32935_v18  ;;  %v32953_v18 = vld [vmem:[#allocation2 + $0x23c] sm:$0xff] }
0x1258   :  { %22727 = vmatprep.mubr.msk.f32.mxu1 %vm26259_vm1, %v26258_v2  ;;  %34121 = vst [vmem:[#allocation14_spill] sm:$0xff] %v32953_v18 }
0x125b   :  { %22728 = vmatmul.mubr.msk.f32.gmra.mrb[140].mxu1 %vm7825_vm2, %v32941_v16  ;;  %v32959_v16 = vld [vmem:[#allocation2 + $0x244] sm:$0xff] }
0x125c   :  { %22730 = vmatprep.mubr.msk.f32.mxu1 %vm26259_vm1, %v26258_v2  ;;  %34122 = vst [vmem:[#allocation15_spill] sm:$0xff] %v32959_v16 }
0x125f   :  { %22731 = vmatmul.mubr.msk.f32.gmra.mrb[142].mxu1 %vm7825_vm2, %v32947_v35  ;;  %v32965_v35 = vld [vmem:[#allocation2 + $0x24c] sm:$0xff] }
0x1260   :  { %22733 = vmatprep.mubr.msk.f32.mxu1 %vm26259_vm1, %v26258_v2  ;;  %34123 = vst [vmem:[#allocation16_spill] sm:$0xff] %v32965_v35 }
0x1263   :  { %22734 = vmatmul.mubr.msk.f32.gmra.mrb[144].mxu1 %vm7825_vm2, %v32953_v18  ;;  %v32971_v18 = vld [vmem:[#allocation2 + $0x254] sm:$0xff] }
0x1264   :  { %22736 = vmatprep.mubr.msk.f32.mxu1 %vm26259_vm1, %v26258_v2  ;;  %34124 = vst [vmem:[#allocation17_spill] sm:$0xff] %v32971_v18 }
0x1267   :  { %22737 = vmatmul.mubr.msk.f32.gmra.mrb[146].mxu1 %vm7825_vm2, %v32959_v16  ;;  %v32977_v16 = vld [vmem:[#allocation2 + $0x25c] sm:$0xff] }
0x1268   :  { %22739 = vmatprep.mubr.msk.f32.mxu1 %vm26259_vm1, %v26258_v2  ;;  %34125 = vst [vmem:[#allocation18_spill] sm:$0xff] %v32977_v16 }
0x126b   :  { %22740 = vmatmul.mubr.msk.f32.gmra.mrb[148].mxu1 %vm7825_vm2, %v32965_v35  ;;  %v32983_v35 = vld [vmem:[#allocation2 + $0x264] sm:$0xff] }
0x126c   :  { %22742 = vmatprep.mubr.msk.f32.mxu1 %vm26259_vm1, %v26258_v2  ;;  %34126 = vst [vmem:[#allocation19_spill] sm:$0xff] %v32983_v35 }
0x126f   :  { %22743 = vmatmul.mubr.msk.f32.gmra.mrb[150].mxu1 %vm7825_vm2, %v32971_v18  ;;  %v32989_v18 = vld [vmem:[#allocation2 + $0x26c] sm:$0xff] }
0x1270   :  { %22745 = vmatprep.mubr.msk.f32.mxu1 %vm26259_vm1, %v26258_v2  ;;  %34127 = vst [vmem:[#allocation20_spill] sm:$0xff] %v32989_v18 }
0x1273   :  { %22746 = vmatmul.mubr.msk.f32.gmra.mrb[152].mxu1 %vm7825_vm2, %v32977_v16  ;;  %v32995_v16 = vld [vmem:[#allocation2 + $0x274] sm:$0xff] }
0x1274   :  { %22748 = vmatprep.mubr.msk.f32.mxu1 %vm26259_vm1, %v26258_v2  ;;  %34128 = vst [vmem:[#allocation21_spill] sm:$0xff] %v32995_v16 }
0x1277   :  { %22749 = vmatmul.mubr.msk.f32.gmra.mrb[154].mxu1 %vm7825_vm2, %v32983_v35  ;;  %v33001_v35 = vld [vmem:[#allocation2 + $0x27c] sm:$0xff] }
0x1278   :  { %22751 = vmatprep.mubr.msk.f32.mxu1 %vm26259_vm1, %v26258_v2  ;;  %34129 = vst [vmem:[#allocation22_spill] sm:$0xff] %v33001_v35 }
0x127b   :  { %22752 = vmatmul.mubr.msk.f32.gmra.mrb[156].mxu1 %vm7825_vm2, %v32989_v18  ;;  %v33007_v18 = vld [vmem:[#allocation2 + $0x284] sm:$0xff] }
0x127c   :  { %22754 = vmatprep.mubr.msk.f32.mxu1 %vm26259_vm1, %v26258_v2 }
0x127f   :  { %22755 = vmatmul.mubr.msk.f32.gmra.mrb[158].mxu1 %vm7825_vm2, %v32995_v16  ;;  %v33013_v16 = vld [vmem:[#allocation2 + $0x28c] sm:$0xff] }
0x1280   :  { %22757 = vmatprep.mubr.msk.f32.mxu1 %vm26259_vm1, %v26258_v2 }
0x1283   :  { %22758 = vmatmul.mubr.msk.f32.gmra.mrb[160].mxu1 %vm7825_vm2, %v33001_v35  ;;  %v33019_v35 = vld [vmem:[#allocation2 + $0x294] sm:$0xff] }
0x1284   :  { %22760 = vmatprep.mubr.msk.f32.mxu1 %vm26259_vm1, %v26258_v2 }
0x1287   :  { %22761 = vmatmul.mubr.msk.f32.gmra.mrb[162].mxu1 %vm7825_vm2, %v33007_v18 }
0x1288   :  { %22763 = vmatprep.mubr.msk.f32.mxu1 %vm26259_vm1, %v26258_v2 }
0x128b   :  { %22764 = vmatmul.mubr.msk.f32.gmra.mrb[164].mxu1 %vm7825_vm2, %v33013_v16 }
0x128c   :  { %22766 = vmatprep.mubr.msk.f32.mxu1 %vm26259_vm1, %v26258_v2 }
0x128f   :  { %22767 = vmatmul.mubr.msk.f32.gmra.mrb[166].mxu1 %vm7825_vm2, %v33019_v35 }
0x1290   :  { %22773 = vmatprep.mubr.msk.f32.mxu1 %vm26259_vm1, %v26258_v2 }
0x1293   :  { %22774 = vmatmul.mubr.msk.f32.vlgmr.msra.gmra.mrb[6].mxu1 %vm7825_vm2, %v32544_v0  ;;  %v13970_v0 = vld [vmem:[%s33945_s2 + $0x70] sm:$0xff] }
0x1294   :  { %22776 = vmatprep.mubr.msk.f32.mxu1 %vm26259_vm1, %v26258_v2 }
0x1297   :  { %22777 = vmatmul.mubr.msk.f32.gmra.mrb[8].mxu1 %vm7825_vm2, %v32550_v1  ;;  %v13971_v1 = vld [vmem:[%s33945_s2 + $0x78] sm:$0xff] }
0x1298   :  { %22779 = vmatprep.mubr.msk.f32.mxu1 %vm26259_vm1, %v26258_v2 }
0x129b   :  { %22780 = vmatmul.mubr.msk.f32.gmra.mrb[10].mxu1 %vm7825_vm2, %v32556_v3  ;;  %v23541_v3 = vpack.c.bf16 %v13971_v1, %v13970_v0  ;;  %v13926_v0 = vld [vmem:[#allocation2 + $0x14d] sm:$0xff]  ;;  %v13927_v1 = vld [vmem:[#allocation2 + $0x155] sm:$0xff] }
0x129c   :  { %22782 = vmatprep.mubr.msk.f32.mxu1 %vm26259_vm1, %v26258_v2 }
0x129d   :  { %23542 = vmatpush3.bf16.msra.mxu1 %v23541_v3  ;;  %v13928_v3 = vld [vmem:[#allocation2 + $0x15d] sm:$0xff] }
0x129e   :  { %23543 = vmatprep.subr.bf16.mxu1 %v34096_v17 }
0x129f   :  { %22783 = vmatmul.mubr.msk.f32.gmra.mrb[12].mxu1 %vm7825_vm2, %v32562_v4  ;;  %v34130_v4 = vld [vmem:[#allocation6_spill] sm:$0xff] }
0x12a0   :  { %22785 = vmatprep.mubr.msk.f32.mxu1 %vm26259_vm1, %v26258_v2 }
0x12a3   :  { %22786 = vmatmul.mubr.msk.f32.gmra.mrb[14].mxu1 %vm7825_vm2, %v32568_v5  ;;  %v34131_v5 = vld [vmem:[#allocation7_spill] sm:$0xff] }
0x12a4   :  { %22788 = vmatprep.mubr.msk.f32.mxu1 %vm26259_vm1, %v26258_v2 }
0x12a7   :  { %22789 = vmatmul.mubr.msk.f32.gmra.mrb[16].mxu1 %vm7825_vm2, %v32574_v6  ;;  %v34132_v6 = vld [vmem:[#allocation8_spill] sm:$0xff] }
0x12a8   :  { %22791 = vmatprep.mubr.msk.f32.mxu1 %vm26259_vm1, %v26258_v2 }
0x12ab   :  { %22792 = vmatmul.mubr.msk.f32.gmra.mrb[18].mxu1 %vm7825_vm2, %v32580_v7  ;;  %v34133_v7 = vld [vmem:[#allocation9_spill] sm:$0xff] }
0x12ac   :  { %22794 = vmatprep.mubr.msk.f32.mxu1 %vm26259_vm1, %v26258_v2 }
0x12af   :  { %22795 = vmatmul.mubr.msk.f32.gmra.mrb[20].mxu1 %vm7825_vm2, %v32586_v8  ;;  %v34134_v8 = vld [vmem:[#allocation10_spill] sm:$0xff] }
0x12b0   :  { %22797 = vmatprep.mubr.msk.f32.mxu1 %vm26259_vm1, %v26258_v2 }
0x12b3   :  { %22798 = vmatmul.mubr.msk.f32.gmra.mrb[22].mxu1 %vm7825_vm2, %v32592_v9  ;;  %v34135_v9 = vld [vmem:[#allocation11_spill] sm:$0xff] }
0x12b4   :  { %22800 = vmatprep.mubr.msk.f32.mxu1 %vm26259_vm1, %v26258_v2 }
0x12b7   :  { %22801 = vmatmul.mubr.msk.f32.gmra.mrb[24].mxu1 %vm7825_vm2, %v32598_v10  ;;  %v34136_v10 = vld [vmem:[#allocation12_spill] sm:$0xff] }
0x12b8   :  { %22803 = vmatprep.mubr.msk.f32.mxu1 %vm26259_vm1, %v26258_v2 }
0x12bb   :  { %22804 = vmatmul.mubr.msk.f32.gmra.mrb[26].mxu1 %vm7825_vm2, %v32604_v11  ;;  %v34137_v11 = vld [vmem:[#allocation13_spill] sm:$0xff] }
0x12bc   :  { %22806 = vmatprep.mubr.msk.f32.mxu1 %vm26259_vm1, %v26258_v2 }
0x12bf   :  { %22807 = vmatmul.mubr.msk.f32.gmra.mrb[28].mxu1 %vm7825_vm2, %v32610_v12  ;;  %v34138_v12 = vld [vmem:[#allocation14_spill] sm:$0xff] }
0x12c0   :  { %22809 = vmatprep.mubr.msk.f32.mxu1 %vm26259_vm1, %v26258_v2 }
0x12c3   :  { %22810 = vmatmul.mubr.msk.f32.gmra.mrb[30].mxu1 %vm7825_vm2, %v32616_v13  ;;  %v34139_v13 = vld [vmem:[#allocation15_spill] sm:$0xff] }
0x12c4   :  { %22812 = vmatprep.mubr.msk.f32.mxu1 %vm26259_vm1, %v26258_v2 }
0x12c7   :  { %22813 = vmatmul.mubr.msk.f32.gmra.mrb[32].mxu1 %vm7825_vm2, %v32622_v14  ;;  %v34140_v14 = vld [vmem:[#allocation16_spill] sm:$0xff] }
0x12c8   :  { %22815 = vmatprep.mubr.msk.f32.mxu1 %vm26259_vm1, %v26258_v2 }
0x12cb   :  { %22816 = vmatmul.mubr.msk.f32.gmra.mrb[34].mxu1 %vm7825_vm2, %v32628_v33  ;;  %v34141_v33 = vld [vmem:[#allocation17_spill] sm:$0xff] }
0x12cc   :  { %22818 = vmatprep.mubr.msk.f32.mxu1 %vm26259_vm1, %v26258_v2 }
0x12cf   :  { %22819 = vmatmul.mubr.msk.f32.gmra.mrb[36].mxu1 %vm7825_vm2, %v32634_v34  ;;  %v34142_v34 = vld [vmem:[#allocation18_spill] sm:$0xff] }
0x12d0   :  { %22821 = vmatprep.mubr.msk.f32.mxu1 %vm26259_vm1, %v26258_v2 }
0x12d3   :  { %22822 = vmatmul.mubr.msk.f32.gmra.mrb[38].mxu1 %vm7825_vm2, %v32640_v36  ;;  %v34143_v36 = vld [vmem:[#allocation19_spill] sm:$0xff] }
0x12d4   :  { %22824 = vmatprep.mubr.msk.f32.mxu1 %vm26259_vm1, %v26258_v2 }
0x12d7   :  { %22825 = vmatmul.mubr.msk.f32.gmra.mrb[40].mxu1 %vm7825_vm2, %v32646_v15  ;;  %v34144_v15 = vld [vmem:[#allocation20_spill] sm:$0xff] }
0x12d8   :  { %22827 = vmatprep.mubr.msk.f32.mxu1 %vm26259_vm1, %v26258_v2 }
0x12db   :  { %22828 = vmatmul.mubr.msk.f32.gmra.mrb[42].mxu1 %vm7825_vm2, %v32658_v19  ;;  %v34145_v19 = vld [vmem:[#allocation21_spill] sm:$0xff] }
0x12dc   :  { %22830 = vmatprep.mubr.msk.f32.mxu1 %vm26259_vm1, %v26258_v2 }
0x12df   :  { %22831 = vmatmul.mubr.msk.f32.gmra.mrb[44].mxu1 %vm7825_vm2, %v32665_v20  ;;  %v34146_v20 = vld [vmem:[#allocation22_spill] sm:$0xff] }
0x12e0   :  { %22833 = vmatprep.mubr.msk.f32.mxu1 %vm26259_vm1, %v26258_v2 }
0x12e3   :  { %22834 = vmatmul.mubr.msk.f32.gmra.mrb[46].mxu1 %vm7825_vm2, %v32671_v21  ;;  %v13091_v21 = vld [vmem:[#allocation2 + $0x29c] sm:$0xff] }
0x12e4   :  { %22836 = vmatprep.mubr.msk.f32.mxu1 %vm26259_vm1, %v26258_v2 }
0x12e7   :  { %22837 = vmatmul.mubr.msk.f32.gmra.mrb[48].mxu1 %vm7825_vm2, %v32677_v22  ;;  %v13092_v22 = vld [vmem:[#allocation2 + $0x2a4] sm:$0xff] }
0x12e8   :  { %22839 = vmatprep.mubr.msk.f32.mxu1 %vm26259_vm1, %v26258_v2 }
0x12eb   :  { %22840 = vmatmul.mubr.msk.f32.gmra.mrb[50].mxu1 %vm7825_vm2, %v32683_v24  ;;  %v13889_v24 = vld [vmem:[#allocation2 + $0x25] sm:$0xff] }
0x12ec   :  { %22842 = vmatprep.mubr.msk.f32.mxu1 %vm26259_vm1, %v26258_v2 }
0x12ef   :  { %22843 = vmatmul.mubr.msk.f32.gmra.mrb[52].mxu1 %vm7825_vm2, %v32689_v25  ;;  %v13890_v25 = vld [vmem:[#allocation2 + $0x2d] sm:$0xff] }
0x12f0   :  { %22845 = vmatprep.mubr.msk.f32.mxu1 %vm26259_vm1, %v26258_v2 }
0x12f3   :  { %22846 = vmatmul.mubr.msk.f32.gmra.mrb[54].mxu1 %vm7825_vm2, %v32695_v26  ;;  %v13891_v26 = vld [vmem:[#allocation2 + $0x35] sm:$0xff] }
0x12f4   :  { %22848 = vmatprep.mubr.msk.f32.mxu1 %vm26259_vm1, %v26258_v2 }
0x12f7   :  { %22849 = vmatmul.mubr.msk.f32.gmra.mrb[56].mxu1 %vm7825_vm2, %v32701_v27  ;;  %v13892_v27 = vld [vmem:[#allocation2 + $0x3d] sm:$0xff] }
0x12f8   :  { %22851 = vmatprep.mubr.msk.f32.mxu1 %vm26259_vm1, %v26258_v2 }
0x12fb   :  { %22852 = vmatmul.mubr.msk.f32.gmra.mrb[58].mxu1 %vm7825_vm2, %v32707_v28  ;;  %v13893_v28 = vld [vmem:[#allocation2 + $0x45] sm:$0xff] }
0x12fc   :  { %22854 = vmatprep.mubr.msk.f32.mxu1 %vm26259_vm1, %v26258_v2 }
0x12ff   :  { %22855 = vmatmul.mubr.msk.f32.gmra.mrb[60].mxu1 %vm7825_vm2, %v32713_v29  ;;  %v13894_v29 = vld [vmem:[#allocation2 + $0x4d] sm:$0xff] }
0x1300   :  { %22857 = vmatprep.mubr.msk.f32.mxu1 %vm26259_vm1, %v26258_v2 }
0x1303   :  { %22858 = vmatmul.mubr.msk.f32.gmra.mrb[62].mxu1 %vm7825_vm2, %v32719_v30  ;;  %v13895_v30 = vld [vmem:[#allocation2 + $0x55] sm:$0xff] }
0x1304   :  { %22860 = vmatprep.mubr.msk.f32.mxu1 %vm26259_vm1, %v26258_v2 }
0x1307   :  { %22861 = vmatmul.mubr.msk.f32.gmra.mrb[64].mxu1 %vm7825_vm2, %v32725_v31  ;;  %v13896_v31 = vld [vmem:[#allocation2 + $0x5d] sm:$0xff] }
0x1308   :  { %22863 = vmatprep.mubr.msk.f32.mxu1 %vm26259_vm1, %v26258_v2 }
0x130b   :  { %22864 = vmatmul.mubr.msk.f32.gmra.mrb[66].mxu1 %vm7825_vm2, %v32731_v32  ;;  %v13897_v32 = vld [vmem:[#allocation2 + $0x65] sm:$0xff] }
0x130c   :  { %22866 = vmatprep.mubr.msk.f32.mxu1 %vm26259_vm1, %v26258_v2 }
0x130f   :  { %22867 = vmatmul.mubr.msk.f32.gmra.mrb[68].mxu1 %vm7825_vm2, %v32737_v38  ;;  %v13898_v38 = vld [vmem:[#allocation2 + $0x6d] sm:$0xff] }
0x1310   :  { %22869 = vmatprep.mubr.msk.f32.mxu1 %vm26259_vm1, %v26258_v2 }
0x1313   :  { %22870 = vmatmul.mubr.msk.f32.gmra.mrb[70].mxu1 %vm7825_vm2, %v32743_v57  ;;  %v13899_v57 = vld [vmem:[#allocation2 + $0x75] sm:$0xff] }
0x1314   :  { %22872 = vmatprep.mubr.msk.f32.mxu1 %vm26259_vm1, %v26258_v2 }
0x1317   :  { %22873 = vmatmul.mubr.msk.f32.gmra.mrb[72].mxu1 %vm7825_vm2, %v32749_v39  ;;  %v13900_v39 = vld [vmem:[#allocation2 + $0x7d] sm:$0xff] }
0x1318   :  { %22875 = vmatprep.mubr.msk.f32.mxu1 %vm26259_vm1, %v26258_v2 }
0x131b   :  { %22876 = vmatmul.mubr.msk.f32.gmra.mrb[74].mxu1 %vm7825_vm2, %v32755_v40  ;;  %v13901_v40 = vld [vmem:[#allocation2 + $0x85] sm:$0xff] }
0x131c   :  { %22878 = vmatprep.mubr.msk.f32.mxu1 %vm26259_vm1, %v26258_v2 }
0x131f   :  { %22879 = vmatmul.mubr.msk.f32.gmra.mrb[76].mxu1 %vm7825_vm2, %v32761_v23  ;;  %v13902_v23 = vld [vmem:[#allocation2 + $0x8d] sm:$0xff] }
0x1320   :  { %22881 = vmatprep.mubr.msk.f32.mxu1 %vm26259_vm1, %v26258_v2 }
0x1323   :  { %22882 = vmatmul.mubr.msk.f32.gmra.mrb[78].mxu1 %vm7825_vm2, %v32767_v41  ;;  %v13903_v41 = vld [vmem:[#allocation2 + $0x95] sm:$0xff] }
0x1324   :  { %22884 = vmatprep.mubr.msk.f32.mxu1 %vm26259_vm1, %v26258_v2 }
0x1327   :  { %22885 = vmatmul.mubr.msk.f32.gmra.mrb[80].mxu1 %vm7825_vm2, %v32773_v42  ;;  %v13904_v42 = vld [vmem:[#allocation2 + $0x9d] sm:$0xff] }
0x1328   :  { %22887 = vmatprep.mubr.msk.f32.mxu1 %vm26259_vm1, %v26258_v2 }
0x132b   :  { %22888 = vmatmul.mubr.msk.f32.gmra.mrb[82].mxu1 %vm7825_vm2, %v32779_v44  ;;  %v13905_v44 = vld [vmem:[#allocation2 + $0xa5] sm:$0xff] }
0x132c   :  { %22890 = vmatprep.mubr.msk.f32.mxu1 %vm26259_vm1, %v26258_v2 }
0x132f   :  { %22891 = vmatmul.mubr.msk.f32.gmra.mrb[84].mxu1 %vm7825_vm2, %v32785_v45  ;;  %v13906_v45 = vld [vmem:[#allocation2 + $0xad] sm:$0xff] }
0x1330   :  { %22893 = vmatprep.mubr.msk.f32.mxu1 %vm26259_vm1, %v26258_v2 }
0x1333   :  { %22894 = vmatmul.mubr.msk.f32.gmra.mrb[86].mxu1 %vm7825_vm2, %v32791_v46  ;;  %v13907_v46 = vld [vmem:[#allocation2 + $0xb5] sm:$0xff] }
0x1334   :  { %22896 = vmatprep.mubr.msk.f32.mxu1 %vm26259_vm1, %v26258_v2 }
0x1337   :  { %22897 = vmatmul.mubr.msk.f32.gmra.mrb[88].mxu1 %vm7825_vm2, %v32797_v47  ;;  %v13908_v47 = vld [vmem:[#allocation2 + $0xbd] sm:$0xff] }
0x1338   :  { %22899 = vmatprep.mubr.msk.f32.mxu1 %vm26259_vm1, %v26258_v2 }
0x133b   :  { %22900 = vmatmul.mubr.msk.f32.gmra.mrb[90].mxu1 %vm7825_vm2, %v32803_v37  ;;  %v14847_v37 = vld [vmem:[%s33945_s2 + $0x80] sm:$0xff] }
0x133c   :  { %22902 = vmatprep.mubr.msk.f32.mxu1 %vm26259_vm1, %v26258_v2 }
0x133f   :  { %22903 = vmatmul.mubr.msk.f32.gmra.mrb[92].mxu1 %vm7825_vm2, %v32809_v48  ;;  %v14848_v48 = vld [vmem:[%s33945_s2 + $0x88] sm:$0xff] }
0x1340   :  { %22905 = vmatprep.mubr.msk.f32.mxu1 %vm26259_vm1, %v26258_v2 }
0x1343   :  { %22906 = vmatmul.mubr.msk.f32.gmra.mrb[94].mxu1 %vm7825_vm2, %v32815_v49  ;;  %v23544_v49 = vpack.c.bf16 %v14848_v48, %v14847_v37  ;;  %v13968_v37 = vld [vmem:[#allocation2 + $0x29d] sm:$0xff]  ;;  %v13969_v48 = vld [vmem:[#allocation2 + $0x2a5] sm:$0xff] }
0x1344   :  { %22908 = vmatprep.mubr.msk.f32.mxu1 %vm26259_vm1, %v26258_v2 }
0x1347   :  { %22909 = vmatmul.mubr.msk.f32.gmra.mrb[96].mxu1 %vm7825_vm2, %v32821_v50  ;;  %v13909_v50 = vld [vmem:[#allocation2 + $0xc5] sm:$0xff] }
0x1348   :  { %22911 = vmatprep.mubr.msk.f32.mxu1 %vm26259_vm1, %v26258_v2 }
0x134b   :  { %22912 = vmatmul.mubr.msk.f32.gmra.mrb[98].mxu1 %vm7825_vm2, %v32827_v43  ;;  %v13910_v43 = vld [vmem:[#allocation2 + $0xcd] sm:$0xff] }
0x134c   :  { %22914 = vmatprep.mubr.msk.f32.mxu1 %vm26259_vm1, %v26258_v2 }
0x134f   :  { %22915 = vmatmul.mubr.msk.f32.gmra.mrb[100].mxu1 %vm7825_vm2, %v32833_v51  ;;  %v13911_v51 = vld [vmem:[#allocation2 + $0xd5] sm:$0xff] }
0x1350   :  { %22917 = vmatprep.mubr.msk.f32.mxu1 %vm26259_vm1, %v26258_v2 }
0x1353   :  { %22918 = vmatmul.mubr.msk.f32.gmra.mrb[102].mxu1 %vm7825_vm2, %v32839_v52  ;;  %v13912_v52 = vld [vmem:[#allocation2 + $0xdd] sm:$0xff] }
0x1354   :  { %22920 = vmatprep.mubr.msk.f32.mxu1 %vm26259_vm1, %v26258_v2 }
0x1357   :  { %22921 = vmatmul.mubr.msk.f32.gmra.mrb[104].mxu1 %vm7825_vm2, %v32845_v53  ;;  %v13913_v53 = vld [vmem:[#allocation2 + $0xe5] sm:$0xff] }
0x1358   :  { %22923 = vmatprep.mubr.msk.f32.mxu1 %vm26259_vm1, %v26258_v2 }
0x135b   :  { %22924 = vmatmul.mubr.msk.f32.gmra.mrb[106].mxu1 %vm7825_vm2, %v32851_v54  ;;  %v13914_v54 = vld [vmem:[#allocation2 + $0xed] sm:$0xff] }
0x135c   :  { %22926 = vmatprep.mubr.msk.f32.mxu1 %vm26259_vm1, %v26258_v2 }
0x135f   :  { %22927 = vmatmul.mubr.msk.f32.gmra.mrb[108].mxu1 %vm7825_vm2, %v32857_v55  ;;  %v13915_v55 = vld [vmem:[#allocation2 + $0xf5] sm:$0xff] }
0x1360   :  { %22929 = vmatprep.mubr.msk.f32.mxu1 %vm26259_vm1, %v26258_v2 }
0x1363   :  { %22930 = vmatmul.mubr.msk.f32.gmra.mrb[110].mxu1 %vm7825_vm2, %v32863_v56  ;;  %v13916_v56 = vld [vmem:[#allocation2 + $0xfd] sm:$0xff] }
0x1364   :  { %22932 = vmatprep.mubr.msk.f32.mxu1 %vm26259_vm1, %v26258_v2 }
0x1367   :  { %22933 = vmatmul.mubr.msk.f32.gmra.mrb[112].mxu1 %vm7825_vm2, %v32869_v58  ;;  %v13917_v58 = vld [vmem:[#allocation2 + $0x105] sm:$0xff] }
0x1368   :  { %22935 = vmatprep.mubr.msk.f32.mxu1 %vm26259_vm1, %v26258_v2 }
0x136b   :  { %22936 = vmatmul.mubr.msk.f32.gmra.mrb[114].mxu1 %vm7825_vm2, %v32875_v59  ;;  %v13918_v59 = vld [vmem:[#allocation2 + $0x10d] sm:$0xff] }
0x136c   :  { %22938 = vmatprep.mubr.msk.f32.mxu1 %vm26259_vm1, %v26258_v2 }
0x136f   :  { %22939 = vmatmul.mubr.msk.f32.gmra.mrb[116].mxu1 %vm7825_vm2, %v32881_v60  ;;  %v13919_v60 = vld [vmem:[#allocation2 + $0x115] sm:$0xff] }
0x1370   :  { %22941 = vmatprep.mubr.msk.f32.mxu1 %vm26259_vm1, %v26258_v2 }
0x1373   :  { %22942 = vmatmul.mubr.msk.f32.gmra.mrb[118].mxu1 %vm7825_vm2, %v32887_v61  ;;  %v13920_v61 = vld [vmem:[#allocation2 + $0x11d] sm:$0xff] }
0x1374   :  { %22944 = vmatprep.mubr.msk.f32.mxu1 %vm26259_vm1, %v26258_v2 }
0x1377   :  { %22945 = vmatmul.mubr.msk.f32.gmra.mrb[120].mxu1 %vm7825_vm2, %v32893_v62  ;;  %v13921_v62 = vld [vmem:[#allocation2 + $0x125] sm:$0xff] }
0x1378   :  { %22947 = vmatprep.mubr.msk.f32.mxu1 %vm26259_vm1, %v26258_v2 }
0x137b   :  { %22948 = vmatmul.mubr.msk.f32.gmra.mrb[122].mxu1 %vm7825_vm2, %v32899_v63  ;;  %v13922_v63 = vld [vmem:[#allocation2 + $0x12d] sm:$0xff] }
0x137c   :  { %22950 = vmatprep.mubr.msk.f32.mxu1 %vm26259_vm1, %v26258_v2 }
0x137f   :  { %22951 = vmatmul.mubr.msk.f32.gmra.mrb[124].mxu1 %vm7825_vm2, %v34130_v4  ;;  %v13929_v4 = vld [vmem:[#allocation2 + $0x165] sm:$0xff] }
0x1380   :  { %22953 = vmatprep.mubr.msk.f32.mxu1 %vm26259_vm1, %v26258_v2 }
0x1383   :  { %22954 = vmatmul.mubr.msk.f32.gmra.mrb[126].mxu1 %vm7825_vm2, %v34131_v5  ;;  %v13930_v5 = vld [vmem:[#allocation2 + $0x16d] sm:$0xff] }
0x1384   :  { %22956 = vmatprep.mubr.msk.f32.mxu1 %vm26259_vm1, %v26258_v2 }
0x1387   :  { %22957 = vmatmul.mubr.msk.f32.gmra.mrb[128].mxu1 %vm7825_vm2, %v34132_v6  ;;  %v13931_v6 = vld [vmem:[#allocation2 + $0x175] sm:$0xff] }
0x1388   :  { %22959 = vmatprep.mubr.msk.f32.mxu1 %vm26259_vm1, %v26258_v2 }
0x138b   :  { %22960 = vmatmul.mubr.msk.f32.gmra.mrb[130].mxu1 %vm7825_vm2, %v34133_v7  ;;  %v13932_v7 = vld [vmem:[#allocation2 + $0x17d] sm:$0xff] }
0x138c   :  { %22962 = vmatprep.mubr.msk.f32.mxu1 %vm26259_vm1, %v26258_v2 }
0x138f   :  { %22963 = vmatmul.mubr.msk.f32.gmra.mrb[132].mxu1 %vm7825_vm2, %v34134_v8  ;;  %v13933_v8 = vld [vmem:[#allocation2 + $0x185] sm:$0xff] }
0x1390   :  { %22965 = vmatprep.mubr.msk.f32.mxu1 %vm26259_vm1, %v26258_v2 }
0x1393   :  { %22966 = vmatmul.mubr.msk.f32.gmra.mrb[134].mxu1 %vm7825_vm2, %v34135_v9  ;;  %v13934_v9 = vld [vmem:[#allocation2 + $0x18d] sm:$0xff] }
0x1394   :  { %22968 = vmatprep.mubr.msk.f32.mxu1 %vm26259_vm1, %v26258_v2 }
0x1397   :  { %22969 = vmatmul.mubr.msk.f32.gmra.mrb[136].mxu1 %vm7825_vm2, %v34136_v10  ;;  %v13935_v10 = vld [vmem:[#allocation2 + $0x195] sm:$0xff] }
0x1398   :  { %22971 = vmatprep.mubr.msk.f32.mxu1 %vm26259_vm1, %v26258_v2 }
0x139b   :  { %22972 = vmatmul.mubr.msk.f32.gmra.mrb[138].mxu1 %vm7825_vm2, %v34137_v11  ;;  %v13936_v11 = vld [vmem:[#allocation2 + $0x19d] sm:$0xff] }
0x139c   :  { %22974 = vmatprep.mubr.msk.f32.mxu1 %vm26259_vm1, %v26258_v2 }
0x139f   :  { %22975 = vmatmul.mubr.msk.f32.gmra.mrb[140].mxu1 %vm7825_vm2, %v34138_v12  ;;  %v13937_v12 = vld [vmem:[#allocation2 + $0x1a5] sm:$0xff] }
0x13a0   :  { %22977 = vmatprep.mubr.msk.f32.mxu1 %vm26259_vm1, %v26258_v2 }
0x13a3   :  { %22978 = vmatmul.mubr.msk.f32.gmra.mrb[142].mxu1 %vm7825_vm2, %v34139_v13  ;;  %v13938_v13 = vld [vmem:[#allocation2 + $0x1ad] sm:$0xff] }
0x13a4   :  { %22980 = vmatprep.mubr.msk.f32.mxu1 %vm26259_vm1, %v26258_v2 }
0x13a7   :  { %22981 = vmatmul.mubr.msk.f32.gmra.mrb[144].mxu1 %vm7825_vm2, %v34140_v14  ;;  %v13939_v14 = vld [vmem:[#allocation2 + $0x1b5] sm:$0xff] }
0x13a8   :  { %22983 = vmatprep.mubr.msk.f32.mxu1 %vm26259_vm1, %v26258_v2 }
0x13ab   :  { %22984 = vmatmul.mubr.msk.f32.gmra.mrb[146].mxu1 %vm7825_vm2, %v34141_v33  ;;  %v13940_v33 = vld [vmem:[#allocation2 + $0x1bd] sm:$0xff] }
0x13ac   :  { %22986 = vmatprep.mubr.msk.f32.mxu1 %vm26259_vm1, %v26258_v2 }
0x13af   :  { %22987 = vmatmul.mubr.msk.f32.gmra.mrb[148].mxu1 %vm7825_vm2, %v34142_v34  ;;  %v13941_v34 = vld [vmem:[#allocation2 + $0x1c5] sm:$0xff] }
0x13b0   :  { %22989 = vmatprep.mubr.msk.f32.mxu1 %vm26259_vm1, %v26258_v2 }
0x13b3   :  { %22990 = vmatmul.mubr.msk.f32.gmra.mrb[150].mxu1 %vm7825_vm2, %v34143_v36  ;;  %v13942_v36 = vld [vmem:[#allocation2 + $0x1cd] sm:$0xff] }
0x13b4   :  { %22992 = vmatprep.mubr.msk.f32.mxu1 %vm26259_vm1, %v26258_v2 }
0x13b7   :  { %22993 = vmatmul.mubr.msk.f32.gmra.mrb[152].mxu1 %vm7825_vm2, %v34144_v15  ;;  %v13943_v15 = vld [vmem:[#allocation2 + $0x1d5] sm:$0xff] }
0x13b8   :  { %22995 = vmatprep.mubr.msk.f32.mxu1 %vm26259_vm1, %v26258_v2 }
0x13bb   :  { %22996 = vmatmul.mubr.msk.f32.gmra.mrb[154].mxu1 %vm7825_vm2, %v34145_v19  ;;  %v13944_v19 = vld [vmem:[#allocation2 + $0x1dd] sm:$0xff] }
0x13bc   :  { %22998 = vmatprep.mubr.msk.f32.mxu1 %vm26259_vm1, %v26258_v2 }
0x13bf   :  { %22999 = vmatmul.mubr.msk.f32.gmra.mrb[156].mxu1 %vm7825_vm2, %v34146_v20  ;;  %v13945_v20 = vld [vmem:[#allocation2 + $0x1e5] sm:$0xff] }
0x13c0   :  { %23001 = vmatprep.mubr.msk.f32.mxu1 %vm26259_vm1, %v26258_v2 }
0x13c3   :  { %23002 = vmatmul.mubr.msk.f32.gmra.mrb[158].mxu1 %vm7825_vm2, %v33007_v18  ;;  %v13925_v18 = vld [vmem:[#allocation2 + $0x145] sm:$0xff] }
0x13c4   :  { %23004 = vmatprep.mubr.msk.f32.mxu1 %vm26259_vm1, %v26258_v2 }
0x13c7   :  { %23005 = vmatmul.mubr.msk.f32.gmra.mrb[160].mxu1 %vm7825_vm2, %v33013_v16  ;;  %v13923_v16 = vld [vmem:[#allocation2 + $0x135] sm:$0xff] }
0x13c8   :  { %23007 = vmatprep.mubr.msk.f32.mxu1 %vm26259_vm1, %v26258_v2 }
0x13cb   :  { %23008 = vmatmul.mubr.msk.f32.gmra.mrb[162].mxu1 %vm7825_vm2, %v33019_v35  ;;  %v13924_v35 = vld [vmem:[#allocation2 + $0x13d] sm:$0xff] }
0x13cc   :  { %23010 = vmatprep.mubr.msk.f32.mxu1 %vm26259_vm1, %v26258_v2 }
0x13cf   :  { %23011 = vmatmul.mubr.msk.f32.gmra.mrb[164].mxu1 %vm7825_vm2, %v13091_v21  ;;  %v13946_v21 = vld [vmem:[#allocation2 + $0x1ed] sm:$0xff] }
0x13d0   :  { %23013 = vmatprep.mubr.msk.f32.mxu1 %vm26259_vm1, %v26258_v2 }
0x13d3   :  { %23014 = vmatmul.mubr.msk.f32.gmra.mrb[166].mxu1 %vm7825_vm2, %v13092_v22  ;;  %v13947_v22 = vld [vmem:[#allocation2 + $0x1f5] sm:$0xff] }
0x13d4   :  { %23020 = vmatprep.mubr.msk.f32.mxu1 %vm26259_vm1, %v26258_v2 }
0x13d7   :  { %23021 = vmatmul.mubr.msk.f32.vlgmr.msra.gmra.mrb[6].mxu1 %vm7825_vm2, %v13889_v24  ;;  %v13948_v24 = vld [vmem:[#allocation2 + $0x1fd] sm:$0xff] }
0x13d8   :  { %23023 = vmatprep.mubr.msk.f32.mxu1 %vm26259_vm1, %v26258_v2  ;;  %23545 = vmatpush3.bf16.msra.mxu1 %v23544_v49  ;;  %v14766_v49 = vld [vmem:[#allocation2 + $0x26] sm:$0xff] }
0x13db   :  { %23024 = vmatmul.mubr.msk.f32.gmra.mrb[8].mxu1 %vm7825_vm2, %v13890_v25  ;;  %v13949_v25 = vld [vmem:[#allocation2 + $0x205] sm:$0xff] }
0x13dc   :  { %23026 = vmatprep.mubr.msk.f32.mxu1 %vm26259_vm1, %v26258_v2 }
0x13df   :  { %23027 = vmatmul.mubr.msk.f32.gmra.mrb[10].mxu1 %vm7825_vm2, %v13891_v26  ;;  %v13950_v26 = vld [vmem:[#allocation2 + $0x20d] sm:$0xff] }
0x13e0   :  { %23029 = vmatprep.mubr.msk.f32.mxu1 %vm26259_vm1, %v26258_v2 }
0x13e3   :  { %23030 = vmatmul.mubr.msk.f32.gmra.mrb[12].mxu1 %vm7825_vm2, %v13892_v27  ;;  %v13951_v27 = vld [vmem:[#allocation2 + $0x215] sm:$0xff] }
0x13e4   :  { %23032 = vmatprep.mubr.msk.f32.mxu1 %vm26259_vm1, %v26258_v2 }
0x13e7   :  { %23033 = vmatmul.mubr.msk.f32.gmra.mrb[14].mxu1 %vm7825_vm2, %v13893_v28  ;;  %v13952_v28 = vld [vmem:[#allocation2 + $0x21d] sm:$0xff] }
0x13e8   :  { %23035 = vmatprep.mubr.msk.f32.mxu1 %vm26259_vm1, %v26258_v2 }
0x13eb   :  { %23036 = vmatmul.mubr.msk.f32.gmra.mrb[16].mxu1 %vm7825_vm2, %v13894_v29  ;;  %v13953_v29 = vld [vmem:[#allocation2 + $0x225] sm:$0xff] }
0x13ec   :  { %23038 = vmatprep.mubr.msk.f32.mxu1 %vm26259_vm1, %v26258_v2 }
0x13ef   :  { %23039 = vmatmul.mubr.msk.f32.gmra.mrb[18].mxu1 %vm7825_vm2, %v13895_v30  ;;  %v13954_v30 = vld [vmem:[#allocation2 + $0x22d] sm:$0xff] }
0x13f0   :  { %23041 = vmatprep.mubr.msk.f32.mxu1 %vm26259_vm1, %v26258_v2 }
0x13f3   :  { %23042 = vmatmul.mubr.msk.f32.gmra.mrb[20].mxu1 %vm7825_vm2, %v13896_v31  ;;  %v13955_v31 = vld [vmem:[#allocation2 + $0x235] sm:$0xff] }
0x13f4   :  { %23044 = vmatprep.mubr.msk.f32.mxu1 %vm26259_vm1, %v26258_v2 }
0x13f7   :  { %23045 = vmatmul.mubr.msk.f32.gmra.mrb[22].mxu1 %vm7825_vm2, %v13897_v32  ;;  %v13956_v32 = vld [vmem:[#allocation2 + $0x23d] sm:$0xff] }
0x13f8   :  { %23047 = vmatprep.mubr.msk.f32.mxu1 %vm26259_vm1, %v26258_v2 }
0x13fb   :  { %23048 = vmatmul.mubr.msk.f32.gmra.mrb[24].mxu1 %vm7825_vm2, %v13898_v38  ;;  %v13957_v38 = vld [vmem:[#allocation2 + $0x245] sm:$0xff] }
0x13fc   :  { %23050 = vmatprep.mubr.msk.f32.mxu1 %vm26259_vm1, %v26258_v2 }
0x13ff   :  { %23051 = vmatmul.mubr.msk.f32.gmra.mrb[26].mxu1 %vm7825_vm2, %v13899_v57  ;;  %v13958_v57 = vld [vmem:[#allocation2 + $0x24d] sm:$0xff] }
0x1400   :  { %23053 = vmatprep.mubr.msk.f32.mxu1 %vm26259_vm1, %v26258_v2 }
0x1403   :  { %23054 = vmatmul.mubr.msk.f32.gmra.mrb[28].mxu1 %vm7825_vm2, %v13900_v39  ;;  %v13959_v39 = vld [vmem:[#allocation2 + $0x255] sm:$0xff] }
0x1404   :  { %23056 = vmatprep.mubr.msk.f32.mxu1 %vm26259_vm1, %v26258_v2 }
0x1407   :  { %23057 = vmatmul.mubr.msk.f32.gmra.mrb[30].mxu1 %vm7825_vm2, %v13901_v40  ;;  %v13960_v40 = vld [vmem:[#allocation2 + $0x25d] sm:$0xff] }
0x1408   :  { %23059 = vmatprep.mubr.msk.f32.mxu1 %vm26259_vm1, %v26258_v2 }
0x140b   :  { %23060 = vmatmul.mubr.msk.f32.gmra.mrb[32].mxu1 %vm7825_vm2, %v13902_v23  ;;  %v13961_v23 = vld [vmem:[#allocation2 + $0x265] sm:$0xff] }
0x140c   :  { %23062 = vmatprep.mubr.msk.f32.mxu1 %vm26259_vm1, %v26258_v2 }
0x140f   :  { %23063 = vmatmul.mubr.msk.f32.gmra.mrb[34].mxu1 %vm7825_vm2, %v13903_v41  ;;  %v13962_v41 = vld [vmem:[#allocation2 + $0x26d] sm:$0xff] }
0x1410   :  { %23065 = vmatprep.mubr.msk.f32.mxu1 %vm26259_vm1, %v26258_v2 }
0x1413   :  { %23066 = vmatmul.mubr.msk.f32.gmra.mrb[36].mxu1 %vm7825_vm2, %v13904_v42  ;;  %v13963_v42 = vld [vmem:[#allocation2 + $0x275] sm:$0xff] }
0x1414   :  { %23068 = vmatprep.mubr.msk.f32.mxu1 %vm26259_vm1, %v26258_v2 }
0x1417   :  { %23069 = vmatmul.mubr.msk.f32.gmra.mrb[38].mxu1 %vm7825_vm2, %v13905_v44  ;;  %v13964_v44 = vld [vmem:[#allocation2 + $0x27d] sm:$0xff] }
0x1418   :  { %23071 = vmatprep.mubr.msk.f32.mxu1 %vm26259_vm1, %v26258_v2 }
0x141b   :  { %23072 = vmatmul.mubr.msk.f32.gmra.mrb[40].mxu1 %vm7825_vm2, %v13906_v45  ;;  %v13965_v45 = vld [vmem:[#allocation2 + $0x285] sm:$0xff] }
0x141c   :  { %23074 = vmatprep.mubr.msk.f32.mxu1 %vm26259_vm1, %v26258_v2 }
0x141f   :  { %23075 = vmatmul.mubr.msk.f32.gmra.mrb[42].mxu1 %vm7825_vm2, %v13907_v46  ;;  %v13966_v46 = vld [vmem:[#allocation2 + $0x28d] sm:$0xff] }
0x1420   :  { %23077 = vmatprep.mubr.msk.f32.mxu1 %vm26259_vm1, %v26258_v2 }
0x1423   :  { %23078 = vmatmul.mubr.msk.f32.gmra.mrb[44].mxu1 %vm7825_vm2, %v13908_v47  ;;  %v13967_v47 = vld [vmem:[#allocation2 + $0x295] sm:$0xff] }
0x1424   :  { %23080 = vmatprep.mubr.msk.f32.mxu1 %vm26259_vm1, %v26258_v2 }
0x1427   :  { %23081 = vmatmul.mubr.msk.f32.gmra.mrb[46].mxu1 %vm7825_vm2, %v13909_v50  ;;  %v14767_v50 = vld [vmem:[#allocation2 + $0x2e] sm:$0xff] }
0x1428   :  { %23083 = vmatprep.mubr.msk.f32.mxu1 %vm26259_vm1, %v26258_v2 }
0x142b   :  { %23084 = vmatmul.mubr.msk.f32.gmra.mrb[48].mxu1 %vm7825_vm2, %v13910_v43  ;;  %v14768_v43 = vld [vmem:[#allocation2 + $0x36] sm:$0xff] }
0x142c   :  { %23086 = vmatprep.mubr.msk.f32.mxu1 %vm26259_vm1, %v26258_v2 }
0x142f   :  { %23087 = vmatmul.mubr.msk.f32.gmra.mrb[50].mxu1 %vm7825_vm2, %v13911_v51  ;;  %v14769_v51 = vld [vmem:[#allocation2 + $0x3e] sm:$0xff] }
0x1430   :  { %23089 = vmatprep.mubr.msk.f32.mxu1 %vm26259_vm1, %v26258_v2 }
0x1433   :  { %23090 = vmatmul.mubr.msk.f32.gmra.mrb[52].mxu1 %vm7825_vm2, %v13912_v52  ;;  %v14770_v52 = vld [vmem:[#allocation2 + $0x46] sm:$0xff] }
0x1434   :  { %23092 = vmatprep.mubr.msk.f32.mxu1 %vm26259_vm1, %v26258_v2 }
0x1437   :  { %23093 = vmatmul.mubr.msk.f32.gmra.mrb[54].mxu1 %vm7825_vm2, %v13913_v53  ;;  %v14771_v53 = vld [vmem:[#allocation2 + $0x4e] sm:$0xff] }
0x1438   :  { %23095 = vmatprep.mubr.msk.f32.mxu1 %vm26259_vm1, %v26258_v2 }
0x143b   :  { %23096 = vmatmul.mubr.msk.f32.gmra.mrb[56].mxu1 %vm7825_vm2, %v13914_v54  ;;  %v14772_v54 = vld [vmem:[#allocation2 + $0x56] sm:$0xff] }
0x143c   :  { %23098 = vmatprep.mubr.msk.f32.mxu1 %vm26259_vm1, %v26258_v2 }
0x143f   :  { %23099 = vmatmul.mubr.msk.f32.gmra.mrb[58].mxu1 %vm7825_vm2, %v13915_v55  ;;  %v14773_v55 = vld [vmem:[#allocation2 + $0x5e] sm:$0xff] }
0x1440   :  { %23101 = vmatprep.mubr.msk.f32.mxu1 %vm26259_vm1, %v26258_v2 }
0x1443   :  { %23102 = vmatmul.mubr.msk.f32.gmra.mrb[60].mxu1 %vm7825_vm2, %v13916_v56  ;;  %v14774_v56 = vld [vmem:[#allocation2 + $0x66] sm:$0xff] }
0x1444   :  { %23104 = vmatprep.mubr.msk.f32.mxu1 %vm26259_vm1, %v26258_v2 }
0x1447   :  { %23105 = vmatmul.mubr.msk.f32.gmra.mrb[62].mxu1 %vm7825_vm2, %v13917_v58  ;;  %v14775_v58 = vld [vmem:[#allocation2 + $0x6e] sm:$0xff] }
0x1448   :  { %23107 = vmatprep.mubr.msk.f32.mxu1 %vm26259_vm1, %v26258_v2 }
0x144b   :  { %23108 = vmatmul.mubr.msk.f32.gmra.mrb[64].mxu1 %vm7825_vm2, %v13918_v59  ;;  %v14776_v59 = vld [vmem:[#allocation2 + $0x76] sm:$0xff] }
0x144c   :  { %23110 = vmatprep.mubr.msk.f32.mxu1 %vm26259_vm1, %v26258_v2 }
0x144f   :  { %23111 = vmatmul.mubr.msk.f32.gmra.mrb[66].mxu1 %vm7825_vm2, %v13919_v60  ;;  %v14777_v60 = vld [vmem:[#allocation2 + $0x7e] sm:$0xff] }
0x1450   :  { %23113 = vmatprep.mubr.msk.f32.mxu1 %vm26259_vm1, %v26258_v2 }
0x1453   :  { %23114 = vmatmul.mubr.msk.f32.gmra.mrb[68].mxu1 %vm7825_vm2, %v13920_v61  ;;  %v14778_v61 = vld [vmem:[#allocation2 + $0x86] sm:$0xff] }
0x1454   :  { %23116 = vmatprep.mubr.msk.f32.mxu1 %vm26259_vm1, %v26258_v2 }
0x1457   :  { %23117 = vmatmul.mubr.msk.f32.gmra.mrb[70].mxu1 %vm7825_vm2, %v13921_v62  ;;  %v14779_v62 = vld [vmem:[#allocation2 + $0x8e] sm:$0xff] }
0x1458   :  { %23119 = vmatprep.mubr.msk.f32.mxu1 %vm26259_vm1, %v26258_v2 }
0x145b   :  { %23120 = vmatmul.mubr.msk.f32.gmra.mrb[72].mxu1 %vm7825_vm2, %v13922_v63  ;;  %v14780_v63 = vld [vmem:[#allocation2 + $0x96] sm:$0xff] }
0x145c   :  { %23122 = vmatprep.mubr.msk.f32.mxu1 %vm26259_vm1, %v26258_v2 }
0x145f   :  { %23123 = vmatmul.mubr.msk.f32.gmra.mrb[74].mxu1 %vm7825_vm2, %v13923_v16  ;;  %v14781_v16 = vld [vmem:[#allocation2 + $0x9e] sm:$0xff] }
0x1460   :  { %23125 = vmatprep.mubr.msk.f32.mxu1 %vm26259_vm1, %v26258_v2 }
0x1463   :  { %23126 = vmatmul.mubr.msk.f32.gmra.mrb[76].mxu1 %vm7825_vm2, %v13924_v35  ;;  %v14782_v35 = vld [vmem:[#allocation2 + $0xa6] sm:$0xff] }
0x1464   :  { %23128 = vmatprep.mubr.msk.f32.mxu1 %vm26259_vm1, %v26258_v2 }
0x1467   :  { %23129 = vmatmul.mubr.msk.f32.gmra.mrb[78].mxu1 %vm7825_vm2, %v13925_v18  ;;  %v14783_v18 = vld [vmem:[#allocation2 + $0xae] sm:$0xff] }
0x1468   :  { %23131 = vmatprep.mubr.msk.f32.mxu1 %vm26259_vm1, %v26258_v2 }
0x146b   :  { %23132 = vmatmul.mubr.msk.f32.gmra.mrb[80].mxu1 %vm7825_vm2, %v13926_v0  ;;  %v14784_v0 = vld [vmem:[#allocation2 + $0xb6] sm:$0xff] }
0x146c   :  { %23134 = vmatprep.mubr.msk.f32.mxu1 %vm26259_vm1, %v26258_v2 }
0x146f   :  { %23135 = vmatmul.mubr.msk.f32.gmra.mrb[82].mxu1 %vm7825_vm2, %v13927_v1  ;;  %v14785_v1 = vld [vmem:[#allocation2 + $0xbe] sm:$0xff] }
0x1470   :  { %23137 = vmatprep.mubr.msk.f32.mxu1 %vm26259_vm1, %v26258_v2 }
0x1473   :  { %23138 = vmatmul.mubr.msk.f32.gmra.mrb[84].mxu1 %vm7825_vm2, %v13928_v3  ;;  %v14786_v3 = vld [vmem:[#allocation2 + $0xc6] sm:$0xff] }
0x1474   :  { %23140 = vmatprep.mubr.msk.f32.mxu1 %vm26259_vm1, %v26258_v2 }
0x1477   :  { %23141 = vmatmul.mubr.msk.f32.gmra.mrb[86].mxu1 %vm7825_vm2, %v13929_v4  ;;  %v14787_v4 = vld [vmem:[#allocation2 + $0xce] sm:$0xff] }
0x1478   :  { %23143 = vmatprep.mubr.msk.f32.mxu1 %vm26259_vm1, %v26258_v2 }
0x147b   :  { %23144 = vmatmul.mubr.msk.f32.gmra.mrb[88].mxu1 %vm7825_vm2, %v13930_v5  ;;  %v14788_v5 = vld [vmem:[#allocation2 + $0xd6] sm:$0xff] }
0x147c   :  { %23146 = vmatprep.mubr.msk.f32.mxu1 %vm26259_vm1, %v26258_v2 }
0x147f   :  { %23147 = vmatmul.mubr.msk.f32.gmra.mrb[90].mxu1 %vm7825_vm2, %v13931_v6  ;;  %v14789_v6 = vld [vmem:[#allocation2 + $0xde] sm:$0xff] }
0x1480   :  { %23149 = vmatprep.mubr.msk.f32.mxu1 %vm26259_vm1, %v26258_v2 }
0x1483   :  { %23150 = vmatmul.mubr.msk.f32.gmra.mrb[92].mxu1 %vm7825_vm2, %v13932_v7  ;;  %v14790_v7 = vld [vmem:[#allocation2 + $0xe6] sm:$0xff] }
0x1484   :  { %23152 = vmatprep.mubr.msk.f32.mxu1 %vm26259_vm1, %v26258_v2 }
0x1487   :  { %23153 = vmatmul.mubr.msk.f32.gmra.mrb[94].mxu1 %vm7825_vm2, %v13933_v8  ;;  %v14791_v8 = vld [vmem:[#allocation2 + $0xee] sm:$0xff] }
0x1488   :  { %23155 = vmatprep.mubr.msk.f32.mxu1 %vm26259_vm1, %v26258_v2 }
0x148b   :  { %23156 = vmatmul.mubr.msk.f32.gmra.mrb[96].mxu1 %vm7825_vm2, %v13934_v9  ;;  %v14792_v9 = vld [vmem:[#allocation2 + $0xf6] sm:$0xff] }
0x148c   :  { %23158 = vmatprep.mubr.msk.f32.mxu1 %vm26259_vm1, %v26258_v2 }
0x148f   :  { %23159 = vmatmul.mubr.msk.f32.gmra.mrb[98].mxu1 %vm7825_vm2, %v13935_v10  ;;  %v14793_v10 = vld [vmem:[#allocation2 + $0xfe] sm:$0xff] }
0x1490   :  { %23161 = vmatprep.mubr.msk.f32.mxu1 %vm26259_vm1, %v26258_v2 }
0x1493   :  { %23162 = vmatmul.mubr.msk.f32.gmra.mrb[100].mxu1 %vm7825_vm2, %v13936_v11  ;;  %v14794_v11 = vld [vmem:[#allocation2 + $0x106] sm:$0xff] }
0x1494   :  { %23164 = vmatprep.mubr.msk.f32.mxu1 %vm26259_vm1, %v26258_v2 }
0x1497   :  { %23165 = vmatmul.mubr.msk.f32.gmra.mrb[102].mxu1 %vm7825_vm2, %v13937_v12  ;;  %v14795_v12 = vld [vmem:[#allocation2 + $0x10e] sm:$0xff] }
0x1498   :  { %23167 = vmatprep.mubr.msk.f32.mxu1 %vm26259_vm1, %v26258_v2 }
0x149b   :  { %23168 = vmatmul.mubr.msk.f32.gmra.mrb[104].mxu1 %vm7825_vm2, %v13938_v13  ;;  %v14796_v13 = vld [vmem:[#allocation2 + $0x116] sm:$0xff] }
0x149c   :  { %23170 = vmatprep.mubr.msk.f32.mxu1 %vm26259_vm1, %v26258_v2 }
0x149f   :  { %23171 = vmatmul.mubr.msk.f32.gmra.mrb[106].mxu1 %vm7825_vm2, %v13939_v14  ;;  %v14797_v14 = vld [vmem:[#allocation2 + $0x11e] sm:$0xff] }
0x14a0   :  { %23173 = vmatprep.mubr.msk.f32.mxu1 %vm26259_vm1, %v26258_v2 }
0x14a3   :  { %23174 = vmatmul.mubr.msk.f32.gmra.mrb[108].mxu1 %vm7825_vm2, %v13940_v33  ;;  %v14798_v33 = vld [vmem:[#allocation2 + $0x126] sm:$0xff] }
0x14a4   :  { %23176 = vmatprep.mubr.msk.f32.mxu1 %vm26259_vm1, %v26258_v2 }
0x14a7   :  { %23177 = vmatmul.mubr.msk.f32.gmra.mrb[110].mxu1 %vm7825_vm2, %v13941_v34  ;;  %v14799_v34 = vld [vmem:[#allocation2 + $0x12e] sm:$0xff] }
0x14a8   :  { %23179 = vmatprep.mubr.msk.f32.mxu1 %vm26259_vm1, %v26258_v2 }
0x14ab   :  { %23180 = vmatmul.mubr.msk.f32.gmra.mrb[112].mxu1 %vm7825_vm2, %v13942_v36  ;;  %v14800_v36 = vld [vmem:[#allocation2 + $0x136] sm:$0xff] }
0x14ac   :  { %23182 = vmatprep.mubr.msk.f32.mxu1 %vm26259_vm1, %v26258_v2 }
0x14af   :  { %23183 = vmatmul.mubr.msk.f32.gmra.mrb[114].mxu1 %vm7825_vm2, %v13943_v15  ;;  %v14801_v15 = vld [vmem:[#allocation2 + $0x13e] sm:$0xff] }
0x14b0   :  { %23185 = vmatprep.mubr.msk.f32.mxu1 %vm26259_vm1, %v26258_v2 }
0x14b3   :  { %23186 = vmatmul.mubr.msk.f32.gmra.mrb[116].mxu1 %vm7825_vm2, %v13944_v19  ;;  %v14802_v19 = vld [vmem:[#allocation2 + $0x146] sm:$0xff] }
0x14b4   :  { %23188 = vmatprep.mubr.msk.f32.mxu1 %vm26259_vm1, %v26258_v2 }
0x14b7   :  { %23189 = vmatmul.mubr.msk.f32.gmra.mrb[118].mxu1 %vm7825_vm2, %v13945_v20  ;;  %v14803_v20 = vld [vmem:[#allocation2 + $0x14e] sm:$0xff] }
0x14b8   :  { %23191 = vmatprep.mubr.msk.f32.mxu1 %vm26259_vm1, %v26258_v2 }
0x14bb   :  { %23192 = vmatmul.mubr.msk.f32.gmra.mrb[120].mxu1 %vm7825_vm2, %v13946_v21  ;;  %v14804_v21 = vld [vmem:[#allocation2 + $0x156] sm:$0xff] }
0x14bc   :  { %23194 = vmatprep.mubr.msk.f32.mxu1 %vm26259_vm1, %v26258_v2 }
0x14bf   :  { %23195 = vmatmul.mubr.msk.f32.gmra.mrb[122].mxu1 %vm7825_vm2, %v13947_v22  ;;  %v14805_v22 = vld [vmem:[#allocation2 + $0x15e] sm:$0xff] }
0x14c0   :  { %23197 = vmatprep.mubr.msk.f32.mxu1 %vm26259_vm1, %v26258_v2 }
0x14c3   :  { %23198 = vmatmul.mubr.msk.f32.gmra.mrb[124].mxu1 %vm7825_vm2, %v13948_v24  ;;  %v14806_v24 = vld [vmem:[#allocation2 + $0x166] sm:$0xff] }
0x14c4   :  { %23200 = vmatprep.mubr.msk.f32.mxu1 %vm26259_vm1, %v26258_v2 }
0x14c7   :  { %23201 = vmatmul.mubr.msk.f32.gmra.mrb[126].mxu1 %vm7825_vm2, %v13949_v25  ;;  %v14807_v25 = vld [vmem:[#allocation2 + $0x16e] sm:$0xff] }
0x14c8   :  { %23203 = vmatprep.mubr.msk.f32.mxu1 %vm26259_vm1, %v26258_v2 }
0x14cb   :  { %23204 = vmatmul.mubr.msk.f32.gmra.mrb[128].mxu1 %vm7825_vm2, %v13950_v26  ;;  %v14808_v26 = vld [vmem:[#allocation2 + $0x176] sm:$0xff] }
0x14cc   :  { %23206 = vmatprep.mubr.msk.f32.mxu1 %vm26259_vm1, %v26258_v2 }
0x14cf   :  { %23207 = vmatmul.mubr.msk.f32.gmra.mrb[130].mxu1 %vm7825_vm2, %v13951_v27  ;;  %v14809_v27 = vld [vmem:[#allocation2 + $0x17e] sm:$0xff] }
0x14d0   :  { %23209 = vmatprep.mubr.msk.f32.mxu1 %vm26259_vm1, %v26258_v2 }
0x14d3   :  { %23210 = vmatmul.mubr.msk.f32.gmra.mrb[132].mxu1 %vm7825_vm2, %v13952_v28  ;;  %v14810_v28 = vld [vmem:[#allocation2 + $0x186] sm:$0xff] }
0x14d4   :  { %23212 = vmatprep.mubr.msk.f32.mxu1 %vm26259_vm1, %v26258_v2 }
0x14d7   :  { %23213 = vmatmul.mubr.msk.f32.gmra.mrb[134].mxu1 %vm7825_vm2, %v13953_v29  ;;  %v14811_v29 = vld [vmem:[#allocation2 + $0x18e] sm:$0xff] }
0x14d8   :  { %23215 = vmatprep.mubr.msk.f32.mxu1 %vm26259_vm1, %v26258_v2 }
0x14db   :  { %23216 = vmatmul.mubr.msk.f32.gmra.mrb[136].mxu1 %vm7825_vm2, %v13954_v30  ;;  %v14812_v30 = vld [vmem:[#allocation2 + $0x196] sm:$0xff] }
0x14dc   :  { %23218 = vmatprep.mubr.msk.f32.mxu1 %vm26259_vm1, %v26258_v2 }
0x14df   :  { %23219 = vmatmul.mubr.msk.f32.gmra.mrb[138].mxu1 %vm7825_vm2, %v13955_v31  ;;  %v14813_v31 = vld [vmem:[#allocation2 + $0x19e] sm:$0xff] }
0x14e0   :  { %23221 = vmatprep.mubr.msk.f32.mxu1 %vm26259_vm1, %v26258_v2 }
0x14e3   :  { %23222 = vmatmul.mubr.msk.f32.gmra.mrb[140].mxu1 %vm7825_vm2, %v13956_v32  ;;  %v14814_v32 = vld [vmem:[#allocation2 + $0x1a6] sm:$0xff] }
0x14e4   :  { %23224 = vmatprep.mubr.msk.f32.mxu1 %vm26259_vm1, %v26258_v2 }
0x14e7   :  { %23225 = vmatmul.mubr.msk.f32.gmra.mrb[142].mxu1 %vm7825_vm2, %v13957_v38  ;;  %v14815_v38 = vld [vmem:[#allocation2 + $0x1ae] sm:$0xff] }
0x14e8   :  { %23227 = vmatprep.mubr.msk.f32.mxu1 %vm26259_vm1, %v26258_v2 }
0x14eb   :  { %23228 = vmatmul.mubr.msk.f32.gmra.mrb[144].mxu1 %vm7825_vm2, %v13958_v57  ;;  %v14816_v57 = vld [vmem:[#allocation2 + $0x1b6] sm:$0xff] }
0x14ec   :  { %23230 = vmatprep.mubr.msk.f32.mxu1 %vm26259_vm1, %v26258_v2 }
0x14ef   :  { %23231 = vmatmul.mubr.msk.f32.gmra.mrb[146].mxu1 %vm7825_vm2, %v13959_v39  ;;  %v14817_v39 = vld [vmem:[#allocation2 + $0x1be] sm:$0xff] }
0x14f0   :  { %23233 = vmatprep.mubr.msk.f32.mxu1 %vm26259_vm1, %v26258_v2 }
0x14f3   :  { %23234 = vmatmul.mubr.msk.f32.gmra.mrb[148].mxu1 %vm7825_vm2, %v13960_v40  ;;  %v14818_v40 = vld [vmem:[#allocation2 + $0x1c6] sm:$0xff] }
0x14f4   :  { %23236 = vmatprep.mubr.msk.f32.mxu1 %vm26259_vm1, %v26258_v2 }
0x14f7   :  { %23237 = vmatmul.mubr.msk.f32.gmra.mrb[150].mxu1 %vm7825_vm2, %v13961_v23 }
0x14f8   :  { %23239 = vmatprep.mubr.msk.f32.mxu1 %vm26259_vm1, %v26258_v2 }
0x14fb   :  { %23240 = vmatmul.mubr.msk.f32.gmra.mrb[152].mxu1 %vm7825_vm2, %v13962_v41  ;;  %v14819_v41 = vld [vmem:[#allocation2 + $0x1ce] sm:$0xff] }
0x14fc   :  { %23242 = vmatprep.mubr.msk.f32.mxu1 %vm26259_vm1, %v26258_v2 }
0x14ff   :  { %23243 = vmatmul.mubr.msk.f32.gmra.mrb[154].mxu1 %vm7825_vm2, %v13963_v42 }
0x1500   :  { %23245 = vmatprep.mubr.msk.f32.mxu1 %vm26259_vm1, %v26258_v2 }
0x1503   :  { %23246 = vmatmul.mubr.msk.f32.gmra.mrb[156].mxu1 %vm7825_vm2, %v13964_v44 }
0x1504   :  { %23248 = vmatprep.mubr.msk.f32.mxu1 %vm26259_vm1, %v26258_v2 }
0x1507   :  { %23249 = vmatmul.mubr.msk.f32.gmra.mrb[158].mxu1 %vm7825_vm2, %v13965_v45  ;;  %v14820_v45 = vld [vmem:[#allocation2 + $0x1d6] sm:$0xff] }
0x1508   :  { %23251 = vmatprep.mubr.msk.f32.mxu1 %vm26259_vm1, %v26258_v2 }
0x150b   :  { %23252 = vmatmul.mubr.msk.f32.gmra.mrb[160].mxu1 %vm7825_vm2, %v13966_v46 }
0x150c   :  { %23254 = vmatprep.mubr.msk.f32.mxu1 %vm26259_vm1, %v26258_v2 }
0x150f   :  { %23255 = vmatmul.mubr.msk.f32.gmra.mrb[162].mxu1 %vm7825_vm2, %v13967_v47 }
0x1510   :  { %23257 = vmatprep.mubr.msk.f32.mxu1 %vm26259_vm1, %v26258_v2 }
0x1513   :  { %23258 = vmatmul.mubr.msk.f32.gmra.mrb[164].mxu1 %vm7825_vm2, %v13968_v37 }
0x1514   :  { %23260 = vmatprep.mubr.msk.f32.mxu1 %vm26259_vm1, %v26258_v2 }
0x1517   :  { %23261 = vmatmul.mubr.msk.f32.gmra.mrb[166].mxu1 %vm7825_vm2, %v13969_v48 }
0x1518   :  { %23267 = vmatprep.mubr.msk.f32.mxu1 %vm26259_vm1, %v26258_v2 }
0x151b   :  { %23268 = vmatmul.mubr.msk.f32.vlgmr.msra.gmra.mrb[6].mxu1 %vm7825_vm2, %v14766_v49 }
0x151c   :  { %23270 = vmatprep.mubr.msk.f32.mxu1 %vm26259_vm1, %v26258_v2 }
0x151f   :  { %23271 = vmatmul.mubr.msk.f32.gmra.mrb[8].mxu1 %vm7825_vm2, %v14767_v50  ;;  %v14821_v50 = vld [vmem:[#allocation2 + $0x1de] sm:$0xff] }
0x1520   :  { %23273 = vmatprep.mubr.msk.f32.mxu1 %vm26259_vm1, %v26258_v2 }
0x1523   :  { %23274 = vmatmul.mubr.msk.f32.gmra.mrb[10].mxu1 %vm7825_vm2, %v14768_v43 }
0x1524   :  { %23276 = vmatprep.mubr.msk.f32.mxu1 %vm26259_vm1, %v26258_v2 }
0x1527   :  { %23277 = vmatmul.mubr.msk.f32.gmra.mrb[12].mxu1 %vm7825_vm2, %v14769_v51 }
0x1528   :  { %23279 = vmatprep.mubr.msk.f32.mxu1 %vm26259_vm1, %v26258_v2 }
0x152b   :  { %23280 = vmatmul.mubr.msk.f32.gmra.mrb[14].mxu1 %vm7825_vm2, %v14770_v52  ;;  %v14822_v52 = vld [vmem:[#allocation2 + $0x1e6] sm:$0xff] }
0x152c   :  { %23282 = vmatprep.mubr.msk.f32.mxu1 %vm26259_vm1, %v26258_v2 }
0x152f   :  { %23283 = vmatmul.mubr.msk.f32.gmra.mrb[16].mxu1 %vm7825_vm2, %v14771_v53 }
0x1530   :  { %23285 = vmatprep.mubr.msk.f32.mxu1 %vm26259_vm1, %v26258_v2 }
0x1533   :  { %23286 = vmatmul.mubr.msk.f32.gmra.mrb[18].mxu1 %vm7825_vm2, %v14772_v54 }
0x1534   :  { %23288 = vmatprep.mubr.msk.f32.mxu1 %vm26259_vm1, %v26258_v2 }
0x1537   :  { %23289 = vmatmul.mubr.msk.f32.gmra.mrb[20].mxu1 %vm7825_vm2, %v14773_v55 }
0x1538   :  { %23291 = vmatprep.mubr.msk.f32.mxu1 %vm26259_vm1, %v26258_v2 }
0x153b   :  { %23292 = vmatmul.mubr.msk.f32.gmra.mrb[22].mxu1 %vm7825_vm2, %v14774_v56 }
0x153c   :  { %23294 = vmatprep.mubr.msk.f32.mxu1 %vm26259_vm1, %v26258_v2 }
0x153f   :  { %23295 = vmatmul.mubr.msk.f32.gmra.mrb[24].mxu1 %vm7825_vm2, %v14775_v58 }
0x1540   :  { %23297 = vmatprep.mubr.msk.f32.mxu1 %vm26259_vm1, %v26258_v2 }
0x1543   :  { %23298 = vmatmul.mubr.msk.f32.gmra.mrb[26].mxu1 %vm7825_vm2, %v14776_v59  ;;  %v14823_v59 = vld [vmem:[#allocation2 + $0x1ee] sm:$0xff] }
0x1544   :  { %23300 = vmatprep.mubr.msk.f32.mxu1 %vm26259_vm1, %v26258_v2 }
0x1547   :  { %23301 = vmatmul.mubr.msk.f32.gmra.mrb[28].mxu1 %vm7825_vm2, %v14777_v60 }
0x1548   :  { %23303 = vmatprep.mubr.msk.f32.mxu1 %vm26259_vm1, %v26258_v2 }
0x154b   :  { %23304 = vmatmul.mubr.msk.f32.gmra.mrb[30].mxu1 %vm7825_vm2, %v14778_v61 }
0x154c   :  { %23306 = vmatprep.mubr.msk.f32.mxu1 %vm26259_vm1, %v26258_v2 }
0x154f   :  { %23307 = vmatmul.mubr.msk.f32.gmra.mrb[32].mxu1 %vm7825_vm2, %v14779_v62  ;;  %v14824_v62 = vld [vmem:[#allocation2 + $0x1f6] sm:$0xff] }
0x1550   :  { %23309 = vmatprep.mubr.msk.f32.mxu1 %vm26259_vm1, %v26258_v2 }
0x1553   :  { %23310 = vmatmul.mubr.msk.f32.gmra.mrb[34].mxu1 %vm7825_vm2, %v14780_v63 }
0x1554   :  { %23312 = vmatprep.mubr.msk.f32.mxu1 %vm26259_vm1, %v26258_v2 }
0x1557   :  { %23313 = vmatmul.mubr.msk.f32.gmra.mrb[36].mxu1 %vm7825_vm2, %v14781_v16 }
0x1558   :  { %23315 = vmatprep.mubr.msk.f32.mxu1 %vm26259_vm1, %v26258_v2 }
0x155b   :  { %23316 = vmatmul.mubr.msk.f32.gmra.mrb[38].mxu1 %vm7825_vm2, %v14782_v35 }
0x155c   :  { %23318 = vmatprep.mubr.msk.f32.mxu1 %vm26259_vm1, %v26258_v2 }
0x155f   :  { %23319 = vmatmul.mubr.msk.f32.gmra.mrb[40].mxu1 %vm7825_vm2, %v14783_v18 }
0x1560   :  { %23321 = vmatprep.mubr.msk.f32.mxu1 %vm26259_vm1, %v26258_v2 }
0x1563   :  { %23322 = vmatmul.mubr.msk.f32.gmra.mrb[42].mxu1 %vm7825_vm2, %v14784_v0 }
0x1564   :  { %23324 = vmatprep.mubr.msk.f32.mxu1 %vm26259_vm1, %v26258_v2 }
0x1567   :  { %23325 = vmatmul.mubr.msk.f32.gmra.mrb[44].mxu1 %vm7825_vm2, %v14785_v1  ;;  %v14825_v1 = vld [vmem:[#allocation2 + $0x1fe] sm:$0xff] }
0x1568   :  { %23327 = vmatprep.mubr.msk.f32.mxu1 %vm26259_vm1, %v26258_v2 }
0x156b   :  { %23328 = vmatmul.mubr.msk.f32.gmra.mrb[46].mxu1 %vm7825_vm2, %v14786_v3 }
0x156c   :  { %23330 = vmatprep.mubr.msk.f32.mxu1 %vm26259_vm1, %v26258_v2 }
0x156f   :  { %23331 = vmatmul.mubr.msk.f32.gmra.mrb[48].mxu1 %vm7825_vm2, %v14787_v4 }
0x1570   :  { %23333 = vmatprep.mubr.msk.f32.mxu1 %vm26259_vm1, %v26258_v2 }
0x1573   :  { %23334 = vmatmul.mubr.msk.f32.gmra.mrb[50].mxu1 %vm7825_vm2, %v14788_v5  ;;  %v14826_v5 = vld [vmem:[#allocation2 + $0x206] sm:$0xff] }
0x1574   :  { %23336 = vmatprep.mubr.msk.f32.mxu1 %vm26259_vm1, %v26258_v2 }
0x1577   :  { %23337 = vmatmul.mubr.msk.f32.gmra.mrb[52].mxu1 %vm7825_vm2, %v14789_v6 }
0x1578   :  { %23339 = vmatprep.mubr.msk.f32.mxu1 %vm26259_vm1, %v26258_v2 }
0x157b   :  { %23340 = vmatmul.mubr.msk.f32.gmra.mrb[54].mxu1 %vm7825_vm2, %v14790_v7 }
0x157c   :  { %23342 = vmatprep.mubr.msk.f32.mxu1 %vm26259_vm1, %v26258_v2 }
0x157f   :  { %23343 = vmatmul.mubr.msk.f32.gmra.mrb[56].mxu1 %vm7825_vm2, %v14791_v8 }
0x1580   :  { %23345 = vmatprep.mubr.msk.f32.mxu1 %vm26259_vm1, %v26258_v2 }
0x1583   :  { %23346 = vmatmul.mubr.msk.f32.gmra.mrb[58].mxu1 %vm7825_vm2, %v14792_v9 }
0x1584   :  { %23348 = vmatprep.mubr.msk.f32.mxu1 %vm26259_vm1, %v26258_v2 }
0x1587   :  { %23349 = vmatmul.mubr.msk.f32.gmra.mrb[60].mxu1 %vm7825_vm2, %v14793_v10 }
0x1588   :  { %23351 = vmatprep.mubr.msk.f32.mxu1 %vm26259_vm1, %v26258_v2 }
0x158b   :  { %23352 = vmatmul.mubr.msk.f32.gmra.mrb[62].mxu1 %vm7825_vm2, %v14794_v11  ;;  %v14827_v11 = vld [vmem:[#allocation2 + $0x20e] sm:$0xff] }
0x158c   :  { %23354 = vmatprep.mubr.msk.f32.mxu1 %vm26259_vm1, %v26258_v2 }
0x158f   :  { %23355 = vmatmul.mubr.msk.f32.gmra.mrb[64].mxu1 %vm7825_vm2, %v14795_v12 }
0x1590   :  { %23357 = vmatprep.mubr.msk.f32.mxu1 %vm26259_vm1, %v26258_v2 }
0x1593   :  { %23358 = vmatmul.mubr.msk.f32.gmra.mrb[66].mxu1 %vm7825_vm2, %v14796_v13 }
0x1594   :  { %23360 = vmatprep.mubr.msk.f32.mxu1 %vm26259_vm1, %v26258_v2 }
0x1597   :  { %23361 = vmatmul.mubr.msk.f32.gmra.mrb[68].mxu1 %vm7825_vm2, %v14797_v14  ;;  %v14828_v14 = vld [vmem:[#allocation2 + $0x216] sm:$0xff] }
0x1598   :  { %23363 = vmatprep.mubr.msk.f32.mxu1 %vm26259_vm1, %v26258_v2 }
0x159b   :  { %23364 = vmatmul.mubr.msk.f32.gmra.mrb[70].mxu1 %vm7825_vm2, %v14798_v33 }
0x159c   :  { %23366 = vmatprep.mubr.msk.f32.mxu1 %vm26259_vm1, %v26258_v2 }
0x159f   :  { %23367 = vmatmul.mubr.msk.f32.gmra.mrb[72].mxu1 %vm7825_vm2, %v14799_v34 }
0x15a0   :  { %23369 = vmatprep.mubr.msk.f32.mxu1 %vm26259_vm1, %v26258_v2 }
0x15a3   :  { %23370 = vmatmul.mubr.msk.f32.gmra.mrb[74].mxu1 %vm7825_vm2, %v14800_v36 }
0x15a4   :  { %23372 = vmatprep.mubr.msk.f32.mxu1 %vm26259_vm1, %v26258_v2 }
0x15a7   :  { %23373 = vmatmul.mubr.msk.f32.gmra.mrb[76].mxu1 %vm7825_vm2, %v14801_v15 }
0x15a8   :  { %23375 = vmatprep.mubr.msk.f32.mxu1 %vm26259_vm1, %v26258_v2 }
0x15ab   :  { %23376 = vmatmul.mubr.msk.f32.gmra.mrb[78].mxu1 %vm7825_vm2, %v14802_v19 }
0x15ac   :  { %23378 = vmatprep.mubr.msk.f32.mxu1 %vm26259_vm1, %v26258_v2 }
0x15af   :  { %23379 = vmatmul.mubr.msk.f32.gmra.mrb[80].mxu1 %vm7825_vm2, %v14803_v20  ;;  %v14829_v20 = vld [vmem:[#allocation2 + $0x21e] sm:$0xff] }
0x15b0   :  { %23381 = vmatprep.mubr.msk.f32.mxu1 %vm26259_vm1, %v26258_v2 }
0x15b3   :  { %23382 = vmatmul.mubr.msk.f32.gmra.mrb[82].mxu1 %vm7825_vm2, %v14804_v21 }
0x15b4   :  { %23384 = vmatprep.mubr.msk.f32.mxu1 %vm26259_vm1, %v26258_v2 }
0x15b7   :  { %23385 = vmatmul.mubr.msk.f32.gmra.mrb[84].mxu1 %vm7825_vm2, %v14805_v22 }
0x15b8   :  { %23387 = vmatprep.mubr.msk.f32.mxu1 %vm26259_vm1, %v26258_v2 }
0x15bb   :  { %23388 = vmatmul.mubr.msk.f32.gmra.mrb[86].mxu1 %vm7825_vm2, %v14806_v24  ;;  %v14830_v24 = vld [vmem:[#allocation2 + $0x226] sm:$0xff] }
0x15bc   :  { %23390 = vmatprep.mubr.msk.f32.mxu1 %vm26259_vm1, %v26258_v2 }
0x15bf   :  { %23391 = vmatmul.mubr.msk.f32.gmra.mrb[88].mxu1 %vm7825_vm2, %v14807_v25 }
0x15c0   :  { %23393 = vmatprep.mubr.msk.f32.mxu1 %vm26259_vm1, %v26258_v2 }
0x15c3   :  { %23394 = vmatmul.mubr.msk.f32.gmra.mrb[90].mxu1 %vm7825_vm2, %v14808_v26 }
0x15c4   :  { %23396 = vmatprep.mubr.msk.f32.mxu1 %vm26259_vm1, %v26258_v2 }
0x15c7   :  { %23397 = vmatmul.mubr.msk.f32.gmra.mrb[92].mxu1 %vm7825_vm2, %v14809_v27 }
0x15c8   :  { %23399 = vmatprep.mubr.msk.f32.mxu1 %vm26259_vm1, %v26258_v2 }
0x15cb   :  { %23400 = vmatmul.mubr.msk.f32.gmra.mrb[94].mxu1 %vm7825_vm2, %v14810_v28 }
0x15cc   :  { %23402 = vmatprep.mubr.msk.f32.mxu1 %vm26259_vm1, %v26258_v2 }
0x15cf   :  { %23403 = vmatmul.mubr.msk.f32.gmra.mrb[96].mxu1 %vm7825_vm2, %v14811_v29 }
0x15d0   :  { %23405 = vmatprep.mubr.msk.f32.mxu1 %vm26259_vm1, %v26258_v2 }
0x15d3   :  { %23406 = vmatmul.mubr.msk.f32.gmra.mrb[98].mxu1 %vm7825_vm2, %v14812_v30  ;;  %v14831_v30 = vld [vmem:[#allocation2 + $0x22e] sm:$0xff] }
0x15d4   :  { %23408 = vmatprep.mubr.msk.f32.mxu1 %vm26259_vm1, %v26258_v2 }
0x15d7   :  { %23409 = vmatmul.mubr.msk.f32.gmra.mrb[100].mxu1 %vm7825_vm2, %v14813_v31 }
0x15d8   :  { %23411 = vmatprep.mubr.msk.f32.mxu1 %vm26259_vm1, %v26258_v2 }
0x15db   :  { %23412 = vmatmul.mubr.msk.f32.gmra.mrb[102].mxu1 %vm7825_vm2, %v14814_v32 }
0x15dc   :  { %23414 = vmatprep.mubr.msk.f32.mxu1 %vm26259_vm1, %v26258_v2 }
0x15df   :  { %23415 = vmatmul.mubr.msk.f32.gmra.mrb[104].mxu1 %vm7825_vm2, %v14815_v38  ;;  %v14832_v38 = vld [vmem:[#allocation2 + $0x236] sm:$0xff] }
0x15e0   :  { %23417 = vmatprep.mubr.msk.f32.mxu1 %vm26259_vm1, %v26258_v2 }
0x15e3   :  { %23418 = vmatmul.mubr.msk.f32.gmra.mrb[106].mxu1 %vm7825_vm2, %v14816_v57 }
0x15e4   :  { %23420 = vmatprep.mubr.msk.f32.mxu1 %vm26259_vm1, %v26258_v2 }
0x15e7   :  { %23421 = vmatmul.mubr.msk.f32.gmra.mrb[108].mxu1 %vm7825_vm2, %v14817_v39 }
0x15e8   :  { %23423 = vmatprep.mubr.msk.f32.mxu1 %vm26259_vm1, %v26258_v2 }
0x15eb   :  { %23424 = vmatmul.mubr.msk.f32.gmra.mrb[110].mxu1 %vm7825_vm2, %v14818_v40 }
0x15ec   :  { %23426 = vmatprep.mubr.msk.f32.mxu1 %vm26259_vm1, %v26258_v2 }
0x15ee   :  { %v15158_v23 = vpop.f32.mrb[6].mxu1 }
0x15ef   :  { %v23269_v42 = vpop.f32.mrb[7].mxu1  ;;  %23427 = vmatmul.mubr.msk.f32.gmra.mrb[112].mxu1 %vm7825_vm2, %v14819_v41  ;;  %v15643_v46 = vmax.f32 %v15158_v23, 0.0 }
0x15f0   :  { %23429 = vmatprep.mubr.msk.f32.mxu1 %vm26259_vm1, %v26258_v2  ;;  %v14833_v42 = vld [vmem:[#allocation2 + $0x23e] sm:$0xff] }
0x15f2   :  { %v15163_v44 = vpop.f32.mrb[8].mxu1 }
0x15f3   :  { %v15644_v47 = vmax.f32 %v15163_v44, 0.0  ;;  %v23272_v37 = vpop.f32.mrb[9].mxu1  ;;  %23430 = vmatmul.mubr.msk.f32.gmra.mrb[114].mxu1 %vm7825_vm2, %v14820_v45 }
0x15f4   :  { %23432 = vmatprep.mubr.msk.f32.mxu1 %vm26259_vm1, %v26258_v2 }
0x15f5   :  { %v33768_v48 = vpack.c.bf16 %v15644_v47, %v15643_v46  ;;  %v14834_v46 = vld [vmem:[#allocation2 + $0x246] sm:$0xff] }
0x15f6   :  { %v15168_v49 = vpop.f32.mrb[10].mxu1 }
0x15f7   :  { %v23275_v43 = vpop.f32.mrb[11].mxu1  ;;  %23433 = vmatmul.mubr.msk.f32.gmra.mrb[116].mxu1 %vm7825_vm2, %v14821_v50  ;;  %v15645_v53 = vmax.f32 %v15168_v49, 0.0 }
0x15f8   :  { %23435 = vmatprep.mubr.msk.f32.mxu1 %vm26259_vm1, %v26258_v2 }
0x15fa   :  { %v15173_v51 = vpop.f32.mrb[12].mxu1 }
0x15fb   :  { %v15646_v54 = vmax.f32 %v15173_v51, 0.0  ;;  %v23278_v55 = vpop.f32.mrb[13].mxu1  ;;  %23436 = vmatmul.mubr.msk.f32.gmra.mrb[118].mxu1 %vm7825_vm2, %v14822_v52  ;;  %v14835_v51 = vld [vmem:[#allocation2 + $0x24e] sm:$0xff] }
0x15fc   :  { %23438 = vmatprep.mubr.msk.f32.mxu1 %vm26259_vm1, %v26258_v2 }
0x15fd   :  { %v33776_v56 = vpack.c.bf16 %v15646_v54, %v15645_v53  ;;  %v14836_v54 = vld [vmem:[#allocation2 + $0x256] sm:$0xff] }
0x15fe   :  { %v15178_v58 = vpop.f32.mrb[14].mxu1 }
0x15ff   :  { %v23281_v60 = vpop.f32.mrb[15].mxu1  ;;  %23439 = vmatmul.mubr.msk.f32.gmra.mrb[120].mxu1 %vm7825_vm2, %v14823_v59  ;;  %v15647_v63 = vmax.f32 %v15178_v58, 0.0 }
0x1600   :  { %23441 = vmatprep.mubr.msk.f32.mxu1 %vm26259_vm1, %v26258_v2 }
0x1602   :  { %v15183_v61 = vpop.f32.mrb[16].mxu1 }
0x1603   :  { %v15648_v16 = vmax.f32 %v15183_v61, 0.0  ;;  %v23284_v35 = vpop.f32.mrb[17].mxu1  ;;  %23442 = vmatmul.mubr.msk.f32.gmra.mrb[122].mxu1 %vm7825_vm2, %v14824_v62  ;;  %v14837_v62 = vld [vmem:[#allocation2 + $0x25e] sm:$0xff] }
0x1604   :  { %23444 = vmatprep.mubr.msk.f32.mxu1 %vm26259_vm1, %v26258_v2  ;;  %v14838_v35 = vld [vmem:[#allocation2 + $0x266] sm:$0xff] }
0x1605   :  { %v33784_v18 = vpack.c.bf16 %v15648_v16, %v15647_v63 }
0x1606   :  { %v15188_v0 = vpop.f32.mrb[18].mxu1 }
0x1607   :  { %v23287_v3 = vpop.f32.mrb[19].mxu1  ;;  %23445 = vmatmul.mubr.msk.f32.gmra.mrb[124].mxu1 %vm7825_vm2, %v14825_v1  ;;  %v15649_v6 = vmax.f32 %v15188_v0, 0.0 }
0x1608   :  { %23447 = vmatprep.mubr.msk.f32.mxu1 %vm26259_vm1, %v26258_v2 }
0x160a   :  { %v15193_v4 = vpop.f32.mrb[20].mxu1 }
0x160b   :  { %v15650_v7 = vmax.f32 %v15193_v4, 0.0  ;;  %v23290_v8 = vpop.f32.mrb[21].mxu1  ;;  %23448 = vmatmul.mubr.msk.f32.gmra.mrb[126].mxu1 %vm7825_vm2, %v14826_v5 }
0x160c   :  { %23450 = vmatprep.mubr.msk.f32.mxu1 %vm26259_vm1, %v26258_v2  ;;  %v14840_v8 = vld [vmem:[#allocation2 + $0x276] sm:$0xff] }
0x160d   :  { %v33792_v9 = vpack.c.bf16 %v15650_v7, %v15649_v6  ;;  %v14839_v6 = vld [vmem:[#allocation2 + $0x26e] sm:$0xff] }
0x160e   :  { %v15198_v10 = vpop.f32.mrb[22].mxu1 }
0x160f   :  { %v23293_v12 = vpop.f32.mrb[23].mxu1  ;;  %23451 = vmatmul.mubr.msk.f32.gmra.mrb[128].mxu1 %vm7825_vm2, %v14827_v11  ;;  %v15651_v33 = vmax.f32 %v15198_v10, 0.0 }
0x1610   :  { %23453 = vmatprep.mubr.msk.f32.mxu1 %vm26259_vm1, %v26258_v2 }
0x1612   :  { %v15203_v13 = vpop.f32.mrb[24].mxu1 }
0x1613   :  { %v15652_v34 = vmax.f32 %v15203_v13, 0.0  ;;  %v23296_v36 = vpop.f32.mrb[25].mxu1  ;;  %23454 = vmatmul.mubr.msk.f32.gmra.mrb[130].mxu1 %vm7825_vm2, %v14828_v14 }
0x1614   :  { %23456 = vmatprep.mubr.msk.f32.mxu1 %vm26259_vm1, %v26258_v2  ;;  %v14842_v36 = vld [vmem:[#allocation2 + $0x286] sm:$0xff] }
0x1615   :  { %v33800_v15 = vpack.c.bf16 %v15652_v34, %v15651_v33  ;;  %v14841_v33 = vld [vmem:[#allocation2 + $0x27e] sm:$0xff] }
0x1616   :  { %v15208_v19 = vpop.f32.mrb[26].mxu1 }
0x1617   :  { %v23299_v21 = vpop.f32.mrb[27].mxu1  ;;  %23457 = vmatmul.mubr.msk.f32.gmra.mrb[132].mxu1 %vm7825_vm2, %v14829_v20  ;;  %v15653_v25 = vmax.f32 %v15208_v19, 0.0 }
0x1618   :  { %23459 = vmatprep.mubr.msk.f32.mxu1 %vm26259_vm1, %v26258_v2 }
0x161a   :  { %v15213_v22 = vpop.f32.mrb[28].mxu1 }
0x161b   :  { %v15654_v26 = vmax.f32 %v15213_v22, 0.0  ;;  %v23302_v27 = vpop.f32.mrb[29].mxu1  ;;  %23460 = vmatmul.mubr.msk.f32.gmra.mrb[134].mxu1 %vm7825_vm2, %v14830_v24  ;;  %v14843_v22 = vld [vmem:[#allocation2 + $0x28e] sm:$0xff] }
0x161c   :  { %23462 = vmatprep.mubr.msk.f32.mxu1 %vm26259_vm1, %v26258_v2 }
0x161d   :  { %v33808_v28 = vpack.c.bf16 %v15654_v26, %v15653_v25 }
0x161e   :  { %v15218_v29 = vpop.f32.mrb[30].mxu1 }
0x161f   :  { %v23305_v31 = vpop.f32.mrb[31].mxu1  ;;  %23463 = vmatmul.mubr.msk.f32.gmra.mrb[136].mxu1 %vm7825_vm2, %v14831_v30  ;;  %v15655_v57 = vmax.f32 %v15218_v29, 0.0 }
0x1620   :  { %23465 = vmatprep.mubr.msk.f32.mxu1 %vm26259_vm1, %v26258_v2 }
0x1622   :  { %v15223_v32 = vpop.f32.mrb[32].mxu1 }
0x1623   :  { %v15656_v39 = vmax.f32 %v15223_v32, 0.0  ;;  %v23308_v40 = vpop.f32.mrb[33].mxu1  ;;  %23466 = vmatmul.mubr.msk.f32.gmra.mrb[138].mxu1 %vm7825_vm2, %v14832_v38  ;;  %v14845_v32 = vld [vmem:[#allocation2 + $0x29e] sm:$0xff] }
0x1624   :  { %23468 = vmatprep.mubr.msk.f32.mxu1 %vm26259_vm1, %v26258_v2 }
0x1625   :  { %v33816_v23 = vpack.c.bf16 %v15656_v39, %v15655_v57 }
0x1626   :  { %v15228_v41 = vpop.f32.mrb[34].mxu1 }
0x1627   :  { %v23311_v44 = vpop.f32.mrb[35].mxu1  ;;  %23469 = vmatmul.mubr.msk.f32.gmra.mrb[140].mxu1 %vm7825_vm2, %v14833_v42  ;;  %v15657_v47 = vmax.f32 %v15228_v41, 0.0 }
0x1628   :  { %23471 = vmatprep.mubr.msk.f32.mxu1 %vm26259_vm1, %v26258_v2 }
0x162a   :  { %v15233_v45 = vpop.f32.mrb[36].mxu1 }
0x162b   :  { %v15658_v37 = vmax.f32 %v15233_v45, 0.0  ;;  %v23314_v49 = vpop.f32.mrb[37].mxu1  ;;  %23472 = vmatmul.mubr.msk.f32.gmra.mrb[142].mxu1 %vm7825_vm2, %v14834_v46 }
0x162c   :  { %23474 = vmatprep.mubr.msk.f32.mxu1 %vm26259_vm1, %v26258_v2 }
0x162d   :  { %v33824_v50 = vpack.c.bf16 %v15658_v37, %v15657_v47 }
0x162e   :  { %v15238_v43 = vpop.f32.mrb[38].mxu1 }
0x162f   :  { %v23317_v52 = vpop.f32.mrb[39].mxu1  ;;  %23475 = vmatmul.mubr.msk.f32.gmra.mrb[144].mxu1 %vm7825_vm2, %v14835_v51  ;;  %v15659_v55 = vmax.f32 %v15238_v43, 0.0 }
0x1630   :  { %23477 = vmatprep.mubr.msk.f32.mxu1 %vm26259_vm1, %v26258_v2 }
0x1632   :  { %v15243_v53 = vpop.f32.mrb[40].mxu1 }
0x1633   :  { %v15660_v58 = vmax.f32 %v15243_v53, 0.0  ;;  %v23320_v59 = vpop.f32.mrb[41].mxu1  ;;  %23478 = vmatmul.mubr.msk.f32.gmra.mrb[146].mxu1 %vm7825_vm2, %v14836_v54 }
0x1634   :  { %23480 = vmatprep.mubr.msk.f32.mxu1 %vm26259_vm1, %v26258_v2 }
0x1635   :  { %v23546_v60 = vpack.c.bf16 %v15660_v58, %v15659_v55 }
0x1636   :  { %v15248_v61 = vpop.f32.mrb[42].mxu1 }
0x1637   :  { %v23323_v63 = vpop.f32.mrb[43].mxu1  ;;  %23481 = vmatmul.mubr.msk.f32.gmra.mrb[148].mxu1 %vm7825_vm2, %v14837_v62  ;;  %23547 = vmatprep.subr.bf16.mxu0 %v23546_v60  ;;  %v15661_v0 = vmax.f32 %v15248_v61, 0.0 }
0x1638   :  { %23549 = vmatpush3.bf16.msra.mxu0 %v33768_v48  ;;  %23483 = vmatprep.mubr.msk.f32.mxu1 %vm26259_vm1, %v26258_v2 }
0x163a   :  { %v15253_v16 = vpop.f32.mrb[44].mxu1 }
0x163b   :  { %v15662_v1 = vmax.f32 %v15253_v16, 0.0  ;;  %v23326_v3 = vpop.f32.mrb[45].mxu1  ;;  %23484 = vmatmul.mubr.msk.f32.gmra.mrb[150].mxu1 %vm7825_vm2, %v14838_v35  ;;  %v15732_v16 = vlaneseq }
0x163c   :  { %23486 = vmatprep.mubr.msk.f32.mxu1 %vm26259_vm1, %v26258_v2 }
0x163d   :  { %v23550_v4 = vpack.c.bf16 %v15662_v1, %v15661_v0  ;;  %v15733_v1 = vshrl.u32 %v15732_v16, 7 }
0x163e   :  { %v15258_v5 = vpop.f32.mrb[46].mxu1 }
0x163f   :  { %v23329_v7 = vpop.f32.mrb[47].mxu1  ;;  %23487 = vmatmul.mubr.msk.f32.gmra.mrb[152].mxu1 %vm7825_vm2, %v14839_v6  ;;  %23551 = vmatprep.subr.bf16.mxu0 %v23550_v4  ;;  %v15663_v10 = vmax.f32 %v15258_v5, 0.0 }
0x1640   :  { %23553 = vmatpush3.bf16.msra.mxu0 %v33776_v56  ;;  %23489 = vmatprep.mubr.msk.f32.mxu1 %vm26259_vm1, %v26258_v2  ;;  %v15724_v7 = vld [vmem:[%s33946_s3] sm:$0xff] }
0x1642   :  { %v15263_v48 = vpop.f32.mrb[48].mxu1 }
0x1643   :  { %v15664_v11 = vmax.f32 %v15263_v48, 0.0  ;;  %v23332_v12 = vpop.f32.mrb[49].mxu1  ;;  %23490 = vmatmul.mubr.msk.f32.gmra.mrb[154].mxu1 %vm7825_vm2, %v14840_v8 }
0x1644   :  { %23492 = vmatprep.mubr.msk.f32.mxu1 %vm26259_vm1, %v26258_v2 }
0x1645   :  { %v23554_v13 = vpack.c.bf16 %v15664_v11, %v15663_v10 }
0x1646   :  { %v15268_v14 = vpop.f32.mrb[50].mxu1 }
0x1647   :  { %v23335_v34 = vpop.f32.mrb[51].mxu1  ;;  %23493 = vmatmul.mubr.msk.f32.gmra.mrb[156].mxu1 %vm7825_vm2, %v14841_v33  ;;  %23555 = vmatprep.subr.bf16.mxu0 %v23554_v13  ;;  %v15665_v19 = vmax.f32 %v15268_v14, 0.0 }
0x1648   :  { %23557 = vmatpush3.bf16.msra.mxu0 %v33784_v18  ;;  %23495 = vmatprep.mubr.msk.f32.mxu1 %vm26259_vm1, %v26258_v2  ;;  %v14844_v18 = vld [vmem:[#allocation2 + $0x296] sm:$0xff] }
0x164a   :  { %v15273_v56 = vpop.f32.mrb[52].mxu1 }
0x164b   :  { %v15666_v20 = vmax.f32 %v15273_v56, 0.0  ;;  %v23338_v21 = vpop.f32.mrb[53].mxu1  ;;  %23496 = vmatmul.mubr.msk.f32.gmra.mrb[158].mxu1 %vm7825_vm2, %v14842_v36 }
0x164c   :  { %23498 = vmatprep.mubr.msk.f32.mxu1 %vm26259_vm1, %v26258_v2 }
0x164d   :  { %v23558_v24 = vpack.c.bf16 %v15666_v20, %v15665_v19 }
0x164e   :  { %v15278_v25 = vpop.f32.mrb[54].mxu1 }
0x164f   :  { %v23341_v26 = vpop.f32.mrb[55].mxu1  ;;  %23499 = vmatmul.mubr.msk.f32.gmra.mrb[160].mxu1 %vm7825_vm2, %v14843_v22  ;;  %23559 = vmatprep.subr.bf16.mxu0 %v23558_v24  ;;  %v15667_v29 = vmax.f32 %v15278_v25, 0.0 }
0x1650   :  { %23561 = vmatpush3.bf16.msra.mxu0 %v33792_v9  ;;  %23501 = vmatprep.mubr.msk.f32.mxu1 %vm26259_vm1, %v26258_v2  ;;  %v14846_v9 = vld [vmem:[#allocation2 + $0x2a6] sm:$0xff] }
0x1652   :  { %v15283_v27 = vpop.f32.mrb[56].mxu1 }
0x1653   :  { %v15668_v30 = vmax.f32 %v15283_v27, 0.0  ;;  %v23344_v31 = vpop.f32.mrb[57].mxu1  ;;  %23502 = vmatmul.mubr.msk.f32.gmra.mrb[162].mxu1 %vm7825_vm2, %v14844_v18 }
0x1654   :  { %23504 = vmatprep.mubr.msk.f32.mxu1 %vm26259_vm1, %v26258_v2 }
0x1655   :  { %v23562_v38 = vpack.c.bf16 %v15668_v30, %v15667_v29 }
0x1656   :  { %v15288_v57 = vpop.f32.mrb[58].mxu1 }
0x1657   :  { %v23347_v39 = vpop.f32.mrb[59].mxu1  ;;  %23505 = vmatmul.mubr.msk.f32.gmra.mrb[164].mxu1 %vm7825_vm2, %v14845_v32  ;;  %23563 = vmatprep.subr.bf16.mxu0 %v23562_v38  ;;  %v15669_v41 = vmax.f32 %v15288_v57, 0.0  ;;  %v15728_v38 = vcombine.high %v15724_v7, %v15724_v7 }
0x1658   :  { %23565 = vmatpush3.bf16.msra.mxu0 %v33800_v15  ;;  %23507 = vmatprep.mubr.msk.f32.mxu1 %vm26259_vm1, %v26258_v2 }
0x165a   :  { %v15293_v40 = vpop.f32.mrb[60].mxu1 }
0x165b   :  { %v15670_v42 = vmax.f32 %v15293_v40, 0.0  ;;  %v23350_v44 = vpop.f32.mrb[61].mxu1  ;;  %23508 = vmatmul.mubr.msk.f32.gmra.mrb[166].mxu1 %vm7825_vm2, %v14846_v9 }
0x165d   :  { %v23566_v45 = vpack.c.bf16 %v15670_v42, %v15669_v41 }
0x165e   :  { %v15298_v46 = vpop.f32.mrb[62].mxu1 }
0x165f   :  { %v23353_v47 = vpop.f32.mrb[63].mxu1  ;;  %23567 = vmatprep.subr.bf16.mxu0 %v23566_v45  ;;  %v15671_v49 = vmax.f32 %v15298_v46, 0.0 }
0x1660   :  { %23569 = vmatpush3.bf16.msra.mxu0 %v33808_v28  ;;  %v26261_v28 = vmov 1983009808  }
0x1661   :  { %v15730_v63 = vunpack.c.l.s4 %v26261_v28 }
0x1662   :  { %v15303_v37 = vpop.f32.mrb[64].mxu1 }
0x1663   :  { %v15672_v43 = vmax.f32 %v15303_v37, 0.0  ;;  %v23356_v15 = vpop.f32.mrb[65].mxu1  ;;  %v15731_v0 = vunpack.c.0.s8 %v15730_v63 }
0x1665   :  { %v23570_v51 = vpack.c.bf16 %v15672_v43, %v15671_v49  ;;  %v15734_v5 = vsub.s32 %v15731_v0, %v15733_v1 }
0x1666   :  { %v15308_v52 = vpop.f32.mrb[66].mxu1 }
0x1667   :  { %v23359_v53 = vpop.f32.mrb[67].mxu1  ;;  %23571 = vmatprep.subr.bf16.mxu0 %v23570_v51  ;;  %v15673_v55 = vmax.f32 %v15308_v52, 0.0  ;;  %v33880_v57 = vrot.slane %v15728_v38, %v15734_v5 }
0x1668   :  { %23573 = vmatpush3.bf16.msra.mxu0 %v33816_v23 }
0x1669   :  { %v15744_v42 = vcombine.high %v33880_v57, %v33880_v57 }
0x166a   :  { %v15313_v54 = vpop.f32.mrb[68].mxu1 }
0x166b   :  { %v15674_v58 = vmax.f32 %v15313_v54, 0.0  ;;  %v23362_v59 = vpop.f32.mrb[69].mxu1  ;;  %15894 = vmatprep.mubr.f32.mxu1 %v15744_v42 }
0x166d   :  { %v23574_v60 = vpack.c.bf16 %v15674_v58, %v15673_v55 }
0x166e   :  { %v15318_v61 = vpop.f32.mrb[70].mxu1 }
0x166f   :  { %v23365_v62 = vpop.f32.mrb[71].mxu1  ;;  %23575 = vmatprep.subr.bf16.mxu0 %v23574_v60  ;;  %v15675_v3 = vmax.f32 %v15318_v61, 0.0 }
0x1670   :  { %23577 = vmatpush3.bf16.msra.mxu0 %v33824_v50  ;;  %v15735_v50 = vrot.slane %v15724_v7, %v15734_v5  ;;  %v33895_v7 = vld.sshfl [vmem:[%s33946_s3 + $0x8] sm:$0x33 pattern:$0x76325410] }
0x1671   :  { %23610 = vmatprep.subr.bf16.mxu0 %v34096_v17 }
0x1672   :  { %v15323_v35 = vpop.f32.mrb[72].mxu1  ;;  %v15743_v10 = vcombine.high %v15735_v50, %v15735_v50 }
0x1673   :  { %v15676_v23 = vmax.f32 %v15323_v35, 0.0  ;;  %v23368_v4 = vpop.f32.mrb[73].mxu1 }
0x1674   :  { %15824 = vmatprep.mubr.f32.mxu0 %v15743_v10 }
0x1675   :  { %v33869_v6 = vpack.c.bf16 %v15676_v23, %v15675_v3  ;;  %15825 = vmatmul.mubr.f32.vlgmr.msra.gmra.mrb[162].mxu0 %v15735_v50 }
0x1676   :  { %v15328_v48 = vpop.f32.mrb[74].mxu1 }
0x1677   :  { %v23371_v8 = vpop.f32.mrb[75].mxu1  ;;  %v15677_v12 = vmax.f32 %v15328_v48, 0.0  ;;  %v15752_v48 = vcombine.high %v33895_v7, %v33895_v7 }
0x1679   :  { %17521 = vmatprep.mubr.msk.f32.mxu0 %vm185_vm0, %v15752_v48 }
0x167a   :  { %v15333_v11 = vpop.f32.mrb[76].mxu1 }
0x167b   :  { %v15678_v13 = vmax.f32 %v15333_v11, 0.0  ;;  %v23374_v14 = vpop.f32.mrb[77].mxu1 }
0x167d   :  { %v33874_v33 = vpack.c.bf16 %v15678_v13, %v15677_v12 }
0x167e   :  { %v15338_v34 = vpop.f32.mrb[78].mxu1 }
0x167f   :  { %v23377_v56 = vpop.f32.mrb[79].mxu1  ;;  %v15679_v19 = vmax.f32 %v15338_v34, 0.0 }
0x1682   :  { %v15343_v36 = vpop.f32.mrb[80].mxu1 }
0x1683   :  { %v15680_v20 = vmax.f32 %v15343_v36, 0.0  ;;  %v23380_v21 = vpop.f32.mrb[81].mxu1 }
0x1685   :  { %v33876_v22 = vpack.c.bf16 %v15680_v20, %v15679_v19 }
0x1686   :  { %v15348_v24 = vpop.f32.mrb[82].mxu1 }
0x1687   :  { %v23383_v25 = vpop.f32.mrb[83].mxu1  ;;  %v15681_v18 = vmax.f32 %v15348_v24, 0.0 }
0x168a   :  { %v15353_v26 = vpop.f32.mrb[84].mxu1 }
0x168b   :  { %v15682_v27 = vmax.f32 %v15353_v26, 0.0  ;;  %v23386_v29 = vpop.f32.mrb[85].mxu1 }
0x168d   :  { %v33878_v30 = vpack.c.bf16 %v15682_v27, %v15681_v18 }
0x168e   :  { %v15358_v31 = vpop.f32.mrb[86].mxu1 }
0x168f   :  { %v23389_v32 = vpop.f32.mrb[87].mxu1  ;;  %v15683_v9 = vmax.f32 %v15358_v31, 0.0 }
0x1692   :  { %v15363_v39 = vpop.f32.mrb[88].mxu1 }
0x1693   :  { %v15684_v40 = vmax.f32 %v15363_v39, 0.0  ;;  %v23392_v41 = vpop.f32.mrb[89].mxu1 }
0x1695   :  { %v33884_v44 = vpack.c.bf16 %v15684_v40, %v15683_v9 }
0x1696   :  { %v15368_v45 = vpop.f32.mrb[90].mxu1 }
0x1697   :  { %v23395_v46 = vpop.f32.mrb[91].mxu1  ;;  %v15685_v37 = vmax.f32 %v15368_v45, 0.0 }
0x169a   :  { %v15373_v47 = vpop.f32.mrb[92].mxu1 }
0x169b   :  { %v15686_v49 = vmax.f32 %v15373_v47, 0.0  ;;  %v23398_v43 = vpop.f32.mrb[93].mxu1 }
0x169d   :  { %v33886_v15 = vpack.c.bf16 %v15686_v49, %v15685_v37 }
0x169e   :  { %v15378_v51 = vpop.f32.mrb[94].mxu1 }
0x169f   :  { %v23401_v52 = vpop.f32.mrb[95].mxu1  ;;  %v15687_v54 = vmax.f32 %v15378_v51, 0.0 }
0x16a2   :  { %v15383_v53 = vpop.f32.mrb[96].mxu1 }
0x16a3   :  { %v15688_v55 = vmax.f32 %v15383_v53, 0.0  ;;  %v23404_v58 = vpop.f32.mrb[97].mxu1 }
0x16a5   :  { %v33888_v59 = vpack.c.bf16 %v15688_v55, %v15687_v54 }
0x16a6   :  { %v15388_v60 = vpop.f32.mrb[98].mxu1 }
0x16a7   :  { %v23407_v61 = vpop.f32.mrb[99].mxu1  ;;  %v15689_v28 = vmax.f32 %v15388_v60, 0.0 }
0x16aa   :  { %v15393_v62 = vpop.f32.mrb[100].mxu1 }
0x16ab   :  { %v15690_v63 = vmax.f32 %v15393_v62, 0.0  ;;  %v23410_v16 = vpop.f32.mrb[101].mxu1 }
0x16ad   :  { %v33890_v35 = vpack.c.bf16 %v15690_v63, %v15689_v28 }
0x16ae   :  { %v15398_v0 = vpop.f32.mrb[102].mxu1 }
0x16af   :  { %v23413_v1 = vpop.f32.mrb[103].mxu1  ;;  %v15691_v3 = vmax.f32 %v15398_v0, 0.0 }
0x16b2   :  { %v15403_v23 = vpop.f32.mrb[104].mxu1 }
0x16b3   :  { %v15692_v4 = vmax.f32 %v15403_v23, 0.0  ;;  %v23416_v5 = vpop.f32.mrb[105].mxu1 }
0x16b5   :  { %v23578_v50 = vpack.c.bf16 %v15692_v4, %v15691_v3 }
0x16b6   :  { %v15408_v8 = vpop.f32.mrb[106].mxu1 }
0x16b7   :  { %v23419_v10 = vpop.f32.mrb[107].mxu1  ;;  %23579 = vmatprep.subr.bf16.mxu1 %v23578_v50  ;;  %v15693_v12 = vmax.f32 %v15408_v8, 0.0 }
0x16b8   :  { %23581 = vmatpush3.bf16.msra.mxu1 %v33869_v6 }
0x16ba   :  { %v15413_v11 = vpop.f32.mrb[108].mxu1 }
0x16bb   :  { %v15694_v13 = vmax.f32 %v15413_v11, 0.0  ;;  %v23422_v14 = vpop.f32.mrb[109].mxu1 }
0x16bd   :  { %v23582_v34 = vpack.c.bf16 %v15694_v13, %v15693_v12 }
0x16be   :  { %v15418_v56 = vpop.f32.mrb[110].mxu1 }
0x16bf   :  { %v23425_v36 = vpop.f32.mrb[111].mxu1  ;;  %23583 = vmatprep.subr.bf16.mxu1 %v23582_v34  ;;  %v15695_v20 = vmax.f32 %v15418_v56, 0.0 }
0x16c0   :  { %23585 = vmatpush3.bf16.msra.mxu1 %v33874_v33 }
0x16c2   :  { %v15423_v19 = vpop.f32.mrb[112].mxu1 }
0x16c3   :  { %v15696_v21 = vmax.f32 %v15423_v19, 0.0  ;;  %v23428_v24 = vpop.f32.mrb[113].mxu1 }
0x16c5   :  { %v23586_v25 = vpack.c.bf16 %v15696_v21, %v15695_v20 }
0x16c6   :  { %v15428_v26 = vpop.f32.mrb[114].mxu1 }
0x16c7   :  { %v23431_v18 = vpop.f32.mrb[115].mxu1  ;;  %23587 = vmatprep.subr.bf16.mxu1 %v23586_v25  ;;  %v15697_v27 = vmax.f32 %v15428_v26, 0.0 }
0x16c8   :  { %23589 = vmatpush3.bf16.msra.mxu1 %v33876_v22 }
0x16ca   :  { %v15433_v6 = vpop.f32.mrb[116].mxu1 }
0x16cb   :  { %v15698_v29 = vmax.f32 %v15433_v6, 0.0  ;;  %v23434_v31 = vpop.f32.mrb[117].mxu1 }
0x16cd   :  { %v23590_v32 = vpack.c.bf16 %v15698_v29, %v15697_v27 }
0x16ce   :  { %v15438_v38 = vpop.f32.mrb[118].mxu1 }
0x16cf   :  { %v23437_v39 = vpop.f32.mrb[119].mxu1  ;;  %23591 = vmatprep.subr.bf16.mxu1 %v23590_v32  ;;  %v15699_v9 = vmax.f32 %v15438_v38, 0.0 }
0x16d0   :  { %23593 = vmatpush3.bf16.msra.mxu1 %v33878_v30 }
0x16d2   :  { %v15443_v33 = vpop.f32.mrb[120].mxu1 }
0x16d3   :  { %v15700_v40 = vmax.f32 %v15443_v33, 0.0  ;;  %v23440_v41 = vpop.f32.mrb[121].mxu1 }
0x16d5   :  { %v23594_v42 = vpack.c.bf16 %v15700_v40, %v15699_v9 }
0x16d6   :  { %v15448_v45 = vpop.f32.mrb[122].mxu1 }
0x16d7   :  { %v23443_v46 = vpop.f32.mrb[123].mxu1  ;;  %23595 = vmatprep.subr.bf16.mxu1 %v23594_v42  ;;  %v15701_v47 = vmax.f32 %v15448_v45, 0.0 }
0x16d8   :  { %23597 = vmatpush3.bf16.msra.mxu1 %v33884_v44 }
0x16da   :  { %v15453_v22 = vpop.f32.mrb[124].mxu1 }
0x16db   :  { %v15702_v37 = vmax.f32 %v15453_v22, 0.0  ;;  %v23446_v49 = vpop.f32.mrb[125].mxu1 }
0x16dd   :  { %v23598_v43 = vpack.c.bf16 %v15702_v37, %v15701_v47 }
0x16de   :  { %v15458_v51 = vpop.f32.mrb[126].mxu1 }
0x16df   :  { %v23449_v52 = vpop.f32.mrb[127].mxu1  ;;  %23599 = vmatprep.subr.bf16.mxu1 %v23598_v43  ;;  %v15703_v53 = vmax.f32 %v15458_v51, 0.0 }
0x16e0   :  { %23601 = vmatpush3.bf16.msra.mxu1 %v33886_v15 }
0x16e2   :  { %v15463_v30 = vpop.f32.mrb[128].mxu1 }
0x16e3   :  { %v15704_v54 = vmax.f32 %v15463_v30, 0.0  ;;  %v23452_v55 = vpop.f32.mrb[129].mxu1 }
0x16e5   :  { %v23602_v58 = vpack.c.bf16 %v15704_v54, %v15703_v53 }
0x16e6   :  { %v15468_v60 = vpop.f32.mrb[130].mxu1 }
0x16e7   :  { %v23455_v61 = vpop.f32.mrb[131].mxu1  ;;  %23603 = vmatprep.subr.bf16.mxu1 %v23602_v58  ;;  %v15705_v62 = vmax.f32 %v15468_v60, 0.0 }
0x16e8   :  { %23605 = vmatpush3.bf16.msra.mxu1 %v33888_v59 }
0x16ea   :  { %v15473_v44 = vpop.f32.mrb[132].mxu1 }
0x16eb   :  { %v15706_v28 = vmax.f32 %v15473_v44, 0.0  ;;  %v23458_v63 = vpop.f32.mrb[133].mxu1 }
0x16ec   :  { %v15970_v63 = vld [vmem:[%s33947_s4] sm:$0xff] }
0x16ed   :  { %v23606_v16 = vpack.c.bf16 %v15706_v28, %v15705_v62 }
0x16ee   :  { %v15478_v0 = vpop.f32.mrb[134].mxu1 }
0x16ef   :  { %v23461_v1 = vpop.f32.mrb[135].mxu1  ;;  %23607 = vmatprep.subr.bf16.mxu1 %v23606_v16  ;;  %v15707_v3 = vmax.f32 %v15478_v0, 0.0 }
0x16f0   :  { %23609 = vmatpush3.bf16.msra.mxu1 %v33890_v35 }
0x16f1   :  { %23634 = vmatprep.subr.bf16.mxu1 %v34096_v17 }
0x16f2   :  { %v15483_v15 = vpop.f32.mrb[136].mxu1 }
0x16f3   :  { %v15708_v23 = vmax.f32 %v15483_v15, 0.0  ;;  %v23464_v4 = vpop.f32.mrb[137].mxu1  ;;  %15895 = vmatmul.mubr.f32.vlgmr.msra.gmra.mrb[168].mxu1 %v33880_v57 }
0x16f4   :  { %23516 = vmatprep.mubr.msk.f32.mxu1 %vm26259_vm1, %v26258_v2 }
0x16f5   :  { %v23611_v59 = vpack.c.bf16 %v15708_v23, %v15707_v3  ;;  %v15972_v3 = vld [vmem:[%s33947_s4 + $0x10] sm:$0xff] }
0x16f6   :  { %v15488_v5 = vpop.f32.mrb[138].mxu1 }
0x16f7   :  { %v23467_v48 = vpop.f32.mrb[139].mxu1  ;;  %23612 = vmatpush1.bf16.msra.mxu0 %v23611_v59  ;;  %v15709_v8 = vmax.f32 %v15488_v5, 0.0 }
0x16f8   :  { %23613 = vmatprep.subr.bf16.mxu0 %v34096_v17 }
0x16fa   :  { %v15493_v50 = vpop.f32.mrb[140].mxu1 }
0x16fb   :  { %v15710_v35 = vmax.f32 %v15493_v50, 0.0  ;;  %v23470_v10 = vpop.f32.mrb[141].mxu1 }
0x16fd   :  { %v23614_v11 = vpack.c.bf16 %v15710_v35, %v15709_v8 }
0x16fe   :  { %v15498_v12 = vpop.f32.mrb[142].mxu1 }
0x16ff   :  { %v23473_v13 = vpop.f32.mrb[143].mxu1  ;;  %23615 = vmatpush1.bf16.msra.mxu0 %v23614_v11  ;;  %v15711_v14 = vmax.f32 %v15498_v12, 0.0 }
0x1700   :  { %23616 = vmatprep.subr.bf16.mxu0 %v34096_v17 }
0x1702   :  { %v15503_v57 = vpop.f32.mrb[144].mxu1 }
0x1703   :  { %v15712_v34 = vmax.f32 %v15503_v57, 0.0  ;;  %v23476_v56 = vpop.f32.mrb[145].mxu1 }
0x1705   :  { %v23617_v36 = vpack.c.bf16 %v15712_v34, %v15711_v14 }
0x1706   :  { %v15508_v19 = vpop.f32.mrb[146].mxu1 }
0x1707   :  { %v23479_v20 = vpop.f32.mrb[147].mxu1  ;;  %23618 = vmatpush1.bf16.msra.mxu0 %v23617_v36  ;;  %v15713_v24 = vmax.f32 %v15508_v19, 0.0 }
0x1708   :  { %23619 = vmatprep.subr.bf16.mxu0 %v34096_v17 }
0x170a   :  { %v15513_v21 = vpop.f32.mrb[148].mxu1 }
0x170b   :  { %v15714_v25 = vmax.f32 %v15513_v21, 0.0  ;;  %v23482_v26 = vpop.f32.mrb[149].mxu1 }
0x170d   :  { %v23620_v18 = vpack.c.bf16 %v15714_v25, %v15713_v24 }
0x170e   :  { %v15518_v6 = vpop.f32.mrb[150].mxu1 }
0x170f   :  { %v23485_v27 = vpop.f32.mrb[151].mxu1  ;;  %23621 = vmatpush1.bf16.msra.mxu0 %v23620_v18  ;;  %v15715_v31 = vmax.f32 %v15518_v6, 0.0 }
0x1710   :  { %23622 = vmatprep.subr.bf16.mxu0 %v34096_v17 }
0x1712   :  { %v15523_v29 = vpop.f32.mrb[152].mxu1 }
0x1713   :  { %v15716_v32 = vmax.f32 %v15523_v29, 0.0  ;;  %v23488_v38 = vpop.f32.mrb[153].mxu1 }
0x1715   :  { %v23623_v39 = vpack.c.bf16 %v15716_v32, %v15715_v31 }
0x1716   :  { %v15528_v33 = vpop.f32.mrb[154].mxu1 }
0x1717   :  { %v23491_v9 = vpop.f32.mrb[155].mxu1  ;;  %23624 = vmatpush1.bf16.msra.mxu0 %v23623_v39  ;;  %v15717_v41 = vmax.f32 %v15528_v33, 0.0 }
0x1718   :  { %23625 = vmatprep.subr.bf16.mxu0 %v34096_v17 }
0x171a   :  { %v15533_v40 = vpop.f32.mrb[156].mxu1 }
0x171b   :  { %v15718_v42 = vmax.f32 %v15533_v40, 0.0  ;;  %v23494_v45 = vpop.f32.mrb[157].mxu1 }
0x171d   :  { %v23626_v46 = vpack.c.bf16 %v15718_v42, %v15717_v41 }
0x171e   :  { %v15538_v22 = vpop.f32.mrb[158].mxu1 }
0x171f   :  { %v23497_v47 = vpop.f32.mrb[159].mxu1  ;;  %23627 = vmatpush1.bf16.msra.mxu0 %v23626_v46  ;;  %v15719_v49 = vmax.f32 %v15538_v22, 0.0 }
0x1720   :  { %23628 = vmatprep.subr.bf16.mxu0 %v34096_v17 }
0x1722   :  { %v15543_v37 = vpop.f32.mrb[160].mxu1 }
0x1723   :  { %v15720_v43 = vmax.f32 %v15543_v37, 0.0  ;;  %v23500_v51 = vpop.f32.mrb[161].mxu1 }
0x1725   :  { %v23629_v52 = vpack.c.bf16 %v15720_v43, %v15719_v49 }
0x1726   :  { %v15548_v30 = vpop.f32.mrb[162].mxu1 }
0x1727   :  { %v23503_v53 = vpop.f32.mrb[163].mxu1  ;;  %23630 = vmatpush1.bf16.msra.mxu0 %v23629_v52  ;;  %v15721_v55 = vmax.f32 %v15548_v30, 0.0 }
0x1728   :  { %23631 = vmatprep.subr.bf16.mxu0 %v34096_v17  ;;  %v15971_v17 = vld [vmem:[%s33947_s4 + $0x8] sm:$0xff] }
0x1729   :  { %v23635_v16 = vpack.c.bf16 %v15971_v17, %v15970_v63 }
0x172a   :  { %v15553_v54 = vpop.f32.mrb[164].mxu1 }
0x172b   :  { %v15722_v58 = vmax.f32 %v15553_v54, 0.0  ;;  %v23506_v60 = vpop.f32.mrb[165].mxu1  ;;  %23636 = vmatpush3.bf16.msra.mxu1 %v23635_v16 }
0x172c   :  { %23514 = vmatprep.subr.mxu1 %v26258_v2 }
0x172d   :  { %v23632_v61 = vpack.c.bf16 %v15722_v58, %v15721_v55 }
0x172e   :  { %v15558_v44 = vpop.f32.mrb[166].mxu1 }
0x172f   :  { %v23509_v62 = vpop.f32.mrb[167].mxu1  ;;  %23633 = vmatpush1.bf16.msra.mxu0 %v23632_v61  ;;  %v15723_v28 = vmax.f32 %v15558_v44, 0.0  ;;  %23515 = vmatpush3.msra.mxu1 %v15972_v3 }
0x1730   :  { %15932 = vmatprep.subr.mxu0 %v26258_v2 }
0x1733   :  { %15933 = vmatpush1.msra.mxu0 %v15723_v28 }
0x1734   :  { %15965 = vmatmul.mubr.f32.vlgmr.msra.gmra.mrb[164].mxu0 %v33895_v7 }
0x1748   :  { %v19040_v0 = vpop.f32.mrb[162].mxu0 }
0x1749   :  { %v19041_v1 = vpop.f32.mrb[163].mxu0 }
0x174a   :  { %v19042_v15 = vadd.f32 %v19041_v1, %v19040_v0 }
0x17c6   :  { %v19075_v7 = vpop.f32.mrb[168].mxu1 }
0x17c7   :  { %v19076_v23 = vpop.f32.mrb[169].mxu1 }
0x17c8   :  { %v19077_v4 = vadd.f32 %v19076_v23, %v19075_v7 }
0x17ca   :  { %v15897_v59 = vadd.f32 %v19077_v4, %v19042_v15 }
0x1807   :  { %v15966_v5 = vpop.f32.mrb[164].mxu0 }
0x1808   :  { %v15967_v48 = vadd.f32 %v15966_v5, %v15897_v59  ;;  %v15968_v50 = vpop.f32.mrb[165].mxu0 }
0x180a   :  { %23517 = vmatmul.mubr.msk.f32.vlgmr.msra.gmra.mrb[170].mxu1 %vm15973_vm3, %v15967_v48 }
0x18dd   :  { %v16043_v2 = vpop.f32.mrb[170].mxu1 }
0x18de   :  { %16047 = vst [vmem:[#allocation3] sm:$0x3] %v16043_v2  ;;  %v23518_v8 = vpop.f32.mrb[171].mxu1 }
0x18df   :  { %26245 = shalt.err (!%p26242_p4)
}
0x18e0   :  { %s26246_s11 = scalar_lea.hbm %s33948_s5, 32 }
0x18e1   :  { %p26247_p5 = scmp.ne.s32.totalorder %s33948_s5, %s26246_s11  ;;  %p26250_p6 = scmp.lt.u32.totalorder %s26246_s11, %s33948_s5 }
0x18e3   :  { %p26252_p7 = pnand %p26250_p6, %p26247_p5 }
0x18e5   :  { %26255 = shalt.err (!%p26252_p7)
}
0x18e6   :  { %16057 = dma.vmem_to_hbm [thread:$0]  %s16055_s8, 32, %s33948_s5, [#allocation4]  }
0x18e7   :  { %26256 = dma.done.wait [#allocation4], 32  }
0x18e8   :  { %26257 = vsyncadd [#allocation4], 4294967264 }
0x18e9   :  { %16061 = vsyncpa [#allocation4], 1 }

</bundles_post_ra>
